<compile_context>
chip_gen: v5e
topology: v5e:2x2
jax: 0.10.0
libtpu: 0.0.40
codegen_flags: <defaults>
</compile_context>

<pallas_src>
import functools

import jax
import jax.numpy as jnp
from jax import lax
from jax.experimental import pallas as pl
from jax.experimental.pallas import tpu as pltpu


# ----------------------------------------------------------------------------
# Hardware-aware knobs
# ----------------------------------------------------------------------------
def _vmem_limit_bytes():
    """Generation-aware scoped-VMEM budget (~half of physical VMEM)."""
    try:
        cap = int(pltpu.get_tpu_info().vmem_capacity_bytes)
    except Exception:
        return 32 * 1024 * 1024          # safe everywhere (v7x has 64 MiB/TC)
    return int(min(max(cap // 2, 16 * 1024 * 1024), 100 * 1024 * 1024))


def _preferred_cout_tile():
    """256-wide N tiles feed the 256x256 MXUs of v6e/v7x; 128 on v5e/older."""
    try:
        kind = jax.devices()[0].device_kind.lower()
    except Exception:
        kind = ""
    old = any(t in kind for t in ("v2", "v3", "v4", "v5"))
    return 128 if old else 256


_VMEM_LIMIT = _vmem_limit_bytes()
_PREF_TN = _preferred_cout_tile()
# Bigger M blocks amortize the ~0.35us per-grid-step overhead; 128 MiB VMEM
# parts (v5e/v6e) can take 2K-row tiles, 64 MiB parts (v7x) stay at 1K.
_TM_CAP = 2048 if _VMEM_LIMIT >= 48 * 1024 * 1024 else 1024


def _round_up(x, m):
    return (x + m - 1) // m * m


def _cout_tile(cout, m_rows):
    """Lane-dense Cout tile; shrink 256->128 if the f32 accumulator gets big."""
    if cout % _PREF_TN == 0:
        tn = _PREF_TN
    elif cout % 128 == 0:
        tn = 128
    else:
        tn = cout            # 32-/64-channel layers: accept lane-masked stores
    acc_budget = max(4 << 20, _VMEM_LIMIT // 8)   # VMEM-aware accumulator cap
    while tn > 128 and m_rows * tn * 4 > acc_budget and cout % (tn // 2) == 0:
        tn //= 2
    return tn


# ----------------------------------------------------------------------------
# Pallas kernels
# ----------------------------------------------------------------------------
def _conv3x3_bn_lrelu_kernel(g_ref, w_ref, s_ref, b_ref, o_ref, *, wp8):
    """Fused 3x3 conv (shifted dots) + folded-BN affine + LeakyReLU(0.1).

    g_ref: (1, Lg, Cin) bf16  zero-padded feature map of one image, flattened
                              row-major over (H+3, wp8) with wp8 = roundup(W+2, 8).
    w_ref: (3, 3, Cin, tn) bf16
    s_ref, b_ref: (1, tn) f32
    o_ref: (1, H, W, tn) bf16  dense output (junk columns never leave VMEM).
    """
    out_h, out_w, tn = o_ref.shape[1], o_ref.shape[2], o_ref.shape[3]
    lo = out_h * wp8                      # conv rows incl. junk columns
    span = 2 * wp8 + lo                   # rows covering all kh offsets

    acc = jnp.zeros((lo, tn), jnp.float32)
    # 3 kw-shifted loads (the only possibly-misaligned accesses); the kh
    # offsets are kh*wp8 which is a multiple of 8, so those slices are
    # sublane-aligned and free.
    for kw in range(3):
        gk = g_ref[0, kw:kw + span, :]                      # (span, Cin) bf16
        for kh in range(3):
            patch = gk[kh * wp8:kh * wp8 + lo, :]           # aligned (lo, Cin)
            acc = acc + jnp.dot(patch, w_ref[kh, kw],
                                preferred_element_type=jnp.float32)

    y = acc * s_ref[...] + b_ref[...]
    y = jnp.where(y >= 0.0, y, 0.1 * y)                     # LeakyReLU(0.1)
    # Dense store: each image row starts at a multiple of wp8 (8-aligned) in
    # the flattened accumulator; slice off the junk columns before the store.
    for r in range(out_h):
        o_ref[0, r] = y[r * wp8:r * wp8 + out_w, :].astype(o_ref.dtype)


def _mm_bn_lrelu_kernel(a_ref, w_ref, s_ref, b_ref, o_ref):
    """Fused matmul + folded-BN affine + LeakyReLU(0.1) (1x1 convolutions).

    a_ref: (tm, K) bf16, w_ref: (K, tn) bf16, s/b: (1, tn) f32, o: (tm, tn) bf16.
    """
    y = jnp.dot(a_ref[...], w_ref[...], preferred_element_type=jnp.float32)
    y = y * s_ref[...] + b_ref[...]
    o_ref[...] = jnp.where(y >= 0.0, y, 0.1 * y).astype(o_ref.dtype)


def _maxpool2x2_kernel(x_ref, o_ref):
    """2x2 / stride-2 max pool, whole image per grid step.

    x_ref: (1, Ho, 2, Wo, 2*C)  row pairs split out, horizontal pairs folded
                                into the channel (lane) dimension.
    o_ref: (1, Ho, Wo, C)
    """
    c = o_ref.shape[-1]
    v = jnp.maximum(x_ref[0, :, 0, :, :], x_ref[0, :, 1, :, :])  # vertical max
    o_ref[0] = jnp.maximum(v[..., :c], v[..., c:])               # horizontal max


# ----------------------------------------------------------------------------
# Wrappers around pallas_call
# ----------------------------------------------------------------------------
def conv3x3_bn_lrelu(x, w, scale, bias):
    """x: (N,H,W,C) bf16, w: (3,3,C,Co) bf16, scale/bias: (1,Co) f32."""
    n, h, ww, c = x.shape
    co = w.shape[3]
    wp8 = _round_up(ww + 2, 8)            # padded row width, sublane-aligned
    lg = (h + 3) * wp8                    # flattened padded length (8-aligned)
    lo = h * wp8

    # Single fused pad: 1 top / 2 bottom rows, 1 left / (wp8-W-1) right cols;
    # the reshape to the flattened layout is free (contiguous).
    xp = jnp.pad(x, ((0, 0), (1, 2), (1, wp8 - ww - 1), (0, 0)))
    g = xp.reshape(n, lg, c)

    tn = _cout_tile(co, lo)
    kernel = functools.partial(_conv3x3_bn_lrelu_kernel, wp8=wp8)
    return pl.pallas_call(
        kernel,
        out_shape=jax.ShapeDtypeStruct((n, h, ww, co), jnp.bfloat16),
        grid_spec=pltpu.PrefetchScalarGridSpec(
            num_scalar_prefetch=0,
            # Cout tile OUTER, batch INNER: the weight block index is constant
            # across consecutive steps -> each weight tile is DMA'd once.
            grid=(co // tn, n),
            in_specs=[
                pl.BlockSpec((1, lg, c), lambda j, b: (b, 0, 0)),
                pl.BlockSpec((3, 3, c, tn), lambda j, b: (0, 0, 0, j)),
                pl.BlockSpec((1, tn), lambda j, b: (0, j)),
                pl.BlockSpec((1, tn), lambda j, b: (0, j)),
            ],
            out_specs=pl.BlockSpec((1, h, ww, tn), lambda j, b: (b, 0, 0, j)),
        ),
        compiler_params=pltpu.CompilerParams(
            dimension_semantics=("parallel", "parallel"),
            vmem_limit_bytes=_VMEM_LIMIT,
        ),
    )(g, w, scale, bias)


def conv1x1_bn_lrelu(x, w, scale, bias):
    """x: (N,H,W,C) bf16, w: (1,1,C,Co) bf16, scale/bias: (1,Co) f32."""
    n, h, ww, c = x.shape
    co = w.shape[3]
    a = x.reshape(n * h * ww, c)
    wm = w.reshape(c, co)

    m = a.shape[0]
    tm = _TM_CAP if m >= _TM_CAP else _round_up(m, 8)   # sublane-multiple M tile
    mp = _round_up(m, tm)
    if mp != m:
        a = jnp.pad(a, ((0, mp - m), (0, 0)))
    tn = _cout_tile(co, tm)

    out = pl.pallas_call(
        _mm_bn_lrelu_kernel,
        out_shape=jax.ShapeDtypeStruct((mp, co), jnp.bfloat16),
        grid_spec=pltpu.PrefetchScalarGridSpec(
            num_scalar_prefetch=0,
            grid=(mp // tm, co // tn),
            in_specs=[
                pl.BlockSpec((tm, c), lambda i, j: (i, 0)),
                pl.BlockSpec((c, tn), lambda i, j: (0, j)),
                pl.BlockSpec((1, tn), lambda i, j: (0, j)),
                pl.BlockSpec((1, tn), lambda i, j: (0, j)),
            ],
            out_specs=pl.BlockSpec((tm, tn), lambda i, j: (i, j)),
        ),
        compiler_params=pltpu.CompilerParams(
            dimension_semantics=("parallel", "parallel"),
            vmem_limit_bytes=_VMEM_LIMIT,
        ),
    )(a, wm, scale, bias)
    if mp != m:
        out = out[:m]
    return out.reshape(n, h, ww, co)


def maxpool2x2(x):
    """x: (N, H, W, C) -> (N, H//2, W//2, C), kernel=2, stride=2 (even H, W)."""
    n, h, ww, c = x.shape
    ho, wo = h // 2, ww // 2
    # Free contiguous reshape: split row pairs and fold column pairs into lanes.
    xr = x.reshape(n, ho, 2, wo, 2 * c)
    return pl.pallas_call(
        _maxpool2x2_kernel,
        out_shape=jax.ShapeDtypeStruct((n, ho, wo, c), x.dtype),
        grid_spec=pltpu.PrefetchScalarGridSpec(
            num_scalar_prefetch=0,
            grid=(n,),                                   # whole image per step
            in_specs=[pl.BlockSpec((1, ho, 2, wo, 2 * c),
                                   lambda b: (b, 0, 0, 0, 0))],
            out_specs=pl.BlockSpec((1, ho, wo, c), lambda b: (b, 0, 0, 0)),
        ),
        compiler_params=pltpu.CompilerParams(
            dimension_semantics=("parallel",),
            vmem_limit_bytes=_VMEM_LIMIT,
        ),
    )(xr)


# ----------------------------------------------------------------------------
# Conv-BN-LeakyReLU layer dispatcher (no carried channel padding anymore)
# ----------------------------------------------------------------------------
def conv_bn_act(x, w, scale, bias, ksize):
    if ksize == 3:
        return conv3x3_bn_lrelu(x, w, scale, bias)
    return conv1x1_bn_lrelu(x, w, scale, bias)


# ----------------------------------------------------------------------------
# Backbone (Darknet19) parameter construction + forward
# ----------------------------------------------------------------------------
CFG = {
    'layer0': [[32, 3]],
    'layer1': ['M', [64, 3]],
    'layer2': ['M', [128, 3], [64, 1], [128, 3]],
    'layer3': ['M', [256, 3], [128, 1], [256, 3]],
    'layer4': ['M', [512, 3], [256, 1], [512, 3], [256, 1], [512, 3]],
    'layer5': ['M', [1024, 3], [512, 1], [1024, 3], [512, 1], [1024, 3]],
}
LAYER_NAMES = ['layer0', 'layer1', 'layer2', 'layer3', 'layer4', 'layer5']
BN_EPS = 1e-5


def init_backbone_params(key, in_channel=3):
    """Deterministic synthetic parameters matching the module's shapes."""
    params = []
    c_in = in_channel
    for name in LAYER_NAMES:
        layer = []
        for item in CFG[name]:
            if item == 'M':
                layer.append(('M',))
            else:
                c_out, k = item
                key, sub = jax.random.split(key)
                fan_in = k * k * c_in
                w = (jax.random.normal(sub, (k, k, c_in, c_out), jnp.float32)
                     / jnp.sqrt(jnp.float32(fan_in))).astype(jnp.bfloat16)
                # BatchNorm2d eval-mode defaults -> folded scale/bias (f32).
                gamma = jnp.ones((c_out,), jnp.float32)
                beta = jnp.zeros((c_out,), jnp.float32)
                r_mean = jnp.zeros((c_out,), jnp.float32)
                r_var = jnp.ones((c_out,), jnp.float32)
                scale = (gamma / jnp.sqrt(r_var + BN_EPS)).reshape(1, c_out)
                bias = (beta - r_mean * scale[0]).reshape(1, c_out)
                layer.append(('C', w, scale, bias, k))
                c_in = c_out
        params.append(layer)
    return params


def backbone_forward(x_nhwc, params):
    x = x_nhwc.astype(jnp.bfloat16)
    for layer in params:
        for item in layer:
            if item[0] == 'M':
                x = maxpool2x2(x)
            else:
                _, w, scale, bias, k = item
                x = conv_bn_act(x, w, scale, bias, k)
    return x


# ----------------------------------------------------------------------------
if __name__ == "__main__":
    key = jax.random.PRNGKey(0)
    key, kx = jax.random.split(key)

    # Small input consistent with the module: NCHW (2, 3, 32, 32)
    # (32x32 spatial so all five 2x2 max-pools are valid, as in darknet).
    x_nchw = jax.random.normal(kx, (2, 3, 32, 32), dtype=jnp.float32)
    x_nhwc = jnp.transpose(x_nchw, (0, 2, 3, 1))   # -> NHWC

    params = init_backbone_params(key, in_channel=3)

    # --- light correctness check of the fused conv + pool kernels (layer0) ---
    w0, s0, b0, _ = params[0][0][1:]
    x_bf = x_nhwc.astype(jnp.bfloat16)
    pallas_c0 = conv_bn_act(x_bf, w0, s0, b0, 3)
    ref = lax.conv_general_dilated(
        x_bf.astype(jnp.float32), w0.astype(jnp.float32), (1, 1), 'SAME',
        dimension_numbers=('NHWC', 'HWIO', 'NHWC'))
    ref = ref * s0 + b0
    ref = jnp.where(ref >= 0.0, ref, 0.1 * ref)
    assert jnp.allclose(pallas_c0.astype(jnp.float32), ref, rtol=5e-2, atol=5e-2)
    pool_ref = lax.reduce_window(pallas_c0, -jnp.inf, lax.max,
                                 (1, 2, 2, 1), (1, 2, 2, 1), 'VALID')
    assert jnp.allclose(maxpool2x2(pallas_c0), pool_ref)

    # --- full backbone forward ---
    fwd = jax.jit(functools.partial(backbone_forward, params=params))
    out_nhwc = fwd(x_nhwc)
    out_nchw = jnp.transpose(out_nhwc, (0, 3, 1, 2)).astype(jnp.float32)
    jax.block_until_ready(out_nchw)

    assert out_nchw.shape == (2, 1024, 1, 1), out_nchw.shape
    assert bool(jnp.all(jnp.isfinite(out_nchw)))
    print("KERNEL_OK")
</pallas_src>

<mosaic_0001>
module attributes {stable_mosaic.version = 11 : i64} {
  func.func @_conv3x3_bn_lrelu_kernel(%arg0: i32, %arg1: i32, %arg2: memref<1x1400x3xbf16, #tpu.memory_space<vmem>>, %arg3: memref<3x3x3x32xbf16, #tpu.memory_space<vmem>>, %arg4: memref<1x32xf32, #tpu.memory_space<vmem>>, %arg5: memref<1x32xf32, #tpu.memory_space<vmem>>, %arg6: memref<1x32x32x32xbf16, #tpu.memory_space<vmem>>) attributes {dimension_semantics = [#tpu.dimension_semantics<parallel>, #tpu.dimension_semantics<parallel>], iteration_bounds = array<i64: 1, 2>, scalar_prefetch = 0 : i64, scratch_operands = 0 : i64, tpu.core_type = #tpu.core_type<tc>, window_params = [{transform_indices = @transform_0, window_bounds = array<i64: 1, 1400, 3>}, {transform_indices = @transform_1, window_bounds = array<i64: 3, 3, 3, 32>}, {transform_indices = @transform_2, window_bounds = array<i64: 1, 32>}, {transform_indices = @transform_3, window_bounds = array<i64: 1, 32>}, {transform_indices = @transform_4, window_bounds = array<i64: 1, 32, 32, 32>}]} {
    %cst = arith.constant 0.000000e+00 : f32
    %0 = vector.broadcast %cst : f32 to vector<1280x32xf32>
    %c0 = arith.constant 0 : index
    %c0_0 = arith.constant 0 : index
    %c0_1 = arith.constant 0 : index
    %1 = vector.load %arg2[%c0, %c0_0, %c0_1] : memref<1x1400x3xbf16, #tpu.memory_space<vmem>>, vector<1x1360x3xbf16>
    %2 = vector.shape_cast %1 : vector<1x1360x3xbf16> to vector<1360x3xbf16>
    %3 = vector.extract_strided_slice %2 {offsets = [0, 0], sizes = [1280, 3], strides = [1, 1]} : vector<1360x3xbf16> to vector<1280x3xbf16>
    %c0_2 = arith.constant 0 : index
    %c0_3 = arith.constant 0 : index
    %c0_4 = arith.constant 0 : index
    %c0_5 = arith.constant 0 : index
    %4 = vector.load %arg3[%c0_2, %c0_3, %c0_4, %c0_5] : memref<3x3x3x32xbf16, #tpu.memory_space<vmem>>, vector<1x1x3x32xbf16>
    %5 = vector.shape_cast %4 : vector<1x1x3x32xbf16> to vector<3x32xbf16>
    %cst_6 = arith.constant dense<0.000000e+00> : vector<1280x32xf32>
    %6 = tpu.matmul %3, %5, %cst_6 {dimension_numbers = #tpu.dot_dimension_numbers<[1], [0], [0], [1], [0, 0, 1, 1], [], []>} : vector<1280x3xbf16>, vector<3x32xbf16>, vector<1280x32xf32> -> vector<1280x32xf32>
    %7 = arith.addf %0, %6 : vector<1280x32xf32>
    %8 = vector.extract_strided_slice %2 {offsets = [40, 0], sizes = [1280, 3], strides = [1, 1]} : vector<1360x3xbf16> to vector<1280x3xbf16>
    %c1 = arith.constant 1 : index
    %c0_7 = arith.constant 0 : index
    %c0_8 = arith.constant 0 : index
    %c0_9 = arith.constant 0 : index
    %9 = vector.load %arg3[%c1, %c0_7, %c0_8, %c0_9] : memref<3x3x3x32xbf16, #tpu.memory_space<vmem>>, vector<1x1x3x32xbf16>
    %10 = vector.shape_cast %9 : vector<1x1x3x32xbf16> to vector<3x32xbf16>
    %cst_10 = arith.constant dense<0.000000e+00> : vector<1280x32xf32>
    %11 = tpu.matmul %8, %10, %cst_10 {dimension_numbers = #tpu.dot_dimension_numbers<[1], [0], [0], [1], [0, 0, 1, 1], [], []>} : vector<1280x3xbf16>, vector<3x32xbf16>, vector<1280x32xf32> -> vector<1280x32xf32>
    %12 = arith.addf %7, %11 : vector<1280x32xf32>
    %13 = vector.extract_strided_slice %2 {offsets = [80, 0], sizes = [1280, 3], strides = [1, 1]} : vector<1360x3xbf16> to vector<1280x3xbf16>
    %c2 = arith.constant 2 : index
    %c0_11 = arith.constant 0 : index
    %c0_12 = arith.constant 0 : index
    %c0_13 = arith.constant 0 : index
    %14 = vector.load %arg3[%c2, %c0_11, %c0_12, %c0_13] : memref<3x3x3x32xbf16, #tpu.memory_space<vmem>>, vector<1x1x3x32xbf16>
    %15 = vector.shape_cast %14 : vector<1x1x3x32xbf16> to vector<3x32xbf16>
    %cst_14 = arith.constant dense<0.000000e+00> : vector<1280x32xf32>
    %16 = tpu.matmul %13, %15, %cst_14 {dimension_numbers = #tpu.dot_dimension_numbers<[1], [0], [0], [1], [0, 0, 1, 1], [], []>} : vector<1280x3xbf16>, vector<3x32xbf16>, vector<1280x32xf32> -> vector<1280x32xf32>
    %17 = arith.addf %12, %16 : vector<1280x32xf32>
    %c0_15 = arith.constant 0 : index
    %c1_16 = arith.constant 1 : index
    %c0_17 = arith.constant 0 : index
    %18 = vector.load %arg2[%c0_15, %c1_16, %c0_17] : memref<1x1400x3xbf16, #tpu.memory_space<vmem>>, vector<1x1360x3xbf16>
    %19 = vector.shape_cast %18 : vector<1x1360x3xbf16> to vector<1360x3xbf16>
    %20 = vector.extract_strided_slice %19 {offsets = [0, 0], sizes = [1280, 3], strides = [1, 1]} : vector<1360x3xbf16> to vector<1280x3xbf16>
    %c0_18 = arith.constant 0 : index
    %c1_19 = arith.constant 1 : index
    %c0_20 = arith.constant 0 : index
    %c0_21 = arith.constant 0 : index
    %21 = vector.load %arg3[%c0_18, %c1_19, %c0_20, %c0_21] : memref<3x3x3x32xbf16, #tpu.memory_space<vmem>>, vector<1x1x3x32xbf16>
    %22 = vector.shape_cast %21 : vector<1x1x3x32xbf16> to vector<3x32xbf16>
    %cst_22 = arith.constant dense<0.000000e+00> : vector<1280x32xf32>
    %23 = tpu.matmul %20, %22, %cst_22 {dimension_numbers = #tpu.dot_dimension_numbers<[1], [0], [0], [1], [0, 0, 1, 1], [], []>} : vector<1280x3xbf16>, vector<3x32xbf16>, vector<1280x32xf32> -> vector<1280x32xf32>
    %24 = arith.addf %17, %23 : vector<1280x32xf32>
    %25 = vector.extract_strided_slice %19 {offsets = [40, 0], sizes = [1280, 3], strides = [1, 1]} : vector<1360x3xbf16> to vector<1280x3xbf16>
    %c1_23 = arith.constant 1 : index
    %c1_24 = arith.constant 1 : index
    %c0_25 = arith.constant 0 : index
    %c0_26 = arith.constant 0 : index
    %26 = vector.load %arg3[%c1_23, %c1_24, %c0_25, %c0_26] : memref<3x3x3x32xbf16, #tpu.memory_space<vmem>>, vector<1x1x3x32xbf16>
    %27 = vector.shape_cast %26 : vector<1x1x3x32xbf16> to vector<3x32xbf16>
    %cst_27 = arith.constant dense<0.000000e+00> : vector<1280x32xf32>
    %28 = tpu.matmul %25, %27, %cst_27 {dimension_numbers = #tpu.dot_dimension_numbers<[1], [0], [0], [1], [0, 0, 1, 1], [], []>} : vector<1280x3xbf16>, vector<3x32xbf16>, vector<1280x32xf32> -> vector<1280x32xf32>
    %29 = arith.addf %24, %28 : vector<1280x32xf32>
    %30 = vector.extract_strided_slice %19 {offsets = [80, 0], sizes = [1280, 3], strides = [1, 1]} : vector<1360x3xbf16> to vector<1280x3xbf16>
    %c2_28 = arith.constant 2 : index
    %c1_29 = arith.constant 1 : index
    %c0_30 = arith.constant 0 : index
    %c0_31 = arith.constant 0 : index
    %31 = vector.load %arg3[%c2_28, %c1_29, %c0_30, %c0_31] : memref<3x3x3x32xbf16, #tpu.memory_space<vmem>>, vector<1x1x3x32xbf16>
    %32 = vector.shape_cast %31 : vector<1x1x3x32xbf16> to vector<3x32xbf16>
    %cst_32 = arith.constant dense<0.000000e+00> : vector<1280x32xf32>
    %33 = tpu.matmul %30, %32, %cst_32 {dimension_numbers = #tpu.dot_dimension_numbers<[1], [0], [0], [1], [0, 0, 1, 1], [], []>} : vector<1280x3xbf16>, vector<3x32xbf16>, vector<1280x32xf32> -> vector<1280x32xf32>
    %34 = arith.addf %29, %33 : vector<1280x32xf32>
    %c0_33 = arith.constant 0 : index
    %c2_34 = arith.constant 2 : index
    %c0_35 = arith.constant 0 : index
    %35 = vector.load %arg2[%c0_33, %c2_34, %c0_35] : memref<1x1400x3xbf16, #tpu.memory_space<vmem>>, vector<1x1360x3xbf16>
    %36 = vector.shape_cast %35 : vector<1x1360x3xbf16> to vector<1360x3xbf16>
    %37 = vector.extract_strided_slice %36 {offsets = [0, 0], sizes = [1280, 3], strides = [1, 1]} : vector<1360x3xbf16> to vector<1280x3xbf16>
    %c0_36 = arith.constant 0 : index
    %c2_37 = arith.constant 2 : index
    %c0_38 = arith.constant 0 : index
    %c0_39 = arith.constant 0 : index
    %38 = vector.load %arg3[%c0_36, %c2_37, %c0_38, %c0_39] : memref<3x3x3x32xbf16, #tpu.memory_space<vmem>>, vector<1x1x3x32xbf16>
    %39 = vector.shape_cast %38 : vector<1x1x3x32xbf16> to vector<3x32xbf16>
    %cst_40 = arith.constant dense<0.000000e+00> : vector<1280x32xf32>
    %40 = tpu.matmul %37, %39, %cst_40 {dimension_numbers = #tpu.dot_dimension_numbers<[1], [0], [0], [1], [0, 0, 1, 1], [], []>} : vector<1280x3xbf16>, vector<3x32xbf16>, vector<1280x32xf32> -> vector<1280x32xf32>
    %41 = arith.addf %34, %40 : vector<1280x32xf32>
    %42 = vector.extract_strided_slice %36 {offsets = [40, 0], sizes = [1280, 3], strides = [1, 1]} : vector<1360x3xbf16> to vector<1280x3xbf16>
    %c1_41 = arith.constant 1 : index
    %c2_42 = arith.constant 2 : index
    %c0_43 = arith.constant 0 : index
    %c0_44 = arith.constant 0 : index
    %43 = vector.load %arg3[%c1_41, %c2_42, %c0_43, %c0_44] : memref<3x3x3x32xbf16, #tpu.memory_space<vmem>>, vector<1x1x3x32xbf16>
    %44 = vector.shape_cast %43 : vector<1x1x3x32xbf16> to vector<3x32xbf16>
    %cst_45 = arith.constant dense<0.000000e+00> : vector<1280x32xf32>
    %45 = tpu.matmul %42, %44, %cst_45 {dimension_numbers = #tpu.dot_dimension_numbers<[1], [0], [0], [1], [0, 0, 1, 1], [], []>} : vector<1280x3xbf16>, vector<3x32xbf16>, vector<1280x32xf32> -> vector<1280x32xf32>
    %46 = arith.addf %41, %45 : vector<1280x32xf32>
    %47 = vector.extract_strided_slice %36 {offsets = [80, 0], sizes = [1280, 3], strides = [1, 1]} : vector<1360x3xbf16> to vector<1280x3xbf16>
    %c2_46 = arith.constant 2 : index
    %c2_47 = arith.constant 2 : index
    %c0_48 = arith.constant 0 : index
    %c0_49 = arith.constant 0 : index
    %48 = vector.load %arg3[%c2_46, %c2_47, %c0_48, %c0_49] : memref<3x3x3x32xbf16, #tpu.memory_space<vmem>>, vector<1x1x3x32xbf16>
    %49 = vector.shape_cast %48 : vector<1x1x3x32xbf16> to vector<3x32xbf16>
    %cst_50 = arith.constant dense<0.000000e+00> : vector<1280x32xf32>
    %50 = tpu.matmul %47, %49, %cst_50 {dimension_numbers = #tpu.dot_dimension_numbers<[1], [0], [0], [1], [0, 0, 1, 1], [], []>} : vector<1280x3xbf16>, vector<3x32xbf16>, vector<1280x32xf32> -> vector<1280x32xf32>
    %51 = arith.addf %46, %50 : vector<1280x32xf32>
    %c0_51 = arith.constant 0 : index
    %c0_52 = arith.constant 0 : index
    %52 = vector.load %arg4[%c0_51, %c0_52] : memref<1x32xf32, #tpu.memory_space<vmem>>, vector<1x32xf32>
    %53 = vector.broadcast %52 : vector<1x32xf32> to vector<1280x32xf32>
    %54 = arith.mulf %51, %53 : vector<1280x32xf32>
    %c0_53 = arith.constant 0 : index
    %c0_54 = arith.constant 0 : index
    %55 = vector.load %arg5[%c0_53, %c0_54] : memref<1x32xf32, #tpu.memory_space<vmem>>, vector<1x32xf32>
    %56 = vector.broadcast %55 : vector<1x32xf32> to vector<1280x32xf32>
    %57 = arith.addf %54, %56 : vector<1280x32xf32>
    %cst_55 = arith.constant 0.000000e+00 : f32
    %58 = vector.broadcast %cst_55 : f32 to vector<1280x32xf32>
    %59 = arith.cmpf oge, %57, %58 : vector<1280x32xf32>
    %cst_56 = arith.constant 1.000000e-01 : f32
    %60 = vector.broadcast %cst_56 : f32 to vector<1280x32xf32>
    %61 = arith.mulf %60, %57 : vector<1280x32xf32>
    %62 = arith.select %59, %57, %61 : vector<1280x32xi1>, vector<1280x32xf32>
    %63 = vector.extract_strided_slice %62 {offsets = [0, 0], sizes = [32, 32], strides = [1, 1]} : vector<1280x32xf32> to vector<32x32xf32>
    %64 = arith.truncf %63 : vector<32x32xf32> to vector<32x32xbf16>
    %c0_57 = arith.constant 0 : index
    %c0_58 = arith.constant 0 : index
    %c0_59 = arith.constant 0 : index
    %c0_60 = arith.constant 0 : index
    %65 = vector.load %arg6[%c0_57, %c0_58, %c0_59, %c0_60] : memref<1x32x32x32xbf16, #tpu.memory_space<vmem>>, vector<1x1x32x32xbf16>
    %66 = vector.shape_cast %65 : vector<1x1x32x32xbf16> to vector<32x32xbf16>
    %67 = vector.shape_cast %64 : vector<32x32xbf16> to vector<1x1x32x32xbf16>
    tpu.vector_store %arg6[%c0_57, %c0_58, %c0_59, %c0_60], %67 {strides = array<i32>} : memref<1x32x32x32xbf16, #tpu.memory_space<vmem>>, vector<1x1x32x32xbf16>,
    %68 = vector.extract_strided_slice %62 {offsets = [40, 0], sizes = [32, 32], strides = [1, 1]} : vector<1280x32xf32> to vector<32x32xf32>
    %69 = arith.truncf %68 : vector<32x32xf32> to vector<32x32xbf16>
    %c0_61 = arith.constant 0 : index
    %c1_62 = arith.constant 1 : index
    %c0_63 = arith.constant 0 : index
    %c0_64 = arith.constant 0 : index
    %70 = vector.load %arg6[%c0_61, %c1_62, %c0_63, %c0_64] : memref<1x32x32x32xbf16, #tpu.memory_space<vmem>>, vector<1x1x32x32xbf16>
    %71 = vector.shape_cast %70 : vector<1x1x32x32xbf16> to vector<32x32xbf16>
    %72 = vector.shape_cast %69 : vector<32x32xbf16> to vector<1x1x32x32xbf16>
    tpu.vector_store %arg6[%c0_61, %c1_62, %c0_63, %c0_64], %72 {strides = array<i32>} : memref<1x32x32x32xbf16, #tpu.memory_space<vmem>>, vector<1x1x32x32xbf16>,
    %73 = vector.extract_strided_slice %62 {offsets = [80, 0], sizes = [32, 32], strides = [1, 1]} : vector<1280x32xf32> to vector<32x32xf32>
    %74 = arith.truncf %73 : vector<32x32xf32> to vector<32x32xbf16>
    %c0_65 = arith.constant 0 : index
    %c2_66 = arith.constant 2 : index
    %c0_67 = arith.constant 0 : index
    %c0_68 = arith.constant 0 : index
    %75 = vector.load %arg6[%c0_65, %c2_66, %c0_67, %c0_68] : memref<1x32x32x32xbf16, #tpu.memory_space<vmem>>, vector<1x1x32x32xbf16>
    %76 = vector.shape_cast %75 : vector<1x1x32x32xbf16> to vector<32x32xbf16>
    %77 = vector.shape_cast %74 : vector<32x32xbf16> to vector<1x1x32x32xbf16>
    tpu.vector_store %arg6[%c0_65, %c2_66, %c0_67, %c0_68], %77 {strides = array<i32>} : memref<1x32x32x32xbf16, #tpu.memory_space<vmem>>, vector<1x1x32x32xbf16>,
    %78 = vector.extract_strided_slice %62 {offsets = [120, 0], sizes = [32, 32], strides = [1, 1]} : vector<1280x32xf32> to vector<32x32xf32>
    %79 = arith.truncf %78 : vector<32x32xf32> to vector<32x32xbf16>
    %c0_69 = arith.constant 0 : index
    %c3 = arith.constant 3 : index
    %c0_70 = arith.constant 0 : index
    %c0_71 = arith.constant 0 : index
    %80 = vector.load %arg6[%c0_69, %c3, %c0_70, %c0_71] : memref<1x32x32x32xbf16, #tpu.memory_space<vmem>>, vector<1x1x32x32xbf16>
    %81 = vector.shape_cast %80 : vector<1x1x32x32xbf16> to vector<32x32xbf16>
    %82 = vector.shape_cast %79 : vector<32x32xbf16> to vector<1x1x32x32xbf16>
    tpu.vector_store %arg6[%c0_69, %c3, %c0_70, %c0_71], %82 {strides = array<i32>} : memref<1x32x32x32xbf16, #tpu.memory_space<vmem>>, vector<1x1x32x32xbf16>,
    %83 = vector.extract_strided_slice %62 {offsets = [160, 0], sizes = [32, 32], strides = [1, 1]} : vector<1280x32xf32> to vector<32x32xf32>
    %84 = arith.truncf %83 : vector<32x32xf32> to vector<32x32xbf16>
    %c0_72 = arith.constant 0 : index
    %c4 = arith.constant 4 : index
    %c0_73 = arith.constant 0 : index
    %c0_74 = arith.constant 0 : index
    %85 = vector.load %arg6[%c0_72, %c4, %c0_73, %c0_74] : memref<1x32x32x32xbf16, #tpu.memory_space<vmem>>, vector<1x1x32x32xbf16>
    %86 = vector.shape_cast %85 : vector<1x1x32x32xbf16> to vector<32x32xbf16>
    %87 = vector.shape_cast %84 : vector<32x32xbf16> to vector<1x1x32x32xbf16>
    tpu.vector_store %arg6[%c0_72, %c4, %c0_73, %c0_74], %87 {strides = array<i32>} : memref<1x32x32x32xbf16, #tpu.memory_space<vmem>>, vector<1x1x32x32xbf16>,
    %88 = vector.extract_strided_slice %62 {offsets = [200, 0], sizes = [32, 32], strides = [1, 1]} : vector<1280x32xf32> to vector<32x32xf32>
    %89 = arith.truncf %88 : vector<32x32xf32> to vector<32x32xbf16>
    %c0_75 = arith.constant 0 : index
    %c5 = arith.constant 5 : index
    %c0_76 = arith.constant 0 : index
    %c0_77 = arith.constant 0 : index
    %90 = vector.load %arg6[%c0_75, %c5, %c0_76, %c0_77] : memref<1x32x32x32xbf16, #tpu.memory_space<vmem>>, vector<1x1x32x32xbf16>
    %91 = vector.shape_cast %90 : vector<1x1x32x32xbf16> to vector<32x32xbf16>
    %92 = vector.shape_cast %89 : vector<32x32xbf16> to vector<1x1x32x32xbf16>
    tpu.vector_store %arg6[%c0_75, %c5, %c0_76, %c0_77], %92 {strides = array<i32>} : memref<1x32x32x32xbf16, #tpu.memory_space<vmem>>, vector<1x1x32x32xbf16>,
    %93 = vector.extract_strided_slice %62 {offsets = [240, 0], sizes = [32, 32], strides = [1, 1]} : vector<1280x32xf32> to vector<32x32xf32>
    %94 = arith.truncf %93 : vector<32x32xf32> to vector<32x32xbf16>
    %c0_78 = arith.constant 0 : index
    %c6 = arith.constant 6 : index
    %c0_79 = arith.constant 0 : index
    %c0_80 = arith.constant 0 : index
    %95 = vector.load %arg6[%c0_78, %c6, %c0_79, %c0_80] : memref<1x32x32x32xbf16, #tpu.memory_space<vmem>>, vector<1x1x32x32xbf16>
    %96 = vector.shape_cast %95 : vector<1x1x32x32xbf16> to vector<32x32xbf16>
    %97 = vector.shape_cast %94 : vector<32x32xbf16> to vector<1x1x32x32xbf16>
    tpu.vector_store %arg6[%c0_78, %c6, %c0_79, %c0_80], %97 {strides = array<i32>} : memref<1x32x32x32xbf16, #tpu.memory_space<vmem>>, vector<1x1x32x32xbf16>,
    %98 = vector.extract_strided_slice %62 {offsets = [280, 0], sizes = [32, 32], strides = [1, 1]} : vector<1280x32xf32> to vector<32x32xf32>
    %99 = arith.truncf %98 : vector<32x32xf32> to vector<32x32xbf16>
    %c0_81 = arith.constant 0 : index
    %c7 = arith.constant 7 : index
    %c0_82 = arith.constant 0 : index
    %c0_83 = arith.constant 0 : index
    %100 = vector.load %arg6[%c0_81, %c7, %c0_82, %c0_83] : memref<1x32x32x32xbf16, #tpu.memory_space<vmem>>, vector<1x1x32x32xbf16>
    %101 = vector.shape_cast %100 : vector<1x1x32x32xbf16> to vector<32x32xbf16>
    %102 = vector.shape_cast %99 : vector<32x32xbf16> to vector<1x1x32x32xbf16>
    tpu.vector_store %arg6[%c0_81, %c7, %c0_82, %c0_83], %102 {strides = array<i32>} : memref<1x32x32x32xbf16, #tpu.memory_space<vmem>>, vector<1x1x32x32xbf16>,
    %103 = vector.extract_strided_slice %62 {offsets = [320, 0], sizes = [32, 32], strides = [1, 1]} : vector<1280x32xf32> to vector<32x32xf32>
    %104 = arith.truncf %103 : vector<32x32xf32> to vector<32x32xbf16>
    %c0_84 = arith.constant 0 : index
    %c8 = arith.constant 8 : index
    %c0_85 = arith.constant 0 : index
    %c0_86 = arith.constant 0 : index
    %105 = vector.load %arg6[%c0_84, %c8, %c0_85, %c0_86] : memref<1x32x32x32xbf16, #tpu.memory_space<vmem>>, vector<1x1x32x32xbf16>
    %106 = vector.shape_cast %105 : vector<1x1x32x32xbf16> to vector<32x32xbf16>
    %107 = vector.shape_cast %104 : vector<32x32xbf16> to vector<1x1x32x32xbf16>
    tpu.vector_store %arg6[%c0_84, %c8, %c0_85, %c0_86], %107 {strides = array<i32>} : memref<1x32x32x32xbf16, #tpu.memory_space<vmem>>, vector<1x1x32x32xbf16>,
    %108 = vector.extract_strided_slice %62 {offsets = [360, 0], sizes = [32, 32], strides = [1, 1]} : vector<1280x32xf32> to vector<32x32xf32>
    %109 = arith.truncf %108 : vector<32x32xf32> to vector<32x32xbf16>
    %c0_87 = arith.constant 0 : index
    %c9 = arith.constant 9 : index
    %c0_88 = arith.constant 0 : index
    %c0_89 = arith.constant 0 : index
    %110 = vector.load %arg6[%c0_87, %c9, %c0_88, %c0_89] : memref<1x32x32x32xbf16, #tpu.memory_space<vmem>>, vector<1x1x32x32xbf16>
    %111 = vector.shape_cast %110 : vector<1x1x32x32xbf16> to vector<32x32xbf16>
    %112 = vector.shape_cast %109 : vector<32x32xbf16> to vector<1x1x32x32xbf16>
    tpu.vector_store %arg6[%c0_87, %c9, %c0_88, %c0_89], %112 {strides = array<i32>} : memref<1x32x32x32xbf16, #tpu.memory_space<vmem>>, vector<1x1x32x32xbf16>,
    %113 = vector.extract_strided_slice %62 {offsets = [400, 0], sizes = [32, 32], strides = [1, 1]} : vector<1280x32xf32> to vector<32x32xf32>
    %114 = arith.truncf %113 : vector<32x32xf32> to vector<32x32xbf16>
    %c0_90 = arith.constant 0 : index
    %c10 = arith.constant 10 : index
    %c0_91 = arith.constant 0 : index
    %c0_92 = arith.constant 0 : index
    %115 = vector.load %arg6[%c0_90, %c10, %c0_91, %c0_92] : memref<1x32x32x32xbf16, #tpu.memory_space<vmem>>, vector<1x1x32x32xbf16>
    %116 = vector.shape_cast %115 : vector<1x1x32x32xbf16> to vector<32x32xbf16>
    %117 = vector.shape_cast %114 : vector<32x32xbf16> to vector<1x1x32x32xbf16>
    tpu.vector_store %arg6[%c0_90, %c10, %c0_91, %c0_92], %117 {strides = array<i32>} : memref<1x32x32x32xbf16, #tpu.memory_space<vmem>>, vector<1x1x32x32xbf16>,
    %118 = vector.extract_strided_slice %62 {offsets = [440, 0], sizes = [32, 32], strides = [1, 1]} : vector<1280x32xf32> to vector<32x32xf32>
    %119 = arith.truncf %118 : vector<32x32xf32> to vector<32x32xbf16>
    %c0_93 = arith.constant 0 : index
    %c11 = arith.constant 11 : index
    %c0_94 = arith.constant 0 : index
    %c0_95 = arith.constant 0 : index
    %120 = vector.load %arg6[%c0_93, %c11, %c0_94, %c0_95] : memref<1x32x32x32xbf16, #tpu.memory_space<vmem>>, vector<1x1x32x32xbf16>
    %121 = vector.shape_cast %120 : vector<1x1x32x32xbf16> to vector<32x32xbf16>
    %122 = vector.shape_cast %119 : vector<32x32xbf16> to vector<1x1x32x32xbf16>
    tpu.vector_store %arg6[%c0_93, %c11, %c0_94, %c0_95], %122 {strides = array<i32>} : memref<1x32x32x32xbf16, #tpu.memory_space<vmem>>, vector<1x1x32x32xbf16>,
    %123 = vector.extract_strided_slice %62 {offsets = [480, 0], sizes = [32, 32], strides = [1, 1]} : vector<1280x32xf32> to vector<32x32xf32>
    %124 = arith.truncf %123 : vector<32x32xf32> to vector<32x32xbf16>
    %c0_96 = arith.constant 0 : index
    %c12 = arith.constant 12 : index
    %c0_97 = arith.constant 0 : index
    %c0_98 = arith.constant 0 : index
    %125 = vector.load %arg6[%c0_96, %c12, %c0_97, %c0_98] : memref<1x32x32x32xbf16, #tpu.memory_space<vmem>>, vector<1x1x32x32xbf16>
    %126 = vector.shape_cast %125 : vector<1x1x32x32xbf16> to vector<32x32xbf16>
    %127 = vector.shape_cast %124 : vector<32x32xbf16> to vector<1x1x32x32xbf16>
    tpu.vector_store %arg6[%c0_96, %c12, %c0_97, %c0_98], %127 {strides = array<i32>} : memref<1x32x32x32xbf16, #tpu.memory_space<vmem>>, vector<1x1x32x32xbf16>,
    %128 = vector.extract_strided_slice %62 {offsets = [520, 0], sizes = [32, 32], strides = [1, 1]} : vector<1280x32xf32> to vector<32x32xf32>
    %129 = arith.truncf %128 : vector<32x32xf32> to vector<32x32xbf16>
    %c0_99 = arith.constant 0 : index
    %c13 = arith.constant 13 : index
    %c0_100 = arith.constant 0 : index
    %c0_101 = arith.constant 0 : index
    %130 = vector.load %arg6[%c0_99, %c13, %c0_100, %c0_101] : memref<1x32x32x32xbf16, #tpu.memory_space<vmem>>, vector<1x1x32x32xbf16>
    %131 = vector.shape_cast %130 : vector<1x1x32x32xbf16> to vector<32x32xbf16>
    %132 = vector.shape_cast %129 : vector<32x32xbf16> to vector<1x1x32x32xbf16>
    tpu.vector_store %arg6[%c0_99, %c13, %c0_100, %c0_101], %132 {strides = array<i32>} : memref<1x32x32x32xbf16, #tpu.memory_space<vmem>>, vector<1x1x32x32xbf16>,
    %133 = vector.extract_strided_slice %62 {offsets = [560, 0], sizes = [32, 32], strides = [1, 1]} : vector<1280x32xf32> to vector<32x32xf32>
    %134 = arith.truncf %133 : vector<32x32xf32> to vector<32x32xbf16>
    %c0_102 = arith.constant 0 : index
    %c14 = arith.constant 14 : index
    %c0_103 = arith.constant 0 : index
    %c0_104 = arith.constant 0 : index
    %135 = vector.load %arg6[%c0_102, %c14, %c0_103, %c0_104] : memref<1x32x32x32xbf16, #tpu.memory_space<vmem>>, vector<1x1x32x32xbf16>
    %136 = vector.shape_cast %135 : vector<1x1x32x32xbf16> to vector<32x32xbf16>
    %137 = vector.shape_cast %134 : vector<32x32xbf16> to vector<1x1x32x32xbf16>
    tpu.vector_store %arg6[%c0_102, %c14, %c0_103, %c0_104], %137 {strides = array<i32>} : memref<1x32x32x32xbf16, #tpu.memory_space<vmem>>, vector<1x1x32x32xbf16>,
    %138 = vector.extract_strided_slice %62 {offsets = [600, 0], sizes = [32, 32], strides = [1, 1]} : vector<1280x32xf32> to vector<32x32xf32>
    %139 = arith.truncf %138 : vector<32x32xf32> to vector<32x32xbf16>
    %c0_105 = arith.constant 0 : index
    %c15 = arith.constant 15 : index
    %c0_106 = arith.constant 0 : index
    %c0_107 = arith.constant 0 : index
    %140 = vector.load %arg6[%c0_105, %c15, %c0_106, %c0_107] : memref<1x32x32x32xbf16, #tpu.memory_space<vmem>>, vector<1x1x32x32xbf16>
    %141 = vector.shape_cast %140 : vector<1x1x32x32xbf16> to vector<32x32xbf16>
    %142 = vector.shape_cast %139 : vector<32x32xbf16> to vector<1x1x32x32xbf16>
    tpu.vector_store %arg6[%c0_105, %c15, %c0_106, %c0_107], %142 {strides = array<i32>} : memref<1x32x32x32xbf16, #tpu.memory_space<vmem>>, vector<1x1x32x32xbf16>,
    %143 = vector.extract_strided_slice %62 {offsets = [640, 0], sizes = [32, 32], strides = [1, 1]} : vector<1280x32xf32> to vector<32x32xf32>
    %144 = arith.truncf %143 : vector<32x32xf32> to vector<32x32xbf16>
    %c0_108 = arith.constant 0 : index
    %c16 = arith.constant 16 : index
    %c0_109 = arith.constant 0 : index
    %c0_110 = arith.constant 0 : index
    %145 = vector.load %arg6[%c0_108, %c16, %c0_109, %c0_110] : memref<1x32x32x32xbf16, #tpu.memory_space<vmem>>, vector<1x1x32x32xbf16>
    %146 = vector.shape_cast %145 : vector<1x1x32x32xbf16> to vector<32x32xbf16>
    %147 = vector.shape_cast %144 : vector<32x32xbf16> to vector<1x1x32x32xbf16>
    tpu.vector_store %arg6[%c0_108, %c16, %c0_109, %c0_110], %147 {strides = array<i32>} : memref<1x32x32x32xbf16, #tpu.memory_space<vmem>>, vector<1x1x32x32xbf16>,
    %148 = vector.extract_strided_slice %62 {offsets = [680, 0], sizes = [32, 32], strides = [1, 1]} : vector<1280x32xf32> to vector<32x32xf32>
    %149 = arith.truncf %148 : vector<32x32xf32> to vector<32x32xbf16>
    %c0_111 = arith.constant 0 : index
    %c17 = arith.constant 17 : index
    %c0_112 = arith.constant 0 : index
    %c0_113 = arith.constant 0 : index
    %150 = vector.load %arg6[%c0_111, %c17, %c0_112, %c0_113] : memref<1x32x32x32xbf16, #tpu.memory_space<vmem>>, vector<1x1x32x32xbf16>
    %151 = vector.shape_cast %150 : vector<1x1x32x32xbf16> to vector<32x32xbf16>
    %152 = vector.shape_cast %149 : vector<32x32xbf16> to vector<1x1x32x32xbf16>
    tpu.vector_store %arg6[%c0_111, %c17, %c0_112, %c0_113], %152 {strides = array<i32>} : memref<1x32x32x32xbf16, #tpu.memory_space<vmem>>, vector<1x1x32x32xbf16>,
    %153 = vector.extract_strided_slice %62 {offsets = [720, 0], sizes = [32, 32], strides = [1, 1]} : vector<1280x32xf32> to vector<32x32xf32>
    %154 = arith.truncf %153 : vector<32x32xf32> to vector<32x32xbf16>
    %c0_114 = arith.constant 0 : index
    %c18 = arith.constant 18 : index
    %c0_115 = arith.constant 0 : index
    %c0_116 = arith.constant 0 : index
    %155 = vector.load %arg6[%c0_114, %c18, %c0_115, %c0_116] : memref<1x32x32x32xbf16, #tpu.memory_space<vmem>>, vector<1x1x32x32xbf16>
    %156 = vector.shape_cast %155 : vector<1x1x32x32xbf16> to vector<32x32xbf16>
    %157 = vector.shape_cast %154 : vector<32x32xbf16> to vector<1x1x32x32xbf16>
    tpu.vector_store %arg6[%c0_114, %c18, %c0_115, %c0_116], %157 {strides = array<i32>} : memref<1x32x32x32xbf16, #tpu.memory_space<vmem>>, vector<1x1x32x32xbf16>,
    %158 = vector.extract_strided_slice %62 {offsets = [760, 0], sizes = [32, 32], strides = [1, 1]} : vector<1280x32xf32> to vector<32x32xf32>
    %159 = arith.truncf %158 : vector<32x32xf32> to vector<32x32xbf16>
    %c0_117 = arith.constant 0 : index
    %c19 = arith.constant 19 : index
    %c0_118 = arith.constant 0 : index
    %c0_119 = arith.constant 0 : index
    %160 = vector.load %arg6[%c0_117, %c19, %c0_118, %c0_119] : memref<1x32x32x32xbf16, #tpu.memory_space<vmem>>, vector<1x1x32x32xbf16>
    %161 = vector.shape_cast %160 : vector<1x1x32x32xbf16> to vector<32x32xbf16>
    %162 = vector.shape_cast %159 : vector<32x32xbf16> to vector<1x1x32x32xbf16>
    tpu.vector_store %arg6[%c0_117, %c19, %c0_118, %c0_119], %162 {strides = array<i32>} : memref<1x32x32x32xbf16, #tpu.memory_space<vmem>>, vector<1x1x32x32xbf16>,
    %163 = vector.extract_strided_slice %62 {offsets = [800, 0], sizes = [32, 32], strides = [1, 1]} : vector<1280x32xf32> to vector<32x32xf32>
    %164 = arith.truncf %163 : vector<32x32xf32> to vector<32x32xbf16>
    %c0_120 = arith.constant 0 : index
    %c20 = arith.constant 20 : index
    %c0_121 = arith.constant 0 : index
    %c0_122 = arith.constant 0 : index
    %165 = vector.load %arg6[%c0_120, %c20, %c0_121, %c0_122] : memref<1x32x32x32xbf16, #tpu.memory_space<vmem>>, vector<1x1x32x32xbf16>
    %166 = vector.shape_cast %165 : vector<1x1x32x32xbf16> to vector<32x32xbf16>
    %167 = vector.shape_cast %164 : vector<32x32xbf16> to vector<1x1x32x32xbf16>
    tpu.vector_store %arg6[%c0_120, %c20, %c0_121, %c0_122], %167 {strides = array<i32>} : memref<1x32x32x32xbf16, #tpu.memory_space<vmem>>, vector<1x1x32x32xbf16>,
    %168 = vector.extract_strided_slice %62 {offsets = [840, 0], sizes = [32, 32], strides = [1, 1]} : vector<1280x32xf32> to vector<32x32xf32>
    %169 = arith.truncf %168 : vector<32x32xf32> to vector<32x32xbf16>
    %c0_123 = arith.constant 0 : index
    %c21 = arith.constant 21 : index
    %c0_124 = arith.constant 0 : index
    %c0_125 = arith.constant 0 : index
    %170 = vector.load %arg6[%c0_123, %c21, %c0_124, %c0_125] : memref<1x32x32x32xbf16, #tpu.memory_space<vmem>>, vector<1x1x32x32xbf16>
    %171 = vector.shape_cast %170 : vector<1x1x32x32xbf16> to vector<32x32xbf16>
    %172 = vector.shape_cast %169 : vector<32x32xbf16> to vector<1x1x32x32xbf16>
    tpu.vector_store %arg6[%c0_123, %c21, %c0_124, %c0_125], %172 {strides = array<i32>} : memref<1x32x32x32xbf16, #tpu.memory_space<vmem>>, vector<1x1x32x32xbf16>,
    %173 = vector.extract_strided_slice %62 {offsets = [880, 0], sizes = [32, 32], strides = [1, 1]} : vector<1280x32xf32> to vector<32x32xf32>
    %174 = arith.truncf %173 : vector<32x32xf32> to vector<32x32xbf16>
    %c0_126 = arith.constant 0 : index
    %c22 = arith.constant 22 : index
    %c0_127 = arith.constant 0 : index
    %c0_128 = arith.constant 0 : index
    %175 = vector.load %arg6[%c0_126, %c22, %c0_127, %c0_128] : memref<1x32x32x32xbf16, #tpu.memory_space<vmem>>, vector<1x1x32x32xbf16>
    %176 = vector.shape_cast %175 : vector<1x1x32x32xbf16> to vector<32x32xbf16>
    %177 = vector.shape_cast %174 : vector<32x32xbf16> to vector<1x1x32x32xbf16>
    tpu.vector_store %arg6[%c0_126, %c22, %c0_127, %c0_128], %177 {strides = array<i32>} : memref<1x32x32x32xbf16, #tpu.memory_space<vmem>>, vector<1x1x32x32xbf16>,
    %178 = vector.extract_strided_slice %62 {offsets = [920, 0], sizes = [32, 32], strides = [1, 1]} : vector<1280x32xf32> to vector<32x32xf32>
    %179 = arith.truncf %178 : vector<32x32xf32> to vector<32x32xbf16>
    %c0_129 = arith.constant 0 : index
    %c23 = arith.constant 23 : index
    %c0_130 = arith.constant 0 : index
    %c0_131 = arith.constant 0 : index
    %180 = vector.load %arg6[%c0_129, %c23, %c0_130, %c0_131] : memref<1x32x32x32xbf16, #tpu.memory_space<vmem>>, vector<1x1x32x32xbf16>
    %181 = vector.shape_cast %180 : vector<1x1x32x32xbf16> to vector<32x32xbf16>
    %182 = vector.shape_cast %179 : vector<32x32xbf16> to vector<1x1x32x32xbf16>
    tpu.vector_store %arg6[%c0_129, %c23, %c0_130, %c0_131], %182 {strides = array<i32>} : memref<1x32x32x32xbf16, #tpu.memory_space<vmem>>, vector<1x1x32x32xbf16>,
    %183 = vector.extract_strided_slice %62 {offsets = [960, 0], sizes = [32, 32], strides = [1, 1]} : vector<1280x32xf32> to vector<32x32xf32>
    %184 = arith.truncf %183 : vector<32x32xf32> to vector<32x32xbf16>
    %c0_132 = arith.constant 0 : index
    %c24 = arith.constant 24 : index
    %c0_133 = arith.constant 0 : index
    %c0_134 = arith.constant 0 : index
    %185 = vector.load %arg6[%c0_132, %c24, %c0_133, %c0_134] : memref<1x32x32x32xbf16, #tpu.memory_space<vmem>>, vector<1x1x32x32xbf16>
    %186 = vector.shape_cast %185 : vector<1x1x32x32xbf16> to vector<32x32xbf16>
    %187 = vector.shape_cast %184 : vector<32x32xbf16> to vector<1x1x32x32xbf16>
    tpu.vector_store %arg6[%c0_132, %c24, %c0_133, %c0_134], %187 {strides = array<i32>} : memref<1x32x32x32xbf16, #tpu.memory_space<vmem>>, vector<1x1x32x32xbf16>,
    %188 = vector.extract_strided_slice %62 {offsets = [1000, 0], sizes = [32, 32], strides = [1, 1]} : vector<1280x32xf32> to vector<32x32xf32>
    %189 = arith.truncf %188 : vector<32x32xf32> to vector<32x32xbf16>
    %c0_135 = arith.constant 0 : index
    %c25 = arith.constant 25 : index
    %c0_136 = arith.constant 0 : index
    %c0_137 = arith.constant 0 : index
    %190 = vector.load %arg6[%c0_135, %c25, %c0_136, %c0_137] : memref<1x32x32x32xbf16, #tpu.memory_space<vmem>>, vector<1x1x32x32xbf16>
    %191 = vector.shape_cast %190 : vector<1x1x32x32xbf16> to vector<32x32xbf16>
    %192 = vector.shape_cast %189 : vector<32x32xbf16> to vector<1x1x32x32xbf16>
    tpu.vector_store %arg6[%c0_135, %c25, %c0_136, %c0_137], %192 {strides = array<i32>} : memref<1x32x32x32xbf16, #tpu.memory_space<vmem>>, vector<1x1x32x32xbf16>,
    %193 = vector.extract_strided_slice %62 {offsets = [1040, 0], sizes = [32, 32], strides = [1, 1]} : vector<1280x32xf32> to vector<32x32xf32>
    %194 = arith.truncf %193 : vector<32x32xf32> to vector<32x32xbf16>
    %c0_138 = arith.constant 0 : index
    %c26 = arith.constant 26 : index
    %c0_139 = arith.constant 0 : index
    %c0_140 = arith.constant 0 : index
    %195 = vector.load %arg6[%c0_138, %c26, %c0_139, %c0_140] : memref<1x32x32x32xbf16, #tpu.memory_space<vmem>>, vector<1x1x32x32xbf16>
    %196 = vector.shape_cast %195 : vector<1x1x32x32xbf16> to vector<32x32xbf16>
    %197 = vector.shape_cast %194 : vector<32x32xbf16> to vector<1x1x32x32xbf16>
    tpu.vector_store %arg6[%c0_138, %c26, %c0_139, %c0_140], %197 {strides = array<i32>} : memref<1x32x32x32xbf16, #tpu.memory_space<vmem>>, vector<1x1x32x32xbf16>,
    %198 = vector.extract_strided_slice %62 {offsets = [1080, 0], sizes = [32, 32], strides = [1, 1]} : vector<1280x32xf32> to vector<32x32xf32>
    %199 = arith.truncf %198 : vector<32x32xf32> to vector<32x32xbf16>
    %c0_141 = arith.constant 0 : index
    %c27 = arith.constant 27 : index
    %c0_142 = arith.constant 0 : index
    %c0_143 = arith.constant 0 : index
    %200 = vector.load %arg6[%c0_141, %c27, %c0_142, %c0_143] : memref<1x32x32x32xbf16, #tpu.memory_space<vmem>>, vector<1x1x32x32xbf16>
    %201 = vector.shape_cast %200 : vector<1x1x32x32xbf16> to vector<32x32xbf16>
    %202 = vector.shape_cast %199 : vector<32x32xbf16> to vector<1x1x32x32xbf16>
    tpu.vector_store %arg6[%c0_141, %c27, %c0_142, %c0_143], %202 {strides = array<i32>} : memref<1x32x32x32xbf16, #tpu.memory_space<vmem>>, vector<1x1x32x32xbf16>,
    %203 = vector.extract_strided_slice %62 {offsets = [1120, 0], sizes = [32, 32], strides = [1, 1]} : vector<1280x32xf32> to vector<32x32xf32>
    %204 = arith.truncf %203 : vector<32x32xf32> to vector<32x32xbf16>
    %c0_144 = arith.constant 0 : index
    %c28 = arith.constant 28 : index
    %c0_145 = arith.constant 0 : index
    %c0_146 = arith.constant 0 : index
    %205 = vector.load %arg6[%c0_144, %c28, %c0_145, %c0_146] : memref<1x32x32x32xbf16, #tpu.memory_space<vmem>>, vector<1x1x32x32xbf16>
    %206 = vector.shape_cast %205 : vector<1x1x32x32xbf16> to vector<32x32xbf16>
    %207 = vector.shape_cast %204 : vector<32x32xbf16> to vector<1x1x32x32xbf16>
    tpu.vector_store %arg6[%c0_144, %c28, %c0_145, %c0_146], %207 {strides = array<i32>} : memref<1x32x32x32xbf16, #tpu.memory_space<vmem>>, vector<1x1x32x32xbf16>,
    %208 = vector.extract_strided_slice %62 {offsets = [1160, 0], sizes = [32, 32], strides = [1, 1]} : vector<1280x32xf32> to vector<32x32xf32>
    %209 = arith.truncf %208 : vector<32x32xf32> to vector<32x32xbf16>
    %c0_147 = arith.constant 0 : index
    %c29 = arith.constant 29 : index
    %c0_148 = arith.constant 0 : index
    %c0_149 = arith.constant 0 : index
    %210 = vector.load %arg6[%c0_147, %c29, %c0_148, %c0_149] : memref<1x32x32x32xbf16, #tpu.memory_space<vmem>>, vector<1x1x32x32xbf16>
    %211 = vector.shape_cast %210 : vector<1x1x32x32xbf16> to vector<32x32xbf16>
    %212 = vector.shape_cast %209 : vector<32x32xbf16> to vector<1x1x32x32xbf16>
    tpu.vector_store %arg6[%c0_147, %c29, %c0_148, %c0_149], %212 {strides = array<i32>} : memref<1x32x32x32xbf16, #tpu.memory_space<vmem>>, vector<1x1x32x32xbf16>,
    %213 = vector.extract_strided_slice %62 {offsets = [1200, 0], sizes = [32, 32], strides = [1, 1]} : vector<1280x32xf32> to vector<32x32xf32>
    %214 = arith.truncf %213 : vector<32x32xf32> to vector<32x32xbf16>
    %c0_150 = arith.constant 0 : index
    %c30 = arith.constant 30 : index
    %c0_151 = arith.constant 0 : index
    %c0_152 = arith.constant 0 : index
    %215 = vector.load %arg6[%c0_150, %c30, %c0_151, %c0_152] : memref<1x32x32x32xbf16, #tpu.memory_space<vmem>>, vector<1x1x32x32xbf16>
    %216 = vector.shape_cast %215 : vector<1x1x32x32xbf16> to vector<32x32xbf16>
    %217 = vector.shape_cast %214 : vector<32x32xbf16> to vector<1x1x32x32xbf16>
    tpu.vector_store %arg6[%c0_150, %c30, %c0_151, %c0_152], %217 {strides = array<i32>} : memref<1x32x32x32xbf16, #tpu.memory_space<vmem>>, vector<1x1x32x32xbf16>,
    %218 = vector.extract_strided_slice %62 {offsets = [1240, 0], sizes = [32, 32], strides = [1, 1]} : vector<1280x32xf32> to vector<32x32xf32>
    %219 = arith.truncf %218 : vector<32x32xf32> to vector<32x32xbf16>
    %c0_153 = arith.constant 0 : index
    %c31 = arith.constant 31 : index
    %c0_154 = arith.constant 0 : index
    %c0_155 = arith.constant 0 : index
    %220 = vector.load %arg6[%c0_153, %c31, %c0_154, %c0_155] : memref<1x32x32x32xbf16, #tpu.memory_space<vmem>>, vector<1x1x32x32xbf16>
    %221 = vector.shape_cast %220 : vector<1x1x32x32xbf16> to vector<32x32xbf16>
    %222 = vector.shape_cast %219 : vector<32x32xbf16> to vector<1x1x32x32xbf16>
    tpu.vector_store %arg6[%c0_153, %c31, %c0_154, %c0_155], %222 {strides = array<i32>} : memref<1x32x32x32xbf16, #tpu.memory_space<vmem>>, vector<1x1x32x32xbf16>,
    return
  }
  func.func @transform_0(%arg0: i32, %arg1: i32) -> (i32, i32, i32) {
    %c0_i32 = arith.constant 0 : i32
    %c0_i32_0 = arith.constant 0 : i32
    %c0_i32_1 = arith.constant 0 : i32
    return %arg1, %c0_i32, %c0_i32_0 : i32, i32, i32
  }
  func.func @transform_1(%arg0: i32, %arg1: i32) -> (i32, i32, i32, i32) {
    %c0_i32 = arith.constant 0 : i32
    %c0_i32_0 = arith.constant 0 : i32
    %c0_i32_1 = arith.constant 0 : i32
    %c0_i32_2 = arith.constant 0 : i32
    return %c0_i32, %c0_i32_0, %c0_i32_1, %arg0 : i32, i32, i32, i32
  }
  func.func @transform_2(%arg0: i32, %arg1: i32) -> (i32, i32) {
    %c0_i32 = arith.constant 0 : i32
    %c0_i32_0 = arith.constant 0 : i32
    return %c0_i32, %arg0 : i32, i32
  }
  func.func @transform_3(%arg0: i32, %arg1: i32) -> (i32, i32) {
    %c0_i32 = arith.constant 0 : i32
    %c0_i32_0 = arith.constant 0 : i32
    return %c0_i32, %arg0 : i32, i32
  }
  func.func @transform_4(%arg0: i32, %arg1: i32) -> (i32, i32, i32, i32) {
    %c0_i32 = arith.constant 0 : i32
    %c0_i32_0 = arith.constant 0 : i32
    %c0_i32_1 = arith.constant 0 : i32
    return %arg1, %c0_i32, %c0_i32_0, %arg0 : i32, i32, i32, i32
  }
}

</mosaic_0001>

<bundles_post_ra>
// kernel: tpu_custom_call.1
= control target key start
LH: loop header
LB: loop body
LE: loop exit
PB: predicated region body
PF: predicated region fallthrough
CT: control target
= control target key end

     0   :  { %9 = vsyncpa [#allocation3], 0  ;;  %s17391_s0 = inlined_call_operand.vmem [shape: bf16[2,1400,3], index: 0, kind: input, shape index: {}]   ;;  %s17392_s1 = inlined_call_operand.vmem [shape: bf16[3,3,3,32], index: 1, kind: input, shape index: {}]   ;;  %s17393_s2 = inlined_call_operand.vmem [shape: f32[1,32], index: 2, kind: input, shape index: {}]   ;;  %s17394_s3 = inlined_call_operand.vmem [shape: f32[1,32], index: 3, kind: input, shape index: {}]   ;;  %s17395_s4 = inlined_call_operand.hbm [shape: bf16[2,32,32,32], index: 4, kind: output, shape index: {}]  }
   0x1   :  { %11 = vsyncpa [#allocation3 + $0x1], 0  ;;  %s13353_s15 = smov 0   ;;  %s13355_s16 = smov 0  }
   0x2   :  { %s13357_s17 = smov 0   ;;  %s13359_s18 = smov 0  }
   0x3   :  { %s13361_s19 = smov 0   ;;  %s13363_s20 = smov 0  }
   0x4 LB: > { %s10178_s21 = sadd.s32 4294967295, %s13323_s20   ;;  %s10179_s22 = sadd.s32 4294967294, %s13323_s20   ;;  %s13323_s20 = sphi %s13363_s20, %s17_s20   ;;  %s13319_s19 = sphi %s13361_s19, %s17974_s19   ;;  %s13315_s18 = sphi %s13359_s18, %s17973_s18   ;;  %s13311_s17 = sphi %s13357_s17, %s17972_s17   ;;  %s13307_s16 = sphi %s13355_s16, %s17971_s16   ;;  %s13303_s15 = sphi %s13353_s15, %s17970_s15  }
   0x5   : > { %s26_s23 = sadd.s32 1, %s13319_s19  ;;  %s142_s24 = sadd.s32 1, %s13311_s17 }
   0x6   : > { %p27_p0 = scmp.ge.s32.totalorder %s26_s23, 2  ;;  %p152_p1 = scmp.ne.s32.totalorder %s13311_s17, %s13307_s16 }
   0x7   : > { %p153_p2 = scmp.eq.s32.totalorder %s10178_s21, 1  ;;  %p158_p3 = scmp.ne.s32.totalorder %s13307_s16, %s13303_s15 }
   0x8   : > { %s17976_s23 = smov (%p27_p0, %s26_s23), 0  ;;  %p159_p5 = scmp.eq.s32.totalorder %s10179_s22, 1 }
   0x9   : > { %p13393_p4 = por %p153_p2, %p152_p1  ;;  %s137_s26 = ssub.s32 %s13319_s19, %s17976_s23 }
   0xa   : > { %p10185_p6 = scmp.ge.s32.totalorder %s13323_s20, 1  ;;  %p140_p7 = scmp.eq.s32.totalorder %s137_s26, 0 }
   0xb   : > { %p13400_p8 = por %p159_p5, %p158_p3  ;;  %p204_p9 = scmp.lt.s32.totalorder %s13323_s20, 3 }
   0xc   : > { %s13406_s28 = scalar_select %p140_p7, %s13311_s17, %s142_s24  }
   0xd   : > { %p205_p10 = pnand %p10185_p6, %p204_p9 }
   0xf   : > { %208 = sbr.rel (%p205_p10) target bundleno = 3046 (0xbe6), region = 36 }
  0x14   : > { %v10188_v0 = vld [vmem:[%s17392_s1 + $0x6] sm:$0x3]  ;;  %vm1070_vm0 = vcmask 1040384   ;;  %vm1071_vm1 = vcmask 1041408   ;;  %p240_p11 = scmp.lt.s32.totalorder %s13315_s18, 1  ;;  %v13325_v1 = vmov 65535  }
  0x15   : > { %v1072_v2 = vsel %vm1070_vm0, 4294967295, %v13325_v1  ;;  %v10357_v3 = vld [vmem:[%s17392_s1 + $0xc] sm:$0x3]  ;;  %v10446_v4 = vld [vmem:[%s17392_s1 + $0x2] sm:$0x3]  ;;  %vm829_vm2 = vcmask 23552  }
  0x16   : > { %v13418_v5 = vsel %vm1071_vm1, %v1072_v2, 0  ;;  %s241_s9 = scalar_select %p240_p11, %s13315_s18, 1  ;;  %v426_v6 = vld [vmem:[%s17392_s1] sm:$0x3]  ;;  %v10531_v7 = vld [vmem:[%s17392_s1 + $0x8] sm:$0x3] }
  0x17   : > { %v1075_v8 = vand.u32 %v10188_v0, %v13418_v5  ;;  %v2197_v9 = vand.u32 %v10357_v3, %v13418_v5  ;;  %v4166_v10 = vand.u32 %v10446_v4, %v13418_v5  ;;  %v1785_v11 = vand.u32 %v13418_v5, %v426_v6  ;;  %s11080_s8 = sshll.u32 %s13315_s18, 9 }
  0x18   : > { %s13014_s14 = smul.u32 700, %s241_s9  ;;  %v5651_v12 = vand.u32 %v10531_v7, %v13418_v5  ;;  %vm3280_vm3 = vsmask.f32 7424  ;;  %vm6753_vm4 = vcmask 1046528   ;;  %vm9766_vm6 = vcmask 257024   ;;  %s10063_s11 = scalar_lea.hbm %s17395_s4, %s11080_s8 }
  0x19   : > { %12847 = vmatpush.bf16.msra.mxu1 %v1075_v8  ;;  %12848 = vmatpush.bf16.msra.mxu2 %v1075_v8  ;;  %s10066_s13 = sshll.u32 %s10063_s11, 4  ;;  %s10067_s13 = int_to_ptr.hbm [resolvable:$true] %s10066_s13 }
  0x1a   : > { %12849 = vmatpush.bf16.msra.mxu3 %v1075_v8  ;;  %1084 = vmatpush.bf16.msra.mxu0 %v1075_v8  ;;  %s13435_s24 = scalar_lea.vmem %s17391_s0, %s13014_s14  ;;  %s237_s14 = sand.u32 1, %s13307_s16  }
  0x1b   : > { %v12892_v13 = vld [vmem:[%s13435_s24 + $0xb4] sm:$0xff]   ;;  %v12894_v17 = vld [vmem:[%s13435_s24 + $0xbc] sm:$0xff]   ;;  %v12896_v21 = vld [vmem:[%s13435_s24 + $0xc4] sm:$0xff]   ;;  %s10186_s21 = sshll.u32 %s237_s14, 9  ;;  %s10051_s18 = scalar_lea.sflag [#allocation3], %s237_s14 }
  0x1c   : > { %v12932_v14 = vld [vmem:[%s13435_s24 + $0x154] sm:$0xff]   ;;  %10209 = vmatmul.msk.bf16.vlgmr.msra.gmra.mxu1 %vm829_vm2, %v12892_v13  ;;  %v12934_v18 = vld [vmem:[%s13435_s24 + $0x15c] sm:$0xff]   ;;  %v12936_v22 = vld [vmem:[%s13435_s24 + $0x164] sm:$0xff]   ;;  %s15754_s22 = scalar_lea.vmem [#allocation2], %s10186_s21  ;;  %s13259_s21 = sshra.s32 %s10067_s13, 4  ;;  %s13260_s21 = int_to_ptr.hbm [resolvable:$true] %s13259_s21 }
  0x1d   : > { %v12972_v15 = vld [vmem:[%s13435_s24 + $0x1f4] sm:$0xff]   ;;  %2206 = vmatpush.bf16.msrb.mxu2 %v2197_v9  ;;  %1794 = vmatpush.bf16.msrb.mxu1 %v1785_v11  ;;  %v12974_v19 = vld [vmem:[%s13435_s24 + $0x1fc] sm:$0xff]   ;;  %v12976_v23 = vld [vmem:[%s13435_s24 + $0x204] sm:$0xff]   ;;  %s10064_s12 = sshll.u32 %s15754_s22, 4  ;;  %s13261_s26 = scalar_lea.hbm %s13260_s21, 512  ;;  %s10065_s12 = int_to_ptr.vmem [resolvable:$true] %s10064_s12 }
  0x1e   : > { %4175 = vmatpush.bf16.msrb.mxu3 %v4166_v10  ;;  %v12852_v16 = vld [vmem:[%s13435_s24 + $0x14] sm:$0xff]   ;;  %5660 = vmatpush.bf16.msrb.mxu0 %v5651_v12  ;;  %v12854_v20 = vld [vmem:[%s13435_s24 + $0x1c] sm:$0xff]   ;;  %v12856_v24 = vld [vmem:[%s13435_s24 + $0x24] sm:$0xff]   ;;  %p13262_p12 = scmp.ne.s32.totalorder %s13260_s21, %s13261_s26  ;;  %p13266_p1 = scmp.lt.s32.totalorder %s13260_s21, %s17395_s4 }
  0x1f   : > { %10229 = vmatmul.msk.bf16.vlgmr.msra.gmra.mxu2 %vm829_vm2, %v12932_v14  ;;  %10249 = vmatmul.msk.bf16.vlgmr.msra.gmra.mxu3 %vm829_vm2, %v12972_v15  ;;  %v12898_v25 = vld [vmem:[%s13435_s24 + $0xcc] sm:$0xff]   ;;  %v12900_v29 = vld [vmem:[%s13435_s24 + $0xd4] sm:$0xff]   ;;  %v12902_v33 = vld [vmem:[%s13435_s24 + $0xdc] sm:$0xff]  }
  0x20   : > { %10189 = vmatmul.msk.bf16.vlgmr.msra.gmra.mxu0 %vm829_vm2, %v12852_v16  ;;  %v12938_v26 = vld [vmem:[%s13435_s24 + $0x16c] sm:$0xff]   ;;  %v12940_v30 = vld [vmem:[%s13435_s24 + $0x174] sm:$0xff]   ;;  %v12942_v34 = vld [vmem:[%s13435_s24 + $0x17c] sm:$0xff]   ;;  %p13263_p13 = pnand %p13262_p12, %p13393_p4 }
  0x21   : > { %v12978_v27 = vld [vmem:[%s13435_s24 + $0x20c] sm:$0xff]   ;;  %v12980_v31 = vld [vmem:[%s13435_s24 + $0x214] sm:$0xff]   ;;  %v12982_v35 = vld [vmem:[%s13435_s24 + $0x21c] sm:$0xff]  }
  0x22   : > { %v12858_v28 = vld [vmem:[%s13435_s24 + $0x2c] sm:$0xff]   ;;  %v12860_v32 = vld [vmem:[%s13435_s24 + $0x34] sm:$0xff]   ;;  %v12862_v36 = vld [vmem:[%s13435_s24 + $0x3c] sm:$0xff]   ;;  %p13264_p0 = pneg %p13263_p13 }
  0x23   : > { %v12904_v37 = vld [vmem:[%s13435_s24 + $0xe4] sm:$0xff]   ;;  %v12906_v41 = vld [vmem:[%s13435_s24 + $0xec] sm:$0xff]   ;;  %v12908_v45 = vld [vmem:[%s13435_s24 + $0xf4] sm:$0xff]  }
  0x24   : > { %v12944_v38 = vld [vmem:[%s13435_s24 + $0x184] sm:$0xff]   ;;  %v12946_v42 = vld [vmem:[%s13435_s24 + $0x18c] sm:$0xff]   ;;  %v12948_v46 = vld [vmem:[%s13435_s24 + $0x194] sm:$0xff]  }
  0x25   : > { %v12984_v39 = vld [vmem:[%s13435_s24 + $0x224] sm:$0xff]   ;;  %v12986_v43 = vld [vmem:[%s13435_s24 + $0x22c] sm:$0xff]   ;;  %v12988_v48 = vld [vmem:[%s13435_s24 + $0x234] sm:$0xff]  }
  0x26   : > { %v12864_v40 = vld [vmem:[%s13435_s24 + $0x44] sm:$0xff]   ;;  %v12866_v44 = vld [vmem:[%s13435_s24 + $0x4c] sm:$0xff]   ;;  %v12868_v49 = vld [vmem:[%s13435_s24 + $0x54] sm:$0xff]  }
  0x27   : > { %v12910_v57 = vld [vmem:[%s13435_s24 + $0xfc] sm:$0xff]   ;;  %v12912_v6 = vld [vmem:[%s13435_s24 + $0x104] sm:$0xff]  }
  0x28   : > { %v12950_v58 = vld [vmem:[%s13435_s24 + $0x19c] sm:$0xff]   ;;  %v12952_v7 = vld [vmem:[%s13435_s24 + $0x1a4] sm:$0xff]  }
  0x29   : > { %v12990_v60 = vld [vmem:[%s13435_s24 + $0x23c] sm:$0xff]   ;;  %v12992_v9 = vld [vmem:[%s13435_s24 + $0x244] sm:$0xff]  }
  0x2a   : > { %v12870_v61 = vld [vmem:[%s13435_s24 + $0x5c] sm:$0xff]   ;;  %v12872_v10 = vld [vmem:[%s13435_s24 + $0x64] sm:$0xff]  }
  0x2c   : > { %10210 = vmatmul.msk.bf16.gmra.mxu1 %vm829_vm2, %v12894_v17 }
  0x2f   : > { %10230 = vmatmul.msk.bf16.gmra.mxu2 %vm829_vm2, %v12934_v18  ;;  %10250 = vmatmul.msk.bf16.gmra.mxu3 %vm829_vm2, %v12974_v19  ;;  %v12914_v18 = vld [vmem:[%s13435_s24 + $0x10c] sm:$0xff]  }
  0x30   : > { %10190 = vmatmul.msk.bf16.gmra.mxu0 %vm829_vm2, %v12854_v20  ;;  %v12954_v19 = vld [vmem:[%s13435_s24 + $0x1ac] sm:$0xff]  }
  0x3c   : > { %10211 = vmatmul.msk.bf16.gmra.mxu1 %vm829_vm2, %v12896_v21  ;;  %v12994_v21 = vld [vmem:[%s13435_s24 + $0x24c] sm:$0xff]  }
  0x3f   : > { %10231 = vmatmul.msk.bf16.gmra.mxu2 %vm829_vm2, %v12936_v22  ;;  %10251 = vmatmul.msk.bf16.gmra.mxu3 %vm829_vm2, %v12976_v23  ;;  %v12874_v22 = vld [vmem:[%s13435_s24 + $0x6c] sm:$0xff]  }
  0x40   : > { %10191 = vmatmul.msk.bf16.gmra.mxu0 %vm829_vm2, %v12856_v24 }
  0x4c   : > { %10212 = vmatmul.msk.bf16.gmra.mxu1 %vm829_vm2, %v12898_v25 }
  0x4f   : > { %10232 = vmatmul.msk.bf16.gmra.mxu2 %vm829_vm2, %v12938_v26  ;;  %10252 = vmatmul.msk.bf16.gmra.mxu3 %vm829_vm2, %v12978_v27 }
  0x50   : > { %10192 = vmatmul.msk.bf16.gmra.mxu0 %vm829_vm2, %v12858_v28 }
  0x5c   : > { %10213 = vmatmul.msk.bf16.gmra.mxu1 %vm829_vm2, %v12900_v29 }
  0x5f   : > { %10233 = vmatmul.msk.bf16.gmra.mxu2 %vm829_vm2, %v12940_v30  ;;  %10253 = vmatmul.msk.bf16.gmra.mxu3 %vm829_vm2, %v12980_v31  ;;  %v12916_v30 = vld [vmem:[%s13435_s24 + $0x114] sm:$0xff]  }
  0x60   : > { %10193 = vmatmul.msk.bf16.gmra.mxu0 %vm829_vm2, %v12860_v32  ;;  %v12956_v31 = vld [vmem:[%s13435_s24 + $0x1b4] sm:$0xff]  }
  0x6c   : > { %10214 = vmatmul.msk.bf16.gmra.mxu1 %vm829_vm2, %v12902_v33  ;;  %v12996_v33 = vld [vmem:[%s13435_s24 + $0x254] sm:$0xff]  }
  0x6f   : > { %10234 = vmatmul.msk.bf16.gmra.mxu2 %vm829_vm2, %v12942_v34  ;;  %10254 = vmatmul.msk.bf16.gmra.mxu3 %vm829_vm2, %v12982_v35  ;;  %v12876_v34 = vld [vmem:[%s13435_s24 + $0x74] sm:$0xff]  }
  0x70   : > { %10194 = vmatmul.msk.bf16.gmra.mxu0 %vm829_vm2, %v12862_v36 }
  0x7c   : > { %10215 = vmatmul.msk.bf16.gmra.mxu1 %vm829_vm2, %v12904_v37 }
  0x7f   : > { %10235 = vmatmul.msk.bf16.gmra.mxu2 %vm829_vm2, %v12944_v38  ;;  %10255 = vmatmul.msk.bf16.gmra.mxu3 %vm829_vm2, %v12984_v39 }
  0x80   : > { %10195 = vmatmul.msk.bf16.gmra.mxu0 %vm829_vm2, %v12864_v40 }
  0x8c   : > { %10216 = vmatmul.msk.bf16.gmra.mxu1 %vm829_vm2, %v12906_v41 }
  0x8f   : > { %10236 = vmatmul.msk.bf16.gmra.mxu2 %vm829_vm2, %v12946_v42  ;;  %10256 = vmatmul.msk.bf16.gmra.mxu3 %vm829_vm2, %v12986_v43  ;;  %v12918_v42 = vld [vmem:[%s13435_s24 + $0x11c] sm:$0xff]  }
  0x90   : > { %10196 = vmatmul.msk.bf16.gmra.mxu0 %vm829_vm2, %v12866_v44  ;;  %v12958_v43 = vld [vmem:[%s13435_s24 + $0x1bc] sm:$0xff]  }
  0x99   : > { %v13503_v47 = vpop.f32.mrf.mxu1 }
  0x9c   : > { %10217 = vmatmul.msk.bf16.gmra.mxu1 %vm829_vm2, %v12908_v45  ;;  %v12998_v45 = vld [vmem:[%s13435_s24 + $0x25c] sm:$0xff]  }
  0x9d   : > { %v13507_v50 = vpop.f32.mrf.mxu0 }
  0x9f   : > { %10237 = vmatmul.msk.bf16.gmra.mxu2 %vm829_vm2, %v12948_v46  ;;  %10257 = vmatmul.msk.bf16.gmra.mxu3 %vm829_vm2, %v12988_v48  ;;  %v12878_v46 = vld [vmem:[%s13435_s24 + $0x7c] sm:$0xff]  }
  0xa0   : > { %10197 = vmatmul.msk.bf16.gmra.mxu0 %vm829_vm2, %v12868_v49 }
  0xa1   : > { %v13517_v53 = vpop.f32.mrf.mxu1 }
  0xa2   : > { %v13513_v51 = vpop.f32.mrf.mxu2  ;;  %v13515_v52 = vpop.f32.mrf.mxu3 }
  0xa3   : > { %17453 = vst [vmem:[#allocation5_spill] sm:$0xff] %v13513_v51 }
  0xa4   : > { %17454 = vst [vmem:[#allocation6_spill] sm:$0xff] %v13515_v52  ;;  %v12890_v52 = vld [vmem:[%s13435_s24 + $0xac] sm:$0xff]  }
  0xa5   : > { %v13519_v54 = vpop.f32.mrf.mxu0 }
  0xa9   : > { %v13527_v59 = vpop.f32.mrf.mxu1 }
  0xaa   : > { %v13521_v55 = vpop.f32.mrf.mxu2  ;;  %v13523_v56 = vpop.f32.mrf.mxu3 }
  0xab   : > { %17455 = vst [vmem:[#allocation7_spill] sm:$0xff] %v13521_v55 }
  0xac   : > { %17456 = vst [vmem:[#allocation8_spill] sm:$0xff] %v13523_v56  ;;  %10218 = vmatmul.msk.bf16.gmra.mxu1 %vm829_vm2, %v12910_v57 }
  0xad   : > { %v13531_v62 = vpop.f32.mrf.mxu0 }
  0xaf   : > { %10238 = vmatmul.msk.bf16.gmra.mxu2 %vm829_vm2, %v12950_v58  ;;  %10258 = vmatmul.msk.bf16.gmra.mxu3 %vm829_vm2, %v12990_v60 }
  0xb0   : > { %10198 = vmatmul.msk.bf16.gmra.mxu0 %vm829_vm2, %v12870_v61 }
  0xb1   : > { %v13541_v1 = vpop.f32.mrf.mxu1 }
  0xb2   : > { %v13537_v63 = vpop.f32.mrf.mxu2  ;;  %v13539_v0 = vpop.f32.mrf.mxu3  ;;  %17459 = vst [vmem:[#allocation11_spill] sm:$0xff] %v13541_v1  ;;  %v14009_v1 = vld [vmem:[%s13435_s24 + $0x70] sm:$0xff]  }
  0xb3   : > { %17457 = vst [vmem:[#allocation9_spill] sm:$0xff] %v13537_v63  ;;  %v13802_v63 = vld [vmem:[%s13435_s24 + $0x30] sm:$0xff]  }
  0xb4   : > { %17458 = vst [vmem:[#allocation10_spill] sm:$0xff] %v13539_v0  ;;  %v13008_v0 = vld [vmem:[%s13435_s24 + $0x284] sm:$0xff]  }
  0xb5   : > { %v13543_v2 = vpop.f32.mrf.mxu0 }
  0xb9   : > { %v1188_v8 = vpop.f32.mrf.mxu1 }
  0xba   : > { %v13545_v3 = vpop.f32.mrf.mxu2  ;;  %v13547_v4 = vpop.f32.mrf.mxu3  ;;  %v12960_v8 = vld [vmem:[%s13435_s24 + $0x1c4] sm:$0xff]  }
  0xbb   : > { %17460 = vst [vmem:[#allocation12_spill] sm:$0xff] %v13545_v3  ;;  %v11074_v3 = vld [vmem:[%s13435_s24 + $0x8] sm:$0xff] }
  0xbc   : > { %17461 = vst [vmem:[#allocation13_spill] sm:$0xff] %v13547_v4  ;;  %10219 = vmatmul.msk.bf16.gmra.mxu1 %vm829_vm2, %v12912_v6 }
  0xbd   : > { %v1096_v11 = vpop.f32.mrf.mxu0 }
  0xbe   : > { %v12880_v11 = vld [vmem:[%s13435_s24 + $0x84] sm:$0xff]  }
  0xbf   : > { %10239 = vmatmul.msk.bf16.gmra.mxu2 %vm829_vm2, %v12952_v7  ;;  %10259 = vmatmul.msk.bf16.gmra.mxu3 %vm829_vm2, %v12992_v9  ;;  %v12920_v7 = vld [vmem:[%s13435_s24 + $0x124] sm:$0xff]  }
  0xc0   : > { %10199 = vmatmul.msk.bf16.gmra.mxu0 %vm829_vm2, %v12872_v10  ;;  %v13000_v10 = vld [vmem:[%s13435_s24 + $0x264] sm:$0xff]  }
  0xc1   : > { %v13557_v14 = vpop.f32.mrf.mxu1 }
  0xc2   : > { %v1280_v12 = vpop.f32.mrf.mxu2  ;;  %v1372_v13 = vpop.f32.mrf.mxu3  ;;  %17462 = vst [vmem:[#allocation14_spill] sm:$0xff] %v13557_v14 }
  0xc5   : > { %v13559_v15 = vpop.f32.mrf.mxu0 }
  0xc9   : > { %v13567_v20 = vpop.f32.mrf.mxu1 }
  0xca   : > { %v13561_v16 = vpop.f32.mrf.mxu2  ;;  %v13563_v17 = vpop.f32.mrf.mxu3  ;;  %17465 = vst [vmem:[#allocation17_spill] sm:$0xff] %v13567_v20 }
  0xcb   : > { %17463 = vst [vmem:[#allocation15_spill] sm:$0xff] %v13561_v16 }
  0xcc   : > { %17464 = vst [vmem:[#allocation16_spill] sm:$0xff] %v13563_v17  ;;  %10220 = vmatmul.msk.bf16.gmra.mxu1 %vm829_vm2, %v12914_v18  ;;  %v12968_v17 = vld [vmem:[%s13435_s24 + $0x1e4] sm:$0xff]  }
  0xcd   : > { %v13571_v23 = vpop.f32.mrf.mxu0 }
  0xcf   : > { %10240 = vmatmul.msk.bf16.gmra.mxu2 %vm829_vm2, %v12954_v19  ;;  %10260 = vmatmul.msk.bf16.gmra.mxu3 %vm829_vm2, %v12994_v21 }
  0xd0   : > { %10200 = vmatmul.msk.bf16.gmra.mxu0 %vm829_vm2, %v12874_v22 }
  0xd1   : > { %v13581_v26 = vpop.f32.mrf.mxu1 }
  0xd2   : > { %v13577_v24 = vpop.f32.mrf.mxu2  ;;  %v13579_v25 = vpop.f32.mrf.mxu3  ;;  %17468 = vst [vmem:[#allocation20_spill] sm:$0xff] %v13581_v26 }
  0xd3   : > { %17466 = vst [vmem:[#allocation18_spill] sm:$0xff] %v13577_v24 }
  0xd4   : > { %17467 = vst [vmem:[#allocation19_spill] sm:$0xff] %v13579_v25  ;;  %v12928_v25 = vld [vmem:[%s13435_s24 + $0x144] sm:$0xff]  }
  0xd5   : > { %v13583_v27 = vpop.f32.mrf.mxu0 }
  0xd9   : > { %v13591_v32 = vpop.f32.mrf.mxu1 }
  0xda   : > { %v13585_v28 = vpop.f32.mrf.mxu2  ;;  %v13587_v29 = vpop.f32.mrf.mxu3  ;;  %17471 = vst [vmem:[#allocation23_spill] sm:$0xff] %v13591_v32  ;;  %v13988_v32 = vld [vmem:[%s13435_s24 + $0x68] sm:$0xff]  }
  0xdb   : > { %17469 = vst [vmem:[#allocation21_spill] sm:$0xff] %v13585_v28 }
  0xdc   : > { %17470 = vst [vmem:[#allocation22_spill] sm:$0xff] %v13587_v29  ;;  %10221 = vmatmul.msk.bf16.gmra.mxu1 %vm829_vm2, %v12916_v30 }
  0xdd   : > { %v13595_v35 = vpop.f32.mrf.mxu0 }
  0xdf   : > { %10241 = vmatmul.msk.bf16.gmra.mxu2 %vm829_vm2, %v12956_v31  ;;  %10261 = vmatmul.msk.bf16.gmra.mxu3 %vm829_vm2, %v12996_v33  ;;  %v12922_v31 = vld [vmem:[%s13435_s24 + $0x12c] sm:$0xff]  }
  0xe0   : > { %10201 = vmatmul.msk.bf16.gmra.mxu0 %vm829_vm2, %v12876_v34  ;;  %v12962_v33 = vld [vmem:[%s13435_s24 + $0x1cc] sm:$0xff]  }
  0xe1   : > { %v1199_v38 = vpop.f32.mrf.mxu1 }
  0xe2   : > { %v13601_v36 = vpop.f32.mrf.mxu2  ;;  %v13603_v37 = vpop.f32.mrf.mxu3  ;;  %v13002_v38 = vld [vmem:[%s13435_s24 + $0x26c] sm:$0xff]  }
  0xe3   : > { %17472 = vst [vmem:[#allocation24_spill] sm:$0xff] %v13601_v36 }
  0xe4   : > { %17473 = vst [vmem:[#allocation25_spill] sm:$0xff] %v13603_v37 }
  0xe5   : > { %v1107_v39 = vpop.f32.mrf.mxu0 }
  0xe6   : > { %v12882_v39 = vld [vmem:[%s13435_s24 + $0x8c] sm:$0xff]  }
  0xe9   : > { %v13607_v44 = vpop.f32.mrf.mxu1 }
  0xea   : > { %v1291_v40 = vpop.f32.mrf.mxu2  ;;  %v1383_v41 = vpop.f32.mrf.mxu3  ;;  %17474 = vst [vmem:[#allocation26_spill] sm:$0xff] %v13607_v44 }
  0xec   : > { %10222 = vmatmul.msk.bf16.gmra.mxu1 %vm829_vm2, %v12918_v42 }
  0xed   : > { %v13611_v48 = vpop.f32.mrf.mxu0 }
  0xef   : > { %10242 = vmatmul.msk.bf16.gmra.mxu2 %vm829_vm2, %v12958_v43  ;;  %10262 = vmatmul.msk.bf16.gmra.mxu3 %vm829_vm2, %v12998_v45 }
  0xf0   : > { %10202 = vmatmul.msk.bf16.gmra.mxu0 %vm829_vm2, %v12878_v46 }
  0xf1   : > { %v13621_v58 = vpop.f32.mrf.mxu1 }
  0xf2   : > { %v13617_v49 = vpop.f32.mrf.mxu2  ;;  %v13619_v57 = vpop.f32.mrf.mxu3  ;;  %17477 = vst [vmem:[#allocation29_spill] sm:$0xff] %v13621_v58 }
  0xf3   : > { %17475 = vst [vmem:[#allocation27_spill] sm:$0xff] %v13617_v49 }
  0xf4   : > { %17476 = vst [vmem:[#allocation28_spill] sm:$0xff] %v13619_v57 }
  0xf5   : > { %v13623_v60 = vpop.f32.mrf.mxu0 }
  0xf9   : > { %v13631_v9 = vpop.f32.mrf.mxu1 }
  0xfa   : > { %v13625_v61 = vpop.f32.mrf.mxu2  ;;  %v13627_v6 = vpop.f32.mrf.mxu3  ;;  %17480 = vst [vmem:[#allocation32_spill] sm:$0xff] %v13631_v9 }
  0xfb   : > { %17478 = vst [vmem:[#allocation30_spill] sm:$0xff] %v13625_v61 }
  0xfc   : > { %17479 = vst [vmem:[#allocation31_spill] sm:$0xff] %v13627_v6  ;;  %10223 = vmatmul.msk.bf16.gmra.mxu1 %vm829_vm2, %v12920_v7 }
  0xfd   : > { %v13635_v12 = vpop.f32.mrf.mxu0 }
  0xff   : > { %10243 = vmatmul.msk.bf16.gmra.mxu2 %vm829_vm2, %v12960_v8  ;;  %10263 = vmatmul.msk.bf16.gmra.mxu3 %vm829_vm2, %v13000_v10  ;;  %v12924_v8 = vld [vmem:[%s13435_s24 + $0x134] sm:$0xff]  }
 0x100   : > { %10203 = vmatmul.msk.bf16.gmra.mxu0 %vm829_vm2, %v12880_v11  ;;  %v12964_v10 = vld [vmem:[%s13435_s24 + $0x1d4] sm:$0xff]  }
 0x101   : > { %v13645_v19 = vpop.f32.mrf.mxu1 }
 0x102   : > { %v13641_v13 = vpop.f32.mrf.mxu2  ;;  %v13643_v18 = vpop.f32.mrf.mxu3  ;;  %17483 = vst [vmem:[#allocation35_spill] sm:$0xff] %v13645_v19 }
 0x103   : > { %17481 = vst [vmem:[#allocation33_spill] sm:$0xff] %v13641_v13 }
 0x104   : > { %17482 = vst [vmem:[#allocation34_spill] sm:$0xff] %v13643_v18 }
 0x105   : > { %v13647_v21 = vpop.f32.mrf.mxu0 }
 0x109   : > { %v1211_v34 = vpop.f32.mrf.mxu1 }
 0x10a   : > { %v13649_v22 = vpop.f32.mrf.mxu2  ;;  %v13651_v30 = vpop.f32.mrf.mxu3 }
 0x10b   : > { %17484 = vst [vmem:[#allocation36_spill] sm:$0xff] %v13649_v22 }
 0x10c   : > { %17485 = vst [vmem:[#allocation37_spill] sm:$0xff] %v13651_v30  ;;  %10224 = vmatmul.msk.bf16.gmra.mxu1 %vm829_vm2, %v12922_v31  ;;  %v13004_v31 = vld [vmem:[%s13435_s24 + $0x274] sm:$0xff]   ;;  %v12926_v30 = vld [vmem:[%s13435_s24 + $0x13c] sm:$0xff]  }
 0x10d   : > { %v1119_v40 = vpop.f32.mrf.mxu0 }
 0x10f   : > { %10244 = vmatmul.msk.bf16.gmra.mxu2 %vm829_vm2, %v12962_v33  ;;  %10264 = vmatmul.msk.bf16.gmra.mxu3 %vm829_vm2, %v13002_v38  ;;  %v12884_v33 = vld [vmem:[%s13435_s24 + $0x94] sm:$0xff]  }
 0x110   : > { %10204 = vmatmul.msk.bf16.gmra.mxu0 %vm829_vm2, %v12882_v39 }
 0x111   : > { %v13661_v43 = vpop.f32.mrf.mxu1 }
 0x112   : > { %v1303_v41 = vpop.f32.mrf.mxu2  ;;  %v1395_v42 = vpop.f32.mrf.mxu3  ;;  %17486 = vst [vmem:[#allocation38_spill] sm:$0xff] %v13661_v43 }
 0x115   : > { %v13663_v45 = vpop.f32.mrf.mxu0 }
 0x119   : > { %v13671_v11 = vpop.f32.mrf.mxu1 }
 0x11a   : > { %v13665_v46 = vpop.f32.mrf.mxu2  ;;  %v13667_v7 = vpop.f32.mrf.mxu3  ;;  %17489 = vst [vmem:[#allocation41_spill] sm:$0xff] %v13671_v11 }
 0x11b   : > { %17487 = vst [vmem:[#allocation39_spill] sm:$0xff] %v13665_v46 }
 0x11c   : > { %17488 = vst [vmem:[#allocation40_spill] sm:$0xff] %v13667_v7  ;;  %10225 = vmatmul.msk.bf16.gmra.mxu1 %vm829_vm2, %v12924_v8  ;;  %v12966_v8 = vld [vmem:[%s13435_s24 + $0x1dc] sm:$0xff]  }
 0x11d   : > { %v13675_v34 = vpop.f32.mrf.mxu0 }
 0x11f   : > { %10245 = vmatmul.msk.bf16.gmra.mxu2 %vm829_vm2, %v12964_v10  ;;  %10265 = vmatmul.msk.bf16.gmra.mxu3 %vm829_vm2, %v13004_v31  ;;  %v13006_v31 = vld [vmem:[%s13435_s24 + $0x27c] sm:$0xff]  }
 0x120   : > { %10205 = vmatmul.msk.bf16.gmra.mxu0 %vm829_vm2, %v12884_v33  ;;  %v12886_v33 = vld [vmem:[%s13435_s24 + $0x9c] sm:$0xff]  }
 0x121   : > { %v13685_v40 = vpop.f32.mrf.mxu1 }
 0x122   : > { %v13681_v38 = vpop.f32.mrf.mxu2  ;;  %v13683_v39 = vpop.f32.mrf.mxu3  ;;  %17492 = vst [vmem:[#allocation44_spill] sm:$0xff] %v13685_v40  ;;  %v13905_v40 = vld [vmem:[%s13435_s24 + $0x50] sm:$0xff]  }
 0x123   : > { %17490 = vst [vmem:[#allocation42_spill] sm:$0xff] %v13681_v38 }
 0x124   : > { %17491 = vst [vmem:[#allocation43_spill] sm:$0xff] %v13683_v39 }
 0x125   : > { %v13687_v41 = vpop.f32.mrf.mxu0 }
 0x129   : > { %v13695_v10 = vpop.f32.mrf.mxu1 }
 0x12a   : > { %v13689_v42 = vpop.f32.mrf.mxu2  ;;  %v13691_v7 = vpop.f32.mrf.mxu3  ;;  %17495 = vst [vmem:[#allocation47_spill] sm:$0xff] %v13695_v10 }
 0x12b   : > { %17493 = vst [vmem:[#allocation45_spill] sm:$0xff] %v13689_v42  ;;  %v12685_v42 = vld [vmem:[%s13435_s24 + $0x14] sm:$0xff]  }
 0x12c   : > { %17494 = vst [vmem:[#allocation46_spill] sm:$0xff] %v13691_v7  ;;  %10226 = vmatmul.msk.bf16.gmra.mxu1 %vm829_vm2, %v12926_v30  ;;  %v12888_v30 = vld [vmem:[%s13435_s24 + $0xa4] sm:$0xff]  }
 0x12d   : > { %v13699_v18 = vpop.f32.mrf.mxu0 }
 0x12f   : > { %10246 = vmatmul.msk.bf16.gmra.mxu2 %vm829_vm2, %v12966_v8  ;;  %10266 = vmatmul.msk.bf16.gmra.mxu3 %vm829_vm2, %v13006_v31 }
 0x130   : > { %10206 = vmatmul.msk.bf16.gmra.mxu0 %vm829_vm2, %v12886_v33 }
 0x131   : > { %v1222_v6 = vpop.f32.mrf.mxu1 }
 0x132   : > { %v13705_v7 = vpop.f32.mrf.mxu2  ;;  %v13707_v39 = vpop.f32.mrf.mxu3 }
 0x133   : > { %17496 = vst [vmem:[#allocation48_spill] sm:$0xff] %v13705_v7  ;;  %v11406_v7 = vld [vmem:[%s13435_s24] sm:$0xff]  }
 0x134   : > { %17497 = vst [vmem:[#allocation49_spill] sm:$0xff] %v13707_v39  ;;  %v3282_v46 = vshrl.u32 %v11406_v7, 16 }
 0x135   : > { %v1130_v57 = vpop.f32.mrf.mxu0 }
 0x139   : > { %v13711_v4 = vpop.f32.mrf.mxu1 }
 0x13a   : > { %v1314_v37 = vpop.f32.mrf.mxu2  ;;  %v1406_v29 = vpop.f32.mrf.mxu3  ;;  %17498 = vst [vmem:[#allocation50_spill] sm:$0xff] %v13711_v4 }
 0x13b   : > { %v10701_v29 = vld [vmem:[%s17392_s1 + $0x4] sm:$0x3]  ;;  %v10782_v37 = vld [vmem:[%s17392_s1 + $0xa] sm:$0x3] }
 0x13c   : > { %10227 = vmatmul.msk.bf16.gmra.mxu1 %vm829_vm2, %v12928_v25  ;;  %v7156_v57 = vand.u32 %v10701_v29, %v13418_v5  ;;  %v8067_v6 = vand.u32 %v10782_v37, %v13418_v5 }
 0x13d   : > { %v13715_v56 = vpop.f32.mrf.mxu0 }
 0x13e   : > { %7165 = vmatpush.bf16.msra.mxu2 %v7156_v57  ;;  %8076 = vmatpush.bf16.msra.mxu3 %v8067_v6  ;;  %v12930_v6 = vld [vmem:[%s13435_s24 + $0x14c] sm:$0xff]  }
 0x13f   : > { %10247 = vmatmul.msk.bf16.gmra.mxu2 %vm829_vm2, %v12968_v17  ;;  %10267 = vmatmul.msk.bf16.gmra.mxu3 %vm829_vm2, %v13008_v0  ;;  %v10612_v0 = vld [vmem:[%s17392_s1 + $0xe] sm:$0x3] }
 0x140   : > { %10207 = vmatmul.msk.bf16.gmra.mxu0 %vm829_vm2, %v12888_v30  ;;  %v6240_v31 = vand.u32 %v10612_v0, %v13418_v5  ;;  %v10863_v30 = vld [vmem:[%s17392_s1 + $0x10] sm:$0x3] }
 0x141   : > { %v13736_v8 = vpop.f32.mrf.mxu1  ;;  %v8607_v29 = vand.u32 %v10863_v30, %v13418_v5  ;;  %v13009_v0 = vld [vmem:[%s13435_s24 + $0x28c] sm:$0xff]   ;;  %v3284_v5 = vshll.u32 %v11406_v7, 16  ;;  %v12687_v30 = vld [vmem:[%s13435_s24 + $0x1c] sm:$0xff]  }
 0x142   : > { %v13729_v25 = vpop.f32.mrf.mxu2  ;;  %v13731_v17 = vpop.f32.mrf.mxu3  ;;  %17501 = vst [vmem:[#allocation53_spill] sm:$0xff] %v13736_v8  ;;  %6249 = vmatpush.bf16.msra.mxu1 %v6240_v31  ;;  %v11077_v31 = vld [vmem:[%s13435_s24 + $0x8] sm:$0xff]  ;;  %v11073_v7 = vld [vmem:[%s13435_s24] sm:$0xff] }
 0x143   : > { %17499 = vst [vmem:[#allocation51_spill] sm:$0xff] %v13729_v25  ;;  %8616 = vmatpush.bf16.msra.mxu0 %v8607_v29  ;;  %v4769_v29 = vshll.u32 %v12685_v42, 16 }
 0x144   : > { %17500 = vst [vmem:[#allocation52_spill] sm:$0xff] %v13731_v17  ;;  %v12970_v17 = vld [vmem:[%s13435_s24 + $0x1ec] sm:$0xff]  }
 0x145   : > { %v13739_v33 = vpop.f32.mrf.mxu0  ;;  %v4771_v13 = vrot.slane %v4769_v29, 1 }
 0x149   : > { %v13751_v39 = vpop.f32.mrf.mxu1 }
 0x14a   : > { %v13745_v37 = vpop.f32.mrf.mxu2  ;;  %v13747_v57 = vpop.f32.mrf.mxu3  ;;  %17504 = vst [vmem:[#allocation56_spill] sm:$0xff] %v13751_v39 }
 0x14b   : > { %17502 = vst [vmem:[#allocation54_spill] sm:$0xff] %v13745_v37 }
 0x14c   : > { %17503 = vst [vmem:[#allocation55_spill] sm:$0xff] %v13747_v57  ;;  %10228 = vmatmul.msk.bf16.gmra.mxu1 %vm829_vm2, %v12930_v6  ;;  %v3286_v6 = vrot.slane %v3284_v5, 1  ;;  %v13779_v5 = vld [vmem:[%s13435_s24 + $0x28] sm:$0xff]  }
 0x14d   : > { %v13755_v25 = vpop.f32.mrf.mxu0 }
 0x14e   : > { %v3287_v61 = vor.u32 %v3286_v6, %v3282_v46 }
 0x14f   : > { %10248 = vmatmul.msk.bf16.gmra.mxu2 %vm829_vm2, %v12970_v17  ;;  %10268 = vmatmul.msk.bf16.gmra.mxu3 %vm829_vm2, %v13009_v0  ;;  %v3289_v17 = vshll.u32 %v11077_v31, 16  ;;  %v4767_v0 = vshrl.u32 %v12685_v42, 16 }
 0x150   : > { %10208 = vmatmul.msk.bf16.gmra.mxu0 %vm829_vm2, %v12890_v52  ;;  %v4774_v52 = vshll.u32 %v12687_v30, 16 }
 0x151   : > { %v13769_v38 = vpop.f32.mrf.mxu1  ;;  %v3291_v49 = vrot.slane %v3289_v17, 1  ;;  %v4772_v36 = vor.u32 %v4771_v13, %v4767_v0  ;;  %v12689_v13 = vld [vmem:[%s13435_s24 + $0x24] sm:$0xff]   ;;  %v4778_v0 = vshrl.u32 %v12687_v30, 16 }
 0x152   : > { %v13765_v57 = vpop.f32.mrf.mxu2  ;;  %v13767_v37 = vpop.f32.mrf.mxu3  ;;  %17507 = vst [vmem:[#allocation59_spill] sm:$0xff] %v13769_v38  ;;  %v4776_v28 = vrot.slane %v4774_v52, 1  ;;  %v4782_v52 = vshll.u32 %v12689_v13, 16 }
 0x153   : > { %17505 = vst [vmem:[#allocation57_spill] sm:$0xff] %v13765_v57  ;;  %v3292_v42 = vsel %vm3280_vm3, %v3287_v61, %v3291_v49 }
 0x154   : > { %17506 = vst [vmem:[#allocation58_spill] sm:$0xff] %v13767_v37  ;;  %v4777_v29 = vsel %vm3280_vm3, %v4772_v36, %v4776_v28  ;;  %v3293_v36 = vshrl.u32 %v11077_v31, 16 }
 0x155   : > { %v13771_v22 = vpop.f32.mrf.mxu0 }
 0x159   : > { %v1234_v24 = vpop.f32.mrf.mxu1 }
 0x15a   : > { %v13773_v57 = vpop.f32.mrf.mxu2  ;;  %v13775_v37 = vpop.f32.mrf.mxu3  ;;  %v11814_v24 = vld [vmem:[%s13435_s24 + $0x10] sm:$0xff]  }
 0x15b   : > { %17508 = vst [vmem:[#allocation60_spill] sm:$0xff] %v13773_v57  ;;  %v3297_v17 = vshll.u32 %v11814_v24, 16 }
 0x15c   : > { %17509 = vst [vmem:[#allocation61_spill] sm:$0xff] %v13775_v37  ;;  %10277 = vmatmul.msk.bf16.vlgmr.msrb.gmra.mxu1 %vm829_vm2, %v11073_v7  ;;  %v3295_v7 = vor.u32 %v3293_v36, %v3291_v49  ;;  %v11815_v36 = vld [vmem:[%s13435_s24 + $0x18] sm:$0xff]  }
 0x15d   : > { %v1142_v16 = vpop.f32.mrf.mxu0  ;;  %v3299_v37 = vrot.slane %v3297_v17, 1 }
 0x15f   : > { %10366 = vmatmul.msk.bf16.vlgmr.msrb.gmra.mxu2 %vm829_vm2, %v13779_v5  ;;  %10451 = vmatmul.msk.bf16.vlgmr.msrb.gmra.mxu3 %vm829_vm2, %v3292_v42  ;;  %v4780_v42 = vor.u32 %v4778_v0, %v4776_v28  ;;  %v3300_v31 = vsel %vm3280_vm3, %v3295_v7, %v3299_v37  ;;  %v12691_v28 = vld [vmem:[%s13435_s24 + $0x2c] sm:$0xff]   ;;  %v3301_v7 = vshrl.u32 %v11814_v24, 16 }
 0x160   : > { %10532 = vmatmul.msk.bf16.vlgmr.msrb.gmra.mxu0 %vm829_vm2, %v4777_v29  ;;  %v4784_v29 = vrot.slane %v4782_v52, 1 }
 0x161   : > { %v13790_v16 = vpop.f32.mrf.mxu1 }
 0x162   : > { %v1326_v46 = vpop.f32.mrf.mxu2  ;;  %v1418_v6 = vpop.f32.mrf.mxu3  ;;  %17510 = vst [vmem:[#allocation62_spill] sm:$0xff] %v13790_v16  ;;  %v4785_v49 = vsel %vm3280_vm3, %v4780_v42, %v4784_v29  ;;  %v4786_v42 = vshrl.u32 %v12689_v13, 16 }
 0x165   : > { %v13792_v61 = vpop.f32.mrf.mxu0 }
 0x169   : > { %v13799_v6 = vpop.f32.mrf.mxu1 }
 0x16a   : > { %v13794_v57 = vpop.f32.mrf.mxu2  ;;  %v13796_v46 = vpop.f32.mrf.mxu3  ;;  %17513 = vst [vmem:[#allocation65_spill] sm:$0xff] %v13799_v6 }
 0x16b   : > { %17511 = vst [vmem:[#allocation63_spill] sm:$0xff] %v13794_v57  ;;  %v3303_v57 = vor.u32 %v3301_v7, %v3299_v37  ;;  %v12693_v37 = vld [vmem:[%s13435_s24 + $0x34] sm:$0xff]  }
 0x16c   : > { %17512 = vst [vmem:[#allocation64_spill] sm:$0xff] %v13796_v46  ;;  %10278 = vmatmul.msk.bf16.gmra.mxu1 %vm829_vm2, %v11074_v3  ;;  %v3305_v3 = vshll.u32 %v11815_v36, 16  ;;  %v4790_v46 = vshll.u32 %v12691_v28, 16 }
 0x16d   : > { %v13804_v55 = vpop.f32.mrf.mxu0 }
 0x16e   : > { %v4792_v51 = vrot.slane %v4790_v46, 1  ;;  %v11816_v46 = vld [vmem:[%s13435_s24 + $0x20] sm:$0xff]  }
 0x16f   : > { %10367 = vmatmul.msk.bf16.gmra.mxu2 %vm829_vm2, %v13802_v63  ;;  %10452 = vmatmul.msk.bf16.gmra.mxu3 %vm829_vm2, %v3300_v31  ;;  %v3307_v31 = vrot.slane %v3305_v3, 1 }
 0x170   : > { %10533 = vmatmul.msk.bf16.gmra.mxu0 %vm829_vm2, %v4785_v49  ;;  %v4788_v49 = vor.u32 %v4786_v42, %v4784_v29  ;;  %v3309_v42 = vshrl.u32 %v11815_v36, 16 }
 0x171   : > { %v13819_v0 = vpop.f32.mrf.mxu1  ;;  %v3308_v38 = vsel %vm3280_vm3, %v3303_v57, %v3307_v31 }
 0x172   : > { %v13814_v30 = vpop.f32.mrf.mxu2  ;;  %v13817_v17 = vpop.f32.mrf.mxu3  ;;  %17516 = vst [vmem:[#allocation68_spill] sm:$0xff] %v13819_v0  ;;  %v4793_v13 = vsel %vm3280_vm3, %v4788_v49, %v4792_v51  ;;  %v3313_v49 = vshll.u32 %v11816_v46, 16 }
 0x173   : > { %17514 = vst [vmem:[#allocation66_spill] sm:$0xff] %v13814_v30 }
 0x174   : > { %17515 = vst [vmem:[#allocation67_spill] sm:$0xff] %v13817_v17  ;;  %v13830_v17 = vld [vmem:[%s13435_s24 + $0x38] sm:$0xff]  }
 0x175   : > { %v13821_v52 = vpop.f32.mrf.mxu0 }
 0x179   : > { %v13827_v16 = vpop.f32.mrf.mxu1 }
 0x17a   : > { %v13823_v6 = vpop.f32.mrf.mxu2  ;;  %v13825_v30 = vpop.f32.mrf.mxu3  ;;  %17519 = vst [vmem:[#allocation71_spill] sm:$0xff] %v13827_v16  ;;  %v3315_v16 = vrot.slane %v3313_v49, 1 }
 0x17b   : > { %17517 = vst [vmem:[#allocation69_spill] sm:$0xff] %v13823_v6  ;;  %v3311_v6 = vor.u32 %v3309_v42, %v3307_v31  ;;  %v4802_v31 = vshrl.u32 %v12693_v37, 16 }
 0x17c   : > { %17518 = vst [vmem:[#allocation70_spill] sm:$0xff] %v13825_v30  ;;  %10279 = vmatmul.msk.bf16.gmra.mxu1 %vm829_vm2, %v11814_v24  ;;  %v4794_v30 = vshrl.u32 %v12691_v28, 16  ;;  %v4798_v24 = vshll.u32 %v12693_v37, 16 }
 0x17d   : > { %v13832_v0 = vpop.f32.mrf.mxu0 }
 0x17e   : > { %v4796_v39 = vor.u32 %v4794_v30, %v4792_v51  ;;  %v12695_v51 = vld [vmem:[%s13435_s24 + $0x3c] sm:$0xff]  }
 0x17f   : > { %10368 = vmatmul.msk.bf16.gmra.mxu2 %vm829_vm2, %v13830_v17  ;;  %10453 = vmatmul.msk.bf16.gmra.mxu3 %vm829_vm2, %v3308_v38  ;;  %v4800_v38 = vrot.slane %v4798_v24, 1  ;;  %v4806_v42 = vshll.u32 %v12695_v51, 16 }
 0x180   : > { %10534 = vmatmul.msk.bf16.gmra.mxu0 %vm829_vm2, %v4793_v13 }
 0x181   : > { %v1245_v3 = vpop.f32.mrf.mxu1 }
 0x182   : > { %v13842_v29 = vpop.f32.mrf.mxu2  ;;  %v13845_v7 = vpop.f32.mrf.mxu3  ;;  %v3316_v3 = vsel %vm3280_vm3, %v3311_v6, %v3315_v16 }
 0x183   : > { %17520 = vst [vmem:[#allocation72_spill] sm:$0xff] %v13842_v29  ;;  %v13850_v29 = vld [vmem:[%s13435_s24 + $0x40] sm:$0xff]  }
 0x184   : > { %17521 = vst [vmem:[#allocation73_spill] sm:$0xff] %v13845_v7 }
 0x185   : > { %v1153_v57 = vpop.f32.mrf.mxu0 }
 0x186   : > { %v4801_v57 = vsel %vm3280_vm3, %v4796_v39, %v4800_v38  ;;  %v3317_v39 = vshrl.u32 %v11816_v46, 16 }
 0x188   : > { %v3319_v49 = vor.u32 %v3317_v39, %v3315_v16  ;;  %v12697_v16 = vld [vmem:[%s13435_s24 + $0x44] sm:$0xff]  }
 0x189   : > { %v13847_v4 = vpop.f32.mrf.mxu1 }
 0x18a   : > { %v1337_v8 = vpop.f32.mrf.mxu2  ;;  %v1429_v13 = vpop.f32.mrf.mxu3  ;;  %17522 = vst [vmem:[#allocation74_spill] sm:$0xff] %v13847_v4 }
 0x18b   : > { %v4804_v13 = vor.u32 %v4802_v31, %v4800_v38 }
 0x18c   : > { %10280 = vmatmul.msk.bf16.gmra.mxu1 %vm829_vm2, %v11815_v36  ;;  %v3321_v36 = vshll.u32 %v13779_v5, 16 }
 0x18d   : > { %v13852_v10 = vpop.f32.mrf.mxu0 }
 0x18e   : > { %v3323_v24 = vrot.slane %v3321_v36, 1 }
 0x18f   : > { %10369 = vmatmul.msk.bf16.gmra.mxu2 %vm829_vm2, %v13850_v29  ;;  %10454 = vmatmul.msk.bf16.gmra.mxu3 %vm829_vm2, %v3316_v3  ;;  %v4808_v3 = vrot.slane %v4806_v42, 1  ;;  %v3325_v42 = vshrl.u32 %v13779_v5, 16 }
 0x190   : > { %10535 = vmatmul.msk.bf16.gmra.mxu0 %vm829_vm2, %v4801_v57  ;;  %v3324_v4 = vsel %vm3280_vm3, %v3319_v49, %v3323_v24  ;;  %v4810_v49 = vshrl.u32 %v12695_v51, 16  ;;  %v12699_v51 = vld [vmem:[%s13435_s24 + $0x4c] sm:$0xff]  }
 0x191   : > { %v13866_v30 = vpop.f32.mrf.mxu1  ;;  %v4809_v37 = vsel %vm3280_vm3, %v4804_v13, %v4808_v3  ;;  %v4814_v13 = vshll.u32 %v12697_v16, 16 }
 0x192   : > { %v13862_v8 = vpop.f32.mrf.mxu2  ;;  %v13864_v28 = vpop.f32.mrf.mxu3  ;;  %17525 = vst [vmem:[#allocation77_spill] sm:$0xff] %v13866_v30 }
 0x193   : > { %17523 = vst [vmem:[#allocation75_spill] sm:$0xff] %v13862_v8 }
 0x194   : > { %17524 = vst [vmem:[#allocation76_spill] sm:$0xff] %v13864_v28  ;;  %v13878_v28 = vld [vmem:[%s13435_s24 + $0x48] sm:$0xff]  }
 0x195   : > { %v13868_v6 = vpop.f32.mrf.mxu0 }
 0x199   : > { %v13875_v8 = vpop.f32.mrf.mxu1 }
 0x19a   : > { %v13871_v57 = vpop.f32.mrf.mxu2  ;;  %v13873_v7 = vpop.f32.mrf.mxu3  ;;  %17528 = vst [vmem:[#allocation80_spill] sm:$0xff] %v13875_v8 }
 0x19b   : > { %17526 = vst [vmem:[#allocation78_spill] sm:$0xff] %v13871_v57  ;;  %v4816_v57 = vrot.slane %v4814_v13, 1 }
 0x19c   : > { %17527 = vst [vmem:[#allocation79_spill] sm:$0xff] %v13873_v7  ;;  %10281 = vmatmul.msk.bf16.gmra.mxu1 %vm829_vm2, %v11816_v46  ;;  %v3329_v46 = vshll.u32 %v13802_v63, 16 }
 0x19d   : > { %v13880_v30 = vpop.f32.mrf.mxu0 }
 0x19e   : > { %v3331_v7 = vrot.slane %v3329_v46, 1  ;;  %v4818_v46 = vshrl.u32 %v12697_v16, 16 }
 0x19f   : > { %10370 = vmatmul.msk.bf16.gmra.mxu2 %vm829_vm2, %v13878_v28  ;;  %10455 = vmatmul.msk.bf16.gmra.mxu3 %vm829_vm2, %v3324_v4  ;;  %v3327_v4 = vor.u32 %v3325_v42, %v3323_v24  ;;  %v3333_v42 = vshrl.u32 %v13802_v63, 16 }
 0x1a0   : > { %10536 = vmatmul.msk.bf16.gmra.mxu0 %vm829_vm2, %v4809_v37  ;;  %v4812_v37 = vor.u32 %v4810_v49, %v4808_v3  ;;  %v4822_v49 = vshll.u32 %v12699_v51, 16 }
 0x1a1   : > { %v13894_v36 = vpop.f32.mrf.mxu1  ;;  %v13908_v11 = vsel %vm3280_vm3, %v3327_v4, %v3331_v7  ;;  %v3335_v13 = vor.u32 %v3333_v42, %v3331_v7  ;;  %v12701_v7 = vld [vmem:[%s13435_s24 + $0x54] sm:$0xff]  }
 0x1a2   : > { %v13890_v38 = vpop.f32.mrf.mxu2  ;;  %v13892_v39 = vpop.f32.mrf.mxu3  ;;  %17531 = vst [vmem:[#allocation83_spill] sm:$0xff] %v13894_v36  ;;  %v4817_v43 = vsel %vm3280_vm3, %v4812_v37, %v4816_v57  ;;  %v4820_v37 = vor.u32 %v4818_v46, %v4816_v57 }
 0x1a3   : > { %17529 = vst [vmem:[#allocation81_spill] sm:$0xff] %v13890_v38 }
 0x1a4   : > { %17530 = vst [vmem:[#allocation82_spill] sm:$0xff] %v13892_v39 }
 0x1a5   : > { %v13896_v31 = vpop.f32.mrf.mxu0  ;;  %17534 = vst [vmem:[#allocation86_spill] sm:$0xff] %v13908_v11 }
 0x1a9   : > { %v1257_v39 = vpop.f32.mrf.mxu1 }
 0x1aa   : > { %v13900_v8 = vpop.f32.mrf.mxu2  ;;  %v13902_v38 = vpop.f32.mrf.mxu3 }
 0x1ab   : > { %17532 = vst [vmem:[#allocation84_spill] sm:$0xff] %v13900_v8 }
 0x1ac   : > { %17533 = vst [vmem:[#allocation85_spill] sm:$0xff] %v13902_v38  ;;  %10282 = vmatmul.msk.bf16.gmra.mxu1 %vm829_vm2, %v13779_v5  ;;  %v3337_v5 = vshll.u32 %v13830_v17, 16  ;;  %v4824_v38 = vrot.slane %v4822_v49, 1  ;;  %v3345_v49 = vshll.u32 %v13850_v29, 16 }
 0x1ad   : > { %v1165_v36 = vpop.f32.mrf.mxu0 }
 0x1ae   : > { %v3339_v4 = vrot.slane %v3337_v5, 1  ;;  %v4825_v16 = vsel %vm3280_vm3, %v4820_v37, %v4824_v38  ;;  %v4830_v37 = vshll.u32 %v12701_v7, 16 }
 0x1af   : > { %10371 = vmatmul.msk.bf16.gmra.mxu2 %vm829_vm2, %v13905_v40  ;;  %10456 = vmatmul.msk.bf16.gmra.mxu3 %vm829_vm2, %v13908_v11 }
 0x1b0   : > { %10537 = vmatmul.msk.bf16.gmra.mxu0 %vm829_vm2, %v4817_v43 }
 0x1b1   : > { %v13919_v39 = vpop.f32.mrf.mxu1 }
 0x1b2   : > { %v1349_v24 = vpop.f32.mrf.mxu2  ;;  %v1441_v3 = vpop.f32.mrf.mxu3  ;;  %17535 = vst [vmem:[#allocation87_spill] sm:$0xff] %v13919_v39  ;;  %v13937_v39 = vsel %vm3280_vm3, %v3335_v13, %v3339_v4  ;;  %v4826_v13 = vshrl.u32 %v12699_v51, 16 }
 0x1b3   : > { %v13932_v3 = vld [vmem:[%s13435_s24 + $0x58] sm:$0xff]   ;;  %17539 = vst [vmem:[#allocation91_spill] sm:$0xff] %v13937_v39 }
 0x1b5   : > { %v13921_v36 = vpop.f32.mrf.mxu0 }
 0x1b9   : > { %v13929_v24 = vpop.f32.mrf.mxu1 }
 0x1ba   : > { %v13925_v43 = vpop.f32.mrf.mxu2  ;;  %v13927_v11 = vpop.f32.mrf.mxu3  ;;  %17538 = vst [vmem:[#allocation90_spill] sm:$0xff] %v13929_v24 }
 0x1bb   : > { %17536 = vst [vmem:[#allocation88_spill] sm:$0xff] %v13925_v43  ;;  %v4832_v43 = vrot.slane %v4830_v37, 1  ;;  %v4834_v37 = vshrl.u32 %v12701_v7, 16 }
 0x1bc   : > { %17537 = vst [vmem:[#allocation89_spill] sm:$0xff] %v13927_v11  ;;  %10283 = vmatmul.msk.bf16.gmra.mxu1 %vm829_vm2, %v13802_v63  ;;  %v3341_v63 = vshrl.u32 %v13830_v17, 16 }
 0x1bd   : > { %v13934_v8 = vpop.f32.mrf.mxu0 }
 0x1be   : > { %v3343_v11 = vor.u32 %v3341_v63, %v3339_v4 }
 0x1bf   : > { %10372 = vmatmul.msk.bf16.gmra.mxu2 %vm829_vm2, %v13932_v3  ;;  %10457 = vmatmul.msk.bf16.gmra.mxu3 %vm829_vm2, %v13937_v39  ;;  %v3347_v39 = vrot.slane %v3345_v49, 1 }
 0x1c0   : > { %10538 = vmatmul.msk.bf16.gmra.mxu0 %vm829_vm2, %v4825_v16  ;;  %v4828_v16 = vor.u32 %v4826_v13, %v4824_v38  ;;  %v12703_v38 = vld [vmem:[%s13435_s24 + $0x5c] sm:$0xff]   ;;  %v3349_v13 = vshrl.u32 %v13850_v29, 16 }
 0x1c1   : > { %v13952_v5 = vpop.f32.mrf.mxu1  ;;  %v13970_v9 = vsel %vm3280_vm3, %v3343_v11, %v3347_v39 }
 0x1c2   : > { %v13948_v57 = vpop.f32.mrf.mxu2  ;;  %v13950_v42 = vpop.f32.mrf.mxu3  ;;  %17542 = vst [vmem:[#allocation94_spill] sm:$0xff] %v13952_v5  ;;  %v13965_v5 = vld [vmem:[%s13435_s24 + $0x60] sm:$0xff]   ;;  %v4833_v51 = vsel %vm3280_vm3, %v4828_v16, %v4832_v43  ;;  %v4838_v16 = vshll.u32 %v12703_v38, 16 }
 0x1c3   : > { %17540 = vst [vmem:[#allocation92_spill] sm:$0xff] %v13948_v57 }
 0x1c4   : > { %17541 = vst [vmem:[#allocation93_spill] sm:$0xff] %v13950_v42 }
 0x1c5   : > { %v13954_v46 = vpop.f32.mrf.mxu0  ;;  %17546 = vst [vmem:[#allocation98_spill] sm:$0xff] %v13970_v9 }
 0x1c9   : > { %v13962_v42 = vpop.f32.mrf.mxu1 }
 0x1ca   : > { %v13958_v24 = vpop.f32.mrf.mxu2  ;;  %v13960_v57 = vpop.f32.mrf.mxu3  ;;  %17545 = vst [vmem:[#allocation97_spill] sm:$0xff] %v13962_v42  ;;  %v4840_v42 = vrot.slane %v4838_v16, 1  ;;  %v4842_v16 = vshrl.u32 %v12703_v38, 16 }
 0x1cb   : > { %17543 = vst [vmem:[#allocation95_spill] sm:$0xff] %v13958_v24 }
 0x1cc   : > { %17544 = vst [vmem:[#allocation96_spill] sm:$0xff] %v13960_v57  ;;  %10284 = vmatmul.msk.bf16.gmra.mxu1 %vm829_vm2, %v13830_v17  ;;  %v3353_v17 = vshll.u32 %v13878_v28, 16  ;;  %v3351_v57 = vor.u32 %v3349_v13, %v3347_v39  ;;  %v12705_v39 = vld [vmem:[%s13435_s24 + $0x64] sm:$0xff]  }
 0x1cd   : > { %v13967_v19 = vpop.f32.mrf.mxu0 }
 0x1ce   : > { %v3355_v24 = vrot.slane %v3353_v17, 1 }
 0x1cf   : > { %10373 = vmatmul.msk.bf16.gmra.mxu2 %vm829_vm2, %v13965_v5  ;;  %10458 = vmatmul.msk.bf16.gmra.mxu3 %vm829_vm2, %v13970_v9  ;;  %v4836_v9 = vor.u32 %v4834_v37, %v4832_v43  ;;  %v3361_v37 = vshll.u32 %v13905_v40, 16 }
 0x1d0   : > { %10539 = vmatmul.msk.bf16.gmra.mxu0 %vm829_vm2, %v4833_v51 }
 0x1d1   : > { %v1268_v11 = vpop.f32.mrf.mxu1 }
 0x1d2   : > { %v13981_v4 = vpop.f32.mrf.mxu2  ;;  %v13983_v63 = vpop.f32.mrf.mxu3  ;;  %v13991_v11 = vsel %vm3280_vm3, %v3351_v57, %v3355_v24 }
 0x1d3   : > { %17547 = vst [vmem:[#allocation99_spill] sm:$0xff] %v13981_v4 }
 0x1d4   : > { %17548 = vst [vmem:[#allocation100_spill] sm:$0xff] %v13983_v63 }
 0x1d5   : > { %v1176_v49 = vpop.f32.mrf.mxu0  ;;  %17549 = vst [vmem:[#allocation101_spill] sm:$0xff] %v13991_v11 }
 0x1d6   : > { %v4841_v49 = vsel %vm3280_vm3, %v4836_v9, %v4840_v42  ;;  %v3357_v9 = vshrl.u32 %v13878_v28, 16 }
 0x1d9   : > { %v1796_v44 = vpop.f32.mrf.mxu1 }
 0x1da   : > { %v1360_v51 = vpop.f32.mrf.mxu2  ;;  %v1452_v58 = vpop.f32.mrf.mxu3 }
 0x1db   : > { %v1797_v58 = vadd.f32 %v1796_v44, %v13507_v50  ;;  %v4846_v51 = vshll.u32 %v12705_v39, 16  ;;  %v3363_v50 = vrot.slane %v3361_v37, 1  ;;  %v4844_v44 = vor.u32 %v4842_v16, %v4840_v42 }
 0x1dc   : > { %10285 = vmatmul.msk.bf16.gmra.mxu1 %vm829_vm2, %v13850_v29  ;;  %v4850_v16 = vshrl.u32 %v12705_v39, 16 }
 0x1dd   : > { %v5662_v4 = vpop.f32.mrf.mxu0  ;;  %v4848_v26 = vrot.slane %v4846_v51, 1 }
 0x1df   : > { %10374 = vmatmul.msk.bf16.gmra.mxu2 %vm829_vm2, %v13988_v32  ;;  %10459 = vmatmul.msk.bf16.gmra.mxu3 %vm829_vm2, %v13991_v11  ;;  %v3359_v11 = vor.u32 %v3357_v9, %v3355_v24  ;;  %v12707_v24 = vld [vmem:[%s13435_s24 + $0x6c] sm:$0xff]  }
 0x1e0   : > { %10540 = vmatmul.msk.bf16.gmra.mxu0 %vm829_vm2, %v4841_v49  ;;  %v4854_v51 = vshll.u32 %v12707_v24, 16 }
 0x1e1   : > { %v1798_v13 = vpop.f32.mrf.mxu1  ;;  %v14012_v38 = vsel %vm3280_vm3, %v3359_v11, %v3363_v50 }
 0x1e2   : > { %v2208_v43 = vpop.f32.mrf.mxu2  ;;  %v4177_v57 = vpop.f32.mrf.mxu3  ;;  %v1799_v49 = vadd.f32 %v1798_v13, %v13519_v54 }
 0x1e3   : > { %v2576_v7 = vadd.f32 %v2208_v43, %v1797_v58 }
 0x1e5   : > { %v4545_v17 = vadd.f32 %v4177_v57, %v2576_v7  ;;  %v5664_v29 = vpop.f32.mrf.mxu0 }
 0x1e7   : > { %v14005_v63 = vadd.f32 %v5662_v4, %v4545_v17  ;;  %v4849_v4 = vsel %vm3280_vm3, %v4844_v44, %v4848_v26  ;;  %v3365_v17 = vshrl.u32 %v13905_v40, 16 }
 0x1e9   : > { %v1801_v14 = vpop.f32.mrf.mxu1  ;;  %v3367_v44 = vor.u32 %v3365_v17, %v3363_v50 }
 0x1ea   : > { %v2210_v58 = vpop.f32.mrf.mxu2  ;;  %v4179_v20 = vpop.f32.mrf.mxu3 }
 0x1eb   : > { %v2577_v43 = vadd.f32 %v2210_v58, %v1799_v49 }
 0x1ec   : > { %10286 = vmatmul.msk.bf16.gmra.mxu1 %vm829_vm2, %v13878_v28 }
 0x1ed   : > { %v4546_v7 = vadd.f32 %v4179_v20, %v2577_v43  ;;  %v5667_v57 = vpop.f32.mrf.mxu0  ;;  %v1802_v20 = vadd.f32 %v1801_v14, %v13531_v62  ;;  %v4852_v14 = vor.u32 %v4850_v16, %v4848_v26  ;;  %v4856_v43 = vrot.slane %v4854_v51, 1  ;;  %v12709_v26 = vld [vmem:[%s13435_s24 + $0x74] sm:$0xff]  }
 0x1ee   : > { %v4858_v16 = vshrl.u32 %v12707_v24, 16  ;;  %v4862_v51 = vshll.u32 %v12709_v26, 16 }
 0x1ef   : > { %10375 = vmatmul.msk.bf16.gmra.mxu2 %vm829_vm2, %v14009_v1  ;;  %v14019_v54 = vadd.f32 %v5664_v29, %v4546_v7  ;;  %10460 = vmatmul.msk.bf16.gmra.mxu3 %vm829_vm2, %v14012_v38  ;;  %v3369_v29 = vshll.u32 %v13932_v3, 16 }
 0x1f0   : > { %10541 = vmatmul.msk.bf16.gmra.mxu0 %vm829_vm2, %v4849_v4 }
 0x1f1   : > { %17550 = vst [vmem:[#allocation102_spill] sm:$0xff] %v14019_v54  ;;  %v1803_v9 = vpop.f32.mrf.mxu1  ;;  %v3371_v62 = vrot.slane %v3369_v29, 1  ;;  %v14032_v54 = vld [vmem:[%s13435_s24 + $0x78] sm:$0xff]  }
 0x1f2   : > { %v2213_v42 = vpop.f32.mrf.mxu2  ;;  %v4182_v13 = vpop.f32.mrf.mxu3  ;;  %v1804_v58 = vadd.f32 %v1803_v9, %v13543_v2 }
 0x1f3   : > { %v2578_v11 = vadd.f32 %v2213_v42, %v1802_v20  ;;  %v14035_v39 = vsel %vm3280_vm3, %v3367_v44, %v3371_v62 }
 0x1f5   : > { %v4547_v28 = vadd.f32 %v4182_v13, %v2578_v11  ;;  %v5669_v37 = vpop.f32.mrf.mxu0 }
 0x1f7   : > { %v14028_v49 = vadd.f32 %v5667_v57, %v4547_v28  ;;  %v4857_v57 = vsel %vm3280_vm3, %v4852_v14, %v4856_v43  ;;  %v3373_v28 = vshrl.u32 %v13932_v3, 16  ;;  %v4860_v14 = vor.u32 %v4858_v16, %v4856_v43  ;;  %v12711_v43 = vld [vmem:[%s13435_s24 + $0x7c] sm:$0xff]  }
 0x1f9   : > { %v1806_v42 = vpop.f32.mrf.mxu1  ;;  %v3375_v44 = vor.u32 %v3373_v28, %v3371_v62 }
 0x1fa   : > { %v2215_v7 = vpop.f32.mrf.mxu2  ;;  %v4184_v20 = vpop.f32.mrf.mxu3 }
 0x1fb   : > { %v2579_v4 = vadd.f32 %v2215_v7, %v1804_v58  ;;  %v4864_v7 = vrot.slane %v4862_v51, 1  ;;  %v3381_v51 = vshrl.u32 %v13965_v5, 16 }
 0x1fc   : > { %10287 = vmatmul.msk.bf16.gmra.mxu1 %vm829_vm2, %v13905_v40  ;;  %v3377_v40 = vshll.u32 %v13965_v5, 16 }
 0x1fd   : > { %v4548_v11 = vadd.f32 %v4184_v20, %v2579_v4  ;;  %v5672_v13 = vpop.f32.mrf.mxu0  ;;  %v4865_v24 = vsel %vm3280_vm3, %v4860_v14, %v4864_v7  ;;  %v4870_v14 = vshll.u32 %v12711_v43, 16 }
 0x1fe   : > { %v3379_v58 = vrot.slane %v3377_v40, 1  ;;  %v14052_v13 = vld [vmem:[%s13435_s24 + $0x80] sm:$0xff]  }
 0x1ff   : > { %10376 = vmatmul.msk.bf16.gmra.mxu2 %vm829_vm2, %v14032_v54  ;;  %v14042_v2 = vadd.f32 %v5669_v37, %v4548_v11  ;;  %10461 = vmatmul.msk.bf16.gmra.mxu3 %vm829_vm2, %v14035_v39 }
 0x200   : > { %10542 = vmatmul.msk.bf16.gmra.mxu0 %vm829_vm2, %v4857_v57 }
 0x201   : > { %17551 = vst [vmem:[#allocation103_spill] sm:$0xff] %v14042_v2  ;;  %v1807_v17 = vpop.f32.mrf.mxu1  ;;  %v14075_v2 = vld [vmem:[%s13435_s24 + $0x88] sm:$0xff]  }
 0x202   : > { %v2218_v50 = vpop.f32.mrf.mxu2  ;;  %v4187_v9 = vpop.f32.mrf.mxu3  ;;  %v1808_v37 = vadd.f32 %v1807_v17, %v13559_v15 }
 0x203   : > { %v14055_v9 = vsel %vm3280_vm3, %v3375_v44, %v3379_v58 }
 0x205   : > { %v5673_v29 = vpop.f32.mrf.mxu0 }
 0x209   : > { %v1810_v11 = vpop.f32.mrf.mxu1 }
 0x20a   : > { %v2219_v4 = vpop.f32.mrf.mxu2  ;;  %v4188_v42 = vpop.f32.mrf.mxu3  ;;  %v1811_v62 = vadd.f32 %v1810_v11, %v13571_v23 }
 0x20b   : > { %v2580_v20 = vadd.f32 %v2219_v4, %v1808_v37  ;;  %v4866_v37 = vshrl.u32 %v12709_v26, 16 }
 0x20c   : > { %10288 = vmatmul.msk.bf16.gmra.mxu1 %vm829_vm2, %v13932_v3 }
 0x20d   : > { %v4549_v57 = vadd.f32 %v4188_v42, %v2580_v20  ;;  %v5676_v50 = vpop.f32.mrf.mxu0  ;;  %v3383_v20 = vor.u32 %v3381_v51, %v3379_v58  ;;  %v4868_v11 = vor.u32 %v4866_v37, %v4864_v7  ;;  %v12713_v7 = vld [vmem:[%s13435_s24 + $0x84] sm:$0xff]  }
 0x20f   : > { %10377 = vmatmul.msk.bf16.gmra.mxu2 %vm829_vm2, %v14052_v13  ;;  %v14062_v15 = vadd.f32 %v5673_v29, %v4549_v57  ;;  %10462 = vmatmul.msk.bf16.gmra.mxu3 %vm829_vm2, %v14055_v9  ;;  %v3385_v29 = vshll.u32 %v13988_v32, 16  ;;  %v4872_v57 = vrot.slane %v4870_v14, 1 }
 0x210   : > { %10543 = vmatmul.msk.bf16.gmra.mxu0 %vm829_vm2, %v4865_v24 }
 0x211   : > { %17552 = vst [vmem:[#allocation104_spill] sm:$0xff] %v14062_v15  ;;  %v1812_v16 = vpop.f32.mrf.mxu1  ;;  %v3387_v23 = vrot.slane %v3385_v29, 1 }
 0x212   : > { %v2222_v17 = vpop.f32.mrf.mxu2  ;;  %v4191_v40 = vpop.f32.mrf.mxu3  ;;  %v1813_v42 = vadd.f32 %v1812_v16, %v13583_v27 }
 0x213   : > { %v2581_v28 = vadd.f32 %v2222_v17, %v1811_v62  ;;  %v14078_v26 = vsel %vm3280_vm3, %v3383_v20, %v3387_v23  ;;  %v4874_v20 = vshrl.u32 %v12711_v43, 16 }
 0x215   : > { %v4550_v3 = vadd.f32 %v4191_v40, %v2581_v28  ;;  %v5678_v44 = vpop.f32.mrf.mxu0 }
 0x217   : > { %v14071_v4 = vadd.f32 %v5676_v50, %v4550_v3  ;;  %v4873_v50 = vsel %vm3280_vm3, %v4868_v11, %v4872_v57 }
 0x219   : > { %v1815_v15 = vpop.f32.mrf.mxu1 }
 0x21a   : > { %v2224_v24 = vpop.f32.mrf.mxu2  ;;  %v4193_v17 = vpop.f32.mrf.mxu3  ;;  %v1816_v58 = vadd.f32 %v1815_v15, %v13595_v35  ;;  %v4876_v35 = vor.u32 %v4874_v20, %v4872_v57  ;;  %v4882_v20 = vshrl.u32 %v12713_v7, 16 }
 0x21b   : > { %v2582_v62 = vadd.f32 %v2224_v24, %v1813_v42  ;;  %v4878_v42 = vshll.u32 %v12713_v7, 16 }
 0x21c   : > { %10289 = vmatmul.msk.bf16.gmra.mxu1 %vm829_vm2, %v13965_v5  ;;  %v3389_v5 = vshrl.u32 %v13988_v32, 16 }
 0x21d   : > { %v4551_v28 = vadd.f32 %v4193_v17, %v2582_v62  ;;  %v5681_v40 = vpop.f32.mrf.mxu0  ;;  %v4880_v15 = vrot.slane %v4878_v42, 1 }
 0x21e   : > { %v3391_v24 = vor.u32 %v3389_v5, %v3387_v23  ;;  %v12715_v23 = vld [vmem:[%s13435_s24 + $0x8c] sm:$0xff]  }
 0x21f   : > { %10378 = vmatmul.msk.bf16.gmra.mxu2 %vm829_vm2, %v14075_v2  ;;  %v14085_v27 = vadd.f32 %v5678_v44, %v4551_v28  ;;  %10463 = vmatmul.msk.bf16.gmra.mxu3 %vm829_vm2, %v14078_v26  ;;  %v3393_v44 = vshll.u32 %v14009_v1, 16  ;;  %v4886_v42 = vshll.u32 %v12715_v23, 16 }
 0x220   : > { %10544 = vmatmul.msk.bf16.gmra.mxu0 %vm829_vm2, %v4873_v50 }
 0x221   : > { %17553 = vst [vmem:[#allocation105_spill] sm:$0xff] %v14085_v27  ;;  %v1817_v29 = vpop.f32.mrf.mxu1  ;;  %v3395_v62 = vrot.slane %v3393_v44, 1  ;;  %v3401_v44 = vshll.u32 %v14032_v54, 16  ;;  %v14118_v27 = vld [vmem:[%s13435_s24 + $0x98] sm:$0xff]  }
 0x222   : > { %v2227_v16 = vpop.f32.mrf.mxu2  ;;  %v4196_v3 = vpop.f32.mrf.mxu3 }
 0x223   : > { %v2583_v51 = vadd.f32 %v2227_v16, %v1816_v58  ;;  %v14097_v58 = vld [vmem:[%s13435_s24 + $0x90] sm:$0xff]  }
 0x225   : > { %v4552_v37 = vadd.f32 %v4196_v3, %v2583_v51  ;;  %v5683_v14 = vpop.f32.mrf.mxu0  ;;  %v14100_v51 = vsel %vm3280_vm3, %v3391_v24, %v3395_v62  ;;  %v4881_v3 = vsel %vm3280_vm3, %v4876_v35, %v4880_v15 }
 0x227   : > { %v14094_v11 = vadd.f32 %v5681_v40, %v4552_v37  ;;  %v3397_v37 = vshrl.u32 %v14009_v1, 16 }
 0x229   : > { %17554 = vst [vmem:[#allocation106_spill] sm:$0xff] %v14094_v11  ;;  %v1819_v50 = vpop.f32.mrf.mxu1  ;;  %v3399_v35 = vor.u32 %v3397_v37, %v3395_v62 }
 0x22a   : > { %v2229_v17 = vpop.f32.mrf.mxu2  ;;  %v4198_v28 = vpop.f32.mrf.mxu3  ;;  %v1820_v43 = vadd.f32 %v1819_v50, %v13611_v48  ;;  %v3403_v48 = vrot.slane %v3401_v44, 1  ;;  %v4888_v50 = vrot.slane %v4886_v42, 1 }
 0x22b   : > { %v4884_v28 = vor.u32 %v4882_v20, %v4880_v15  ;;  %v12717_v15 = vld [vmem:[%s13435_s24 + $0x94] sm:$0xff]   ;;  %v3405_v20 = vshrl.u32 %v14032_v54, 16 }
 0x22c   : > { %10290 = vmatmul.msk.bf16.gmra.mxu1 %vm829_vm2, %v13988_v32  ;;  %v14121_v7 = vsel %vm3280_vm3, %v3399_v35, %v3403_v48  ;;  %v4890_v35 = vshrl.u32 %v12715_v23, 16 }
 0x22d   : > { %v5685_v16 = vpop.f32.mrf.mxu0 }
 0x22f   : > { %10379 = vmatmul.msk.bf16.gmra.mxu2 %vm829_vm2, %v14097_v58  ;;  %10464 = vmatmul.msk.bf16.gmra.mxu3 %vm829_vm2, %v14100_v51 }
 0x230   : > { %10545 = vmatmul.msk.bf16.gmra.mxu0 %vm829_vm2, %v4881_v3 }
 0x231   : > { %v1821_v5 = vpop.f32.mrf.mxu1 }
 0x232   : > { %v2231_v57 = vpop.f32.mrf.mxu2  ;;  %v4200_v29 = vpop.f32.mrf.mxu3  ;;  %v1822_v17 = vadd.f32 %v1821_v5, %v13623_v60 }
 0x233   : > { %v2584_v40 = vadd.f32 %v2231_v57, %v1820_v43 }
 0x235   : > { %v4553_v14 = vadd.f32 %v4200_v29, %v2584_v40  ;;  %v5687_v32 = vpop.f32.mrf.mxu0 }
 0x237   : > { %v14114_v24 = vadd.f32 %v5685_v16, %v4553_v14  ;;  %v4889_v16 = vsel %vm3280_vm3, %v4884_v28, %v4888_v50 }
 0x239   : > { %v1824_v11 = vpop.f32.mrf.mxu1 }
 0x23a   : > { %v2233_v3 = vpop.f32.mrf.mxu2  ;;  %v4202_v57 = vpop.f32.mrf.mxu3  ;;  %v1825_v62 = vadd.f32 %v1824_v11, %v13635_v12  ;;  %v4892_v11 = vor.u32 %v4890_v35, %v4888_v50  ;;  %v4898_v35 = vshrl.u32 %v12717_v15, 16 }
 0x23b   : > { %v2585_v43 = vadd.f32 %v2233_v3, %v1822_v17  ;;  %v4894_v17 = vshll.u32 %v12717_v15, 16  ;;  %v3407_v3 = vor.u32 %v3405_v20, %v3403_v48  ;;  %v12719_v48 = vld [vmem:[%s13435_s24 + $0x9c] sm:$0xff]  }
 0x23c   : > { %10291 = vmatmul.msk.bf16.gmra.mxu1 %vm829_vm2, %v14009_v1 }
 0x23d   : > { %v4554_v40 = vadd.f32 %v4202_v57, %v2585_v43  ;;  %v5690_v29 = vpop.f32.mrf.mxu0  ;;  %v4896_v57 = vrot.slane %v4894_v17, 1  ;;  %v4902_v17 = vshll.u32 %v12719_v48, 16 }
 0x23f   : > { %10380 = vmatmul.msk.bf16.gmra.mxu2 %vm829_vm2, %v14118_v27  ;;  %v14128_v60 = vadd.f32 %v5687_v32, %v4554_v40  ;;  %10465 = vmatmul.msk.bf16.gmra.mxu3 %vm829_vm2, %v14121_v7  ;;  %v3409_v32 = vshll.u32 %v14052_v13, 16 }
 0x240   : > { %10546 = vmatmul.msk.bf16.gmra.mxu0 %vm829_vm2, %v4889_v16 }
 0x241   : > { %17555 = vst [vmem:[#allocation107_spill] sm:$0xff] %v14128_v60  ;;  %v1826_v44 = vpop.f32.mrf.mxu1  ;;  %v3411_v12 = vrot.slane %v3409_v32, 1  ;;  %v14141_v60 = vld [vmem:[%s13435_s24 + $0xa0] sm:$0xff]  }
 0x242   : > { %v2236_v5 = vpop.f32.mrf.mxu2  ;;  %v4205_v14 = vpop.f32.mrf.mxu3  ;;  %v1827_v43 = vadd.f32 %v1826_v44, %v13647_v21 }
 0x243   : > { %v2586_v37 = vadd.f32 %v2236_v5, %v1825_v62  ;;  %v14144_v23 = vsel %vm3280_vm3, %v3407_v3, %v3411_v12 }
 0x245   : > { %v4555_v1 = vadd.f32 %v4205_v14, %v2586_v37  ;;  %v5692_v42 = vpop.f32.mrf.mxu0 }
 0x247   : > { %v14137_v28 = vadd.f32 %v5690_v29, %v4555_v1  ;;  %v4897_v29 = vsel %vm3280_vm3, %v4892_v11, %v4896_v57  ;;  %v3413_v1 = vshrl.u32 %v14052_v13, 16  ;;  %v4900_v11 = vor.u32 %v4898_v35, %v4896_v57  ;;  %v12721_v57 = vld [vmem:[%s13435_s24 + $0xa4] sm:$0xff]  }
 0x249   : > { %v1829_v5 = vpop.f32.mrf.mxu1  ;;  %v3415_v3 = vor.u32 %v3413_v1, %v3411_v12 }
 0x24a   : > { %v2238_v40 = vpop.f32.mrf.mxu2  ;;  %v4207_v62 = vpop.f32.mrf.mxu3 }
 0x24b   : > { %v2587_v16 = vadd.f32 %v2238_v40, %v1827_v43  ;;  %v4904_v40 = vrot.slane %v4902_v17, 1  ;;  %v3421_v17 = vshrl.u32 %v14075_v2, 16 }
 0x24c   : > { %10292 = vmatmul.msk.bf16.gmra.mxu1 %vm829_vm2, %v14032_v54  ;;  %v3417_v54 = vshll.u32 %v14075_v2, 16 }
 0x24d   : > { %v4556_v37 = vadd.f32 %v4207_v62, %v2587_v16  ;;  %v5695_v14 = vpop.f32.mrf.mxu0  ;;  %v4905_v15 = vsel %vm3280_vm3, %v4900_v11, %v4904_v40  ;;  %v4910_v11 = vshll.u32 %v12721_v57, 16 }
 0x24e   : > { %v3419_v43 = vrot.slane %v3417_v54, 1  ;;  %v14161_v14 = vld [vmem:[%s13435_s24 + $0xa8] sm:$0xff]  }
 0x24f   : > { %10381 = vmatmul.msk.bf16.gmra.mxu2 %vm829_vm2, %v14141_v60  ;;  %v14151_v21 = vadd.f32 %v5692_v42, %v4556_v37  ;;  %10466 = vmatmul.msk.bf16.gmra.mxu3 %vm829_vm2, %v14144_v23 }
 0x250   : > { %10547 = vmatmul.msk.bf16.gmra.mxu0 %vm829_vm2, %v4897_v29 }
 0x251   : > { %17556 = vst [vmem:[#allocation108_spill] sm:$0xff] %v14151_v21  ;;  %v1830_v20 = vpop.f32.mrf.mxu1  ;;  %v14184_v21 = vld [vmem:[%s13435_s24 + $0xb0] sm:$0xff]  }
 0x252   : > { %v2241_v50 = vpop.f32.mrf.mxu2  ;;  %v4210_v44 = vpop.f32.mrf.mxu3  ;;  %v1831_v42 = vadd.f32 %v1830_v20, %v13663_v45 }
 0x253   : > { %v14164_v44 = vsel %vm3280_vm3, %v3415_v3, %v3419_v43 }
 0x255   : > { %v5696_v32 = vpop.f32.mrf.mxu0 }
 0x259   : > { %v1833_v37 = vpop.f32.mrf.mxu1 }
 0x25a   : > { %v2242_v16 = vpop.f32.mrf.mxu2  ;;  %v4211_v5 = vpop.f32.mrf.mxu3  ;;  %v1834_v12 = vadd.f32 %v1833_v37, %v13675_v34 }
 0x25b   : > { %v2588_v62 = vadd.f32 %v2242_v16, %v1831_v42  ;;  %v4906_v42 = vshrl.u32 %v12719_v48, 16 }
 0x25c   : > { %10293 = vmatmul.msk.bf16.gmra.mxu1 %vm829_vm2, %v14052_v13 }
 0x25d   : > { %v4557_v29 = vadd.f32 %v4211_v5, %v2588_v62  ;;  %v5699_v50 = vpop.f32.mrf.mxu0  ;;  %v3423_v62 = vor.u32 %v3421_v17, %v3419_v43  ;;  %v4908_v37 = vor.u32 %v4906_v42, %v4904_v40  ;;  %v12723_v40 = vld [vmem:[%s13435_s24 + $0xac] sm:$0xff]  }
 0x25f   : > { %10382 = vmatmul.msk.bf16.gmra.mxu2 %vm829_vm2, %v14161_v14  ;;  %v14171_v45 = vadd.f32 %v5696_v32, %v4557_v29  ;;  %10467 = vmatmul.msk.bf16.gmra.mxu3 %vm829_vm2, %v14164_v44  ;;  %v3425_v32 = vshll.u32 %v14097_v58, 16  ;;  %v4912_v29 = vrot.slane %v4910_v11, 1 }
 0x260   : > { %10548 = vmatmul.msk.bf16.gmra.mxu0 %vm829_vm2, %v4905_v15 }
 0x261   : > { %17557 = vst [vmem:[#allocation109_spill] sm:$0xff] %v14171_v45  ;;  %v1835_v35 = vpop.f32.mrf.mxu1  ;;  %v3427_v34 = vrot.slane %v3425_v32, 1 }
 0x262   : > { %v2245_v20 = vpop.f32.mrf.mxu2  ;;  %v4214_v54 = vpop.f32.mrf.mxu3  ;;  %v1836_v5 = vadd.f32 %v1835_v35, %v13687_v41 }
 0x263   : > { %v2589_v1 = vadd.f32 %v2245_v20, %v1834_v12  ;;  %v14187_v48 = vsel %vm3280_vm3, %v3423_v62, %v3427_v34  ;;  %v4914_v62 = vshrl.u32 %v12721_v57, 16 }
 0x265   : > { %v4558_v13 = vadd.f32 %v4214_v54, %v2589_v1  ;;  %v5701_v3 = vpop.f32.mrf.mxu0 }
 0x267   : > { %v14180_v16 = vadd.f32 %v5699_v50, %v4558_v13  ;;  %v4913_v50 = vsel %vm3280_vm3, %v4908_v37, %v4912_v29 }
 0x269   : > { %v1838_v45 = vpop.f32.mrf.mxu1 }
 0x26a   : > { %v2247_v15 = vpop.f32.mrf.mxu2  ;;  %v4216_v20 = vpop.f32.mrf.mxu3  ;;  %v1839_v43 = vadd.f32 %v1838_v45, %v13699_v18  ;;  %v4916_v18 = vor.u32 %v4914_v62, %v4912_v29  ;;  %v4922_v62 = vshrl.u32 %v12723_v40, 16 }
 0x26b   : > { %v2590_v12 = vadd.f32 %v2247_v15, %v1836_v5  ;;  %v4918_v5 = vshll.u32 %v12723_v40, 16 }
 0x26c   : > { %10294 = vmatmul.msk.bf16.gmra.mxu1 %vm829_vm2, %v14075_v2  ;;  %v3429_v2 = vshrl.u32 %v14097_v58, 16 }
 0x26d   : > { %v4559_v1 = vadd.f32 %v4216_v20, %v2590_v12  ;;  %v5704_v54 = vpop.f32.mrf.mxu0  ;;  %v4920_v45 = vrot.slane %v4918_v5, 1 }
 0x26e   : > { %v3431_v15 = vor.u32 %v3429_v2, %v3427_v34  ;;  %v12725_v34 = vld [vmem:[%s13435_s24 + $0xb4] sm:$0xff]  }
 0x26f   : > { %10383 = vmatmul.msk.bf16.gmra.mxu2 %vm829_vm2, %v14184_v21  ;;  %v14194_v41 = vadd.f32 %v5701_v3, %v4559_v1  ;;  %10468 = vmatmul.msk.bf16.gmra.mxu3 %vm829_vm2, %v14187_v48  ;;  %v3433_v3 = vshll.u32 %v14118_v27, 16  ;;  %v4926_v5 = vshll.u32 %v12725_v34, 16 }
 0x270   : > { %10549 = vmatmul.msk.bf16.gmra.mxu0 %vm829_vm2, %v4913_v50 }
 0x271   : > { %17558 = vst [vmem:[#allocation110_spill] sm:$0xff] %v14194_v41  ;;  %v1840_v32 = vpop.f32.mrf.mxu1  ;;  %v3435_v12 = vrot.slane %v3433_v3, 1  ;;  %v3441_v3 = vshll.u32 %v14141_v60, 16  ;;  %v14227_v41 = vld [vmem:[%s13435_s24 + $0xc0] sm:$0xff]  }
 0x272   : > { %v2250_v35 = vpop.f32.mrf.mxu2  ;;  %v4219_v13 = vpop.f32.mrf.mxu3 }
 0x273   : > { %v2591_v17 = vadd.f32 %v2250_v35, %v1839_v43  ;;  %v14206_v43 = vld [vmem:[%s13435_s24 + $0xb8] sm:$0xff]  }
 0x275   : > { %v4560_v42 = vadd.f32 %v4219_v13, %v2591_v17  ;;  %v5706_v11 = vpop.f32.mrf.mxu0  ;;  %v14209_v17 = vsel %vm3280_vm3, %v3431_v15, %v3435_v12  ;;  %v4921_v13 = vsel %vm3280_vm3, %v4916_v18, %v4920_v45 }
 0x277   : > { %v14203_v37 = vadd.f32 %v5704_v54, %v4560_v42  ;;  %v3437_v42 = vshrl.u32 %v14118_v27, 16 }
 0x279   : > { %17559 = vst [vmem:[#allocation111_spill] sm:$0xff] %v14203_v37  ;;  %v1842_v50 = vpop.f32.mrf.mxu1  ;;  %v3439_v18 = vor.u32 %v3437_v42, %v3435_v12 }
 0x27a   : > { %v2252_v20 = vpop.f32.mrf.mxu2  ;;  %v4221_v1 = vpop.f32.mrf.mxu3  ;;  %v1843_v57 = vadd.f32 %v1842_v50, %v13715_v56  ;;  %v3443_v56 = vrot.slane %v3441_v3, 1  ;;  %v4928_v50 = vrot.slane %v4926_v5, 1 }
 0x27b   : > { %v4924_v1 = vor.u32 %v4922_v62, %v4920_v45  ;;  %v12727_v45 = vld [vmem:[%s13435_s24 + $0xbc] sm:$0xff]   ;;  %v3445_v62 = vshrl.u32 %v14141_v60, 16 }
 0x27c   : > { %10295 = vmatmul.msk.bf16.gmra.mxu1 %vm829_vm2, %v14097_v58  ;;  %v14230_v40 = vsel %vm3280_vm3, %v3439_v18, %v3443_v56  ;;  %v4930_v18 = vshrl.u32 %v12725_v34, 16 }
 0x27d   : > { %v5708_v35 = vpop.f32.mrf.mxu0 }
 0x27f   : > { %10384 = vmatmul.msk.bf16.gmra.mxu2 %vm829_vm2, %v14206_v43  ;;  %10469 = vmatmul.msk.bf16.gmra.mxu3 %vm829_vm2, %v14209_v17 }
 0x280   : > { %10550 = vmatmul.msk.bf16.gmra.mxu0 %vm829_vm2, %v4921_v13 }
 0x281   : > { %v1844_v2 = vpop.f32.mrf.mxu1 }
 0x282   : > { %v2254_v29 = vpop.f32.mrf.mxu2  ;;  %v4223_v32 = vpop.f32.mrf.mxu3  ;;  %v1845_v20 = vadd.f32 %v1844_v2, %v13739_v33 }
 0x283   : > { %v2592_v54 = vadd.f32 %v2254_v29, %v1843_v57 }
 0x285   : > { %v4561_v11 = vadd.f32 %v4223_v32, %v2592_v54  ;;  %v5710_v58 = vpop.f32.mrf.mxu0 }
 0x287   : > { %v14223_v15 = vadd.f32 %v5708_v35, %v4561_v11  ;;  %v4929_v35 = vsel %vm3280_vm3, %v4924_v1, %v4928_v50 }
 0x289   : > { %v1847_v37 = vpop.f32.mrf.mxu1 }
 0x28a   : > { %v2256_v13 = vpop.f32.mrf.mxu2  ;;  %v4225_v29 = vpop.f32.mrf.mxu3  ;;  %v1848_v12 = vadd.f32 %v1847_v37, %v13755_v25  ;;  %v4932_v37 = vor.u32 %v4930_v18, %v4928_v50  ;;  %v4938_v18 = vshrl.u32 %v12727_v45, 16 }
 0x28b   : > { %v2593_v57 = vadd.f32 %v2256_v13, %v1845_v20  ;;  %v4934_v20 = vshll.u32 %v12727_v45, 16  ;;  %v3447_v13 = vor.u32 %v3445_v62, %v3443_v56  ;;  %v12729_v56 = vld [vmem:[%s13435_s24 + $0xc4] sm:$0xff]  }
 0x28c   : > { %10296 = vmatmul.msk.bf16.gmra.mxu1 %vm829_vm2, %v14118_v27 }
 0x28d   : > { %v4562_v54 = vadd.f32 %v4225_v29, %v2593_v57  ;;  %v5713_v32 = vpop.f32.mrf.mxu0  ;;  %v4936_v29 = vrot.slane %v4934_v20, 1  ;;  %v4942_v20 = vshll.u32 %v12729_v56, 16 }
 0x28f   : > { %10385 = vmatmul.msk.bf16.gmra.mxu2 %vm829_vm2, %v14227_v41  ;;  %v14237_v33 = vadd.f32 %v5710_v58, %v4562_v54  ;;  %10470 = vmatmul.msk.bf16.gmra.mxu3 %vm829_vm2, %v14230_v40  ;;  %v3449_v58 = vshll.u32 %v14161_v14, 16 }
 0x290   : > { %10551 = vmatmul.msk.bf16.gmra.mxu0 %vm829_vm2, %v4929_v35 }
 0x291   : > { %17560 = vst [vmem:[#allocation112_spill] sm:$0xff] %v14237_v33  ;;  %v1849_v3 = vpop.f32.mrf.mxu1  ;;  %v3451_v25 = vrot.slane %v3449_v58, 1  ;;  %v14250_v33 = vld [vmem:[%s13435_s24 + $0xc8] sm:$0xff]  }
 0x292   : > { %v2259_v2 = vpop.f32.mrf.mxu2  ;;  %v4228_v11 = vpop.f32.mrf.mxu3  ;;  %v1850_v57 = vadd.f32 %v1849_v3, %v13771_v22 }
 0x293   : > { %v2594_v42 = vadd.f32 %v2259_v2, %v1848_v12  ;;  %v14253_v34 = vsel %vm3280_vm3, %v3447_v13, %v3451_v25 }
 0x295   : > { %v4563_v27 = vadd.f32 %v4228_v11, %v2594_v42  ;;  %v5715_v5 = vpop.f32.mrf.mxu0 }
 0x297   : > { %v14246_v1 = vadd.f32 %v5713_v32, %v4563_v27  ;;  %v4937_v32 = vsel %vm3280_vm3, %v4932_v37, %v4936_v29  ;;  %v3453_v27 = vshrl.u32 %v14161_v14, 16  ;;  %v4940_v37 = vor.u32 %v4938_v18, %v4936_v29  ;;  %v12731_v29 = vld [vmem:[%s13435_s24 + $0xcc] sm:$0xff]  }
 0x299   : > { %v1852_v2 = vpop.f32.mrf.mxu1  ;;  %v3455_v13 = vor.u32 %v3453_v27, %v3451_v25 }
 0x29a   : > { %v2261_v54 = vpop.f32.mrf.mxu2  ;;  %v4230_v12 = vpop.f32.mrf.mxu3 }
 0x29b   : > { %v2595_v35 = vadd.f32 %v2261_v54, %v1850_v57  ;;  %v4944_v54 = vrot.slane %v4942_v20, 1  ;;  %v3461_v20 = vshrl.u32 %v14184_v21, 16 }
 0x29c   : > { %10297 = vmatmul.msk.bf16.gmra.mxu1 %vm829_vm2, %v14141_v60  ;;  %v3457_v60 = vshll.u32 %v14184_v21, 16 }
 0x29d   : > { %v4564_v42 = vadd.f32 %v4230_v12, %v2595_v35  ;;  %v5718_v11 = vpop.f32.mrf.mxu0  ;;  %v4945_v45 = vsel %vm3280_vm3, %v4940_v37, %v4944_v54  ;;  %v4950_v37 = vshll.u32 %v12731_v29, 16 }
 0x29e   : > { %v3459_v57 = vrot.slane %v3457_v60, 1  ;;  %v14270_v11 = vld [vmem:[%s13435_s24 + $0xd0] sm:$0xff]  }
 0x29f   : > { %10386 = vmatmul.msk.bf16.gmra.mxu2 %vm829_vm2, %v14250_v33  ;;  %v14260_v22 = vadd.f32 %v5715_v5, %v4564_v42  ;;  %10471 = vmatmul.msk.bf16.gmra.mxu3 %vm829_vm2, %v14253_v34 }
 0x2a0   : > { %10552 = vmatmul.msk.bf16.gmra.mxu0 %vm829_vm2, %v4937_v32 }
 0x2a1   : > { %17561 = vst [vmem:[#allocation113_spill] sm:$0xff] %v14260_v22  ;;  %v1853_v62 = vpop.f32.mrf.mxu1  ;;  %v14293_v22 = vld [vmem:[%s13435_s24 + $0xd8] sm:$0xff]  }
 0x2a2   : > { %v2264_v50 = vpop.f32.mrf.mxu2  ;;  %v4233_v3 = vpop.f32.mrf.mxu3  ;;  %v1854_v5 = vadd.f32 %v1853_v62, %v13792_v61 }
 0x2a3   : > { %v14273_v3 = vsel %vm3280_vm3, %v3455_v13, %v3459_v57 }
 0x2a5   : > { %v5719_v58 = vpop.f32.mrf.mxu0 }
 0x2a9   : > { %v1856_v42 = vpop.f32.mrf.mxu1 }
 0x2aa   : > { %v2265_v35 = vpop.f32.mrf.mxu2  ;;  %v4234_v2 = vpop.f32.mrf.mxu3  ;;  %v1857_v25 = vadd.f32 %v1856_v42, %v13804_v55 }
 0x2ab   : > { %v2596_v12 = vadd.f32 %v2265_v35, %v1854_v5  ;;  %v4946_v5 = vshrl.u32 %v12729_v56, 16 }
 0x2ac   : > { %10298 = vmatmul.msk.bf16.gmra.mxu1 %vm829_vm2, %v14161_v14 }
 0x2ad   : > { %v4565_v32 = vadd.f32 %v4234_v2, %v2596_v12  ;;  %v5722_v50 = vpop.f32.mrf.mxu0  ;;  %v3463_v12 = vor.u32 %v3461_v20, %v3459_v57  ;;  %v4948_v42 = vor.u32 %v4946_v5, %v4944_v54  ;;  %v12733_v54 = vld [vmem:[%s13435_s24 + $0xd4] sm:$0xff]  }
 0x2af   : > { %10387 = vmatmul.msk.bf16.gmra.mxu2 %vm829_vm2, %v14270_v11  ;;  %v14280_v61 = vadd.f32 %v5719_v58, %v4565_v32  ;;  %10472 = vmatmul.msk.bf16.gmra.mxu3 %vm829_vm2, %v14273_v3  ;;  %v3465_v58 = vshll.u32 %v14206_v43, 16  ;;  %v4952_v32 = vrot.slane %v4950_v37, 1 }
 0x2b0   : > { %10553 = vmatmul.msk.bf16.gmra.mxu0 %vm829_vm2, %v4945_v45 }
 0x2b1   : > { %17562 = vst [vmem:[#allocation114_spill] sm:$0xff] %v14280_v61  ;;  %v1858_v18 = vpop.f32.mrf.mxu1  ;;  %v3467_v55 = vrot.slane %v3465_v58, 1 }
 0x2b2   : > { %v2268_v62 = vpop.f32.mrf.mxu2  ;;  %v4237_v60 = vpop.f32.mrf.mxu3  ;;  %v1859_v2 = vadd.f32 %v1858_v18, %v13821_v52 }
 0x2b3   : > { %v2597_v27 = vadd.f32 %v2268_v62, %v1857_v25  ;;  %v14296_v56 = vsel %vm3280_vm3, %v3463_v12, %v3467_v55  ;;  %v4954_v12 = vshrl.u32 %v12731_v29, 16 }
 0x2b5   : > { %v4566_v14 = vadd.f32 %v4237_v60, %v2597_v27  ;;  %v5724_v13 = vpop.f32.mrf.mxu0 }
 0x2b7   : > { %v14289_v35 = vadd.f32 %v5722_v50, %v4566_v14  ;;  %v4953_v50 = vsel %vm3280_vm3, %v4948_v42, %v4952_v32 }
 0x2b9   : > { %v1861_v61 = vpop.f32.mrf.mxu1 }
 0x2ba   : > { %v2270_v45 = vpop.f32.mrf.mxu2  ;;  %v4239_v62 = vpop.f32.mrf.mxu3  ;;  %v1862_v57 = vadd.f32 %v1861_v61, %v13832_v0  ;;  %v4956_v0 = vor.u32 %v4954_v12, %v4952_v32  ;;  %v4962_v12 = vshrl.u32 %v12733_v54, 16 }
 0x2bb   : > { %v2598_v25 = vadd.f32 %v2270_v45, %v1859_v2  ;;  %v4958_v2 = vshll.u32 %v12733_v54, 16 }
 0x2bc   : > { %10299 = vmatmul.msk.bf16.gmra.mxu1 %vm829_vm2, %v14184_v21  ;;  %v3469_v21 = vshrl.u32 %v14206_v43, 16 }
 0x2bd   : > { %v4567_v27 = vadd.f32 %v4239_v62, %v2598_v25  ;;  %v5727_v60 = vpop.f32.mrf.mxu0  ;;  %v4960_v61 = vrot.slane %v4958_v2, 1 }
 0x2be   : > { %v3471_v45 = vor.u32 %v3469_v21, %v3467_v55  ;;  %v12735_v55 = vld [vmem:[%s13435_s24 + $0xdc] sm:$0xff]  }
 0x2bf   : > { %10388 = vmatmul.msk.bf16.gmra.mxu2 %vm829_vm2, %v14293_v22  ;;  %v14303_v52 = vadd.f32 %v5724_v13, %v4567_v27  ;;  %10473 = vmatmul.msk.bf16.gmra.mxu3 %vm829_vm2, %v14296_v56  ;;  %v3473_v13 = vshll.u32 %v14227_v41, 16  ;;  %v4966_v2 = vshll.u32 %v12735_v55, 16 }
 0x2c0   : > { %10554 = vmatmul.msk.bf16.gmra.mxu0 %vm829_vm2, %v4953_v50 }
 0x2c1   : > { %17563 = vst [vmem:[#allocation115_spill] sm:$0xff] %v14303_v52  ;;  %v1863_v58 = vpop.f32.mrf.mxu1  ;;  %v3475_v25 = vrot.slane %v3473_v13, 1  ;;  %v3481_v13 = vshll.u32 %v14250_v33, 16  ;;  %v14336_v52 = vld [vmem:[%s13435_s24 + $0xe8] sm:$0xff]  }
 0x2c2   : > { %v2273_v18 = vpop.f32.mrf.mxu2  ;;  %v4242_v14 = vpop.f32.mrf.mxu3 }
 0x2c3   : > { %v2599_v20 = vadd.f32 %v2273_v18, %v1862_v57  ;;  %v14315_v57 = vld [vmem:[%s13435_s24 + $0xe0] sm:$0xff]  }
 0x2c5   : > { %v4568_v5 = vadd.f32 %v4242_v14, %v2599_v20  ;;  %v5729_v37 = vpop.f32.mrf.mxu0  ;;  %v14318_v20 = vsel %vm3280_vm3, %v3471_v45, %v3475_v25  ;;  %v4961_v14 = vsel %vm3280_vm3, %v4956_v0, %v4960_v61 }
 0x2c7   : > { %v14312_v42 = vadd.f32 %v5727_v60, %v4568_v5  ;;  %v3477_v5 = vshrl.u32 %v14227_v41, 16 }
 0x2c9   : > { %17564 = vst [vmem:[#allocation116_spill] sm:$0xff] %v14312_v42  ;;  %v1865_v50 = vpop.f32.mrf.mxu1  ;;  %v3479_v0 = vor.u32 %v3477_v5, %v3475_v25 }
 0x2ca   : > { %v2275_v62 = vpop.f32.mrf.mxu2  ;;  %v4244_v27 = vpop.f32.mrf.mxu3  ;;  %v1866_v29 = vadd.f32 %v1865_v50, %v13852_v10  ;;  %v3483_v10 = vrot.slane %v3481_v13, 1  ;;  %v4968_v50 = vrot.slane %v4966_v2, 1 }
 0x2cb   : > { %v4964_v27 = vor.u32 %v4962_v12, %v4960_v61  ;;  %v12737_v61 = vld [vmem:[%s13435_s24 + $0xe4] sm:$0xff]   ;;  %v3485_v12 = vshrl.u32 %v14250_v33, 16 }
 0x2cc   : > { %10300 = vmatmul.msk.bf16.gmra.mxu1 %vm829_vm2, %v14206_v43  ;;  %v14339_v54 = vsel %vm3280_vm3, %v3479_v0, %v3483_v10  ;;  %v4970_v0 = vshrl.u32 %v12735_v55, 16 }
 0x2cd   : > { %v5731_v18 = vpop.f32.mrf.mxu0 }
 0x2cf   : > { %10389 = vmatmul.msk.bf16.gmra.mxu2 %vm829_vm2, %v14315_v57  ;;  %10474 = vmatmul.msk.bf16.gmra.mxu3 %vm829_vm2, %v14318_v20 }
 0x2d0   : > { %10555 = vmatmul.msk.bf16.gmra.mxu0 %vm829_vm2, %v4961_v14 }
 0x2d1   : > { %v1867_v21 = vpop.f32.mrf.mxu1 }
 0x2d2   : > { %v2277_v32 = vpop.f32.mrf.mxu2  ;;  %v4246_v58 = vpop.f32.mrf.mxu3  ;;  %v1868_v62 = vadd.f32 %v1867_v21, %v13868_v6 }
 0x2d3   : > { %v2600_v60 = vadd.f32 %v2277_v32, %v1866_v29 }
 0x2d5   : > { %v4569_v37 = vadd.f32 %v4246_v58, %v2600_v60  ;;  %v5733_v43 = vpop.f32.mrf.mxu0 }
 0x2d7   : > { %v14332_v45 = vadd.f32 %v5731_v18, %v4569_v37  ;;  %v4969_v18 = vsel %vm3280_vm3, %v4964_v27, %v4968_v50 }
 0x2d9   : > { %v1870_v42 = vpop.f32.mrf.mxu1 }
 0x2da   : > { %v2279_v14 = vpop.f32.mrf.mxu2  ;;  %v4248_v32 = vpop.f32.mrf.mxu3  ;;  %v1871_v25 = vadd.f32 %v1870_v42, %v13880_v30  ;;  %v4972_v42 = vor.u32 %v4970_v0, %v4968_v50  ;;  %v4978_v0 = vshrl.u32 %v12737_v61, 16 }
 0x2db   : > { %v2601_v29 = vadd.f32 %v2279_v14, %v1868_v62  ;;  %v4974_v62 = vshll.u32 %v12737_v61, 16  ;;  %v3487_v14 = vor.u32 %v3485_v12, %v3483_v10  ;;  %v12739_v10 = vld [vmem:[%s13435_s24 + $0xec] sm:$0xff]  }
 0x2dc   : > { %10301 = vmatmul.msk.bf16.gmra.mxu1 %vm829_vm2, %v14227_v41 }
 0x2dd   : > { %v4570_v60 = vadd.f32 %v4248_v32, %v2601_v29  ;;  %v5736_v58 = vpop.f32.mrf.mxu0  ;;  %v4976_v32 = vrot.slane %v4974_v62, 1  ;;  %v4982_v62 = vshll.u32 %v12739_v10, 16 }
 0x2df   : > { %10390 = vmatmul.msk.bf16.gmra.mxu2 %vm829_vm2, %v14336_v52  ;;  %v14346_v6 = vadd.f32 %v5733_v43, %v4570_v60  ;;  %10475 = vmatmul.msk.bf16.gmra.mxu3 %vm829_vm2, %v14339_v54  ;;  %v3489_v43 = vshll.u32 %v14270_v11, 16 }
 0x2e0   : > { %10556 = vmatmul.msk.bf16.gmra.mxu0 %vm829_vm2, %v4969_v18 }
 0x2e1   : > { %17565 = vst [vmem:[#allocation117_spill] sm:$0xff] %v14346_v6  ;;  %v1872_v13 = vpop.f32.mrf.mxu1  ;;  %v3491_v30 = vrot.slane %v3489_v43, 1  ;;  %v14359_v6 = vld [vmem:[%s13435_s24 + $0xf0] sm:$0xff]  }
 0x2e2   : > { %v2282_v21 = vpop.f32.mrf.mxu2  ;;  %v4251_v37 = vpop.f32.mrf.mxu3  ;;  %v1873_v29 = vadd.f32 %v1872_v13, %v13896_v31 }
 0x2e3   : > { %v2602_v5 = vadd.f32 %v2282_v21, %v1871_v25  ;;  %v14362_v55 = vsel %vm3280_vm3, %v3487_v14, %v3491_v30 }
 0x2e5   : > { %v4571_v41 = vadd.f32 %v4251_v37, %v2602_v5  ;;  %v5738_v2 = vpop.f32.mrf.mxu0 }
 0x2e7   : > { %v14355_v27 = vadd.f32 %v5736_v58, %v4571_v41  ;;  %v4977_v58 = vsel %vm3280_vm3, %v4972_v42, %v4976_v32  ;;  %v3493_v41 = vshrl.u32 %v14270_v11, 16  ;;  %v4980_v42 = vor.u32 %v4978_v0, %v4976_v32  ;;  %v12741_v32 = vld [vmem:[%s13435_s24 + $0xf4] sm:$0xff]  }
 0x2e9   : > { %v1875_v21 = vpop.f32.mrf.mxu1  ;;  %v3495_v14 = vor.u32 %v3493_v41, %v3491_v30 }
 0x2ea   : > { %v2284_v60 = vpop.f32.mrf.mxu2  ;;  %v4253_v25 = vpop.f32.mrf.mxu3 }
 0x2eb   : > { %v2603_v18 = vadd.f32 %v2284_v60, %v1873_v29  ;;  %v4984_v60 = vrot.slane %v4982_v62, 1  ;;  %v3501_v62 = vshrl.u32 %v14293_v22, 16 }
 0x2ec   : > { %10302 = vmatmul.msk.bf16.gmra.mxu1 %vm829_vm2, %v14250_v33  ;;  %v3497_v33 = vshll.u32 %v14293_v22, 16 }
 0x2ed   : > { %v4572_v5 = vadd.f32 %v4253_v25, %v2603_v18  ;;  %v5741_v37 = vpop.f32.mrf.mxu0  ;;  %v4985_v61 = vsel %vm3280_vm3, %v4980_v42, %v4984_v60  ;;  %v4990_v42 = vshll.u32 %v12741_v32, 16 }
 0x2ee   : > { %v3499_v29 = vrot.slane %v3497_v33, 1  ;;  %v14379_v37 = vld [vmem:[%s13435_s24 + $0xf8] sm:$0xff]  }
 0x2ef   : > { %10391 = vmatmul.msk.bf16.gmra.mxu2 %vm829_vm2, %v14359_v6  ;;  %v14369_v31 = vadd.f32 %v5738_v2, %v4572_v5  ;;  %10476 = vmatmul.msk.bf16.gmra.mxu3 %vm829_vm2, %v14362_v55 }
 0x2f0   : > { %10557 = vmatmul.msk.bf16.gmra.mxu0 %vm829_vm2, %v4977_v58 }
 0x2f1   : > { %17566 = vst [vmem:[#allocation118_spill] sm:$0xff] %v14369_v31  ;;  %v1876_v12 = vpop.f32.mrf.mxu1  ;;  %v14402_v31 = vld [vmem:[%s13435_s24 + $0x100] sm:$0xff]  }
 0x2f2   : > { %v2287_v50 = vpop.f32.mrf.mxu2  ;;  %v4256_v13 = vpop.f32.mrf.mxu3  ;;  %v1877_v2 = vadd.f32 %v1876_v12, %v13921_v36 }
 0x2f3   : > { %v14382_v13 = vsel %vm3280_vm3, %v3495_v14, %v3499_v29 }
 0x2f5   : > { %v5742_v43 = vpop.f32.mrf.mxu0 }
 0x2f9   : > { %v1879_v5 = vpop.f32.mrf.mxu1 }
 0x2fa   : > { %v2288_v18 = vpop.f32.mrf.mxu2  ;;  %v4257_v21 = vpop.f32.mrf.mxu3  ;;  %v1880_v30 = vadd.f32 %v1879_v5, %v13934_v8 }
 0x2fb   : > { %v2604_v25 = vadd.f32 %v2288_v18, %v1877_v2  ;;  %v4986_v2 = vshrl.u32 %v12739_v10, 16 }
 0x2fc   : > { %10303 = vmatmul.msk.bf16.gmra.mxu1 %vm829_vm2, %v14270_v11 }
 0x2fd   : > { %v4573_v58 = vadd.f32 %v4257_v21, %v2604_v25  ;;  %v5745_v50 = vpop.f32.mrf.mxu0  ;;  %v3503_v25 = vor.u32 %v3501_v62, %v3499_v29  ;;  %v4988_v5 = vor.u32 %v4986_v2, %v4984_v60  ;;  %v12743_v60 = vld [vmem:[%s13435_s24 + $0xfc] sm:$0xff]  }
 0x2ff   : > { %10392 = vmatmul.msk.bf16.gmra.mxu2 %vm829_vm2, %v14379_v37  ;;  %v14389_v36 = vadd.f32 %v5742_v43, %v4573_v58  ;;  %10477 = vmatmul.msk.bf16.gmra.mxu3 %vm829_vm2, %v14382_v13  ;;  %v3505_v43 = vshll.u32 %v14315_v57, 16  ;;  %v4992_v58 = vrot.slane %v4990_v42, 1 }
 0x300   : > { %10558 = vmatmul.msk.bf16.gmra.mxu0 %vm829_vm2, %v4985_v61 }
 0x301   : > { %17567 = vst [vmem:[#allocation119_spill] sm:$0xff] %v14389_v36  ;;  %v1881_v0 = vpop.f32.mrf.mxu1  ;;  %v3507_v8 = vrot.slane %v3505_v43, 1 }
 0x302   : > { %v2291_v12 = vpop.f32.mrf.mxu2  ;;  %v4260_v33 = vpop.f32.mrf.mxu3  ;;  %v1882_v21 = vadd.f32 %v1881_v0, %v13954_v46 }
 0x303   : > { %v2605_v41 = vadd.f32 %v2291_v12, %v1880_v30  ;;  %v14405_v10 = vsel %vm3280_vm3, %v3503_v25, %v3507_v8  ;;  %v4994_v25 = vshrl.u32 %v12741_v32, 16 }
 0x305   : > { %v4574_v11 = vadd.f32 %v4260_v33, %v2605_v41  ;;  %v5747_v14 = vpop.f32.mrf.mxu0 }
 0x307   : > { %v14398_v18 = vadd.f32 %v5745_v50, %v4574_v11  ;;  %v4993_v50 = vsel %vm3280_vm3, %v4988_v5, %v4992_v58 }
 0x309   : > { %17568 = vst [vmem:[#allocation120_spill] sm:$0xff] %v14398_v18  ;;  %v1884_v36 = vpop.f32.mrf.mxu1 }
 0x30a   : > { %v2293_v61 = vpop.f32.mrf.mxu2  ;;  %v4262_v12 = vpop.f32.mrf.mxu3  ;;  %v1885_v29 = vadd.f32 %v1884_v36, %v13967_v19  ;;  %v4996_v19 = vor.u32 %v4994_v25, %v4992_v58  ;;  %v5002_v25 = vshrl.u32 %v12743_v60, 16 }
 0x30b   : > { %v2606_v30 = vadd.f32 %v2293_v61, %v1882_v21  ;;  %v4998_v21 = vshll.u32 %v12743_v60, 16 }
 0x30c   : > { %10304 = vmatmul.msk.bf16.gmra.mxu1 %vm829_vm2, %v14293_v22  ;;  %v3509_v22 = vshrl.u32 %v14315_v57, 16 }
 0x30d   : > { %v4575_v41 = vadd.f32 %v4262_v12, %v2606_v30  ;;  %v5750_v33 = vpop.f32.mrf.mxu0  ;;  %v5000_v36 = vrot.slane %v4998_v21, 1 }
 0x30e   : > { %v3511_v61 = vor.u32 %v3509_v22, %v3507_v8  ;;  %v12745_v8 = vld [vmem:[%s13435_s24 + $0x104] sm:$0xff]  }
 0x30f   : > { %10393 = vmatmul.msk.bf16.gmra.mxu2 %vm829_vm2, %v14402_v31  ;;  %v14412_v46 = vadd.f32 %v5747_v14, %v4575_v41  ;;  %10478 = vmatmul.msk.bf16.gmra.mxu3 %vm829_vm2, %v14405_v10  ;;  %v3513_v14 = vshll.u32 %v14336_v52, 16  ;;  %v5006_v21 = vshll.u32 %v12745_v8, 16 }
 0x310   : > { %10559 = vmatmul.msk.bf16.gmra.mxu0 %vm829_vm2, %v4993_v50 }
 0x311   : > { %17569 = vst [vmem:[#allocation121_spill] sm:$0xff] %v14412_v46  ;;  %v1886_v43 = vpop.f32.mrf.mxu1  ;;  %v3515_v30 = vrot.slane %v3513_v14, 1  ;;  %v3521_v14 = vshll.u32 %v14359_v6, 16  ;;  %v14445_v46 = vld [vmem:[%s13435_s24 + $0x110] sm:$0xff]  }
 0x312   : > { %v2296_v0 = vpop.f32.mrf.mxu2  ;;  %v4265_v11 = vpop.f32.mrf.mxu3 }
 0x313   : > { %v2607_v62 = vadd.f32 %v2296_v0, %v1885_v29  ;;  %v14424_v29 = vld [vmem:[%s13435_s24 + $0x108] sm:$0xff]  }
 0x315   : > { %v4576_v2 = vadd.f32 %v4265_v11, %v2607_v62  ;;  %v5752_v42 = vpop.f32.mrf.mxu0  ;;  %v14427_v62 = vsel %vm3280_vm3, %v3511_v61, %v3515_v30  ;;  %v5001_v11 = vsel %vm3280_vm3, %v4996_v19, %v5000_v36 }
 0x317   : > { %v14421_v5 = vadd.f32 %v5750_v33, %v4576_v2  ;;  %v3517_v2 = vshrl.u32 %v14336_v52, 16 }
 0x319   : > { %17570 = vst [vmem:[#allocation122_spill] sm:$0xff] %v14421_v5  ;;  %v1888_v50 = vpop.f32.mrf.mxu1  ;;  %v3519_v19 = vor.u32 %v3517_v2, %v3515_v30 }
 0x31a   : > { %v2298_v12 = vpop.f32.mrf.mxu2  ;;  %v4267_v41 = vpop.f32.mrf.mxu3  ;;  %v1889_v32 = vadd.f32 %v1888_v50, %v13503_v47  ;;  %v3523_v47 = vrot.slane %v3521_v14, 1  ;;  %v5008_v50 = vrot.slane %v5006_v21, 1 }
 0x31b   : > { %v5004_v41 = vor.u32 %v5002_v25, %v5000_v36  ;;  %v12747_v36 = vld [vmem:[%s13435_s24 + $0x10c] sm:$0xff]   ;;  %v3525_v25 = vshrl.u32 %v14359_v6, 16 }
 0x31c   : > { %10305 = vmatmul.msk.bf16.gmra.mxu1 %vm829_vm2, %v14315_v57  ;;  %v14448_v60 = vsel %vm3280_vm3, %v3519_v19, %v3523_v47  ;;  %v5010_v19 = vshrl.u32 %v12745_v8, 16 }
 0x31d   : > { %v5754_v0 = vpop.f32.mrf.mxu0 }
 0x31f   : > { %10394 = vmatmul.msk.bf16.gmra.mxu2 %vm829_vm2, %v14424_v29  ;;  %10479 = vmatmul.msk.bf16.gmra.mxu3 %vm829_vm2, %v14427_v62 }
 0x320   : > { %10560 = vmatmul.msk.bf16.gmra.mxu0 %vm829_vm2, %v5001_v11 }
 0x321   : > { %v1890_v22 = vpop.f32.mrf.mxu1 }
 0x322   : > { %v2300_v58 = vpop.f32.mrf.mxu2  ;;  %v4269_v43 = vpop.f32.mrf.mxu3  ;;  %v1891_v12 = vadd.f32 %v1890_v22, %v13517_v53 }
 0x323   : > { %v2608_v33 = vadd.f32 %v2300_v58, %v1889_v32 }
 0x325   : > { %v4577_v42 = vadd.f32 %v4269_v43, %v2608_v33  ;;  %v5756_v57 = vpop.f32.mrf.mxu0 }
 0x327   : > { %v14441_v61 = vadd.f32 %v5754_v0, %v4577_v42  ;;  %v5009_v0 = vsel %vm3280_vm3, %v5004_v41, %v5008_v50 }
 0x329   : > { %17571 = vst [vmem:[#allocation123_spill] sm:$0xff] %v14441_v61  ;;  %v1893_v5 = vpop.f32.mrf.mxu1  ;;  %v14468_v61 = vld [vmem:[%s13435_s24 + $0x118] sm:$0xff]  }
 0x32a   : > { %v2302_v11 = vpop.f32.mrf.mxu2  ;;  %v4271_v58 = vpop.f32.mrf.mxu3  ;;  %v1894_v30 = vadd.f32 %v1893_v5, %v13527_v59  ;;  %v5012_v5 = vor.u32 %v5010_v19, %v5008_v50  ;;  %v12749_v50 = vld [vmem:[%s13435_s24 + $0x114] sm:$0xff]   ;;  %v5018_v19 = vshrl.u32 %v12747_v36, 16 }
 0x32b   : > { %v2609_v32 = vadd.f32 %v2302_v11, %v1891_v12  ;;  %v5014_v12 = vshll.u32 %v12747_v36, 16  ;;  %v3527_v11 = vor.u32 %v3525_v25, %v3523_v47 }
 0x32c   : > { %10306 = vmatmul.msk.bf16.gmra.mxu1 %vm829_vm2, %v14336_v52 }
 0x32d   : > { %v4578_v33 = vadd.f32 %v4271_v58, %v2609_v32  ;;  %v5759_v43 = vpop.f32.mrf.mxu0  ;;  %v17574_v32 = vld [vmem:[#allocation11_spill] sm:$0xff] }
 0x32f   : > { %10395 = vmatmul.msk.bf16.gmra.mxu2 %vm829_vm2, %v14445_v46  ;;  %v14455_v53 = vadd.f32 %v5756_v57, %v4578_v33  ;;  %10480 = vmatmul.msk.bf16.gmra.mxu3 %vm829_vm2, %v14448_v60  ;;  %v3529_v57 = vshll.u32 %v14379_v37, 16  ;;  %v5016_v33 = vrot.slane %v5014_v12, 1  ;;  %v5022_v12 = vshll.u32 %v12749_v50, 16 }
 0x330   : > { %10561 = vmatmul.msk.bf16.gmra.mxu0 %vm829_vm2, %v5009_v0 }
 0x331   : > { %17572 = vst [vmem:[#allocation124_spill] sm:$0xff] %v14455_v53  ;;  %v1895_v14 = vpop.f32.mrf.mxu1  ;;  %v3531_v59 = vrot.slane %v3529_v57, 1 }
 0x332   : > { %v2305_v22 = vpop.f32.mrf.mxu2  ;;  %v4274_v42 = vpop.f32.mrf.mxu3  ;;  %v1896_v58 = vadd.f32 %v1895_v14, %v17574_v32 }
 0x333   : > { %v2610_v2 = vadd.f32 %v2305_v22, %v1894_v30  ;;  %v14471_v8 = vsel %vm3280_vm3, %v3527_v11, %v3531_v59 }
 0x334   : > { %17575 = vst [vmem:[#allocation11_spill] sm:$0xff] %v14471_v8 }
 0x335   : > { %v4579_v52 = vadd.f32 %v4274_v42, %v2610_v2  ;;  %v5761_v21 = vpop.f32.mrf.mxu0 }
 0x337   : > { %v14464_v41 = vadd.f32 %v5759_v43, %v4579_v52  ;;  %v5017_v43 = vsel %vm3280_vm3, %v5012_v5, %v5016_v33  ;;  %v3533_v52 = vshrl.u32 %v14379_v37, 16  ;;  %v5020_v5 = vor.u32 %v5018_v19, %v5016_v33  ;;  %v17580_v33 = vld [vmem:[#allocation17_spill] sm:$0xff] }
 0x339   : > { %17573 = vst [vmem:[#allocation125_spill] sm:$0xff] %v14464_v41  ;;  %v1898_v53 = vpop.f32.mrf.mxu1  ;;  %v3535_v11 = vor.u32 %v3533_v52, %v3531_v59  ;;  %v12751_v52 = vld [vmem:[%s13435_s24 + $0x11c] sm:$0xff]  }
 0x33a   : > { %v2307_v0 = vpop.f32.mrf.mxu2  ;;  %v4276_v22 = vpop.f32.mrf.mxu3 }
 0x33b   : > { %v2611_v30 = vadd.f32 %v2307_v0, %v1896_v58  ;;  %v5024_v0 = vrot.slane %v5022_v12, 1 }
 0x33c   : > { %10307 = vmatmul.msk.bf16.gmra.mxu1 %vm829_vm2, %v14359_v6  ;;  %v3537_v6 = vshll.u32 %v14402_v31, 16 }
 0x33d   : > { %v4580_v2 = vadd.f32 %v4276_v22, %v2611_v30  ;;  %v5764_v42 = vpop.f32.mrf.mxu0  ;;  %v5025_v36 = vsel %vm3280_vm3, %v5020_v5, %v5024_v0  ;;  %v5026_v5 = vshrl.u32 %v12749_v50, 16 }
 0x33e   : > { %v3539_v58 = vrot.slane %v3537_v6, 1 }
 0x33f   : > { %10396 = vmatmul.msk.bf16.gmra.mxu2 %vm829_vm2, %v14468_v61  ;;  %v14478_v47 = vadd.f32 %v5761_v21, %v4580_v2  ;;  %10481 = vmatmul.msk.bf16.gmra.mxu3 %vm829_vm2, %v14471_v8  ;;  %v17577_v21 = vld [vmem:[#allocation14_spill] sm:$0xff] }
 0x340   : > { %10562 = vmatmul.msk.bf16.gmra.mxu0 %vm829_vm2, %v5017_v43  ;;  %v14488_v43 = vld [vmem:[%s13435_s24 + $0x120] sm:$0xff]  }
 0x341   : > { %17576 = vst [vmem:[#allocation126_spill] sm:$0xff] %v14478_v47  ;;  %v1899_v25 = vpop.f32.mrf.mxu1  ;;  %v14491_v47 = vsel %vm3280_vm3, %v3535_v11, %v3539_v58 }
 0x342   : > { %v2310_v53 = vpop.f32.mrf.mxu2  ;;  %v4279_v14 = vpop.f32.mrf.mxu3  ;;  %v1900_v32 = vadd.f32 %v1899_v25, %v17577_v21  ;;  %17578 = vst [vmem:[#allocation14_spill] sm:$0xff] %v14491_v47  ;;  %v3541_v21 = vshrl.u32 %v14402_v31, 16 }
 0x345   : > { %v5765_v57 = vpop.f32.mrf.mxu0 }
 0x349   : > { %v1902_v42 = vpop.f32.mrf.mxu1 }
 0x34a   : > { %v2311_v30 = vpop.f32.mrf.mxu2  ;;  %v4280_v2 = vpop.f32.mrf.mxu3  ;;  %v1903_v25 = vadd.f32 %v1902_v42, %v17580_v33  ;;  %v5028_v33 = vor.u32 %v5026_v5, %v5024_v0 }
 0x34b   : > { %v2612_v22 = vadd.f32 %v2311_v30, %v1900_v32  ;;  %v5030_v30 = vshll.u32 %v12751_v52, 16 }
 0x34c   : > { %10308 = vmatmul.msk.bf16.gmra.mxu1 %vm829_vm2, %v14379_v37 }
 0x34d   : > { %v4581_v53 = vadd.f32 %v4280_v2, %v2612_v22  ;;  %v5768_v14 = vpop.f32.mrf.mxu0  ;;  %v3543_v2 = vor.u32 %v3541_v21, %v3539_v58 }
 0x34f   : > { %10397 = vmatmul.msk.bf16.gmra.mxu2 %vm829_vm2, %v14488_v43  ;;  %v14498_v59 = vadd.f32 %v5765_v57, %v4581_v53  ;;  %10482 = vmatmul.msk.bf16.gmra.mxu3 %vm829_vm2, %v14491_v47  ;;  %v3545_v57 = vshll.u32 %v14424_v29, 16  ;;  %v17582_v53 = vld [vmem:[#allocation20_spill] sm:$0xff]  ;;  %v14511_v47 = vld [vmem:[%s13435_s24 + $0x128] sm:$0xff]  }
 0x350   : > { %10563 = vmatmul.msk.bf16.gmra.mxu0 %vm829_vm2, %v5025_v36 }
 0x351   : > { %17579 = vst [vmem:[#allocation127_spill] sm:$0xff] %v14498_v59  ;;  %v1904_v11 = vpop.f32.mrf.mxu1  ;;  %v3547_v42 = vrot.slane %v3545_v57, 1  ;;  %v5032_v59 = vrot.slane %v5030_v30, 1 }
 0x352   : > { %v2314_v6 = vpop.f32.mrf.mxu2  ;;  %v4283_v12 = vpop.f32.mrf.mxu3  ;;  %v1905_v36 = vadd.f32 %v1904_v11, %v17582_v53  ;;  %v12753_v11 = vld [vmem:[%s13435_s24 + $0x124] sm:$0xff]   ;;  %v5034_v53 = vshrl.u32 %v12751_v52, 16 }
 0x353   : > { %v2613_v19 = vadd.f32 %v2314_v6, %v1903_v25  ;;  %v14514_v50 = vsel %vm3280_vm3, %v3543_v2, %v3547_v42 }
 0x354   : > { %17583 = vst [vmem:[#allocation20_spill] sm:$0xff] %v14514_v50 }
 0x355   : > { %v4582_v37 = vadd.f32 %v4283_v12, %v2613_v19  ;;  %v5770_v32 = vpop.f32.mrf.mxu0 }
 0x357   : > { %v14507_v22 = vadd.f32 %v5768_v14, %v4582_v37  ;;  %v5033_v14 = vsel %vm3280_vm3, %v5028_v33, %v5032_v59 }
 0x359   : > { %17581 = vst [vmem:[#allocation17_spill] sm:$0xff] %v14507_v22  ;;  %v1907_v18 = vpop.f32.mrf.mxu1 }
 0x35a   : > { %v2316_v25 = vpop.f32.mrf.mxu2  ;;  %v4285_v41 = vpop.f32.mrf.mxu3 }
 0x35b   : > { %v2614_v6 = vadd.f32 %v2316_v25, %v1905_v36  ;;  %v5038_v36 = vshll.u32 %v12753_v11, 16 }
 0x35c   : > { %10309 = vmatmul.msk.bf16.gmra.mxu1 %vm829_vm2, %v14402_v31  ;;  %v3549_v31 = vshrl.u32 %v14424_v29, 16 }
 0x35d   : > { %v4583_v19 = vadd.f32 %v4285_v41, %v2614_v6  ;;  %v5773_v12 = vpop.f32.mrf.mxu0  ;;  %v17585_v41 = vld [vmem:[#allocation23_spill] sm:$0xff] }
 0x35e   : > { %v1908_v0 = vadd.f32 %v1907_v18, %v17585_v41  ;;  %v3551_v25 = vor.u32 %v3549_v31, %v3547_v42  ;;  %v5036_v18 = vor.u32 %v5034_v53, %v5032_v59  ;;  %v17588_v59 = vld [vmem:[#allocation26_spill] sm:$0xff] }
 0x35f   : > { %10398 = vmatmul.msk.bf16.gmra.mxu2 %vm829_vm2, %v14511_v47  ;;  %v14521_v58 = vadd.f32 %v5770_v32, %v4583_v19  ;;  %10483 = vmatmul.msk.bf16.gmra.mxu3 %vm829_vm2, %v14514_v50  ;;  %v3553_v32 = vshll.u32 %v14445_v46, 16  ;;  %v5040_v19 = vrot.slane %v5038_v36, 1  ;;  %v12755_v42 = vld [vmem:[%s13435_s24 + $0x12c] sm:$0xff]   ;;  %v3561_v36 = vshll.u32 %v14468_v61, 16  ;;  %v14554_v50 = vld [vmem:[%s13435_s24 + $0x138] sm:$0xff]  }
 0x360   : > { %10564 = vmatmul.msk.bf16.gmra.mxu0 %vm829_vm2, %v5033_v14 }
 0x361   : > { %17584 = vst [vmem:[#allocation128_spill] sm:$0xff] %v14521_v58  ;;  %v1909_v5 = vpop.f32.mrf.mxu1  ;;  %v3555_v6 = vrot.slane %v3553_v32, 1  ;;  %v3557_v32 = vshrl.u32 %v14445_v46, 16 }
 0x362   : > { %v2319_v21 = vpop.f32.mrf.mxu2  ;;  %v4288_v57 = vpop.f32.mrf.mxu3 }
 0x363   : > { %v2615_v37 = vadd.f32 %v2319_v21, %v1908_v0  ;;  %v14533_v21 = vld [vmem:[%s13435_s24 + $0x130] sm:$0xff]  }
 0x365   : > { %v4584_v30 = vadd.f32 %v4288_v57, %v2615_v37  ;;  %v5775_v2 = vpop.f32.mrf.mxu0  ;;  %v14536_v37 = vsel %vm3280_vm3, %v3551_v25, %v3555_v6  ;;  %v5041_v57 = vsel %vm3280_vm3, %v5036_v18, %v5040_v19  ;;  %v5042_v25 = vshrl.u32 %v12753_v11, 16 }
 0x366   : > { %17587 = vst [vmem:[#allocation129_spill] sm:$0xff] %v14536_v37  ;;  %v5046_v18 = vshll.u32 %v12755_v42, 16 }
 0x367   : > { %v14530_v33 = vadd.f32 %v5773_v12, %v4584_v30 }
 0x368   : > { %v5048_v58 = vrot.slane %v5046_v18, 1 }
 0x369   : > { %17586 = vst [vmem:[#allocation23_spill] sm:$0xff] %v14530_v33  ;;  %v1911_v0 = vpop.f32.mrf.mxu1 }
 0x36a   : > { %v2321_v14 = vpop.f32.mrf.mxu2  ;;  %v4290_v41 = vpop.f32.mrf.mxu3  ;;  %v1912_v52 = vadd.f32 %v1911_v0, %v17588_v59  ;;  %v3563_v0 = vrot.slane %v3561_v36, 1  ;;  %v5044_v59 = vor.u32 %v5042_v25, %v5040_v19  ;;  %v12757_v19 = vld [vmem:[%s13435_s24 + $0x134] sm:$0xff]   ;;  %v3565_v25 = vshrl.u32 %v14468_v61, 16 }
 0x36b   : > { %v3559_v41 = vor.u32 %v3557_v32, %v3555_v6 }
 0x36c   : > { %10310 = vmatmul.msk.bf16.gmra.mxu1 %vm829_vm2, %v14424_v29 }
 0x36d   : > { %v5777_v5 = vpop.f32.mrf.mxu0  ;;  %v14557_v11 = vsel %vm3280_vm3, %v3559_v41, %v3563_v0  ;;  %v5050_v41 = vshrl.u32 %v12755_v42, 16 }
 0x36f   : > { %10399 = vmatmul.msk.bf16.gmra.mxu2 %vm829_vm2, %v14533_v21  ;;  %10484 = vmatmul.msk.bf16.gmra.mxu3 %vm829_vm2, %v14536_v37 }
 0x370   : > { %10565 = vmatmul.msk.bf16.gmra.mxu0 %vm829_vm2, %v5041_v57  ;;  %v17590_v57 = vld [vmem:[#allocation29_spill] sm:$0xff] }
 0x371   : > { %v1913_v2 = vpop.f32.mrf.mxu1  ;;  %17591 = vst [vmem:[#allocation29_spill] sm:$0xff] %v14557_v11 }
 0x372   : > { %v2323_v12 = vpop.f32.mrf.mxu2  ;;  %v4292_v30 = vpop.f32.mrf.mxu3  ;;  %v1914_v33 = vadd.f32 %v1913_v2, %v17590_v57  ;;  %v5054_v57 = vshll.u32 %v12757_v19, 16 }
 0x373   : > { %v2616_v31 = vadd.f32 %v2323_v12, %v1912_v52 }
 0x375   : > { %v4585_v53 = vadd.f32 %v4292_v30, %v2616_v31  ;;  %v5779_v29 = vpop.f32.mrf.mxu0 }
 0x377   : > { %v14550_v14 = vadd.f32 %v5777_v5, %v4585_v53  ;;  %v5049_v5 = vsel %vm3280_vm3, %v5044_v59, %v5048_v58 }
 0x379   : > { %17589 = vst [vmem:[#allocation26_spill] sm:$0xff] %v14550_v14  ;;  %v1916_v37 = vpop.f32.mrf.mxu1 }
 0x37a   : > { %v2325_v52 = vpop.f32.mrf.mxu2  ;;  %v4294_v22 = vpop.f32.mrf.mxu3 }
 0x37b   : > { %v2617_v12 = vadd.f32 %v2325_v52, %v1914_v33  ;;  %v3567_v52 = vor.u32 %v3565_v25, %v3563_v0  ;;  %v3573_v25 = vshrl.u32 %v14488_v43, 16 }
 0x37c   : > { %10311 = vmatmul.msk.bf16.gmra.mxu1 %vm829_vm2, %v14445_v46 }
 0x37d   : > { %v4586_v31 = vadd.f32 %v4294_v22, %v2617_v12  ;;  %v5782_v30 = vpop.f32.mrf.mxu0  ;;  %v17593_v22 = vld [vmem:[#allocation32_spill] sm:$0xff]  ;;  %v17595_v12 = vld [vmem:[#allocation35_spill] sm:$0xff] }
 0x37e   : > { %v1917_v33 = vadd.f32 %v1916_v37, %v17593_v22  ;;  %v5056_v22 = vrot.slane %v5054_v57, 1 }
 0x37f   : > { %10400 = vmatmul.msk.bf16.gmra.mxu2 %vm829_vm2, %v14554_v50  ;;  %v14564_v6 = vadd.f32 %v5779_v29, %v4586_v31  ;;  %10485 = vmatmul.msk.bf16.gmra.mxu3 %vm829_vm2, %v14557_v11  ;;  %v3569_v29 = vshll.u32 %v14488_v43, 16  ;;  %v14577_v11 = vld [vmem:[%s13435_s24 + $0x140] sm:$0xff]  }
 0x380   : > { %10566 = vmatmul.msk.bf16.gmra.mxu0 %vm829_vm2, %v5049_v5  ;;  %v5052_v5 = vor.u32 %v5050_v41, %v5048_v58 }
 0x381   : > { %17592 = vst [vmem:[#allocation130_spill] sm:$0xff] %v14564_v6  ;;  %v1918_v36 = vpop.f32.mrf.mxu1  ;;  %v3571_v37 = vrot.slane %v3569_v29, 1  ;;  %v5058_v29 = vshrl.u32 %v12757_v19, 16 }
 0x382   : > { %v2328_v2 = vpop.f32.mrf.mxu2  ;;  %v4297_v53 = vpop.f32.mrf.mxu3  ;;  %v1919_v31 = vadd.f32 %v1918_v36, %v17595_v12 }
 0x383   : > { %v2618_v32 = vadd.f32 %v2328_v2, %v1917_v33  ;;  %v14580_v42 = vsel %vm3280_vm3, %v3567_v52, %v3571_v37  ;;  %v3575_v57 = vor.u32 %v3573_v25, %v3571_v37  ;;  %v12761_v25 = vld [vmem:[%s13435_s24 + $0x144] sm:$0xff]  }
 0x384   : > { %17596 = vst [vmem:[#allocation35_spill] sm:$0xff] %v14580_v42 }
 0x385   : > { %v4587_v46 = vadd.f32 %v4297_v53, %v2618_v32  ;;  %v5784_v18 = vpop.f32.mrf.mxu0 }
 0x387   : > { %v14573_v59 = vadd.f32 %v5782_v30, %v4587_v46  ;;  %v5057_v30 = vsel %vm3280_vm3, %v5052_v5, %v5056_v22 }
 0x389   : > { %17594 = vst [vmem:[#allocation32_spill] sm:$0xff] %v14573_v59  ;;  %v1921_v14 = vpop.f32.mrf.mxu1 }
 0x38a   : > { %v2330_v33 = vpop.f32.mrf.mxu2  ;;  %v4299_v6 = vpop.f32.mrf.mxu3  ;;  %v12759_v14 = vld [vmem:[%s13435_s24 + $0x13c] sm:$0xff]  }
 0x38b   : > { %v2619_v2 = vadd.f32 %v2330_v33, %v1919_v31  ;;  %v5062_v41 = vshll.u32 %v12759_v14, 16  ;;  %v5060_v31 = vor.u32 %v5058_v29, %v5056_v22  ;;  %v17601_v22 = vld [vmem:[#allocation41_spill] sm:$0xff] }
 0x38c   : > { %10312 = vmatmul.msk.bf16.gmra.mxu1 %vm829_vm2, %v14468_v61  ;;  %v3577_v61 = vshll.u32 %v14511_v47, 16 }
 0x38d   : > { %v4588_v32 = vadd.f32 %v4299_v6, %v2619_v2  ;;  %v5787_v53 = vpop.f32.mrf.mxu0  ;;  %v5064_v5 = vrot.slane %v5062_v41, 1 }
 0x38e   : > { %v3579_v12 = vrot.slane %v3577_v61, 1 }
 0x38f   : > { %10401 = vmatmul.msk.bf16.gmra.mxu2 %vm829_vm2, %v14577_v11  ;;  %v14587_v58 = vadd.f32 %v5784_v18, %v4588_v32  ;;  %10486 = vmatmul.msk.bf16.gmra.mxu3 %vm829_vm2, %v14580_v42  ;;  %v17598_v18 = vld [vmem:[#allocation38_spill] sm:$0xff]  ;;  %v5065_v19 = vsel %vm3280_vm3, %v5060_v31, %v5064_v5  ;;  %v5066_v31 = vshrl.u32 %v12759_v14, 16  ;;  %v14620_v42 = vld [vmem:[%s13435_s24 + $0x150] sm:$0xff]  }
 0x390   : > { %10567 = vmatmul.msk.bf16.gmra.mxu0 %vm829_vm2, %v5057_v30  ;;  %v14597_v30 = vld [vmem:[%s13435_s24 + $0x148] sm:$0xff]  }
 0x391   : > { %17597 = vst [vmem:[#allocation131_spill] sm:$0xff] %v14587_v58  ;;  %v1922_v36 = vpop.f32.mrf.mxu1  ;;  %v14600_v58 = vsel %vm3280_vm3, %v3575_v57, %v3579_v12 }
 0x392   : > { %v2333_v0 = vpop.f32.mrf.mxu2  ;;  %v4302_v6 = vpop.f32.mrf.mxu3  ;;  %v1923_v52 = vadd.f32 %v1922_v36, %v17598_v18  ;;  %17599 = vst [vmem:[#allocation38_spill] sm:$0xff] %v14600_v58  ;;  %v3581_v18 = vshrl.u32 %v14511_v47, 16 }
 0x395   : > { %v5788_v46 = vpop.f32.mrf.mxu0 }
 0x399   : > { %v1925_v53 = vpop.f32.mrf.mxu1 }
 0x39a   : > { %v2334_v33 = vpop.f32.mrf.mxu2  ;;  %v4303_v32 = vpop.f32.mrf.mxu3  ;;  %v1926_v36 = vadd.f32 %v1925_v53, %v17601_v22  ;;  %v5068_v22 = vor.u32 %v5066_v31, %v5064_v5 }
 0x39b   : > { %v2620_v2 = vadd.f32 %v2334_v33, %v1923_v52  ;;  %v5070_v33 = vshll.u32 %v12761_v25, 16 }
 0x39c   : > { %10313 = vmatmul.msk.bf16.gmra.mxu1 %vm829_vm2, %v14488_v43 }
 0x39d   : > { %v4589_v0 = vadd.f32 %v4303_v32, %v2620_v2  ;;  %v5791_v6 = vpop.f32.mrf.mxu0  ;;  %v3583_v32 = vor.u32 %v3581_v18, %v3579_v12 }
 0x39f   : > { %10402 = vmatmul.msk.bf16.gmra.mxu2 %vm829_vm2, %v14597_v30  ;;  %v14607_v37 = vadd.f32 %v5788_v46, %v4589_v0  ;;  %10487 = vmatmul.msk.bf16.gmra.mxu3 %vm829_vm2, %v14600_v58  ;;  %v3585_v46 = vshll.u32 %v14533_v21, 16  ;;  %v17603_v0 = vld [vmem:[#allocation44_spill] sm:$0xff] }
 0x3a0   : > { %10568 = vmatmul.msk.bf16.gmra.mxu0 %vm829_vm2, %v5065_v19 }
 0x3a1   : > { %17600 = vst [vmem:[#allocation132_spill] sm:$0xff] %v14607_v37  ;;  %v1927_v57 = vpop.f32.mrf.mxu1  ;;  %v3587_v53 = vrot.slane %v3585_v46, 1  ;;  %v5072_v37 = vrot.slane %v5070_v33, 1 }
 0x3a2   : > { %v2337_v61 = vpop.f32.mrf.mxu2  ;;  %v4306_v41 = vpop.f32.mrf.mxu3  ;;  %v1928_v19 = vadd.f32 %v1927_v57, %v17603_v0  ;;  %v12763_v57 = vld [vmem:[%s13435_s24 + $0x14c] sm:$0xff]   ;;  %v5074_v0 = vshrl.u32 %v12761_v25, 16 }
 0x3a3   : > { %v2621_v29 = vadd.f32 %v2337_v61, %v1926_v36  ;;  %v14623_v14 = vsel %vm3280_vm3, %v3583_v32, %v3587_v53 }
 0x3a4   : > { %17604 = vst [vmem:[#allocation44_spill] sm:$0xff] %v14623_v14 }
 0x3a5   : > { %v4590_v43 = vadd.f32 %v4306_v41, %v2621_v29  ;;  %v5793_v52 = vpop.f32.mrf.mxu0 }
 0x3a7   : > { %v14616_v2 = vadd.f32 %v5791_v6, %v4590_v43  ;;  %v5073_v6 = vsel %vm3280_vm3, %v5068_v22, %v5072_v37 }
 0x3a9   : > { %17602 = vst [vmem:[#allocation41_spill] sm:$0xff] %v14616_v2  ;;  %v1930_v58 = vpop.f32.mrf.mxu1 }
 0x3aa   : > { %v2339_v36 = vpop.f32.mrf.mxu2  ;;  %v4308_v59 = vpop.f32.mrf.mxu3 }
 0x3ab   : > { %v2622_v61 = vadd.f32 %v2339_v36, %v1928_v19  ;;  %v5078_v19 = vshll.u32 %v12763_v57, 16 }
 0x3ac   : > { %10314 = vmatmul.msk.bf16.gmra.mxu1 %vm829_vm2, %v14511_v47  ;;  %v3589_v47 = vshrl.u32 %v14533_v21, 16 }
 0x3ad   : > { %v4591_v29 = vadd.f32 %v4308_v59, %v2622_v61  ;;  %v5796_v41 = vpop.f32.mrf.mxu0  ;;  %v17606_v59 = vld [vmem:[#allocation47_spill] sm:$0xff] }
 0x3ae   : > { %v1931_v5 = vadd.f32 %v1930_v58, %v17606_v59  ;;  %v3591_v36 = vor.u32 %v3589_v47, %v3587_v53  ;;  %v5076_v58 = vor.u32 %v5074_v0, %v5072_v37  ;;  %v17609_v37 = vld [vmem:[#allocation50_spill] sm:$0xff]  ;;  %v12765_v53 = vld [vmem:[%s13435_s24 + $0x154] sm:$0xff]  }
 0x3af   : > { %10403 = vmatmul.msk.bf16.gmra.mxu2 %vm829_vm2, %v14620_v42  ;;  %v14630_v12 = vadd.f32 %v5793_v52, %v4591_v29  ;;  %10488 = vmatmul.msk.bf16.gmra.mxu3 %vm829_vm2, %v14623_v14  ;;  %v3593_v52 = vshll.u32 %v14554_v50, 16  ;;  %v5080_v29 = vrot.slane %v5078_v19, 1  ;;  %v3601_v19 = vshll.u32 %v14577_v11, 16  ;;  %v14663_v14 = vld [vmem:[%s13435_s24 + $0x160] sm:$0xff]  }
 0x3b0   : > { %10569 = vmatmul.msk.bf16.gmra.mxu0 %vm829_vm2, %v5073_v6 }
 0x3b1   : > { %17605 = vst [vmem:[#allocation133_spill] sm:$0xff] %v14630_v12  ;;  %v1932_v31 = vpop.f32.mrf.mxu1  ;;  %v3595_v61 = vrot.slane %v3593_v52, 1  ;;  %v3597_v52 = vshrl.u32 %v14554_v50, 16 }
 0x3b2   : > { %v2342_v18 = vpop.f32.mrf.mxu2  ;;  %v4311_v46 = vpop.f32.mrf.mxu3 }
 0x3b3   : > { %v2623_v43 = vadd.f32 %v2342_v18, %v1931_v5  ;;  %v14642_v18 = vld [vmem:[%s13435_s24 + $0x158] sm:$0xff]  }
 0x3b5   : > { %v4592_v33 = vadd.f32 %v4311_v46, %v2623_v43  ;;  %v5798_v32 = vpop.f32.mrf.mxu0  ;;  %v14645_v43 = vsel %vm3280_vm3, %v3591_v36, %v3595_v61  ;;  %v5081_v46 = vsel %vm3280_vm3, %v5076_v58, %v5080_v29  ;;  %v5082_v36 = vshrl.u32 %v12763_v57, 16 }
 0x3b6   : > { %17608 = vst [vmem:[#allocation134_spill] sm:$0xff] %v14645_v43  ;;  %v5086_v58 = vshll.u32 %v12765_v53, 16 }
 0x3b7   : > { %v14639_v22 = vadd.f32 %v5796_v41, %v4592_v33 }
 0x3b8   : > { %v5088_v12 = vrot.slane %v5086_v58, 1 }
 0x3b9   : > { %17607 = vst [vmem:[#allocation47_spill] sm:$0xff] %v14639_v22  ;;  %v1934_v5 = vpop.f32.mrf.mxu1 }
 0x3ba   : > { %v2344_v6 = vpop.f32.mrf.mxu2  ;;  %v4313_v59 = vpop.f32.mrf.mxu3  ;;  %v1935_v25 = vadd.f32 %v1934_v5, %v17609_v37  ;;  %v3603_v5 = vrot.slane %v3601_v19, 1  ;;  %v5084_v37 = vor.u32 %v5082_v36, %v5080_v29  ;;  %v12767_v29 = vld [vmem:[%s13435_s24 + $0x15c] sm:$0xff]   ;;  %v3605_v36 = vshrl.u32 %v14577_v11, 16 }
 0x3bb   : > { %v3599_v59 = vor.u32 %v3597_v52, %v3595_v61 }
 0x3bc   : > { %10315 = vmatmul.msk.bf16.gmra.mxu1 %vm829_vm2, %v14533_v21 }
 0x3bd   : > { %v5800_v31 = vpop.f32.mrf.mxu0  ;;  %v14666_v57 = vsel %vm3280_vm3, %v3599_v59, %v3603_v5  ;;  %v5090_v59 = vshrl.u32 %v12765_v53, 16 }
 0x3bf   : > { %10404 = vmatmul.msk.bf16.gmra.mxu2 %vm829_vm2, %v14642_v18  ;;  %10489 = vmatmul.msk.bf16.gmra.mxu3 %vm829_vm2, %v14645_v43 }
 0x3c0   : > { %10570 = vmatmul.msk.bf16.gmra.mxu0 %vm829_vm2, %v5081_v46  ;;  %v17611_v46 = vld [vmem:[#allocation53_spill] sm:$0xff] }
 0x3c1   : > { %v1936_v32 = vpop.f32.mrf.mxu1  ;;  %17612 = vst [vmem:[#allocation53_spill] sm:$0xff] %v14666_v57 }
 0x3c2   : > { %v2346_v41 = vpop.f32.mrf.mxu2  ;;  %v4315_v33 = vpop.f32.mrf.mxu3  ;;  %v1937_v22 = vadd.f32 %v1936_v32, %v17611_v46  ;;  %v5094_v46 = vshll.u32 %v12767_v29, 16 }
 0x3c3   : > { %v2624_v47 = vadd.f32 %v2346_v41, %v1935_v25 }
 0x3c5   : > { %v4593_v0 = vadd.f32 %v4315_v33, %v2624_v47  ;;  %v5802_v21 = vpop.f32.mrf.mxu0 }
 0x3c7   : > { %v14659_v6 = vadd.f32 %v5800_v31, %v4593_v0  ;;  %v5089_v31 = vsel %vm3280_vm3, %v5084_v37, %v5088_v12 }
 0x3c9   : > { %17610 = vst [vmem:[#allocation50_spill] sm:$0xff] %v14659_v6  ;;  %v1939_v43 = vpop.f32.mrf.mxu1 }
 0x3ca   : > { %v2348_v25 = vpop.f32.mrf.mxu2  ;;  %v4317_v2 = vpop.f32.mrf.mxu3 }
 0x3cb   : > { %v2625_v41 = vadd.f32 %v2348_v25, %v1937_v22  ;;  %v3607_v25 = vor.u32 %v3605_v36, %v3603_v5  ;;  %v3613_v36 = vshrl.u32 %v14597_v30, 16 }
 0x3cc   : > { %10316 = vmatmul.msk.bf16.gmra.mxu1 %vm829_vm2, %v14554_v50 }
 0x3cd   : > { %v4594_v47 = vadd.f32 %v4317_v2, %v2625_v41  ;;  %v5805_v33 = vpop.f32.mrf.mxu0  ;;  %v17614_v2 = vld [vmem:[#allocation56_spill] sm:$0xff]  ;;  %v17616_v41 = vld [vmem:[#allocation59_spill] sm:$0xff] }
 0x3ce   : > { %v1940_v22 = vadd.f32 %v1939_v43, %v17614_v2  ;;  %v5096_v2 = vrot.slane %v5094_v46, 1 }
 0x3cf   : > { %10405 = vmatmul.msk.bf16.gmra.mxu2 %vm829_vm2, %v14663_v14  ;;  %v14673_v61 = vadd.f32 %v5802_v21, %v4594_v47  ;;  %10490 = vmatmul.msk.bf16.gmra.mxu3 %vm829_vm2, %v14666_v57  ;;  %v3609_v21 = vshll.u32 %v14597_v30, 16  ;;  %v14686_v57 = vld [vmem:[%s13435_s24 + $0x168] sm:$0xff]  }
 0x3d0   : > { %10571 = vmatmul.msk.bf16.gmra.mxu0 %vm829_vm2, %v5089_v31  ;;  %v5092_v31 = vor.u32 %v5090_v59, %v5088_v12 }
 0x3d1   : > { %17613 = vst [vmem:[#allocation135_spill] sm:$0xff] %v14673_v61  ;;  %v1941_v19 = vpop.f32.mrf.mxu1  ;;  %v3611_v43 = vrot.slane %v3609_v21, 1  ;;  %v5098_v21 = vshrl.u32 %v12767_v29, 16 }
 0x3d2   : > { %v2351_v32 = vpop.f32.mrf.mxu2  ;;  %v4320_v0 = vpop.f32.mrf.mxu3  ;;  %v1942_v47 = vadd.f32 %v1941_v19, %v17616_v41 }
 0x3d3   : > { %v2626_v52 = vadd.f32 %v2351_v32, %v1940_v22  ;;  %v14689_v53 = vsel %vm3280_vm3, %v3607_v25, %v3611_v43  ;;  %v3615_v46 = vor.u32 %v3613_v36, %v3611_v43  ;;  %v12771_v36 = vld [vmem:[%s13435_s24 + $0x16c] sm:$0xff]  }
 0x3d4   : > { %17617 = vst [vmem:[#allocation59_spill] sm:$0xff] %v14689_v53 }
 0x3d5   : > { %v4595_v50 = vadd.f32 %v4320_v0, %v2626_v52  ;;  %v5807_v58 = vpop.f32.mrf.mxu0 }
 0x3d7   : > { %v14682_v37 = vadd.f32 %v5805_v33, %v4595_v50  ;;  %v5097_v33 = vsel %vm3280_vm3, %v5092_v31, %v5096_v2 }
 0x3d9   : > { %17615 = vst [vmem:[#allocation56_spill] sm:$0xff] %v14682_v37  ;;  %v1944_v6 = vpop.f32.mrf.mxu1 }
 0x3da   : > { %v2353_v22 = vpop.f32.mrf.mxu2  ;;  %v4322_v61 = vpop.f32.mrf.mxu3  ;;  %v12769_v6 = vld [vmem:[%s13435_s24 + $0x164] sm:$0xff]  }
 0x3db   : > { %v2627_v32 = vadd.f32 %v2353_v22, %v1942_v47  ;;  %v5102_v59 = vshll.u32 %v12769_v6, 16  ;;  %v5100_v47 = vor.u32 %v5098_v21, %v5096_v2  ;;  %v17622_v2 = vld [vmem:[#allocation65_spill] sm:$0xff] }
 0x3dc   : > { %10317 = vmatmul.msk.bf16.gmra.mxu1 %vm829_vm2, %v14577_v11  ;;  %v3617_v11 = vshll.u32 %v14620_v42, 16 }
 0x3dd   : > { %v4596_v52 = vadd.f32 %v4322_v61, %v2627_v32  ;;  %v5810_v0 = vpop.f32.mrf.mxu0  ;;  %v5104_v31 = vrot.slane %v5102_v59, 1 }
 0x3de   : > { %v3619_v41 = vrot.slane %v3617_v11, 1 }
 0x3df   : > { %10406 = vmatmul.msk.bf16.gmra.mxu2 %vm829_vm2, %v14686_v57  ;;  %v14696_v12 = vadd.f32 %v5807_v58, %v4596_v52  ;;  %10491 = vmatmul.msk.bf16.gmra.mxu3 %vm829_vm2, %v14689_v53  ;;  %v17619_v58 = vld [vmem:[#allocation62_spill] sm:$0xff]  ;;  %v5105_v29 = vsel %vm3280_vm3, %v5100_v47, %v5104_v31  ;;  %v5106_v47 = vshrl.u32 %v12769_v6, 16  ;;  %v14729_v53 = vld [vmem:[%s13435_s24 + $0x178] sm:$0xff]  }
 0x3e0   : > { %10572 = vmatmul.msk.bf16.gmra.mxu0 %vm829_vm2, %v5097_v33  ;;  %v14706_v33 = vld [vmem:[%s13435_s24 + $0x170] sm:$0xff]  }
 0x3e1   : > { %17618 = vst [vmem:[#allocation136_spill] sm:$0xff] %v14696_v12  ;;  %v1945_v19 = vpop.f32.mrf.mxu1  ;;  %v14709_v12 = vsel %vm3280_vm3, %v3615_v46, %v3619_v41 }
 0x3e2   : > { %v2356_v5 = vpop.f32.mrf.mxu2  ;;  %v4325_v61 = vpop.f32.mrf.mxu3  ;;  %v1946_v25 = vadd.f32 %v1945_v19, %v17619_v58  ;;  %17620 = vst [vmem:[#allocation62_spill] sm:$0xff] %v14709_v12  ;;  %v3621_v58 = vshrl.u32 %v14620_v42, 16 }
 0x3e5   : > { %v5811_v50 = vpop.f32.mrf.mxu0 }
 0x3e9   : > { %v1948_v0 = vpop.f32.mrf.mxu1 }
 0x3ea   : > { %v2357_v22 = vpop.f32.mrf.mxu2  ;;  %v4326_v52 = vpop.f32.mrf.mxu3  ;;  %v1949_v19 = vadd.f32 %v1948_v0, %v17622_v2  ;;  %v5108_v2 = vor.u32 %v5106_v47, %v5104_v31 }
 0x3eb   : > { %v2628_v32 = vadd.f32 %v2357_v22, %v1946_v25  ;;  %v5110_v22 = vshll.u32 %v12771_v36, 16 }
 0x3ec   : > { %10318 = vmatmul.msk.bf16.gmra.mxu1 %vm829_vm2, %v14597_v30 }
 0x3ed   : > { %v4597_v5 = vadd.f32 %v4326_v52, %v2628_v32  ;;  %v5814_v61 = vpop.f32.mrf.mxu0  ;;  %v3623_v52 = vor.u32 %v3621_v58, %v3619_v41 }
 0x3ef   : > { %10407 = vmatmul.msk.bf16.gmra.mxu2 %vm829_vm2, %v14706_v33  ;;  %v14716_v43 = vadd.f32 %v5811_v50, %v4597_v5  ;;  %10492 = vmatmul.msk.bf16.gmra.mxu3 %vm829_vm2, %v14709_v12  ;;  %v3625_v50 = vshll.u32 %v14642_v18, 16  ;;  %v17624_v5 = vld [vmem:[#allocation68_spill] sm:$0xff] }
 0x3f0   : > { %10573 = vmatmul.msk.bf16.gmra.mxu0 %vm829_vm2, %v5105_v29 }
 0x3f1   : > { %17621 = vst [vmem:[#allocation137_spill] sm:$0xff] %v14716_v43  ;;  %v1950_v46 = vpop.f32.mrf.mxu1  ;;  %v3627_v0 = vrot.slane %v3625_v50, 1  ;;  %v5112_v43 = vrot.slane %v5110_v22, 1 }
 0x3f2   : > { %v2360_v11 = vpop.f32.mrf.mxu2  ;;  %v4329_v59 = vpop.f32.mrf.mxu3  ;;  %v1951_v29 = vadd.f32 %v1950_v46, %v17624_v5  ;;  %v12773_v46 = vld [vmem:[%s13435_s24 + $0x174] sm:$0xff]   ;;  %v5114_v5 = vshrl.u32 %v12771_v36, 16 }
 0x3f3   : > { %v2629_v21 = vadd.f32 %v2360_v11, %v1949_v19  ;;  %v14732_v6 = vsel %vm3280_vm3, %v3623_v52, %v3627_v0 }
 0x3f4   : > { %17625 = vst [vmem:[#allocation68_spill] sm:$0xff] %v14732_v6 }
 0x3f5   : > { %v4598_v30 = vadd.f32 %v4329_v59, %v2629_v21  ;;  %v5816_v25 = vpop.f32.mrf.mxu0 }
 0x3f7   : > { %v14725_v32 = vadd.f32 %v5814_v61, %v4598_v30  ;;  %v5113_v61 = vsel %vm3280_vm3, %v5108_v2, %v5112_v43 }
 0x3f9   : > { %17623 = vst [vmem:[#allocation65_spill] sm:$0xff] %v14725_v32  ;;  %v1953_v12 = vpop.f32.mrf.mxu1 }
 0x3fa   : > { %v2362_v19 = vpop.f32.mrf.mxu2  ;;  %v4331_v37 = vpop.f32.mrf.mxu3 }
 0x3fb   : > { %v2630_v11 = vadd.f32 %v2362_v19, %v1951_v29  ;;  %v5118_v29 = vshll.u32 %v12773_v46, 16 }
 0x3fc   : > { %10319 = vmatmul.msk.bf16.gmra.mxu1 %vm829_vm2, %v14620_v42  ;;  %v3629_v42 = vshrl.u32 %v14642_v18, 16 }
 0x3fd   : > { %v4599_v21 = vadd.f32 %v4331_v37, %v2630_v11  ;;  %v5819_v59 = vpop.f32.mrf.mxu0  ;;  %v17627_v37 = vld [vmem:[#allocation71_spill] sm:$0xff] }
 0x3fe   : > { %v1954_v31 = vadd.f32 %v1953_v12, %v17627_v37  ;;  %v3631_v19 = vor.u32 %v3629_v42, %v3627_v0  ;;  %v5116_v12 = vor.u32 %v5114_v5, %v5112_v43  ;;  %v17630_v43 = vld [vmem:[#allocation74_spill] sm:$0xff]  ;;  %v12775_v0 = vld [vmem:[%s13435_s24 + $0x17c] sm:$0xff]  }
 0x3ff   : > { %10408 = vmatmul.msk.bf16.gmra.mxu2 %vm829_vm2, %v14729_v53  ;;  %v14739_v41 = vadd.f32 %v5816_v25, %v4599_v21  ;;  %10493 = vmatmul.msk.bf16.gmra.mxu3 %vm829_vm2, %v14732_v6  ;;  %v3633_v25 = vshll.u32 %v14663_v14, 16  ;;  %v5120_v21 = vrot.slane %v5118_v29, 1  ;;  %v3641_v29 = vshll.u32 %v14686_v57, 16  ;;  %v14772_v6 = vld [vmem:[%s13435_s24 + $0x188] sm:$0xff]  }
 0x400   : > { %10574 = vmatmul.msk.bf16.gmra.mxu0 %vm829_vm2, %v5113_v61 }
 0x401   : > { %17626 = vst [vmem:[#allocation138_spill] sm:$0xff] %v14739_v41  ;;  %v1955_v47 = vpop.f32.mrf.mxu1  ;;  %v3635_v11 = vrot.slane %v3633_v25, 1  ;;  %v3637_v25 = vshrl.u32 %v14663_v14, 16 }
 0x402   : > { %v2365_v58 = vpop.f32.mrf.mxu2  ;;  %v4334_v50 = vpop.f32.mrf.mxu3 }
 0x403   : > { %v2631_v30 = vadd.f32 %v2365_v58, %v1954_v31  ;;  %v14751_v58 = vld [vmem:[%s13435_s24 + $0x180] sm:$0xff]  }
 0x405   : > { %v4600_v22 = vadd.f32 %v4334_v50, %v2631_v30  ;;  %v5821_v52 = vpop.f32.mrf.mxu0  ;;  %v14754_v30 = vsel %vm3280_vm3, %v3631_v19, %v3635_v11  ;;  %v5121_v50 = vsel %vm3280_vm3, %v5116_v12, %v5120_v21  ;;  %v5122_v19 = vshrl.u32 %v12773_v46, 16 }
 0x406   : > { %17629 = vst [vmem:[#allocation139_spill] sm:$0xff] %v14754_v30  ;;  %v5126_v12 = vshll.u32 %v12775_v0, 16 }
 0x407   : > { %v14748_v2 = vadd.f32 %v5819_v59, %v4600_v22 }
 0x408   : > { %v5128_v41 = vrot.slane %v5126_v12, 1 }
 0x409   : > { %17628 = vst [vmem:[#allocation71_spill] sm:$0xff] %v14748_v2  ;;  %v1957_v31 = vpop.f32.mrf.mxu1 }
 0x40a   : > { %v2367_v61 = vpop.f32.mrf.mxu2  ;;  %v4336_v37 = vpop.f32.mrf.mxu3  ;;  %v1958_v36 = vadd.f32 %v1957_v31, %v17630_v43  ;;  %v3643_v31 = vrot.slane %v3641_v29, 1  ;;  %v5124_v43 = vor.u32 %v5122_v19, %v5120_v21  ;;  %v12777_v21 = vld [vmem:[%s13435_s24 + $0x184] sm:$0xff]   ;;  %v3645_v19 = vshrl.u32 %v14686_v57, 16 }
 0x40b   : > { %v3639_v37 = vor.u32 %v3637_v25, %v3635_v11 }
 0x40c   : > { %10320 = vmatmul.msk.bf16.gmra.mxu1 %vm829_vm2, %v14642_v18 }
 0x40d   : > { %v5823_v47 = vpop.f32.mrf.mxu0  ;;  %v14775_v46 = vsel %vm3280_vm3, %v3639_v37, %v3643_v31  ;;  %v5130_v37 = vshrl.u32 %v12775_v0, 16 }
 0x40f   : > { %10409 = vmatmul.msk.bf16.gmra.mxu2 %vm829_vm2, %v14751_v58  ;;  %10494 = vmatmul.msk.bf16.gmra.mxu3 %vm829_vm2, %v14754_v30 }
 0x410   : > { %10575 = vmatmul.msk.bf16.gmra.mxu0 %vm829_vm2, %v5121_v50  ;;  %v17632_v50 = vld [vmem:[#allocation77_spill] sm:$0xff] }
 0x411   : > { %v1959_v52 = vpop.f32.mrf.mxu1  ;;  %17633 = vst [vmem:[#allocation77_spill] sm:$0xff] %v14775_v46 }
 0x412   : > { %v2369_v59 = vpop.f32.mrf.mxu2  ;;  %v4338_v22 = vpop.f32.mrf.mxu3  ;;  %v1960_v2 = vadd.f32 %v1959_v52, %v17632_v50  ;;  %v5134_v50 = vshll.u32 %v12777_v21, 16 }
 0x413   : > { %v2632_v42 = vadd.f32 %v2369_v59, %v1958_v36 }
 0x415   : > { %v4601_v5 = vadd.f32 %v4338_v22, %v2632_v42  ;;  %v5825_v18 = vpop.f32.mrf.mxu0 }
 0x417   : > { %v14768_v61 = vadd.f32 %v5823_v47, %v4601_v5  ;;  %v5129_v47 = vsel %vm3280_vm3, %v5124_v43, %v5128_v41 }
 0x419   : > { %17631 = vst [vmem:[#allocation74_spill] sm:$0xff] %v14768_v61  ;;  %v1962_v30 = vpop.f32.mrf.mxu1 }
 0x41a   : > { %v2371_v36 = vpop.f32.mrf.mxu2  ;;  %v4340_v32 = vpop.f32.mrf.mxu3 }
 0x41b   : > { %v2633_v59 = vadd.f32 %v2371_v36, %v1960_v2  ;;  %v3647_v36 = vor.u32 %v3645_v19, %v3643_v31  ;;  %v3653_v19 = vshrl.u32 %v14706_v33, 16 }
 0x41c   : > { %10321 = vmatmul.msk.bf16.gmra.mxu1 %vm829_vm2, %v14663_v14 }
 0x41d   : > { %v4602_v42 = vadd.f32 %v4340_v32, %v2633_v59  ;;  %v5828_v22 = vpop.f32.mrf.mxu0  ;;  %v17635_v32 = vld [vmem:[#allocation80_spill] sm:$0xff]  ;;  %v17637_v59 = vld [vmem:[#allocation83_spill] sm:$0xff] }
 0x41e   : > { %v1963_v2 = vadd.f32 %v1962_v30, %v17635_v32  ;;  %v5136_v32 = vrot.slane %v5134_v50, 1 }
 0x41f   : > { %10410 = vmatmul.msk.bf16.gmra.mxu2 %vm829_vm2, %v14772_v6  ;;  %v14782_v11 = vadd.f32 %v5825_v18, %v4602_v42  ;;  %10495 = vmatmul.msk.bf16.gmra.mxu3 %vm829_vm2, %v14775_v46  ;;  %v3649_v18 = vshll.u32 %v14706_v33, 16  ;;  %v14795_v46 = vld [vmem:[%s13435_s24 + $0x190] sm:$0xff]  }
 0x420   : > { %10576 = vmatmul.msk.bf16.gmra.mxu0 %vm829_vm2, %v5129_v47  ;;  %v5132_v47 = vor.u32 %v5130_v37, %v5128_v41 }
 0x421   : > { %17634 = vst [vmem:[#allocation140_spill] sm:$0xff] %v14782_v11  ;;  %v1964_v29 = vpop.f32.mrf.mxu1  ;;  %v3651_v30 = vrot.slane %v3649_v18, 1  ;;  %v5138_v18 = vshrl.u32 %v12777_v21, 16 }
 0x422   : > { %v2374_v52 = vpop.f32.mrf.mxu2  ;;  %v4343_v5 = vpop.f32.mrf.mxu3  ;;  %v1965_v42 = vadd.f32 %v1964_v29, %v17637_v59 }
 0x423   : > { %v2634_v25 = vadd.f32 %v2374_v52, %v1963_v2  ;;  %v14798_v0 = vsel %vm3280_vm3, %v3647_v36, %v3651_v30  ;;  %v3655_v50 = vor.u32 %v3653_v19, %v3651_v30  ;;  %v12781_v19 = vld [vmem:[%s13435_s24 + $0x194] sm:$0xff]  }
 0x424   : > { %17638 = vst [vmem:[#allocation83_spill] sm:$0xff] %v14798_v0 }
 0x425   : > { %v4603_v14 = vadd.f32 %v4343_v5, %v2634_v25  ;;  %v5830_v12 = vpop.f32.mrf.mxu0 }
 0x427   : > { %v14791_v43 = vadd.f32 %v5828_v22, %v4603_v14  ;;  %v5137_v22 = vsel %vm3280_vm3, %v5132_v47, %v5136_v32 }
 0x429   : > { %17636 = vst [vmem:[#allocation80_spill] sm:$0xff] %v14791_v43  ;;  %v1967_v61 = vpop.f32.mrf.mxu1 }
 0x42a   : > { %v2376_v2 = vpop.f32.mrf.mxu2  ;;  %v4345_v11 = vpop.f32.mrf.mxu3  ;;  %v12779_v61 = vld [vmem:[%s13435_s24 + $0x18c] sm:$0xff]  }
 0x42b   : > { %v2635_v52 = vadd.f32 %v2376_v2, %v1965_v42  ;;  %v5142_v37 = vshll.u32 %v12779_v61, 16  ;;  %v5140_v42 = vor.u32 %v5138_v18, %v5136_v32  ;;  %v17643_v32 = vld [vmem:[#allocation90_spill] sm:$0xff] }
 0x42c   : > { %10322 = vmatmul.msk.bf16.gmra.mxu1 %vm829_vm2, %v14686_v57  ;;  %v3657_v57 = vshll.u32 %v14729_v53, 16 }
 0x42d   : > { %v4604_v25 = vadd.f32 %v4345_v11, %v2635_v52  ;;  %v5833_v5 = vpop.f32.mrf.mxu0  ;;  %v5144_v47 = vrot.slane %v5142_v37, 1 }
 0x42e   : > { %v3659_v59 = vrot.slane %v3657_v57, 1 }
 0x42f   : > { %10411 = vmatmul.msk.bf16.gmra.mxu2 %vm829_vm2, %v14795_v46  ;;  %v14805_v41 = vadd.f32 %v5830_v12, %v4604_v25  ;;  %10496 = vmatmul.msk.bf16.gmra.mxu3 %vm829_vm2, %v14798_v0  ;;  %v17640_v12 = vld [vmem:[#allocation87_spill] sm:$0xff]  ;;  %v5145_v21 = vsel %vm3280_vm3, %v5140_v42, %v5144_v47  ;;  %v5146_v42 = vshrl.u32 %v12779_v61, 16  ;;  %v14838_v0 = vld [vmem:[%s13435_s24 + $0x1a0] sm:$0xff]  }
 0x430   : > { %10577 = vmatmul.msk.bf16.gmra.mxu0 %vm829_vm2, %v5137_v22  ;;  %v14815_v22 = vld [vmem:[%s13435_s24 + $0x198] sm:$0xff]  }
 0x431   : > { %17639 = vst [vmem:[#allocation141_spill] sm:$0xff] %v14805_v41  ;;  %v1968_v29 = vpop.f32.mrf.mxu1  ;;  %v14818_v41 = vsel %vm3280_vm3, %v3655_v50, %v3659_v59 }
 0x432   : > { %v2379_v31 = vpop.f32.mrf.mxu2  ;;  %v4348_v11 = vpop.f32.mrf.mxu3  ;;  %v1969_v36 = vadd.f32 %v1968_v29, %v17640_v12  ;;  %17641 = vst [vmem:[#allocation87_spill] sm:$0xff] %v14818_v41  ;;  %v3661_v12 = vshrl.u32 %v14729_v53, 16 }
 0x435   : > { %v5834_v14 = vpop.f32.mrf.mxu0 }
 0x439   : > { %v1971_v5 = vpop.f32.mrf.mxu1 }
 0x43a   : > { %v2380_v2 = vpop.f32.mrf.mxu2  ;;  %v4349_v25 = vpop.f32.mrf.mxu3  ;;  %v1972_v29 = vadd.f32 %v1971_v5, %v17643_v32  ;;  %v5148_v32 = vor.u32 %v5146_v42, %v5144_v47 }
 0x43b   : > { %v2636_v52 = vadd.f32 %v2380_v2, %v1969_v36  ;;  %v5150_v2 = vshll.u32 %v12781_v19, 16 }
 0x43c   : > { %10323 = vmatmul.msk.bf16.gmra.mxu1 %vm829_vm2, %v14706_v33 }
 0x43d   : > { %v4605_v31 = vadd.f32 %v4349_v25, %v2636_v52  ;;  %v5837_v11 = vpop.f32.mrf.mxu0  ;;  %v3663_v25 = vor.u32 %v3661_v12, %v3659_v59 }
 0x43f   : > { %10412 = vmatmul.msk.bf16.gmra.mxu2 %vm829_vm2, %v14815_v22  ;;  %v14825_v30 = vadd.f32 %v5834_v14, %v4605_v31  ;;  %10497 = vmatmul.msk.bf16.gmra.mxu3 %vm829_vm2, %v14818_v41  ;;  %v3665_v14 = vshll.u32 %v14751_v58, 16  ;;  %v17645_v31 = vld [vmem:[#allocation94_spill] sm:$0xff] }
 0x440   : > { %10578 = vmatmul.msk.bf16.gmra.mxu0 %vm829_vm2, %v5145_v21 }
 0x441   : > { %17642 = vst [vmem:[#allocation142_spill] sm:$0xff] %v14825_v30  ;;  %v1973_v50 = vpop.f32.mrf.mxu1  ;;  %v3667_v5 = vrot.slane %v3665_v14, 1  ;;  %v5152_v30 = vrot.slane %v5150_v2, 1 }
 0x442   : > { %v2383_v57 = vpop.f32.mrf.mxu2  ;;  %v4352_v37 = vpop.f32.mrf.mxu3  ;;  %v1974_v21 = vadd.f32 %v1973_v50, %v17645_v31  ;;  %v12783_v50 = vld [vmem:[%s13435_s24 + $0x19c] sm:$0xff]   ;;  %v5154_v31 = vshrl.u32 %v12781_v19, 16 }
 0x443   : > { %v2637_v18 = vadd.f32 %v2383_v57, %v1972_v29  ;;  %v14841_v61 = vsel %vm3280_vm3, %v3663_v25, %v3667_v5 }
 0x444   : > { %17646 = vst [vmem:[#allocation94_spill] sm:$0xff] %v14841_v61 }
 0x445   : > { %v4606_v33 = vadd.f32 %v4352_v37, %v2637_v18  ;;  %v5839_v36 = vpop.f32.mrf.mxu0 }
 0x447   : > { %v14834_v52 = vadd.f32 %v5837_v11, %v4606_v33  ;;  %v5153_v11 = vsel %vm3280_vm3, %v5148_v32, %v5152_v30 }
 0x449   : > { %17644 = vst [vmem:[#allocation90_spill] sm:$0xff] %v14834_v52  ;;  %v1976_v41 = vpop.f32.mrf.mxu1 }
 0x44a   : > { %v2385_v29 = vpop.f32.mrf.mxu2  ;;  %v4354_v43 = vpop.f32.mrf.mxu3 }
 0x44b   : > { %v2638_v57 = vadd.f32 %v2385_v29, %v1974_v21  ;;  %v5158_v21 = vshll.u32 %v12783_v50, 16 }
 0x44c   : > { %10324 = vmatmul.msk.bf16.gmra.mxu1 %vm829_vm2, %v14729_v53  ;;  %v3669_v53 = vshrl.u32 %v14751_v58, 16 }
 0x44d   : > { %v4607_v18 = vadd.f32 %v4354_v43, %v2638_v57  ;;  %v5842_v37 = vpop.f32.mrf.mxu0  ;;  %v17648_v43 = vld [vmem:[#allocation97_spill] sm:$0xff] }
 0x44e   : > { %v1977_v47 = vadd.f32 %v1976_v41, %v17648_v43  ;;  %v3671_v29 = vor.u32 %v3669_v53, %v3667_v5  ;;  %v5156_v41 = vor.u32 %v5154_v31, %v5152_v30  ;;  %v17651_v30 = vld [vmem:[#allocation5_spill] sm:$0xff] }
 0x44f   : > { %10413 = vmatmul.msk.bf16.gmra.mxu2 %vm829_vm2, %v14838_v0  ;;  %v14848_v59 = vadd.f32 %v5839_v36, %v4607_v18  ;;  %10498 = vmatmul.msk.bf16.gmra.mxu3 %vm829_vm2, %v14841_v61  ;;  %v3673_v36 = vshll.u32 %v14772_v6, 16  ;;  %v5160_v18 = vrot.slane %v5158_v21, 1  ;;  %v12785_v5 = vld [vmem:[%s13435_s24 + $0x1a4] sm:$0xff]   ;;  %v3681_v21 = vshll.u32 %v14795_v46, 16  ;;  %v14881_v61 = vld [vmem:[%s13435_s24 + $0x1b0] sm:$0xff]  }
 0x450   : > { %10579 = vmatmul.msk.bf16.gmra.mxu0 %vm829_vm2, %v5153_v11 }
 0x451   : > { %17647 = vst [vmem:[#allocation143_spill] sm:$0xff] %v14848_v59  ;;  %v1978_v42 = vpop.f32.mrf.mxu1  ;;  %v3675_v57 = vrot.slane %v3673_v36, 1  ;;  %v3677_v36 = vshrl.u32 %v14772_v6, 16 }
 0x452   : > { %v2388_v12 = vpop.f32.mrf.mxu2  ;;  %v4357_v14 = vpop.f32.mrf.mxu3 }
 0x453   : > { %v2639_v33 = vadd.f32 %v2388_v12, %v1977_v47  ;;  %v14860_v12 = vld [vmem:[%s13435_s24 + $0x1a8] sm:$0xff]  }
 0x455   : > { %v4608_v2 = vadd.f32 %v4357_v14, %v2639_v33  ;;  %v5844_v25 = vpop.f32.mrf.mxu0  ;;  %v14863_v33 = vsel %vm3280_vm3, %v3671_v29, %v3675_v57  ;;  %v5161_v14 = vsel %vm3280_vm3, %v5156_v41, %v5160_v18  ;;  %v5162_v29 = vshrl.u32 %v12783_v50, 16 }
 0x456   : > { %17650 = vst [vmem:[#allocation144_spill] sm:$0xff] %v14863_v33  ;;  %v5166_v41 = vshll.u32 %v12785_v5, 16 }
 0x457   : > { %v14857_v32 = vadd.f32 %v5842_v37, %v4608_v2 }
 0x458   : > { %v5168_v59 = vrot.slane %v5166_v41, 1 }
 0x459   : > { %17649 = vst [vmem:[#allocation97_spill] sm:$0xff] %v14857_v32  ;;  %v1980_v47 = vpop.f32.mrf.mxu1 }
 0x45a   : > { %v2390_v11 = vpop.f32.mrf.mxu2  ;;  %v4359_v43 = vpop.f32.mrf.mxu3  ;;  %v1981_v19 = vadd.f32 %v1980_v47, %v17651_v30  ;;  %v3683_v47 = vrot.slane %v3681_v21, 1  ;;  %v5164_v30 = vor.u32 %v5162_v29, %v5160_v18  ;;  %v12787_v18 = vld [vmem:[%s13435_s24 + $0x1ac] sm:$0xff]   ;;  %v3685_v29 = vshrl.u32 %v14795_v46, 16 }
 0x45b   : > { %v3679_v43 = vor.u32 %v3677_v36, %v3675_v57 }
 0x45c   : > { %10325 = vmatmul.msk.bf16.gmra.mxu1 %vm829_vm2, %v14751_v58 }
 0x45d   : > { %v5846_v42 = vpop.f32.mrf.mxu0  ;;  %v14884_v50 = vsel %vm3280_vm3, %v3679_v43, %v3683_v47  ;;  %v5170_v43 = vshrl.u32 %v12785_v5, 16 }
 0x45f   : > { %10414 = vmatmul.msk.bf16.gmra.mxu2 %vm829_vm2, %v14860_v12  ;;  %10499 = vmatmul.msk.bf16.gmra.mxu3 %vm829_vm2, %v14863_v33 }
 0x460   : > { %10580 = vmatmul.msk.bf16.gmra.mxu0 %vm829_vm2, %v5161_v14  ;;  %v17653_v14 = vld [vmem:[#allocation7_spill] sm:$0xff] }
 0x461   : > { %v1982_v25 = vpop.f32.mrf.mxu1  ;;  %17654 = vst [vmem:[#allocation7_spill] sm:$0xff] %v14884_v50 }
 0x462   : > { %v2392_v37 = vpop.f32.mrf.mxu2  ;;  %v4361_v2 = vpop.f32.mrf.mxu3  ;;  %v1983_v32 = vadd.f32 %v1982_v25, %v17653_v14  ;;  %v5174_v14 = vshll.u32 %v12787_v18, 16 }
 0x463   : > { %v2640_v53 = vadd.f32 %v2392_v37, %v1981_v19 }
 0x465   : > { %v4609_v31 = vadd.f32 %v4361_v2, %v2640_v53  ;;  %v5848_v58 = vpop.f32.mrf.mxu0 }
 0x467   : > { %v14877_v11 = vadd.f32 %v5846_v42, %v4609_v31  ;;  %v5169_v42 = vsel %vm3280_vm3, %v5164_v30, %v5168_v59 }
 0x469   : > { %17652 = vst [vmem:[#allocation5_spill] sm:$0xff] %v14877_v11  ;;  %v1985_v33 = vpop.f32.mrf.mxu1 }
 0x46a   : > { %v2394_v19 = vpop.f32.mrf.mxu2  ;;  %v4363_v52 = vpop.f32.mrf.mxu3 }
 0x46b   : > { %v2641_v37 = vadd.f32 %v2394_v19, %v1983_v32  ;;  %v3687_v19 = vor.u32 %v3685_v29, %v3683_v47  ;;  %v3693_v29 = vshrl.u32 %v14815_v22, 16 }
 0x46c   : > { %10326 = vmatmul.msk.bf16.gmra.mxu1 %vm829_vm2, %v14772_v6 }
 0x46d   : > { %v4610_v53 = vadd.f32 %v4363_v52, %v2641_v37  ;;  %v5851_v2 = vpop.f32.mrf.mxu0  ;;  %v17656_v52 = vld [vmem:[#allocation9_spill] sm:$0xff]  ;;  %v17658_v37 = vld [vmem:[#allocation12_spill] sm:$0xff] }
 0x46e   : > { %v1986_v32 = vadd.f32 %v1985_v33, %v17656_v52  ;;  %v5176_v52 = vrot.slane %v5174_v14, 1 }
 0x46f   : > { %10415 = vmatmul.msk.bf16.gmra.mxu2 %vm829_vm2, %v14881_v61  ;;  %v14891_v57 = vadd.f32 %v5848_v58, %v4610_v53  ;;  %10500 = vmatmul.msk.bf16.gmra.mxu3 %vm829_vm2, %v14884_v50  ;;  %v3689_v58 = vshll.u32 %v14815_v22, 16  ;;  %v14904_v50 = vld [vmem:[%s13435_s24 + $0x1b8] sm:$0xff]  }
 0x470   : > { %10581 = vmatmul.msk.bf16.gmra.mxu0 %vm829_vm2, %v5169_v42  ;;  %v5172_v42 = vor.u32 %v5170_v43, %v5168_v59 }
 0x471   : > { %17655 = vst [vmem:[#allocation145_spill] sm:$0xff] %v14891_v57  ;;  %v1987_v21 = vpop.f32.mrf.mxu1  ;;  %v3691_v33 = vrot.slane %v3689_v58, 1  ;;  %v5178_v58 = vshrl.u32 %v12787_v18, 16 }
 0x472   : > { %v2397_v25 = vpop.f32.mrf.mxu2  ;;  %v4366_v31 = vpop.f32.mrf.mxu3  ;;  %v1988_v53 = vadd.f32 %v1987_v21, %v17658_v37 }
 0x473   : > { %v2642_v36 = vadd.f32 %v2397_v25, %v1986_v32  ;;  %v14907_v5 = vsel %vm3280_vm3, %v3687_v19, %v3691_v33  ;;  %v3695_v14 = vor.u32 %v3693_v29, %v3691_v33  ;;  %v12791_v29 = vld [vmem:[%s13435_s24 + $0x1bc] sm:$0xff]  }
 0x474   : > { %17659 = vst [vmem:[#allocation12_spill] sm:$0xff] %v14907_v5 }
 0x475   : > { %v4611_v6 = vadd.f32 %v4366_v31, %v2642_v36  ;;  %v5853_v41 = vpop.f32.mrf.mxu0 }
 0x477   : > { %v14900_v30 = vadd.f32 %v5851_v2, %v4611_v6  ;;  %v5177_v2 = vsel %vm3280_vm3, %v5172_v42, %v5176_v52 }
 0x479   : > { %17657 = vst [vmem:[#allocation9_spill] sm:$0xff] %v14900_v30  ;;  %v1990_v11 = vpop.f32.mrf.mxu1 }
 0x47a   : > { %v2399_v32 = vpop.f32.mrf.mxu2  ;;  %v4368_v57 = vpop.f32.mrf.mxu3  ;;  %v12789_v11 = vld [vmem:[%s13435_s24 + $0x1b4] sm:$0xff]  }
 0x47b   : > { %v2643_v25 = vadd.f32 %v2399_v32, %v1988_v53  ;;  %v5182_v43 = vshll.u32 %v12789_v11, 16  ;;  %v5180_v53 = vor.u32 %v5178_v58, %v5176_v52  ;;  %v17664_v52 = vld [vmem:[#allocation18_spill] sm:$0xff] }
 0x47c   : > { %10327 = vmatmul.msk.bf16.gmra.mxu1 %vm829_vm2, %v14795_v46  ;;  %v3697_v46 = vshll.u32 %v14838_v0, 16 }
 0x47d   : > { %v4612_v36 = vadd.f32 %v4368_v57, %v2643_v25  ;;  %v5856_v31 = vpop.f32.mrf.mxu0  ;;  %v5184_v42 = vrot.slane %v5182_v43, 1 }
 0x47e   : > { %v3699_v37 = vrot.slane %v3697_v46, 1 }
 0x47f   : > { %10416 = vmatmul.msk.bf16.gmra.mxu2 %vm829_vm2, %v14904_v50  ;;  %v14914_v59 = vadd.f32 %v5853_v41, %v4612_v36  ;;  %10501 = vmatmul.msk.bf16.gmra.mxu3 %vm829_vm2, %v14907_v5  ;;  %v17661_v41 = vld [vmem:[#allocation15_spill] sm:$0xff]  ;;  %v5185_v18 = vsel %vm3280_vm3, %v5180_v53, %v5184_v42  ;;  %v5186_v53 = vshrl.u32 %v12789_v11, 16  ;;  %v14947_v5 = vld [vmem:[%s13435_s24 + $0x1c8] sm:$0xff]  }
 0x480   : > { %10582 = vmatmul.msk.bf16.gmra.mxu0 %vm829_vm2, %v5177_v2  ;;  %v14924_v2 = vld [vmem:[%s13435_s24 + $0x1c0] sm:$0xff]  }
 0x481   : > { %17660 = vst [vmem:[#allocation146_spill] sm:$0xff] %v14914_v59  ;;  %v1991_v21 = vpop.f32.mrf.mxu1  ;;  %v14927_v59 = vsel %vm3280_vm3, %v3695_v14, %v3699_v37 }
 0x482   : > { %v2402_v47 = vpop.f32.mrf.mxu2  ;;  %v4371_v57 = vpop.f32.mrf.mxu3  ;;  %v1992_v19 = vadd.f32 %v1991_v21, %v17661_v41  ;;  %17662 = vst [vmem:[#allocation15_spill] sm:$0xff] %v14927_v59  ;;  %v3701_v41 = vshrl.u32 %v14838_v0, 16 }
 0x485   : > { %v5857_v6 = vpop.f32.mrf.mxu0 }
 0x489   : > { %v1994_v31 = vpop.f32.mrf.mxu1 }
 0x48a   : > { %v2403_v32 = vpop.f32.mrf.mxu2  ;;  %v4372_v36 = vpop.f32.mrf.mxu3  ;;  %v1995_v21 = vadd.f32 %v1994_v31, %v17664_v52  ;;  %v5188_v52 = vor.u32 %v5186_v53, %v5184_v42 }
 0x48b   : > { %v2644_v25 = vadd.f32 %v2403_v32, %v1992_v19  ;;  %v5190_v32 = vshll.u32 %v12791_v29, 16 }
 0x48c   : > { %10328 = vmatmul.msk.bf16.gmra.mxu1 %vm829_vm2, %v14815_v22 }
 0x48d   : > { %v4613_v47 = vadd.f32 %v4372_v36, %v2644_v25  ;;  %v5860_v57 = vpop.f32.mrf.mxu0  ;;  %v3703_v36 = vor.u32 %v3701_v41, %v3699_v37 }
 0x48f   : > { %10417 = vmatmul.msk.bf16.gmra.mxu2 %vm829_vm2, %v14924_v2  ;;  %v14934_v33 = vadd.f32 %v5857_v6, %v4613_v47  ;;  %10502 = vmatmul.msk.bf16.gmra.mxu3 %vm829_vm2, %v14927_v59  ;;  %v3705_v6 = vshll.u32 %v14860_v12, 16  ;;  %v17666_v47 = vld [vmem:[#allocation21_spill] sm:$0xff] }
 0x490   : > { %10583 = vmatmul.msk.bf16.gmra.mxu0 %vm829_vm2, %v5185_v18 }
 0x491   : > { %17663 = vst [vmem:[#allocation147_spill] sm:$0xff] %v14934_v33  ;;  %v1996_v14 = vpop.f32.mrf.mxu1  ;;  %v3707_v31 = vrot.slane %v3705_v6, 1  ;;  %v5192_v33 = vrot.slane %v5190_v32, 1 }
 0x492   : > { %v2406_v46 = vpop.f32.mrf.mxu2  ;;  %v4375_v43 = vpop.f32.mrf.mxu3  ;;  %v1997_v18 = vadd.f32 %v1996_v14, %v17666_v47  ;;  %v12793_v14 = vld [vmem:[%s13435_s24 + $0x1c4] sm:$0xff]   ;;  %v5194_v47 = vshrl.u32 %v12791_v29, 16 }
 0x493   : > { %v2645_v58 = vadd.f32 %v2406_v46, %v1995_v21  ;;  %v14950_v11 = vsel %vm3280_vm3, %v3703_v36, %v3707_v31 }
 0x494   : > { %17667 = vst [vmem:[#allocation21_spill] sm:$0xff] %v14950_v11 }
 0x495   : > { %v4614_v22 = vadd.f32 %v4375_v43, %v2645_v58  ;;  %v5862_v19 = vpop.f32.mrf.mxu0 }
 0x497   : > { %v14943_v25 = vadd.f32 %v5860_v57, %v4614_v22  ;;  %v5193_v57 = vsel %vm3280_vm3, %v5188_v52, %v5192_v33 }
 0x499   : > { %17665 = vst [vmem:[#allocation18_spill] sm:$0xff] %v14943_v25  ;;  %v1999_v59 = vpop.f32.mrf.mxu1 }
 0x49a   : > { %v2408_v21 = vpop.f32.mrf.mxu2  ;;  %v4377_v30 = vpop.f32.mrf.mxu3 }
 0x49b   : > { %v2646_v46 = vadd.f32 %v2408_v21, %v1997_v18  ;;  %v5198_v18 = vshll.u32 %v12793_v14, 16 }
 0x49c   : > { %10329 = vmatmul.msk.bf16.gmra.mxu1 %vm829_vm2, %v14838_v0  ;;  %v3709_v0 = vshrl.u32 %v14860_v12, 16 }
 0x49d   : > { %v4615_v58 = vadd.f32 %v4377_v30, %v2646_v46  ;;  %v5865_v43 = vpop.f32.mrf.mxu0  ;;  %v17669_v30 = vld [vmem:[#allocation24_spill] sm:$0xff] }
 0x49e   : > { %v2000_v42 = vadd.f32 %v1999_v59, %v17669_v30  ;;  %v3711_v21 = vor.u32 %v3709_v0, %v3707_v31  ;;  %v5196_v59 = vor.u32 %v5194_v47, %v5192_v33  ;;  %v17672_v33 = vld [vmem:[#allocation27_spill] sm:$0xff] }
 0x49f   : > { %10418 = vmatmul.msk.bf16.gmra.mxu2 %vm829_vm2, %v14947_v5  ;;  %v14957_v37 = vadd.f32 %v5862_v19, %v4615_v58  ;;  %10503 = vmatmul.msk.bf16.gmra.mxu3 %vm829_vm2, %v14950_v11  ;;  %v3713_v19 = vshll.u32 %v14881_v61, 16  ;;  %v5200_v58 = vrot.slane %v5198_v18, 1  ;;  %v12795_v31 = vld [vmem:[%s13435_s24 + $0x1cc] sm:$0xff]   ;;  %v3721_v18 = vshll.u32 %v14904_v50, 16  ;;  %v14990_v11 = vld [vmem:[%s13435_s24 + $0x1d8] sm:$0xff]  }
 0x4a0   : > { %10584 = vmatmul.msk.bf16.gmra.mxu0 %vm829_vm2, %v5193_v57 }
 0x4a1   : > { %17668 = vst [vmem:[#allocation148_spill] sm:$0xff] %v14957_v37  ;;  %v2001_v53 = vpop.f32.mrf.mxu1  ;;  %v3715_v46 = vrot.slane %v3713_v19, 1  ;;  %v3717_v19 = vshrl.u32 %v14881_v61, 16 }
 0x4a2   : > { %v2411_v41 = vpop.f32.mrf.mxu2  ;;  %v4380_v6 = vpop.f32.mrf.mxu3 }
 0x4a3   : > { %v2647_v22 = vadd.f32 %v2411_v41, %v2000_v42  ;;  %v14969_v41 = vld [vmem:[%s13435_s24 + $0x1d0] sm:$0xff]  }
 0x4a5   : > { %v4616_v32 = vadd.f32 %v4380_v6, %v2647_v22  ;;  %v5867_v36 = vpop.f32.mrf.mxu0  ;;  %v14972_v22 = vsel %vm3280_vm3, %v3711_v21, %v3715_v46  ;;  %v5201_v6 = vsel %vm3280_vm3, %v5196_v59, %v5200_v58  ;;  %v5202_v21 = vshrl.u32 %v12793_v14, 16 }
 0x4a6   : > { %17671 = vst [vmem:[#allocation149_spill] sm:$0xff] %v14972_v22  ;;  %v5206_v59 = vshll.u32 %v12795_v31, 16 }
 0x4a7   : > { %v14966_v52 = vadd.f32 %v5865_v43, %v4616_v32 }
 0x4a8   : > { %v5208_v37 = vrot.slane %v5206_v59, 1 }
 0x4a9   : > { %17670 = vst [vmem:[#allocation24_spill] sm:$0xff] %v14966_v52  ;;  %v2003_v42 = vpop.f32.mrf.mxu1 }
 0x4aa   : > { %v2413_v57 = vpop.f32.mrf.mxu2  ;;  %v4382_v30 = vpop.f32.mrf.mxu3  ;;  %v2004_v29 = vadd.f32 %v2003_v42, %v17672_v33  ;;  %v3723_v42 = vrot.slane %v3721_v18, 1  ;;  %v5204_v33 = vor.u32 %v5202_v21, %v5200_v58  ;;  %v12797_v58 = vld [vmem:[%s13435_s24 + $0x1d4] sm:$0xff]   ;;  %v3725_v21 = vshrl.u32 %v14904_v50, 16 }
 0x4ab   : > { %v3719_v30 = vor.u32 %v3717_v19, %v3715_v46 }
 0x4ac   : > { %10330 = vmatmul.msk.bf16.gmra.mxu1 %vm829_vm2, %v14860_v12 }
 0x4ad   : > { %v5869_v53 = vpop.f32.mrf.mxu0  ;;  %v14993_v14 = vsel %vm3280_vm3, %v3719_v30, %v3723_v42  ;;  %v5210_v30 = vshrl.u32 %v12795_v31, 16 }
 0x4af   : > { %10419 = vmatmul.msk.bf16.gmra.mxu2 %vm829_vm2, %v14969_v41  ;;  %10504 = vmatmul.msk.bf16.gmra.mxu3 %vm829_vm2, %v14972_v22 }
 0x4b0   : > { %10585 = vmatmul.msk.bf16.gmra.mxu0 %vm829_vm2, %v5201_v6  ;;  %v17674_v6 = vld [vmem:[#allocation30_spill] sm:$0xff] }
 0x4b1   : > { %v2005_v36 = vpop.f32.mrf.mxu1  ;;  %17675 = vst [vmem:[#allocation30_spill] sm:$0xff] %v14993_v14 }
 0x4b2   : > { %v2415_v43 = vpop.f32.mrf.mxu2  ;;  %v4384_v32 = vpop.f32.mrf.mxu3  ;;  %v2006_v52 = vadd.f32 %v2005_v36, %v17674_v6  ;;  %v5214_v6 = vshll.u32 %v12797_v58, 16 }
 0x4b3   : > { %v2648_v0 = vadd.f32 %v2415_v43, %v2004_v29 }
 0x4b5   : > { %v4617_v47 = vadd.f32 %v4384_v32, %v2648_v0  ;;  %v5871_v12 = vpop.f32.mrf.mxu0 }
 0x4b7   : > { %v14986_v57 = vadd.f32 %v5869_v53, %v4617_v47  ;;  %v5209_v53 = vsel %vm3280_vm3, %v5204_v33, %v5208_v37 }
 0x4b9   : > { %17673 = vst [vmem:[#allocation27_spill] sm:$0xff] %v14986_v57  ;;  %v2008_v22 = vpop.f32.mrf.mxu1 }
 0x4ba   : > { %v2417_v29 = vpop.f32.mrf.mxu2  ;;  %v4386_v25 = vpop.f32.mrf.mxu3 }
 0x4bb   : > { %v2649_v43 = vadd.f32 %v2417_v29, %v2006_v52  ;;  %v3727_v29 = vor.u32 %v3725_v21, %v3723_v42  ;;  %v3733_v21 = vshrl.u32 %v14924_v2, 16 }
 0x4bc   : > { %10331 = vmatmul.msk.bf16.gmra.mxu1 %vm829_vm2, %v14881_v61 }
 0x4bd   : > { %v4618_v0 = vadd.f32 %v4386_v25, %v2649_v43  ;;  %v5874_v32 = vpop.f32.mrf.mxu0  ;;  %v17677_v25 = vld [vmem:[#allocation33_spill] sm:$0xff]  ;;  %v17679_v43 = vld [vmem:[#allocation36_spill] sm:$0xff] }
 0x4be   : > { %v2009_v52 = vadd.f32 %v2008_v22, %v17677_v25  ;;  %v5216_v25 = vrot.slane %v5214_v6, 1 }
 0x4bf   : > { %10420 = vmatmul.msk.bf16.gmra.mxu2 %vm829_vm2, %v14990_v11  ;;  %v15000_v46 = vadd.f32 %v5871_v12, %v4618_v0  ;;  %10505 = vmatmul.msk.bf16.gmra.mxu3 %vm829_vm2, %v14993_v14  ;;  %v3729_v12 = vshll.u32 %v14924_v2, 16  ;;  %v15013_v14 = vld [vmem:[%s13435_s24 + $0x1e0] sm:$0xff]  }
 0x4c0   : > { %10586 = vmatmul.msk.bf16.gmra.mxu0 %vm829_vm2, %v5209_v53  ;;  %v5212_v53 = vor.u32 %v5210_v30, %v5208_v37 }
 0x4c1   : > { %17676 = vst [vmem:[#allocation150_spill] sm:$0xff] %v15000_v46  ;;  %v2010_v18 = vpop.f32.mrf.mxu1  ;;  %v3731_v22 = vrot.slane %v3729_v12, 1  ;;  %v5218_v12 = vshrl.u32 %v12797_v58, 16 }
 0x4c2   : > { %v2420_v36 = vpop.f32.mrf.mxu2  ;;  %v4389_v47 = vpop.f32.mrf.mxu3  ;;  %v2011_v0 = vadd.f32 %v2010_v18, %v17679_v43 }
 0x4c3   : > { %v2650_v19 = vadd.f32 %v2420_v36, %v2009_v52  ;;  %v15016_v31 = vsel %vm3280_vm3, %v3727_v29, %v3731_v22  ;;  %v3735_v6 = vor.u32 %v3733_v21, %v3731_v22  ;;  %v12801_v21 = vld [vmem:[%s13435_s24 + $0x1e4] sm:$0xff]  }
 0x4c4   : > { %17680 = vst [vmem:[#allocation36_spill] sm:$0xff] %v15016_v31 }
 0x4c5   : > { %v4619_v61 = vadd.f32 %v4389_v47, %v2650_v19  ;;  %v5876_v59 = vpop.f32.mrf.mxu0 }
 0x4c7   : > { %v15009_v33 = vadd.f32 %v5874_v32, %v4619_v61  ;;  %v5217_v32 = vsel %vm3280_vm3, %v5212_v53, %v5216_v25 }
 0x4c9   : > { %17678 = vst [vmem:[#allocation33_spill] sm:$0xff] %v15009_v33  ;;  %v2013_v57 = vpop.f32.mrf.mxu1 }
 0x4ca   : > { %v2422_v52 = vpop.f32.mrf.mxu2  ;;  %v4391_v46 = vpop.f32.mrf.mxu3  ;;  %v12799_v57 = vld [vmem:[%s13435_s24 + $0x1dc] sm:$0xff]  }
 0x4cb   : > { %v2651_v36 = vadd.f32 %v2422_v52, %v2011_v0  ;;  %v5222_v30 = vshll.u32 %v12799_v57, 16  ;;  %v5220_v0 = vor.u32 %v5218_v12, %v5216_v25  ;;  %v17685_v25 = vld [vmem:[#allocation42_spill] sm:$0xff] }
 0x4cc   : > { %10332 = vmatmul.msk.bf16.gmra.mxu1 %vm829_vm2, %v14904_v50  ;;  %v3737_v50 = vshll.u32 %v14947_v5, 16 }
 0x4cd   : > { %v4620_v19 = vadd.f32 %v4391_v46, %v2651_v36  ;;  %v5879_v47 = vpop.f32.mrf.mxu0  ;;  %v5224_v53 = vrot.slane %v5222_v30, 1 }
 0x4ce   : > { %v3739_v43 = vrot.slane %v3737_v50, 1 }
 0x4cf   : > { %10421 = vmatmul.msk.bf16.gmra.mxu2 %vm829_vm2, %v15013_v14  ;;  %v15023_v37 = vadd.f32 %v5876_v59, %v4620_v19  ;;  %10506 = vmatmul.msk.bf16.gmra.mxu3 %vm829_vm2, %v15016_v31  ;;  %v17682_v59 = vld [vmem:[#allocation39_spill] sm:$0xff]  ;;  %v5225_v58 = vsel %vm3280_vm3, %v5220_v0, %v5224_v53  ;;  %v5226_v0 = vshrl.u32 %v12799_v57, 16 }
 0x4d0   : > { %10587 = vmatmul.msk.bf16.gmra.mxu0 %vm829_vm2, %v5217_v32  ;;  %v15033_v32 = vld [vmem:[%s13435_s24 + $0x1e8] sm:$0xff]   ;;  %v15056_v31 = vld [vmem:[%s13435_s24 + $0x1f0] sm:$0xff]  }
 0x4d1   : > { %17681 = vst [vmem:[#allocation151_spill] sm:$0xff] %v15023_v37  ;;  %v2014_v18 = vpop.f32.mrf.mxu1  ;;  %v15036_v37 = vsel %vm3280_vm3, %v3735_v6, %v3739_v43 }
 0x4d2   : > { %v2425_v42 = vpop.f32.mrf.mxu2  ;;  %v4394_v46 = vpop.f32.mrf.mxu3  ;;  %v2015_v29 = vadd.f32 %v2014_v18, %v17682_v59  ;;  %17683 = vst [vmem:[#allocation39_spill] sm:$0xff] %v15036_v37  ;;  %v3741_v59 = vshrl.u32 %v14947_v5, 16 }
 0x4d5   : > { %v5880_v61 = vpop.f32.mrf.mxu0 }
 0x4d9   : > { %v2017_v47 = vpop.f32.mrf.mxu1 }
 0x4da   : > { %v2426_v52 = vpop.f32.mrf.mxu2  ;;  %v4395_v19 = vpop.f32.mrf.mxu3  ;;  %v2018_v18 = vadd.f32 %v2017_v47, %v17685_v25  ;;  %v5228_v25 = vor.u32 %v5226_v0, %v5224_v53 }
 0x4db   : > { %v2652_v36 = vadd.f32 %v2426_v52, %v2015_v29  ;;  %v5230_v52 = vshll.u32 %v12801_v21, 16 }
 0x4dc   : > { %10333 = vmatmul.msk.bf16.gmra.mxu1 %vm829_vm2, %v14924_v2 }
 0x4dd   : > { %v4621_v42 = vadd.f32 %v4395_v19, %v2652_v36  ;;  %v5883_v46 = vpop.f32.mrf.mxu0  ;;  %v3743_v19 = vor.u32 %v3741_v59, %v3739_v43 }
 0x4df   : > { %10422 = vmatmul.msk.bf16.gmra.mxu2 %vm829_vm2, %v15033_v32  ;;  %v15043_v22 = vadd.f32 %v5880_v61, %v4621_v42  ;;  %10507 = vmatmul.msk.bf16.gmra.mxu3 %vm829_vm2, %v15036_v37  ;;  %v3745_v61 = vshll.u32 %v14969_v41, 16  ;;  %v17687_v42 = vld [vmem:[#allocation45_spill] sm:$0xff] }
 0x4e0   : > { %10588 = vmatmul.msk.bf16.gmra.mxu0 %vm829_vm2, %v5225_v58 }
 0x4e1   : > { %17684 = vst [vmem:[#allocation152_spill] sm:$0xff] %v15043_v22  ;;  %v2019_v6 = vpop.f32.mrf.mxu1  ;;  %v3747_v47 = vrot.slane %v3745_v61, 1  ;;  %v5232_v22 = vrot.slane %v5230_v52, 1 }
 0x4e2   : > { %v2429_v50 = vpop.f32.mrf.mxu2  ;;  %v4398_v30 = vpop.f32.mrf.mxu3  ;;  %v2020_v58 = vadd.f32 %v2019_v6, %v17687_v42  ;;  %v12803_v6 = vld [vmem:[%s13435_s24 + $0x1ec] sm:$0xff]   ;;  %v5234_v42 = vshrl.u32 %v12801_v21, 16 }
 0x4e3   : > { %v2653_v12 = vadd.f32 %v2429_v50, %v2018_v18  ;;  %v15059_v57 = vsel %vm3280_vm3, %v3743_v19, %v3747_v47 }
 0x4e4   : > { %17688 = vst [vmem:[#allocation45_spill] sm:$0xff] %v15059_v57 }
 0x4e5   : > { %v4622_v2 = vadd.f32 %v4398_v30, %v2653_v12  ;;  %v5885_v29 = vpop.f32.mrf.mxu0 }
 0x4e7   : > { %v15052_v36 = vadd.f32 %v5883_v46, %v4622_v2  ;;  %v5233_v46 = vsel %vm3280_vm3, %v5228_v25, %v5232_v22 }
 0x4e9   : > { %17686 = vst [vmem:[#allocation42_spill] sm:$0xff] %v15052_v36  ;;  %v2022_v37 = vpop.f32.mrf.mxu1 }
 0x4ea   : > { %v2431_v18 = vpop.f32.mrf.mxu2  ;;  %v4400_v33 = vpop.f32.mrf.mxu3 }
 0x4eb   : > { %v2654_v50 = vadd.f32 %v2431_v18, %v2020_v58  ;;  %v5238_v58 = vshll.u32 %v12803_v6, 16 }
 0x4ec   : > { %10334 = vmatmul.msk.bf16.gmra.mxu1 %vm829_vm2, %v14947_v5  ;;  %v3749_v5 = vshrl.u32 %v14969_v41, 16 }
 0x4ed   : > { %v4623_v12 = vadd.f32 %v4400_v33, %v2654_v50  ;;  %v5888_v30 = vpop.f32.mrf.mxu0  ;;  %v17690_v33 = vld [vmem:[#allocation48_spill] sm:$0xff] }
 0x4ee   : > { %v2023_v53 = vadd.f32 %v2022_v37, %v17690_v33  ;;  %v3751_v18 = vor.u32 %v3749_v5, %v3747_v47  ;;  %v5236_v37 = vor.u32 %v5234_v42, %v5232_v22  ;;  %v17693_v22 = vld [vmem:[#allocation51_spill] sm:$0xff] }
 0x4ef   : > { %10423 = vmatmul.msk.bf16.gmra.mxu2 %vm829_vm2, %v15056_v31  ;;  %v15066_v43 = vadd.f32 %v5885_v29, %v4623_v12  ;;  %10508 = vmatmul.msk.bf16.gmra.mxu3 %vm829_vm2, %v15059_v57  ;;  %v3753_v29 = vshll.u32 %v14990_v11, 16  ;;  %v5240_v12 = vrot.slane %v5238_v58, 1  ;;  %v12805_v47 = vld [vmem:[%s13435_s24 + $0x1f4] sm:$0xff]   ;;  %v3761_v58 = vshll.u32 %v15013_v14, 16  ;;  %v15099_v57 = vld [vmem:[%s13435_s24 + $0x200] sm:$0xff]  }
 0x4f0   : > { %10589 = vmatmul.msk.bf16.gmra.mxu0 %vm829_vm2, %v5233_v46 }
 0x4f1   : > { %17689 = vst [vmem:[#allocation153_spill] sm:$0xff] %v15066_v43  ;;  %v2024_v0 = vpop.f32.mrf.mxu1  ;;  %v3755_v50 = vrot.slane %v3753_v29, 1  ;;  %v3757_v29 = vshrl.u32 %v14990_v11, 16 }
 0x4f2   : > { %v2434_v59 = vpop.f32.mrf.mxu2  ;;  %v4403_v61 = vpop.f32.mrf.mxu3 }
 0x4f3   : > { %v2655_v2 = vadd.f32 %v2434_v59, %v2023_v53  ;;  %v15078_v59 = vld [vmem:[%s13435_s24 + $0x1f8] sm:$0xff]  }
 0x4f5   : > { %v4624_v52 = vadd.f32 %v4403_v61, %v2655_v2  ;;  %v5890_v19 = vpop.f32.mrf.mxu0  ;;  %v15081_v2 = vsel %vm3280_vm3, %v3751_v18, %v3755_v50  ;;  %v5241_v61 = vsel %vm3280_vm3, %v5236_v37, %v5240_v12  ;;  %v5242_v18 = vshrl.u32 %v12803_v6, 16 }
 0x4f6   : > { %17692 = vst [vmem:[#allocation154_spill] sm:$0xff] %v15081_v2  ;;  %v5246_v37 = vshll.u32 %v12805_v47, 16 }
 0x4f7   : > { %v15075_v25 = vadd.f32 %v5888_v30, %v4624_v52 }
 0x4f8   : > { %v5248_v43 = vrot.slane %v5246_v37, 1 }
 0x4f9   : > { %17691 = vst [vmem:[#allocation48_spill] sm:$0xff] %v15075_v25  ;;  %v2026_v53 = vpop.f32.mrf.mxu1 }
 0x4fa   : > { %v2436_v46 = vpop.f32.mrf.mxu2  ;;  %v4405_v33 = vpop.f32.mrf.mxu3  ;;  %v2027_v21 = vadd.f32 %v2026_v53, %v17693_v22  ;;  %v3763_v53 = vrot.slane %v3761_v58, 1  ;;  %v5244_v22 = vor.u32 %v5242_v18, %v5240_v12  ;;  %v12807_v12 = vld [vmem:[%s13435_s24 + $0x1fc] sm:$0xff]   ;;  %v3765_v18 = vshrl.u32 %v15013_v14, 16 }
 0x4fb   : > { %v3759_v33 = vor.u32 %v3757_v29, %v3755_v50 }
 0x4fc   : > { %10335 = vmatmul.msk.bf16.gmra.mxu1 %vm829_vm2, %v14969_v41 }
 0x4fd   : > { %v5892_v0 = vpop.f32.mrf.mxu0  ;;  %v15102_v6 = vsel %vm3280_vm3, %v3759_v33, %v3763_v53  ;;  %v5250_v33 = vshrl.u32 %v12805_v47, 16 }
 0x4ff   : > { %10424 = vmatmul.msk.bf16.gmra.mxu2 %vm829_vm2, %v15078_v59  ;;  %10509 = vmatmul.msk.bf16.gmra.mxu3 %vm829_vm2, %v15081_v2 }
 0x500   : > { %10590 = vmatmul.msk.bf16.gmra.mxu0 %vm829_vm2, %v5241_v61  ;;  %v17695_v61 = vld [vmem:[#allocation54_spill] sm:$0xff] }
 0x501   : > { %v2028_v19 = vpop.f32.mrf.mxu1  ;;  %17696 = vst [vmem:[#allocation54_spill] sm:$0xff] %v15102_v6 }
 0x502   : > { %v2438_v30 = vpop.f32.mrf.mxu2  ;;  %v4407_v52 = vpop.f32.mrf.mxu3  ;;  %v2029_v25 = vadd.f32 %v2028_v19, %v17695_v61  ;;  %v5254_v61 = vshll.u32 %v12807_v12, 16 }
 0x503   : > { %v2656_v5 = vadd.f32 %v2438_v30, %v2027_v21 }
 0x505   : > { %v4625_v42 = vadd.f32 %v4407_v52, %v2656_v5  ;;  %v5894_v41 = vpop.f32.mrf.mxu0 }
 0x507   : > { %v15095_v46 = vadd.f32 %v5892_v0, %v4625_v42  ;;  %v5249_v0 = vsel %vm3280_vm3, %v5244_v22, %v5248_v43 }
 0x509   : > { %17694 = vst [vmem:[#allocation51_spill] sm:$0xff] %v15095_v46  ;;  %v2031_v2 = vpop.f32.mrf.mxu1 }
 0x50a   : > { %v2440_v21 = vpop.f32.mrf.mxu2  ;;  %v4409_v36 = vpop.f32.mrf.mxu3 }
 0x50b   : > { %v2657_v30 = vadd.f32 %v2440_v21, %v2029_v25  ;;  %v3767_v21 = vor.u32 %v3765_v18, %v3763_v53  ;;  %v3773_v18 = vshrl.u32 %v15033_v32, 16 }
 0x50c   : > { %10336 = vmatmul.msk.bf16.gmra.mxu1 %vm829_vm2, %v14990_v11 }
 0x50d   : > { %v4626_v5 = vadd.f32 %v4409_v36, %v2657_v30  ;;  %v5897_v52 = vpop.f32.mrf.mxu0  ;;  %v17698_v36 = vld [vmem:[#allocation57_spill] sm:$0xff]  ;;  %v17700_v30 = vld [vmem:[#allocation60_spill] sm:$0xff] }
 0x50e   : > { %v2032_v25 = vadd.f32 %v2031_v2, %v17698_v36  ;;  %v5256_v36 = vrot.slane %v5254_v61, 1 }
 0x50f   : > { %10425 = vmatmul.msk.bf16.gmra.mxu2 %vm829_vm2, %v15099_v57  ;;  %v15109_v50 = vadd.f32 %v5894_v41, %v4626_v5  ;;  %10510 = vmatmul.msk.bf16.gmra.mxu3 %vm829_vm2, %v15102_v6  ;;  %v3769_v41 = vshll.u32 %v15033_v32, 16  ;;  %v15122_v6 = vld [vmem:[%s13435_s24 + $0x208] sm:$0xff]  }
 0x510   : > { %10591 = vmatmul.msk.bf16.gmra.mxu0 %vm829_vm2, %v5249_v0  ;;  %v5252_v0 = vor.u32 %v5250_v33, %v5248_v43 }
 0x511   : > { %17697 = vst [vmem:[#allocation155_spill] sm:$0xff] %v15109_v50  ;;  %v2033_v58 = vpop.f32.mrf.mxu1  ;;  %v3771_v2 = vrot.slane %v3769_v41, 1  ;;  %v5258_v41 = vshrl.u32 %v12807_v12, 16 }
 0x512   : > { %v2443_v19 = vpop.f32.mrf.mxu2  ;;  %v4412_v42 = vpop.f32.mrf.mxu3  ;;  %v2034_v5 = vadd.f32 %v2033_v58, %v17700_v30 }
 0x513   : > { %v2658_v29 = vadd.f32 %v2443_v19, %v2032_v25  ;;  %v15125_v47 = vsel %vm3280_vm3, %v3767_v21, %v3771_v2  ;;  %v3775_v61 = vor.u32 %v3773_v18, %v3771_v2  ;;  %v12811_v18 = vld [vmem:[%s13435_s24 + $0x20c] sm:$0xff]  }
 0x514   : > { %17701 = vst [vmem:[#allocation60_spill] sm:$0xff] %v15125_v47 }
 0x515   : > { %v4627_v11 = vadd.f32 %v4412_v42, %v2658_v29  ;;  %v5899_v37 = vpop.f32.mrf.mxu0 }
 0x517   : > { %v15118_v22 = vadd.f32 %v5897_v52, %v4627_v11  ;;  %v5257_v52 = vsel %vm3280_vm3, %v5252_v0, %v5256_v36 }
 0x519   : > { %17699 = vst [vmem:[#allocation57_spill] sm:$0xff] %v15118_v22  ;;  %v2036_v46 = vpop.f32.mrf.mxu1 }
 0x51a   : > { %v2445_v25 = vpop.f32.mrf.mxu2  ;;  %v4414_v50 = vpop.f32.mrf.mxu3  ;;  %v12809_v46 = vld [vmem:[%s13435_s24 + $0x204] sm:$0xff]  }
 0x51b   : > { %v2659_v19 = vadd.f32 %v2445_v25, %v2034_v5  ;;  %v5262_v33 = vshll.u32 %v12809_v46, 16  ;;  %v5260_v5 = vor.u32 %v5258_v41, %v5256_v36  ;;  %v17706_v36 = vld [vmem:[#allocation66_spill] sm:$0xff] }
 0x51c   : > { %10337 = vmatmul.msk.bf16.gmra.mxu1 %vm829_vm2, %v15013_v14  ;;  %v3777_v14 = vshll.u32 %v15056_v31, 16 }
 0x51d   : > { %v4628_v29 = vadd.f32 %v4414_v50, %v2659_v19  ;;  %v5902_v42 = vpop.f32.mrf.mxu0  ;;  %v5264_v0 = vrot.slane %v5262_v33, 1 }
 0x51e   : > { %v3779_v30 = vrot.slane %v3777_v14, 1 }
 0x51f   : > { %10426 = vmatmul.msk.bf16.gmra.mxu2 %vm829_vm2, %v15122_v6  ;;  %v15132_v43 = vadd.f32 %v5899_v37, %v4628_v29  ;;  %10511 = vmatmul.msk.bf16.gmra.mxu3 %vm829_vm2, %v15125_v47  ;;  %v17703_v37 = vld [vmem:[#allocation63_spill] sm:$0xff]  ;;  %v5265_v12 = vsel %vm3280_vm3, %v5260_v5, %v5264_v0  ;;  %v5266_v5 = vshrl.u32 %v12809_v46, 16  ;;  %v15165_v47 = vld [vmem:[%s13435_s24 + $0x218] sm:$0xff]  }
 0x520   : > { %10592 = vmatmul.msk.bf16.gmra.mxu0 %vm829_vm2, %v5257_v52  ;;  %v15142_v52 = vld [vmem:[%s13435_s24 + $0x210] sm:$0xff]  }
 0x521   : > { %17702 = vst [vmem:[#allocation156_spill] sm:$0xff] %v15132_v43  ;;  %v2037_v58 = vpop.f32.mrf.mxu1  ;;  %v15145_v43 = vsel %vm3280_vm3, %v3775_v61, %v3779_v30 }
 0x522   : > { %v2448_v53 = vpop.f32.mrf.mxu2  ;;  %v4417_v50 = vpop.f32.mrf.mxu3  ;;  %v2038_v21 = vadd.f32 %v2037_v58, %v17703_v37  ;;  %17704 = vst [vmem:[#allocation63_spill] sm:$0xff] %v15145_v43  ;;  %v3781_v37 = vshrl.u32 %v15056_v31, 16 }
 0x525   : > { %v5903_v11 = vpop.f32.mrf.mxu0 }
 0x529   : > { %v2040_v42 = vpop.f32.mrf.mxu1 }
 0x52a   : > { %v2449_v25 = vpop.f32.mrf.mxu2  ;;  %v4418_v29 = vpop.f32.mrf.mxu3  ;;  %v2041_v58 = vadd.f32 %v2040_v42, %v17706_v36  ;;  %v5268_v36 = vor.u32 %v5266_v5, %v5264_v0 }
 0x52b   : > { %v2660_v19 = vadd.f32 %v2449_v25, %v2038_v21  ;;  %v5270_v25 = vshll.u32 %v12811_v18, 16 }
 0x52c   : > { %10338 = vmatmul.msk.bf16.gmra.mxu1 %vm829_vm2, %v15033_v32 }
 0x52d   : > { %v4629_v53 = vadd.f32 %v4418_v29, %v2660_v19  ;;  %v5906_v50 = vpop.f32.mrf.mxu0  ;;  %v3783_v29 = vor.u32 %v3781_v37, %v3779_v30 }
 0x52f   : > { %10427 = vmatmul.msk.bf16.gmra.mxu2 %vm829_vm2, %v15142_v52  ;;  %v15152_v2 = vadd.f32 %v5903_v11, %v4629_v53  ;;  %10512 = vmatmul.msk.bf16.gmra.mxu3 %vm829_vm2, %v15145_v43  ;;  %v3785_v11 = vshll.u32 %v15078_v59, 16  ;;  %v17708_v53 = vld [vmem:[#allocation69_spill] sm:$0xff] }
 0x530   : > { %10593 = vmatmul.msk.bf16.gmra.mxu0 %vm829_vm2, %v5265_v12 }
 0x531   : > { %17705 = vst [vmem:[#allocation157_spill] sm:$0xff] %v15152_v2  ;;  %v2042_v61 = vpop.f32.mrf.mxu1  ;;  %v3787_v42 = vrot.slane %v3785_v11, 1  ;;  %v5272_v2 = vrot.slane %v5270_v25, 1 }
 0x532   : > { %v2452_v14 = vpop.f32.mrf.mxu2  ;;  %v4421_v33 = vpop.f32.mrf.mxu3  ;;  %v2043_v12 = vadd.f32 %v2042_v61, %v17708_v53  ;;  %v12813_v61 = vld [vmem:[%s13435_s24 + $0x214] sm:$0xff]   ;;  %v5274_v53 = vshrl.u32 %v12811_v18, 16 }
 0x533   : > { %v2661_v41 = vadd.f32 %v2452_v14, %v2041_v58  ;;  %v15168_v46 = vsel %vm3280_vm3, %v3783_v29, %v3787_v42 }
 0x534   : > { %17709 = vst [vmem:[#allocation69_spill] sm:$0xff] %v15168_v46 }
 0x535   : > { %v4630_v32 = vadd.f32 %v4421_v33, %v2661_v41  ;;  %v5908_v21 = vpop.f32.mrf.mxu0 }
 0x537   : > { %v15161_v19 = vadd.f32 %v5906_v50, %v4630_v32  ;;  %v5273_v50 = vsel %vm3280_vm3, %v5268_v36, %v5272_v2 }
 0x539   : > { %17707 = vst [vmem:[#allocation66_spill] sm:$0xff] %v15161_v19  ;;  %v2045_v43 = vpop.f32.mrf.mxu1 }
 0x53a   : > { %v2454_v58 = vpop.f32.mrf.mxu2  ;;  %v4423_v22 = vpop.f32.mrf.mxu3 }
 0x53b   : > { %v2662_v14 = vadd.f32 %v2454_v58, %v2043_v12  ;;  %v5278_v12 = vshll.u32 %v12813_v61, 16 }
 0x53c   : > { %10339 = vmatmul.msk.bf16.gmra.mxu1 %vm829_vm2, %v15056_v31  ;;  %v3789_v31 = vshrl.u32 %v15078_v59, 16 }
 0x53d   : > { %v4631_v41 = vadd.f32 %v4423_v22, %v2662_v14  ;;  %v5911_v33 = vpop.f32.mrf.mxu0  ;;  %v17711_v22 = vld [vmem:[#allocation72_spill] sm:$0xff] }
 0x53e   : > { %v2046_v0 = vadd.f32 %v2045_v43, %v17711_v22  ;;  %v3791_v58 = vor.u32 %v3789_v31, %v3787_v42  ;;  %v5276_v43 = vor.u32 %v5274_v53, %v5272_v2  ;;  %v17714_v2 = vld [vmem:[#allocation75_spill] sm:$0xff]  ;;  %v12815_v42 = vld [vmem:[%s13435_s24 + $0x21c] sm:$0xff]  }
 0x53f   : > { %10428 = vmatmul.msk.bf16.gmra.mxu2 %vm829_vm2, %v15165_v47  ;;  %v15175_v30 = vadd.f32 %v5908_v21, %v4631_v41  ;;  %10513 = vmatmul.msk.bf16.gmra.mxu3 %vm829_vm2, %v15168_v46  ;;  %v3793_v21 = vshll.u32 %v15099_v57, 16  ;;  %v5280_v41 = vrot.slane %v5278_v12, 1  ;;  %v3801_v12 = vshll.u32 %v15122_v6, 16  ;;  %v15208_v46 = vld [vmem:[%s13435_s24 + $0x228] sm:$0xff]  }
 0x540   : > { %10594 = vmatmul.msk.bf16.gmra.mxu0 %vm829_vm2, %v5273_v50 }
 0x541   : > { %17710 = vst [vmem:[#allocation158_spill] sm:$0xff] %v15175_v30  ;;  %v2047_v5 = vpop.f32.mrf.mxu1  ;;  %v3795_v14 = vrot.slane %v3793_v21, 1  ;;  %v3797_v21 = vshrl.u32 %v15099_v57, 16 }
 0x542   : > { %v2457_v37 = vpop.f32.mrf.mxu2  ;;  %v4426_v11 = vpop.f32.mrf.mxu3 }
 0x543   : > { %v2663_v32 = vadd.f32 %v2457_v37, %v2046_v0  ;;  %v15187_v37 = vld [vmem:[%s13435_s24 + $0x220] sm:$0xff]  }
 0x545   : > { %v4632_v25 = vadd.f32 %v4426_v11, %v2663_v32  ;;  %v5913_v29 = vpop.f32.mrf.mxu0  ;;  %v15190_v32 = vsel %vm3280_vm3, %v3791_v58, %v3795_v14  ;;  %v5281_v11 = vsel %vm3280_vm3, %v5276_v43, %v5280_v41  ;;  %v5282_v58 = vshrl.u32 %v12813_v61, 16 }
 0x546   : > { %17713 = vst [vmem:[#allocation159_spill] sm:$0xff] %v15190_v32  ;;  %v5286_v43 = vshll.u32 %v12815_v42, 16 }
 0x547   : > { %v15184_v36 = vadd.f32 %v5911_v33, %v4632_v25 }
 0x548   : > { %v5288_v30 = vrot.slane %v5286_v43, 1 }
 0x549   : > { %17712 = vst [vmem:[#allocation72_spill] sm:$0xff] %v15184_v36  ;;  %v2049_v0 = vpop.f32.mrf.mxu1 }
 0x54a   : > { %v2459_v50 = vpop.f32.mrf.mxu2  ;;  %v4428_v22 = vpop.f32.mrf.mxu3  ;;  %v2050_v18 = vadd.f32 %v2049_v0, %v17714_v2  ;;  %v3803_v0 = vrot.slane %v3801_v12, 1  ;;  %v5284_v2 = vor.u32 %v5282_v58, %v5280_v41  ;;  %v12817_v41 = vld [vmem:[%s13435_s24 + $0x224] sm:$0xff]   ;;  %v3805_v58 = vshrl.u32 %v15122_v6, 16 }
 0x54b   : > { %v3799_v22 = vor.u32 %v3797_v21, %v3795_v14 }
 0x54c   : > { %10340 = vmatmul.msk.bf16.gmra.mxu1 %vm829_vm2, %v15078_v59 }
 0x54d   : > { %v5915_v5 = vpop.f32.mrf.mxu0  ;;  %v15211_v61 = vsel %vm3280_vm3, %v3799_v22, %v3803_v0  ;;  %v5290_v22 = vshrl.u32 %v12815_v42, 16 }
 0x54f   : > { %10429 = vmatmul.msk.bf16.gmra.mxu2 %vm829_vm2, %v15187_v37  ;;  %10514 = vmatmul.msk.bf16.gmra.mxu3 %vm829_vm2, %v15190_v32 }
 0x550   : > { %10595 = vmatmul.msk.bf16.gmra.mxu0 %vm829_vm2, %v5281_v11  ;;  %v17716_v11 = vld [vmem:[#allocation78_spill] sm:$0xff] }
 0x551   : > { %v2051_v29 = vpop.f32.mrf.mxu1  ;;  %17717 = vst [vmem:[#allocation78_spill] sm:$0xff] %v15211_v61 }
 0x552   : > { %v2461_v33 = vpop.f32.mrf.mxu2  ;;  %v4430_v25 = vpop.f32.mrf.mxu3  ;;  %v2052_v36 = vadd.f32 %v2051_v29, %v17716_v11  ;;  %v5294_v11 = vshll.u32 %v12817_v41, 16 }
 0x553   : > { %v2664_v31 = vadd.f32 %v2461_v33, %v2050_v18 }
 0x555   : > { %v4633_v53 = vadd.f32 %v4430_v25, %v2664_v31  ;;  %v5917_v59 = vpop.f32.mrf.mxu0 }
 0x557   : > { %v15204_v50 = vadd.f32 %v5915_v5, %v4633_v53  ;;  %v5289_v5 = vsel %vm3280_vm3, %v5284_v2, %v5288_v30 }
 0x559   : > { %17715 = vst [vmem:[#allocation75_spill] sm:$0xff] %v15204_v50  ;;  %v2054_v32 = vpop.f32.mrf.mxu1 }
 0x55a   : > { %v2463_v18 = vpop.f32.mrf.mxu2  ;;  %v4432_v19 = vpop.f32.mrf.mxu3 }
 0x55b   : > { %v2665_v33 = vadd.f32 %v2463_v18, %v2052_v36  ;;  %v3807_v18 = vor.u32 %v3805_v58, %v3803_v0  ;;  %v3813_v58 = vshrl.u32 %v15142_v52, 16 }
 0x55c   : > { %10341 = vmatmul.msk.bf16.gmra.mxu1 %vm829_vm2, %v15099_v57 }
 0x55d   : > { %v4634_v31 = vadd.f32 %v4432_v19, %v2665_v33  ;;  %v5920_v25 = vpop.f32.mrf.mxu0  ;;  %v17719_v19 = vld [vmem:[#allocation81_spill] sm:$0xff]  ;;  %v17721_v33 = vld [vmem:[#allocation84_spill] sm:$0xff] }
 0x55e   : > { %v2055_v36 = vadd.f32 %v2054_v32, %v17719_v19  ;;  %v5296_v19 = vrot.slane %v5294_v11, 1 }
 0x55f   : > { %10430 = vmatmul.msk.bf16.gmra.mxu2 %vm829_vm2, %v15208_v46  ;;  %v15218_v14 = vadd.f32 %v5917_v59, %v4634_v31  ;;  %10515 = vmatmul.msk.bf16.gmra.mxu3 %vm829_vm2, %v15211_v61  ;;  %v3809_v59 = vshll.u32 %v15142_v52, 16  ;;  %v15231_v61 = vld [vmem:[%s13435_s24 + $0x230] sm:$0xff]  }
 0x560   : > { %10596 = vmatmul.msk.bf16.gmra.mxu0 %vm829_vm2, %v5289_v5  ;;  %v5292_v5 = vor.u32 %v5290_v22, %v5288_v30 }
 0x561   : > { %17718 = vst [vmem:[#allocation160_spill] sm:$0xff] %v15218_v14  ;;  %v2056_v12 = vpop.f32.mrf.mxu1  ;;  %v3811_v32 = vrot.slane %v3809_v59, 1  ;;  %v5298_v59 = vshrl.u32 %v12817_v41, 16 }
 0x562   : > { %v2466_v29 = vpop.f32.mrf.mxu2  ;;  %v4435_v53 = vpop.f32.mrf.mxu3  ;;  %v2057_v31 = vadd.f32 %v2056_v12, %v17721_v33 }
 0x563   : > { %v2666_v21 = vadd.f32 %v2466_v29, %v2055_v36  ;;  %v15234_v42 = vsel %vm3280_vm3, %v3807_v18, %v3811_v32  ;;  %v3815_v11 = vor.u32 %v3813_v58, %v3811_v32  ;;  %v12821_v58 = vld [vmem:[%s13435_s24 + $0x234] sm:$0xff]  }
 0x564   : > { %17722 = vst [vmem:[#allocation84_spill] sm:$0xff] %v15234_v42 }
 0x565   : > { %v4635_v57 = vadd.f32 %v4435_v53, %v2666_v21  ;;  %v5922_v43 = vpop.f32.mrf.mxu0 }
 0x567   : > { %v15227_v2 = vadd.f32 %v5920_v25, %v4635_v57  ;;  %v5297_v25 = vsel %vm3280_vm3, %v5292_v5, %v5296_v19 }
 0x569   : > { %17720 = vst [vmem:[#allocation81_spill] sm:$0xff] %v15227_v2  ;;  %v2059_v50 = vpop.f32.mrf.mxu1 }
 0x56a   : > { %v2468_v36 = vpop.f32.mrf.mxu2  ;;  %v4437_v14 = vpop.f32.mrf.mxu3  ;;  %v12819_v50 = vld [vmem:[%s13435_s24 + $0x22c] sm:$0xff]  }
 0x56b   : > { %v2667_v29 = vadd.f32 %v2468_v36, %v2057_v31  ;;  %v5302_v22 = vshll.u32 %v12819_v50, 16  ;;  %v5300_v31 = vor.u32 %v5298_v59, %v5296_v19  ;;  %v17727_v19 = vld [vmem:[#allocation92_spill] sm:$0xff] }
 0x56c   : > { %10342 = vmatmul.msk.bf16.gmra.mxu1 %vm829_vm2, %v15122_v6  ;;  %v3817_v6 = vshll.u32 %v15165_v47, 16 }
 0x56d   : > { %v4636_v21 = vadd.f32 %v4437_v14, %v2667_v29  ;;  %v5925_v53 = vpop.f32.mrf.mxu0  ;;  %v5304_v5 = vrot.slane %v5302_v22, 1 }
 0x56e   : > { %v3819_v33 = vrot.slane %v3817_v6, 1 }
 0x56f   : > { %10431 = vmatmul.msk.bf16.gmra.mxu2 %vm829_vm2, %v15231_v61  ;;  %v15241_v30 = vadd.f32 %v5922_v43, %v4636_v21  ;;  %10516 = vmatmul.msk.bf16.gmra.mxu3 %vm829_vm2, %v15234_v42  ;;  %v17724_v43 = vld [vmem:[#allocation88_spill] sm:$0xff]  ;;  %v5305_v41 = vsel %vm3280_vm3, %v5300_v31, %v5304_v5  ;;  %v5306_v31 = vshrl.u32 %v12819_v50, 16  ;;  %v15274_v42 = vld [vmem:[%s13435_s24 + $0x240] sm:$0xff]  }
 0x570   : > { %10597 = vmatmul.msk.bf16.gmra.mxu0 %vm829_vm2, %v5297_v25  ;;  %v15251_v25 = vld [vmem:[%s13435_s24 + $0x238] sm:$0xff]  }
 0x571   : > { %17723 = vst [vmem:[#allocation161_spill] sm:$0xff] %v15241_v30  ;;  %v2060_v12 = vpop.f32.mrf.mxu1  ;;  %v15254_v30 = vsel %vm3280_vm3, %v3815_v11, %v3819_v33 }
 0x572   : > { %v2471_v0 = vpop.f32.mrf.mxu2  ;;  %v4440_v14 = vpop.f32.mrf.mxu3  ;;  %v2061_v18 = vadd.f32 %v2060_v12, %v17724_v43  ;;  %17725 = vst [vmem:[#allocation88_spill] sm:$0xff] %v15254_v30  ;;  %v3821_v43 = vshrl.u32 %v15165_v47, 16 }
 0x575   : > { %v5926_v57 = vpop.f32.mrf.mxu0 }
 0x579   : > { %v2063_v53 = vpop.f32.mrf.mxu1 }
 0x57a   : > { %v2472_v36 = vpop.f32.mrf.mxu2  ;;  %v4441_v21 = vpop.f32.mrf.mxu3  ;;  %v2064_v12 = vadd.f32 %v2063_v53, %v17727_v19  ;;  %v5308_v19 = vor.u32 %v5306_v31, %v5304_v5 }
 0x57b   : > { %v2668_v29 = vadd.f32 %v2472_v36, %v2061_v18  ;;  %v5310_v36 = vshll.u32 %v12821_v58, 16 }
 0x57c   : > { %10343 = vmatmul.msk.bf16.gmra.mxu1 %vm829_vm2, %v15142_v52 }
 0x57d   : > { %v4637_v0 = vadd.f32 %v4441_v21, %v2668_v29  ;;  %v5929_v14 = vpop.f32.mrf.mxu0  ;;  %v3823_v21 = vor.u32 %v3821_v43, %v3819_v33 }
 0x57f   : > { %10432 = vmatmul.msk.bf16.gmra.mxu2 %vm829_vm2, %v15251_v25  ;;  %v15261_v32 = vadd.f32 %v5926_v57, %v4637_v0  ;;  %10517 = vmatmul.msk.bf16.gmra.mxu3 %vm829_vm2, %v15254_v30  ;;  %v3825_v57 = vshll.u32 %v15187_v37, 16  ;;  %v17729_v0 = vld [vmem:[#allocation95_spill] sm:$0xff] }
 0x580   : > { %10598 = vmatmul.msk.bf16.gmra.mxu0 %vm829_vm2, %v5305_v41 }
 0x581   : > { %17726 = vst [vmem:[#allocation162_spill] sm:$0xff] %v15261_v32  ;;  %v2065_v11 = vpop.f32.mrf.mxu1  ;;  %v3827_v53 = vrot.slane %v3825_v57, 1  ;;  %v5312_v32 = vrot.slane %v5310_v36, 1 }
 0x582   : > { %v2475_v6 = vpop.f32.mrf.mxu2  ;;  %v4444_v22 = vpop.f32.mrf.mxu3  ;;  %v2066_v41 = vadd.f32 %v2065_v11, %v17729_v0  ;;  %v12823_v11 = vld [vmem:[%s13435_s24 + $0x23c] sm:$0xff]   ;;  %v5314_v0 = vshrl.u32 %v12821_v58, 16 }
 0x583   : > { %v2669_v59 = vadd.f32 %v2475_v6, %v2064_v12  ;;  %v15277_v50 = vsel %vm3280_vm3, %v3823_v21, %v3827_v53 }
 0x584   : > { %17730 = vst [vmem:[#allocation95_spill] sm:$0xff] %v15277_v50 }
 0x585   : > { %v4638_v52 = vadd.f32 %v4444_v22, %v2669_v59  ;;  %v5931_v18 = vpop.f32.mrf.mxu0 }
 0x587   : > { %v15270_v29 = vadd.f32 %v5929_v14, %v4638_v52  ;;  %v5313_v14 = vsel %vm3280_vm3, %v5308_v19, %v5312_v32 }
 0x589   : > { %17728 = vst [vmem:[#allocation92_spill] sm:$0xff] %v15270_v29  ;;  %v2068_v30 = vpop.f32.mrf.mxu1 }
 0x58a   : > { %v2477_v12 = vpop.f32.mrf.mxu2  ;;  %v4446_v2 = vpop.f32.mrf.mxu3 }
 0x58b   : > { %v2670_v6 = vadd.f32 %v2477_v12, %v2066_v41  ;;  %v5318_v41 = vshll.u32 %v12823_v11, 16 }
 0x58c   : > { %10344 = vmatmul.msk.bf16.gmra.mxu1 %vm829_vm2, %v15165_v47  ;;  %v3829_v47 = vshrl.u32 %v15187_v37, 16 }
 0x58d   : > { %v4639_v59 = vadd.f32 %v4446_v2, %v2670_v6  ;;  %v5934_v22 = vpop.f32.mrf.mxu0  ;;  %v17732_v2 = vld [vmem:[#allocation99_spill] sm:$0xff] }
 0x58e   : > { %v2069_v5 = vadd.f32 %v2068_v30, %v17732_v2  ;;  %v3831_v12 = vor.u32 %v3829_v47, %v3827_v53  ;;  %v5316_v30 = vor.u32 %v5314_v0, %v5312_v32  ;;  %v17735_v32 = vld [vmem:[#allocation6_spill] sm:$0xff] }
 0x58f   : > { %10433 = vmatmul.msk.bf16.gmra.mxu2 %vm829_vm2, %v15274_v42  ;;  %v15284_v33 = vadd.f32 %v5931_v18, %v4639_v59  ;;  %10518 = vmatmul.msk.bf16.gmra.mxu3 %vm829_vm2, %v15277_v50  ;;  %v3833_v18 = vshll.u32 %v15208_v46, 16  ;;  %v5320_v59 = vrot.slane %v5318_v41, 1  ;;  %v12825_v53 = vld [vmem:[%s13435_s24 + $0x244] sm:$0xff]   ;;  %v3841_v41 = vshll.u32 %v15231_v61, 16  ;;  %v15317_v50 = vld [vmem:[%s13435_s24 + $0x250] sm:$0xff]  }
 0x590   : > { %10599 = vmatmul.msk.bf16.gmra.mxu0 %vm829_vm2, %v5313_v14 }
 0x591   : > { %17731 = vst [vmem:[#allocation163_spill] sm:$0xff] %v15284_v33  ;;  %v2070_v31 = vpop.f32.mrf.mxu1  ;;  %v3835_v6 = vrot.slane %v3833_v18, 1  ;;  %v3837_v18 = vshrl.u32 %v15208_v46, 16 }
 0x592   : > { %v2480_v43 = vpop.f32.mrf.mxu2  ;;  %v4449_v57 = vpop.f32.mrf.mxu3 }
 0x593   : > { %v2671_v52 = vadd.f32 %v2480_v43, %v2069_v5  ;;  %v15296_v43 = vld [vmem:[%s13435_s24 + $0x248] sm:$0xff]  }
 0x595   : > { %v4640_v36 = vadd.f32 %v4449_v57, %v2671_v52  ;;  %v5936_v21 = vpop.f32.mrf.mxu0  ;;  %v15299_v52 = vsel %vm3280_vm3, %v3831_v12, %v3835_v6  ;;  %v5321_v57 = vsel %vm3280_vm3, %v5316_v30, %v5320_v59  ;;  %v5322_v12 = vshrl.u32 %v12823_v11, 16 }
 0x596   : > { %17734 = vst [vmem:[#allocation164_spill] sm:$0xff] %v15299_v52  ;;  %v5326_v30 = vshll.u32 %v12825_v53, 16 }
 0x597   : > { %v15293_v19 = vadd.f32 %v5934_v22, %v4640_v36 }
 0x598   : > { %v5328_v33 = vrot.slane %v5326_v30, 1 }
 0x599   : > { %17733 = vst [vmem:[#allocation99_spill] sm:$0xff] %v15293_v19  ;;  %v2072_v5 = vpop.f32.mrf.mxu1 }
 0x59a   : > { %v2482_v14 = vpop.f32.mrf.mxu2  ;;  %v4451_v2 = vpop.f32.mrf.mxu3  ;;  %v2073_v58 = vadd.f32 %v2072_v5, %v17735_v32  ;;  %v3843_v5 = vrot.slane %v3841_v41, 1  ;;  %v5324_v32 = vor.u32 %v5322_v12, %v5320_v59  ;;  %v12827_v59 = vld [vmem:[%s13435_s24 + $0x24c] sm:$0xff]   ;;  %v3845_v12 = vshrl.u32 %v15231_v61, 16 }
 0x59b   : > { %v3839_v2 = vor.u32 %v3837_v18, %v3835_v6 }
 0x59c   : > { %10345 = vmatmul.msk.bf16.gmra.mxu1 %vm829_vm2, %v15187_v37 }
 0x59d   : > { %v5938_v31 = vpop.f32.mrf.mxu0  ;;  %v15320_v11 = vsel %vm3280_vm3, %v3839_v2, %v3843_v5  ;;  %v5330_v2 = vshrl.u32 %v12825_v53, 16 }
 0x59f   : > { %10434 = vmatmul.msk.bf16.gmra.mxu2 %vm829_vm2, %v15296_v43  ;;  %10519 = vmatmul.msk.bf16.gmra.mxu3 %vm829_vm2, %v15299_v52 }
 0x5a0   : > { %10600 = vmatmul.msk.bf16.gmra.mxu0 %vm829_vm2, %v5321_v57  ;;  %v17737_v57 = vld [vmem:[#allocation8_spill] sm:$0xff] }
 0x5a1   : > { %v2074_v21 = vpop.f32.mrf.mxu1  ;;  %17738 = vst [vmem:[#allocation8_spill] sm:$0xff] %v15320_v11 }
 0x5a2   : > { %v2484_v22 = vpop.f32.mrf.mxu2  ;;  %v4453_v36 = vpop.f32.mrf.mxu3  ;;  %v2075_v19 = vadd.f32 %v2074_v21, %v17737_v57  ;;  %v5334_v57 = vshll.u32 %v12827_v59, 16 }
 0x5a3   : > { %v2672_v47 = vadd.f32 %v2484_v22, %v2073_v58 }
 0x5a5   : > { %v4641_v0 = vadd.f32 %v4453_v36, %v2672_v47  ;;  %v5940_v37 = vpop.f32.mrf.mxu0 }
 0x5a7   : > { %v15313_v14 = vadd.f32 %v5938_v31, %v4641_v0  ;;  %v5329_v31 = vsel %vm3280_vm3, %v5324_v32, %v5328_v33 }
 0x5a9   : > { %17736 = vst [vmem:[#allocation6_spill] sm:$0xff] %v15313_v14  ;;  %v2077_v52 = vpop.f32.mrf.mxu1 }
 0x5aa   : > { %v2486_v58 = vpop.f32.mrf.mxu2  ;;  %v4455_v29 = vpop.f32.mrf.mxu3 }
 0x5ab   : > { %v2673_v22 = vadd.f32 %v2486_v58, %v2075_v19  ;;  %v3847_v58 = vor.u32 %v3845_v12, %v3843_v5  ;;  %v3853_v12 = vshrl.u32 %v15251_v25, 16 }
 0x5ac   : > { %10346 = vmatmul.msk.bf16.gmra.mxu1 %vm829_vm2, %v15208_v46 }
 0x5ad   : > { %v4642_v47 = vadd.f32 %v4455_v29, %v2673_v22  ;;  %v5943_v36 = vpop.f32.mrf.mxu0  ;;  %v17740_v29 = vld [vmem:[#allocation10_spill] sm:$0xff]  ;;  %v17742_v22 = vld [vmem:[#allocation13_spill] sm:$0xff] }
 0x5ae   : > { %v2078_v19 = vadd.f32 %v2077_v52, %v17740_v29  ;;  %v5336_v29 = vrot.slane %v5334_v57, 1 }
 0x5af   : > { %10435 = vmatmul.msk.bf16.gmra.mxu2 %vm829_vm2, %v15317_v50  ;;  %v15327_v6 = vadd.f32 %v5940_v37, %v4642_v47  ;;  %10520 = vmatmul.msk.bf16.gmra.mxu3 %vm829_vm2, %v15320_v11  ;;  %v3849_v37 = vshll.u32 %v15251_v25, 16  ;;  %v15340_v11 = vld [vmem:[%s13435_s24 + $0x258] sm:$0xff]  }
 0x5b0   : > { %10601 = vmatmul.msk.bf16.gmra.mxu0 %vm829_vm2, %v5329_v31  ;;  %v5332_v31 = vor.u32 %v5330_v2, %v5328_v33 }
 0x5b1   : > { %17739 = vst [vmem:[#allocation165_spill] sm:$0xff] %v15327_v6  ;;  %v2079_v41 = vpop.f32.mrf.mxu1  ;;  %v3851_v52 = vrot.slane %v3849_v37, 1  ;;  %v5338_v37 = vshrl.u32 %v12827_v59, 16 }
 0x5b2   : > { %v2489_v21 = vpop.f32.mrf.mxu2  ;;  %v4458_v0 = vpop.f32.mrf.mxu3  ;;  %v2080_v47 = vadd.f32 %v2079_v41, %v17742_v22 }
 0x5b3   : > { %v2674_v18 = vadd.f32 %v2489_v21, %v2078_v19  ;;  %v15343_v53 = vsel %vm3280_vm3, %v3847_v58, %v3851_v52  ;;  %v3855_v57 = vor.u32 %v3853_v12, %v3851_v52  ;;  %v12831_v12 = vld [vmem:[%s13435_s24 + $0x25c] sm:$0xff]  }
 0x5b4   : > { %17743 = vst [vmem:[#allocation13_spill] sm:$0xff] %v15343_v53 }
 0x5b5   : > { %v4643_v46 = vadd.f32 %v4458_v0, %v2674_v18  ;;  %v5945_v30 = vpop.f32.mrf.mxu0 }
 0x5b7   : > { %v15336_v32 = vadd.f32 %v5943_v36, %v4643_v46  ;;  %v5337_v36 = vsel %vm3280_vm3, %v5332_v31, %v5336_v29 }
 0x5b9   : > { %17741 = vst [vmem:[#allocation10_spill] sm:$0xff] %v15336_v32  ;;  %v2082_v14 = vpop.f32.mrf.mxu1 }
 0x5ba   : > { %v2491_v19 = vpop.f32.mrf.mxu2  ;;  %v4460_v6 = vpop.f32.mrf.mxu3  ;;  %v12829_v14 = vld [vmem:[%s13435_s24 + $0x254] sm:$0xff]  }
 0x5bb   : > { %v2675_v21 = vadd.f32 %v2491_v19, %v2080_v47  ;;  %v5342_v2 = vshll.u32 %v12829_v14, 16  ;;  %v5340_v47 = vor.u32 %v5338_v37, %v5336_v29  ;;  %v17748_v29 = vld [vmem:[#allocation19_spill] sm:$0xff] }
 0x5bc   : > { %10347 = vmatmul.msk.bf16.gmra.mxu1 %vm829_vm2, %v15231_v61  ;;  %v3857_v61 = vshll.u32 %v15274_v42, 16 }
 0x5bd   : > { %v4644_v18 = vadd.f32 %v4460_v6, %v2675_v21  ;;  %v5948_v0 = vpop.f32.mrf.mxu0  ;;  %v5344_v31 = vrot.slane %v5342_v2, 1 }
 0x5be   : > { %v3859_v22 = vrot.slane %v3857_v61, 1 }
 0x5bf   : > { %10436 = vmatmul.msk.bf16.gmra.mxu2 %vm829_vm2, %v15340_v11  ;;  %v15350_v33 = vadd.f32 %v5945_v30, %v4644_v18  ;;  %10521 = vmatmul.msk.bf16.gmra.mxu3 %vm829_vm2, %v15343_v53  ;;  %v17745_v30 = vld [vmem:[#allocation16_spill] sm:$0xff]  ;;  %v5345_v59 = vsel %vm3280_vm3, %v5340_v47, %v5344_v31  ;;  %v5346_v47 = vshrl.u32 %v12829_v14, 16  ;;  %v15383_v53 = vld [vmem:[%s13435_s24 + $0x268] sm:$0xff]  }
 0x5c0   : > { %10602 = vmatmul.msk.bf16.gmra.mxu0 %vm829_vm2, %v5337_v36  ;;  %v15360_v36 = vld [vmem:[%s13435_s24 + $0x260] sm:$0xff]  }
 0x5c1   : > { %17744 = vst [vmem:[#allocation166_spill] sm:$0xff] %v15350_v33  ;;  %v2083_v41 = vpop.f32.mrf.mxu1  ;;  %v15363_v33 = vsel %vm3280_vm3, %v3855_v57, %v3859_v22 }
 0x5c2   : > { %v2494_v5 = vpop.f32.mrf.mxu2  ;;  %v4463_v6 = vpop.f32.mrf.mxu3  ;;  %v2084_v58 = vadd.f32 %v2083_v41, %v17745_v30  ;;  %17746 = vst [vmem:[#allocation16_spill] sm:$0xff] %v15363_v33  ;;  %v3861_v30 = vshrl.u32 %v15274_v42, 16 }
 0x5c5   : > { %v5949_v46 = vpop.f32.mrf.mxu0 }
 0x5c9   : > { %v2086_v0 = vpop.f32.mrf.mxu1 }
 0x5ca   : > { %v2495_v19 = vpop.f32.mrf.mxu2  ;;  %v4464_v18 = vpop.f32.mrf.mxu3  ;;  %v2087_v41 = vadd.f32 %v2086_v0, %v17748_v29  ;;  %v5348_v29 = vor.u32 %v5346_v47, %v5344_v31 }
 0x5cb   : > { %v2676_v21 = vadd.f32 %v2495_v19, %v2084_v58  ;;  %v5350_v19 = vshll.u32 %v12831_v12, 16 }
 0x5cc   : > { %10348 = vmatmul.msk.bf16.gmra.mxu1 %vm829_vm2, %v15251_v25 }
 0x5cd   : > { %v4645_v5 = vadd.f32 %v4464_v18, %v2676_v21  ;;  %v5952_v6 = vpop.f32.mrf.mxu0  ;;  %v3863_v18 = vor.u32 %v3861_v30, %v3859_v22 }
 0x5cf   : > { %10437 = vmatmul.msk.bf16.gmra.mxu2 %vm829_vm2, %v15360_v36  ;;  %v15370_v52 = vadd.f32 %v5949_v46, %v4645_v5  ;;  %10522 = vmatmul.msk.bf16.gmra.mxu3 %vm829_vm2, %v15363_v33  ;;  %v3865_v46 = vshll.u32 %v15296_v43, 16  ;;  %v17750_v5 = vld [vmem:[#allocation22_spill] sm:$0xff] }
 0x5d0   : > { %10603 = vmatmul.msk.bf16.gmra.mxu0 %vm829_vm2, %v5345_v59 }
 0x5d1   : > { %17747 = vst [vmem:[#allocation167_spill] sm:$0xff] %v15370_v52  ;;  %v2088_v57 = vpop.f32.mrf.mxu1  ;;  %v3867_v0 = vrot.slane %v3865_v46, 1  ;;  %v5352_v52 = vrot.slane %v5350_v19, 1 }
 0x5d2   : > { %v2498_v61 = vpop.f32.mrf.mxu2  ;;  %v4467_v2 = vpop.f32.mrf.mxu3  ;;  %v2089_v59 = vadd.f32 %v2088_v57, %v17750_v5  ;;  %v12833_v57 = vld [vmem:[%s13435_s24 + $0x264] sm:$0xff]   ;;  %v5354_v5 = vshrl.u32 %v12831_v12, 16 }
 0x5d3   : > { %v2677_v37 = vadd.f32 %v2498_v61, %v2087_v41  ;;  %v15386_v14 = vsel %vm3280_vm3, %v3863_v18, %v3867_v0 }
 0x5d4   : > { %17751 = vst [vmem:[#allocation22_spill] sm:$0xff] %v15386_v14 }
 0x5d5   : > { %v4646_v25 = vadd.f32 %v4467_v2, %v2677_v37  ;;  %v5954_v58 = vpop.f32.mrf.mxu0 }
 0x5d7   : > { %v15379_v21 = vadd.f32 %v5952_v6, %v4646_v25  ;;  %v5353_v6 = vsel %vm3280_vm3, %v5348_v29, %v5352_v52 }
 0x5d9   : > { %17749 = vst [vmem:[#allocation19_spill] sm:$0xff] %v15379_v21  ;;  %v2091_v33 = vpop.f32.mrf.mxu1 }
 0x5da   : > { %v2500_v41 = vpop.f32.mrf.mxu2  ;;  %v4469_v32 = vpop.f32.mrf.mxu3 }
 0x5db   : > { %v2678_v61 = vadd.f32 %v2500_v41, %v2089_v59  ;;  %v5358_v59 = vshll.u32 %v12833_v57, 16 }
 0x5dc   : > { %10349 = vmatmul.msk.bf16.gmra.mxu1 %vm829_vm2, %v15274_v42  ;;  %v3869_v42 = vshrl.u32 %v15296_v43, 16 }
 0x5dd   : > { %v4647_v37 = vadd.f32 %v4469_v32, %v2678_v61  ;;  %v5957_v2 = vpop.f32.mrf.mxu0  ;;  %v17753_v32 = vld [vmem:[#allocation25_spill] sm:$0xff] }
 0x5de   : > { %v2092_v31 = vadd.f32 %v2091_v33, %v17753_v32  ;;  %v3871_v41 = vor.u32 %v3869_v42, %v3867_v0  ;;  %v5356_v33 = vor.u32 %v5354_v5, %v5352_v52  ;;  %v17756_v52 = vld [vmem:[#allocation28_spill] sm:$0xff]  ;;  %v12835_v0 = vld [vmem:[%s13435_s24 + $0x26c] sm:$0xff]  }
 0x5df   : > { %10438 = vmatmul.msk.bf16.gmra.mxu2 %vm829_vm2, %v15383_v53  ;;  %v15393_v22 = vadd.f32 %v5954_v58, %v4647_v37  ;;  %10523 = vmatmul.msk.bf16.gmra.mxu3 %vm829_vm2, %v15386_v14  ;;  %v3873_v58 = vshll.u32 %v15317_v50, 16  ;;  %v5360_v37 = vrot.slane %v5358_v59, 1  ;;  %v3881_v59 = vshll.u32 %v15340_v11, 16  ;;  %v15426_v14 = vld [vmem:[%s13435_s24 + $0x278] sm:$0xff]  }
 0x5e0   : > { %10604 = vmatmul.msk.bf16.gmra.mxu0 %vm829_vm2, %v5353_v6 }
 0x5e1   : > { %17752 = vst [vmem:[#allocation168_spill] sm:$0xff] %v15393_v22  ;;  %v2093_v47 = vpop.f32.mrf.mxu1  ;;  %v3875_v61 = vrot.slane %v3873_v58, 1  ;;  %v3877_v58 = vshrl.u32 %v15317_v50, 16 }
 0x5e2   : > { %v2503_v30 = vpop.f32.mrf.mxu2  ;;  %v4472_v46 = vpop.f32.mrf.mxu3 }
 0x5e3   : > { %v2679_v25 = vadd.f32 %v2503_v30, %v2092_v31  ;;  %v15405_v30 = vld [vmem:[%s13435_s24 + $0x270] sm:$0xff]  }
 0x5e5   : > { %v4648_v19 = vadd.f32 %v4472_v46, %v2679_v25  ;;  %v5959_v18 = vpop.f32.mrf.mxu0  ;;  %v15408_v25 = vsel %vm3280_vm3, %v3871_v41, %v3875_v61  ;;  %v5361_v46 = vsel %vm3280_vm3, %v5356_v33, %v5360_v37  ;;  %v5362_v41 = vshrl.u32 %v12833_v57, 16 }
 0x5e6   : > { %17755 = vst [vmem:[#allocation169_spill] sm:$0xff] %v15408_v25  ;;  %v5366_v33 = vshll.u32 %v12835_v0, 16 }
 0x5e7   : > { %v15402_v29 = vadd.f32 %v5957_v2, %v4648_v19 }
 0x5e8   : > { %v5368_v22 = vrot.slane %v5366_v33, 1 }
 0x5e9   : > { %17754 = vst [vmem:[#allocation25_spill] sm:$0xff] %v15402_v29  ;;  %v2095_v31 = vpop.f32.mrf.mxu1 }
 0x5ea   : > { %v2505_v6 = vpop.f32.mrf.mxu2  ;;  %v4474_v32 = vpop.f32.mrf.mxu3  ;;  %v2096_v12 = vadd.f32 %v2095_v31, %v17756_v52  ;;  %v3883_v31 = vrot.slane %v3881_v59, 1  ;;  %v5364_v52 = vor.u32 %v5362_v41, %v5360_v37  ;;  %v12836_v37 = vld [vmem:[%s13435_s24 + $0x274] sm:$0xff]   ;;  %v3885_v41 = vshrl.u32 %v15340_v11, 16 }
 0x5eb   : > { %v3879_v32 = vor.u32 %v3877_v58, %v3875_v61 }
 0x5ec   : > { %10350 = vmatmul.msk.bf16.gmra.mxu1 %vm829_vm2, %v15296_v43 }
 0x5ed   : > { %v5961_v47 = vpop.f32.mrf.mxu0  ;;  %v15429_v57 = vsel %vm3280_vm3, %v3879_v32, %v3883_v31  ;;  %v5370_v32 = vshrl.u32 %v12835_v0, 16 }
 0x5ef   : > { %10439 = vmatmul.msk.bf16.gmra.mxu2 %vm829_vm2, %v15405_v30  ;;  %10524 = vmatmul.msk.bf16.gmra.mxu3 %vm829_vm2, %v15408_v25 }
 0x5f0   : > { %10605 = vmatmul.msk.bf16.gmra.mxu0 %vm829_vm2, %v5361_v46  ;;  %v17758_v46 = vld [vmem:[#allocation31_spill] sm:$0xff] }
 0x5f1   : > { %v2097_v18 = vpop.f32.mrf.mxu1  ;;  %17759 = vst [vmem:[#allocation31_spill] sm:$0xff] %v15429_v57 }
 0x5f2   : > { %v2507_v2 = vpop.f32.mrf.mxu2  ;;  %v4476_v19 = vpop.f32.mrf.mxu3  ;;  %v2098_v29 = vadd.f32 %v2097_v18, %v17758_v46  ;;  %v5374_v46 = vshll.u32 %v12836_v37, 16 }
 0x5f3   : > { %v2680_v42 = vadd.f32 %v2507_v2, %v2096_v12 }
 0x5f5   : > { %v4649_v5 = vadd.f32 %v4476_v19, %v2680_v42  ;;  %v5963_v43 = vpop.f32.mrf.mxu0 }
 0x5f7   : > { %v15422_v6 = vadd.f32 %v5961_v47, %v4649_v5  ;;  %v5369_v47 = vsel %vm3280_vm3, %v5364_v52, %v5368_v22 }
 0x5f9   : > { %17757 = vst [vmem:[#allocation28_spill] sm:$0xff] %v15422_v6  ;;  %v2100_v25 = vpop.f32.mrf.mxu1 }
 0x5fa   : > { %v2509_v12 = vpop.f32.mrf.mxu2  ;;  %v4478_v21 = vpop.f32.mrf.mxu3 }
 0x5fb   : > { %v2681_v2 = vadd.f32 %v2509_v12, %v2098_v29  ;;  %v3887_v12 = vor.u32 %v3885_v41, %v3883_v31 }
 0x5fc   : > { %10351 = vmatmul.msk.bf16.gmra.mxu1 %vm829_vm2, %v15317_v50  ;;  %v3889_v50 = vshll.u32 %v15360_v36, 16 }
 0x5fd   : > { %v4650_v42 = vadd.f32 %v4478_v21, %v2681_v2  ;;  %v5966_v19 = vpop.f32.mrf.mxu0  ;;  %v17761_v21 = vld [vmem:[#allocation34_spill] sm:$0xff] }
 0x5fe   : > { %v2101_v29 = vadd.f32 %v2100_v25, %v17761_v21  ;;  %v3891_v2 = vrot.slane %v3889_v50, 1  ;;  %v5376_v21 = vrot.slane %v5374_v46, 1  ;;  %v3893_v50 = vshrl.u32 %v15360_v36, 16  ;;  %v17766_v46 = vld [vmem:[#allocation40_spill] sm:$0xff] }
 0x5ff   : > { %10440 = vmatmul.msk.bf16.gmra.mxu2 %vm829_vm2, %v15426_v14  ;;  %v15436_v61 = vadd.f32 %v5963_v43, %v4650_v42  ;;  %10525 = vmatmul.msk.bf16.gmra.mxu3 %vm829_vm2, %v15429_v57  ;;  %v17763_v42 = vld [vmem:[#allocation37_spill] sm:$0xff] }
 0x600   : > { %10606 = vmatmul.msk.bf16.gmra.mxu0 %vm829_vm2, %v5369_v47  ;;  %v5372_v47 = vor.u32 %v5370_v32, %v5368_v22  ;;  %v11811_v57 = vld [vmem:[%s13435_s24 + $0x280] sm:$0xff]   ;;  %v15450_v8 = vsel %vm3280_vm3, %v3887_v12, %v3891_v2  ;;  %v3895_v32 = vor.u32 %v3893_v50, %v3891_v2 }
 0x601   : > { %17760 = vst [vmem:[#allocation170_spill] sm:$0xff] %v15436_v61  ;;  %v2102_v59 = vpop.f32.mrf.mxu1  ;;  %v15454_v31 = vunpack.c.l.b16 %v11811_v57  ;;  %v13012_v50 = vld [vmem:[%s13435_s24 + $0x284] sm:$0xff]  }
 0x602   : > { %v2512_v18 = vpop.f32.mrf.mxu2  ;;  %v4481_v5 = vpop.f32.mrf.mxu3  ;;  %v2103_v25 = vadd.f32 %v2102_v59, %v17763_v42  ;;  %v5377_v0 = vsel %vm3280_vm3, %v5372_v47, %v5376_v21 }
 0x603   : > { %v2682_v58 = vadd.f32 %v2512_v18, %v2101_v29 }
 0x605   : > { %v4651_v33 = vadd.f32 %v4481_v5, %v2682_v58  ;;  %v5968_v43 = vpop.f32.mrf.mxu0 }
 0x607   : > { %v15445_v52 = vadd.f32 %v5966_v19, %v4651_v33  ;;  %v11720_v19 = vunpack.c.h.b16 %v15426_v14 }
 0x609   : > { %17762 = vst [vmem:[#allocation34_spill] sm:$0xff] %v15445_v52  ;;  %v2105_v6 = vpop.f32.mrf.mxu1 }
 0x60a   : > { %v2514_v29 = vpop.f32.mrf.mxu2  ;;  %v4483_v61 = vpop.f32.mrf.mxu3  ;;  %v15465_v6 = vpack.c.b16 %v15454_v31, %v11720_v19 }
 0x60b   : > { %v2683_v18 = vadd.f32 %v2514_v29, %v2103_v25 }
 0x60c   : > { %10352 = vmatmul.msk.bf16.gmra.mxu1 %vm829_vm2, %v15340_v11  ;;  %17765 = vst [vmem:[#allocation171_spill] sm:$0xff] %v15465_v6  ;;  %v3897_v11 = vshll.u32 %v15383_v53, 16 }
 0x60d   : > { %v4652_v58 = vadd.f32 %v4483_v61, %v2683_v18  ;;  %v5971_v5 = vpop.f32.mrf.mxu0 }
 0x60e   : > { %v3899_v42 = vrot.slane %v3897_v11, 1 }
 0x60f   : > { %10441 = vmatmul.msk.bf16.gmra.mxu2 %vm829_vm2, %v11811_v57  ;;  %v15459_v22 = vadd.f32 %v5968_v43, %v4652_v58  ;;  %10526 = vmatmul.msk.bf16.gmra.mxu3 %vm829_vm2, %v15450_v8  ;;  %v5378_v57 = vshrl.u32 %v12836_v37, 16  ;;  %v5382_v43 = vshll.u32 %v15465_v6, 16 }
 0x610   : > { %10607 = vmatmul.msk.bf16.gmra.mxu0 %vm829_vm2, %v5377_v0  ;;  %v11812_v0 = vld [vmem:[%s13435_s24 + $0x288] sm:$0xff]  }
 0x611   : > { %17764 = vst [vmem:[#allocation37_spill] sm:$0xff] %v15459_v22  ;;  %v2106_v41 = vpop.f32.mrf.mxu1  ;;  %v5380_v25 = vor.u32 %v5378_v57, %v5376_v21  ;;  %v5384_v47 = vrot.slane %v5382_v43, 1  ;;  %v17769_v21 = vld [vmem:[#allocation43_spill] sm:$0xff] }
 0x612   : > { %v2517_v61 = vpop.f32.mrf.mxu2  ;;  %v4486_v59 = vpop.f32.mrf.mxu3  ;;  %v2107_v12 = vadd.f32 %v2106_v41, %v17766_v46  ;;  %v3901_v46 = vshrl.u32 %v15383_v53, 16 }
 0x613   : > { %v15473_v59 = vsel %vm3280_vm3, %v3895_v32, %v3899_v42  ;;  %v5385_v37 = vsel %vm3280_vm3, %v5380_v25, %v5384_v47  ;;  %v5386_v25 = vshrl.u32 %v15465_v6, 16 }
 0x614   : > { %17767 = vst [vmem:[#allocation40_spill] sm:$0xff] %v15473_v59 }
 0x615   : > { %v5972_v33 = vpop.f32.mrf.mxu0 }
 0x619   : > { %v2109_v5 = vpop.f32.mrf.mxu1 }
 0x61a   : > { %v2518_v29 = vpop.f32.mrf.mxu2  ;;  %v4487_v58 = vpop.f32.mrf.mxu3  ;;  %v2110_v41 = vadd.f32 %v2109_v5, %v17769_v21 }
 0x61b   : > { %v2684_v18 = vadd.f32 %v2518_v29, %v2107_v12  ;;  %v5390_v29 = vshll.u32 %v13012_v50, 16 }
 0x61c   : > { %10353 = vmatmul.msk.bf16.gmra.mxu1 %vm829_vm2, %v15360_v36 }
 0x61d   : > { %v4653_v19 = vadd.f32 %v4487_v58, %v2684_v18  ;;  %v5975_v61 = vpop.f32.mrf.mxu0  ;;  %v3903_v58 = vor.u32 %v3901_v46, %v3899_v42  ;;  %v5392_v21 = vrot.slane %v5390_v29, 1  ;;  %v3909_v29 = vshrl.u32 %v15405_v30, 16 }
 0x61f   : > { %10442 = vmatmul.msk.bf16.gmra.mxu2 %vm829_vm2, %v11812_v0  ;;  %v15479_v2 = vadd.f32 %v5972_v33, %v4653_v19  ;;  %10527 = vmatmul.msk.bf16.gmra.mxu3 %vm829_vm2, %v15473_v59  ;;  %v3905_v33 = vshll.u32 %v15405_v30, 16  ;;  %v17771_v0 = vld [vmem:[#allocation46_spill] sm:$0xff] }
 0x620   : > { %10608 = vmatmul.msk.bf16.gmra.mxu0 %vm829_vm2, %v5385_v37  ;;  %v5388_v37 = vor.u32 %v5386_v25, %v5384_v47  ;;  %v17773_v47 = vld [vmem:[#allocation49_spill] sm:$0xff] }
 0x621   : > { %17768 = vst [vmem:[#allocation172_spill] sm:$0xff] %v15479_v2  ;;  %v2111_v32 = vpop.f32.mrf.mxu1  ;;  %v3907_v19 = vrot.slane %v3905_v33, 1 }
 0x622   : > { %v2521_v11 = vpop.f32.mrf.mxu2  ;;  %v4490_v43 = vpop.f32.mrf.mxu3  ;;  %v2112_v5 = vadd.f32 %v2111_v32, %v17771_v0  ;;  %v13013_v32 = vld [vmem:[%s13435_s24 + $0x28c] sm:$0xff]   ;;  %v5394_v0 = vshrl.u32 %v13012_v50, 16 }
 0x623   : > { %v2685_v57 = vadd.f32 %v2521_v11, %v2110_v41  ;;  %v15494_v59 = vsel %vm3280_vm3, %v3903_v58, %v3907_v19 }
 0x625   : > { %v4654_v36 = vadd.f32 %v4490_v43, %v2685_v57  ;;  %v5977_v12 = vpop.f32.mrf.mxu0  ;;  %v11813_v57 = vld [vmem:[%s13435_s24 + $0x290] sm:$0xff]  }
 0x627   : > { %v15489_v18 = vadd.f32 %v5975_v61, %v4654_v36  ;;  %v5393_v61 = vsel %vm3280_vm3, %v5388_v37, %v5392_v21 }
 0x629   : > { %17770 = vst [vmem:[#allocation43_spill] sm:$0xff] %v15489_v18  ;;  %v2114_v22 = vpop.f32.mrf.mxu1 }
 0x62a   : > { %v2523_v41 = vpop.f32.mrf.mxu2  ;;  %v4492_v2 = vpop.f32.mrf.mxu3 }
 0x62b   : > { %v2686_v11 = vadd.f32 %v2523_v41, %v2112_v5  ;;  %v5398_v5 = vshll.u32 %v13013_v32, 16  ;;  %v3911_v41 = vor.u32 %v3909_v29, %v3907_v19  ;;  %v15525_v19 = vpack.c.b16 %v15454_v31, %v15454_v31 }
 0x62c   : > { %10354 = vmatmul.msk.bf16.gmra.mxu1 %vm829_vm2, %v15383_v53 }
 0x62d   : > { %v4655_v43 = vadd.f32 %v4492_v2, %v2686_v11  ;;  %v5980_v52 = vpop.f32.mrf.mxu0  ;;  %v2115_v2 = vadd.f32 %v2114_v22, %v17773_v47  ;;  %v5400_v22 = vrot.slane %v5398_v5, 1  ;;  %v3921_v5 = vshll.u32 %v15525_v19, 16 }
 0x62f   : > { %10443 = vmatmul.msk.bf16.gmra.mxu2 %vm829_vm2, %v11813_v57  ;;  %v15500_v42 = vadd.f32 %v5977_v12, %v4655_v43  ;;  %10528 = vmatmul.msk.bf16.gmra.mxu3 %vm829_vm2, %v15494_v59  ;;  %v3913_v12 = vshll.u32 %v15426_v14, 16  ;;  %v5396_v43 = vor.u32 %v5394_v0, %v5392_v21 }
 0x630   : > { %10609 = vmatmul.msk.bf16.gmra.mxu0 %vm829_vm2, %v5393_v61 }
 0x631   : > { %17772 = vst [vmem:[#allocation46_spill] sm:$0xff] %v15500_v42  ;;  %v2116_v25 = vpop.f32.mrf.mxu1  ;;  %v3915_v11 = vrot.slane %v3913_v12, 1 }
 0x632   : > { %v2526_v46 = vpop.f32.mrf.mxu2  ;;  %v4495_v33 = vpop.f32.mrf.mxu3 }
 0x633   : > { %v2687_v36 = vadd.f32 %v2526_v46, %v2115_v2  ;;  %v11075_v2 = vld [vmem:[%s13435_s24 + $0x298] sm:$0xff]  ;;  %v15513_v25 = vsel %vm3280_vm3, %v3911_v41, %v3915_v11  ;;  %v5402_v41 = vshrl.u32 %v13013_v32, 16 }
 0x635   : > { %v4656_v53 = vadd.f32 %v4495_v33, %v2687_v36  ;;  %v5982_v58 = vpop.f32.mrf.mxu0  ;;  %v5401_v36 = vsel %vm3280_vm3, %v5396_v43, %v5400_v22  ;;  %v11732_v33 = vunpack.c.h.b16 %v11813_v57 }
 0x637   : > { %v15509_v37 = vadd.f32 %v5980_v52, %v4656_v53  ;;  %v17775_v52 = vld [vmem:[#allocation52_spill] sm:$0xff]  ;;  %v15527_v21 = vpack.c.b16 %v11732_v33, %v11732_v33 }
 0x638   : > { %17776 = vst [vmem:[#allocation52_spill] sm:$0xff] %v15525_v19 }
 0x639   : > { %17774 = vst [vmem:[#allocation49_spill] sm:$0xff] %v15509_v37  ;;  %v2118_v46 = vpop.f32.mrf.mxu1  ;;  %v5406_v43 = vshll.u32 %v15527_v21, 16 }
 0x63a   : > { %v2528_v61 = vpop.f32.mrf.mxu2  ;;  %v4497_v47 = vpop.f32.mrf.mxu3  ;;  %v2119_v50 = vadd.f32 %v2118_v46, %v17775_v52  ;;  %17777 = vst [vmem:[#allocation173_spill] sm:$0xff] %v15527_v21  ;;  %v3923_v46 = vrot.slane %v3921_v5, 1  ;;  %v12281_v5 = vld [vmem:[%s13435_s24] sm:$0xe] }
 0x63b   : > { %v17780_v47 = vld [vmem:[#allocation55_spill] sm:$0xff]  ;;  %v5408_v33 = vrot.slane %v5406_v43, 1 }
 0x63c   : > { %10355 = vmatmul.msk.bf16.gmra.mxu1 %vm829_vm2, %v15405_v30  ;;  %v3917_v30 = vshrl.u32 %v15426_v14, 16 }
 0x63d   : > { %v5984_v42 = vpop.f32.mrf.mxu0 }
 0x63e   : > { %v15534_v31 = vor.u32 %v3917_v30, %v3915_v11 }
 0x63f   : > { %10444 = vmatmul.msk.bf16.gmra.mxu2 %vm829_vm2, %v11075_v2  ;;  %10529 = vmatmul.msk.bf16.gmra.mxu3 %vm829_vm2, %v15513_v25 }
 0x640   : > { %10610 = vmatmul.msk.bf16.gmra.mxu0 %vm829_vm2, %v5401_v36  ;;  %17779 = vst [vmem:[#allocation175_spill] sm:$0xff] %v15534_v31  ;;  %v5404_v36 = vor.u32 %v5402_v41, %v5400_v22 }
 0x641   : > { %v2120_v58 = vpop.f32.mrf.mxu1 }
 0x642   : > { %v2530_v29 = vpop.f32.mrf.mxu2  ;;  %v4499_v53 = vpop.f32.mrf.mxu3  ;;  %v2121_v2 = vadd.f32 %v2120_v58, %v17780_v47  ;;  %v5409_v11 = vsel %vm3280_vm3, %v5404_v36, %v5408_v33  ;;  %v17782_v58 = vld [vmem:[#allocation58_spill] sm:$0xff] }
 0x643   : > { %v2688_v57 = vadd.f32 %v2530_v29, %v2119_v50  ;;  %v13075_v33 = vld [vmem:[%s13435_s24 + $0x8] sm:$0xff] }
 0x645   : > { %v4657_v12 = vadd.f32 %v4499_v53, %v2688_v57  ;;  %v5986_v0 = vpop.f32.mrf.mxu0  ;;  %v11076_v57 = vld [vmem:[%s13435_s24 + $0x2a0] sm:$0xff] }
 0x647   : > { %v15532_v61 = vadd.f32 %v5984_v42, %v4657_v12  ;;  %v3924_v42 = vsel %vm3280_vm3, %v15534_v31, %v3923_v46  ;;  %v12280_v12 = vld [vmem:[%s13435_s24] sm:$0xf0] }
 0x649   : > { %17778 = vst [vmem:[#allocation174_spill] sm:$0xff] %v15532_v61  ;;  %v2123_v53 = vpop.f32.mrf.mxu1 }
 0x64a   : > { %v2532_v52 = vpop.f32.mrf.mxu2  ;;  %v4501_v29 = vpop.f32.mrf.mxu3  ;;  %v2124_v30 = vadd.f32 %v2123_v53, %v17782_v58  ;;  %v15558_v58 = vld [vmem:[%s13435_s24 + $0x28] sm:$0xff]  }
 0x64b   : > { %v2689_v50 = vadd.f32 %v2532_v52, %v2121_v2  ;;  %v12282_v2 = vor.u32 %v12281_v5, %v12280_v12  ;;  %v6755_v52 = vrot.slane %v13075_v33, 1 }
 0x64c   : > { %10356 = vmatmul.msk.bf16.gmra.mxu1 %vm829_vm2, %v15426_v14 }
 0x64d   : > { %v4658_v19 = vadd.f32 %v4501_v29, %v2689_v50  ;;  %v5989_v32 = vpop.f32.mrf.mxu0  ;;  %v6754_v36 = vrot.slane %v12282_v2, 1  ;;  %v13076_v50 = vld [vmem:[%s13435_s24 + $0x14] sm:$0xff]  }
 0x64e   : > { %v7665_v29 = vrot.slane %v13076_v50, 1 }
 0x64f   : > { %10445 = vmatmul.msk.bf16.gmra.mxu2 %vm829_vm2, %v11076_v57  ;;  %v15544_v22 = vadd.f32 %v5986_v0, %v4658_v19  ;;  %10530 = vmatmul.msk.bf16.gmra.mxu3 %vm829_vm2, %v3924_v42  ;;  %v17784_v57 = vld [vmem:[#allocation61_spill] sm:$0xff]  ;;  %v6756_v2 = vsel %vm6753_vm4, %v6754_v36, %v6755_v52 }
 0x650   : > { %10611 = vmatmul.msk.bf16.gmra.mxu0 %vm829_vm2, %v5409_v11  ;;  %v13077_v42 = vld [vmem:[%s13435_s24 + $0x1c] sm:$0xff]  }
 0x651   : > { %17781 = vst [vmem:[#allocation55_spill] sm:$0xff] %v15544_v22  ;;  %v2125_v14 = vpop.f32.mrf.mxu1  ;;  %v7666_v11 = vrot.slane %v13077_v42, 1 }
 0x652   : > { %v2535_v41 = vpop.f32.mrf.mxu2  ;;  %v4504_v47 = vpop.f32.mrf.mxu3  ;;  %v2126_v53 = vadd.f32 %v2125_v14, %v17784_v57  ;;  %v17785_v57 = vld [vmem:[#allocation86_spill] sm:$0xff] }
 0x653   : > { %v2690_v43 = vadd.f32 %v2535_v41, %v2124_v30  ;;  %v17447_v30 = vrot.slane %v15558_v58, 1  ;;  %v13079_v41 = vld [vmem:[%s13435_s24 + $0x30] sm:$0xff]   ;;  %v7667_v14 = vsel %vm6753_vm4, %v7665_v29, %v7666_v11 }
 0x654   : > { %v6765_v12 = vrot.slane %v13079_v41, 1 }
 0x655   : > { %v4659_v19 = vadd.f32 %v4504_v47, %v2690_v43  ;;  %v5991_v0 = vpop.f32.mrf.mxu0 }
 0x656   : > { %v15567_v50 = vsel %vm6753_vm4, %v17447_v30, %v6765_v12 }
 0x657   : > { %v15551_v46 = vadd.f32 %v5989_v32, %v4659_v19 }
 0x659   : > { %17783 = vst [vmem:[#allocation58_spill] sm:$0xff] %v15551_v46  ;;  %v2128_v47 = vpop.f32.mrf.mxu1 }
 0x65a   : > { %v2537_v5 = vpop.f32.mrf.mxu2  ;;  %v4506_v32 = vpop.f32.mrf.mxu3 }
 0x65b   : > { %v2691_v43 = vadd.f32 %v2537_v5, %v2126_v53  ;;  %v13080_v5 = vld [vmem:[%s13435_s24 + $0x10] sm:$0xff]  }
 0x65c   : > { %10621 = vmatmul.msk.bf16.vlgmr.msra.gmra.mxu1 %vm829_vm2, %v17785_v57  ;;  %v13082_v57 = vld [vmem:[%s13435_s24 + $0x38] sm:$0xff]  }
 0x65d   : > { %v4660_v19 = vadd.f32 %v4506_v32, %v2691_v43  ;;  %v5994_v33 = vpop.f32.mrf.mxu0  ;;  %v6757_v43 = vrot.slane %v13080_v5, 1  ;;  %v17787_v32 = vld [vmem:[#allocation64_spill] sm:$0xff]  ;;  %v6767_v46 = vrot.slane %v13082_v57, 1  ;;  %v17788_v5 = vld [vmem:[#allocation91_spill] sm:$0xff] }
 0x65e   : > { %v13081_v33 = vld [vmem:[%s13435_s24 + $0x24] sm:$0xff]  }
 0x65f   : > { %10702 = vmatmul.msk.bf16.vlgmr.msra.gmra.mxu2 %vm829_vm2, %v6756_v2  ;;  %v15572_v53 = vadd.f32 %v5991_v0, %v4660_v19  ;;  %10783 = vmatmul.msk.bf16.vlgmr.msra.gmra.mxu3 %vm829_vm2, %v7667_v14  ;;  %v7668_v30 = vrot.slane %v13081_v33, 1  ;;  %v6758_v14 = vsel %vm6753_vm4, %v6755_v52, %v6757_v43  ;;  %v17790_v52 = vld [vmem:[#allocation67_spill] sm:$0xff] }
 0x660   : > { %10864 = vmatmul.msk.bf16.vlgmr.msra.gmra.mxu0 %vm829_vm2, %v15567_v50 }
 0x661   : > { %17786 = vst [vmem:[#allocation61_spill] sm:$0xff] %v15572_v53  ;;  %v2129_v42 = vpop.f32.mrf.mxu1 }
 0x662   : > { %v2540_v36 = vpop.f32.mrf.mxu2  ;;  %v4509_v29 = vpop.f32.mrf.mxu3  ;;  %v2130_v47 = vadd.f32 %v2129_v42, %v17787_v32 }
 0x663   : > { %v7669_v36 = vsel %vm6753_vm4, %v7666_v11, %v7668_v30  ;;  %v15584_v29 = vsel %vm6753_vm4, %v6765_v12, %v6767_v46 }
 0x665   : > { %v5995_v41 = vpop.f32.mrf.mxu0 }
 0x669   : > { %v2132_v53 = vpop.f32.mrf.mxu1 }
 0x66a   : > { %v2541_v2 = vpop.f32.mrf.mxu2  ;;  %v4510_v19 = vpop.f32.mrf.mxu3  ;;  %v2133_v32 = vadd.f32 %v2132_v53, %v17790_v52 }
 0x66b   : > { %v2692_v0 = vadd.f32 %v2541_v2, %v2130_v47 }
 0x66c   : > { %10622 = vmatmul.msk.bf16.gmra.mxu1 %vm829_vm2, %v17788_v5  ;;  %v13084_v5 = vld [vmem:[%s13435_s24 + $0x2c] sm:$0xff]  }
 0x66d   : > { %v4661_v22 = vadd.f32 %v4510_v19, %v2692_v0  ;;  %v5998_v21 = vpop.f32.mrf.mxu0  ;;  %v13083_v19 = vld [vmem:[%s13435_s24 + $0x18] sm:$0xff]  }
 0x66f   : > { %10703 = vmatmul.msk.bf16.gmra.mxu2 %vm829_vm2, %v6758_v14  ;;  %v15589_v42 = vadd.f32 %v5995_v41, %v4661_v22  ;;  %10784 = vmatmul.msk.bf16.gmra.mxu3 %vm829_vm2, %v7669_v36  ;;  %v6759_v14 = vrot.slane %v13083_v19, 1  ;;  %v17792_v22 = vld [vmem:[#allocation70_spill] sm:$0xff]  ;;  %v13085_v36 = vld [vmem:[%s13435_s24 + $0x40] sm:$0xff]  }
 0x670   : > { %10865 = vmatmul.msk.bf16.gmra.mxu0 %vm829_vm2, %v15584_v29  ;;  %v6769_v61 = vrot.slane %v13085_v36, 1  ;;  %v13087_v36 = vld [vmem:[%s13435_s24 + $0x34] sm:$0xff]  }
 0x671   : > { %17789 = vst [vmem:[#allocation86_spill] sm:$0xff] %v15589_v42  ;;  %v2134_v33 = vpop.f32.mrf.mxu1  ;;  %v7670_v42 = vrot.slane %v13084_v5, 1  ;;  %v6760_v52 = vsel %vm6753_vm4, %v6757_v43, %v6759_v14 }
 0x672   : > { %v2544_v11 = vpop.f32.mrf.mxu2  ;;  %v4513_v12 = vpop.f32.mrf.mxu3  ;;  %v2135_v41 = vadd.f32 %v2134_v33, %v17792_v22 }
 0x673   : > { %v2693_v47 = vadd.f32 %v2544_v11, %v2133_v32 }
 0x675   : > { %v4662_v57 = vadd.f32 %v4513_v12, %v2693_v47  ;;  %v6000_v2 = vpop.f32.mrf.mxu0  ;;  %v15604_v47 = vsel %vm6753_vm4, %v6767_v46, %v6769_v61  ;;  %v17793_v12 = vld [vmem:[#allocation98_spill] sm:$0xff] }
 0x677   : > { %v15595_v0 = vadd.f32 %v5998_v21, %v4662_v57  ;;  %v7671_v21 = vsel %vm6753_vm4, %v7668_v30, %v7670_v42 }
 0x679   : > { %17791 = vst [vmem:[#allocation64_spill] sm:$0xff] %v15595_v0  ;;  %v2137_v53 = vpop.f32.mrf.mxu1 }
 0x67a   : > { %v2546_v37 = vpop.f32.mrf.mxu2  ;;  %v4515_v6 = vpop.f32.mrf.mxu3 }
 0x67b   : > { %v2694_v18 = vadd.f32 %v2546_v37, %v2135_v41  ;;  %v13086_v41 = vld [vmem:[%s13435_s24 + $0x20] sm:$0xff]  }
 0x67c   : > { %10623 = vmatmul.msk.bf16.gmra.mxu1 %vm829_vm2, %v17793_v12  ;;  %v6761_v5 = vrot.slane %v13086_v41, 1  ;;  %v17799_v41 = vld [vmem:[#allocation79_spill] sm:$0xff] }
 0x67d   : > { %v4663_v32 = vadd.f32 %v4515_v6, %v2694_v18  ;;  %v6003_v11 = vpop.f32.mrf.mxu0  ;;  %v17795_v6 = vld [vmem:[#allocation73_spill] sm:$0xff] }
 0x67e   : > { %v2138_v18 = vadd.f32 %v2137_v53, %v17795_v6  ;;  %v6762_v0 = vsel %vm6753_vm4, %v6759_v14, %v6761_v5 }
 0x67f   : > { %10704 = vmatmul.msk.bf16.gmra.mxu2 %vm829_vm2, %v6760_v52  ;;  %v15609_v37 = vadd.f32 %v6000_v2, %v4663_v32  ;;  %10785 = vmatmul.msk.bf16.gmra.mxu3 %vm829_vm2, %v7671_v21  ;;  %v7672_v2 = vrot.slane %v13087_v36, 1  ;;  %v13088_v52 = vld [vmem:[%s13435_s24 + $0x48] sm:$0xff]  }
 0x680   : > { %10866 = vmatmul.msk.bf16.gmra.mxu0 %vm829_vm2, %v15604_v47  ;;  %v6771_v32 = vrot.slane %v13088_v52, 1  ;;  %v13089_v52 = vld [vmem:[%s13435_s24 + $0x3c] sm:$0xff]  }
 0x681   : > { %17794 = vst [vmem:[#allocation91_spill] sm:$0xff] %v15609_v37  ;;  %v2139_v33 = vpop.f32.mrf.mxu1  ;;  %v7673_v6 = vsel %vm6753_vm4, %v7670_v42, %v7672_v2 }
 0x682   : > { %v2549_v30 = vpop.f32.mrf.mxu2  ;;  %v4518_v46 = vpop.f32.mrf.mxu3 }
 0x683   : > { %v2695_v43 = vadd.f32 %v2549_v30, %v2138_v18  ;;  %v15623_v18 = vsel %vm6753_vm4, %v6769_v61, %v6771_v32  ;;  %v17798_v30 = vld [vmem:[#allocation76_spill] sm:$0xff] }
 0x685   : > { %v4664_v57 = vadd.f32 %v4518_v46, %v2695_v43  ;;  %v6005_v19 = vpop.f32.mrf.mxu0 }
 0x687   : > { %v15615_v22 = vadd.f32 %v6003_v11, %v4664_v57  ;;  %v17797_v11 = vld [vmem:[#allocation101_spill] sm:$0xff] }
 0x689   : > { %17796 = vst [vmem:[#allocation67_spill] sm:$0xff] %v15615_v22  ;;  %v2141_v37 = vpop.f32.mrf.mxu1 }
 0x68a   : > { %v2551_v21 = vpop.f32.mrf.mxu2  ;;  %v4520_v12 = vpop.f32.mrf.mxu3  ;;  %v2142_v14 = vadd.f32 %v2141_v37, %v17798_v30  ;;  %v17800_v37 = vrot.slane %v15558_v58, 1  ;;  %v17801_v58 = vld [vmem:[#allocation82_spill] sm:$0xff] }
 0x68b   : > { %v7674_v21 = vrot.slane %v13089_v52, 1 }
 0x68c   : > { %10624 = vmatmul.msk.bf16.gmra.mxu1 %vm829_vm2, %v17797_v11  ;;  %v6764_v30 = vsel %vm6753_vm4, %v6761_v5, %v17800_v37 }
 0x68d   : > { %v6007_v53 = vpop.f32.mrf.mxu0 }
 0x68f   : > { %10705 = vmatmul.msk.bf16.gmra.mxu2 %vm829_vm2, %v6762_v0  ;;  %10786 = vmatmul.msk.bf16.gmra.mxu3 %vm829_vm2, %v7673_v6  ;;  %v13090_v0 = vld [vmem:[%s13435_s24 + $0x50] sm:$0xff]  }
 0x690   : > { %10867 = vmatmul.msk.bf16.gmra.mxu0 %vm829_vm2, %v15623_v18  ;;  %v6773_v12 = vrot.slane %v13090_v0, 1  ;;  %v13091_v0 = vld [vmem:[%s13435_s24 + $0x44] sm:$0xff]  }
 0x691   : > { %v2143_v42 = vpop.f32.mrf.mxu1 }
 0x692   : > { %v2553_v43 = vpop.f32.mrf.mxu2  ;;  %v4522_v33 = vpop.f32.mrf.mxu3  ;;  %v2144_v36 = vadd.f32 %v2143_v42, %v17799_v41 }
 0x693   : > { %v2696_v46 = vadd.f32 %v2553_v43, %v2142_v14 }
 0x695   : > { %v4665_v57 = vadd.f32 %v4522_v33, %v2696_v46  ;;  %v6009_v61 = vpop.f32.mrf.mxu0  ;;  %v7675_v46 = vsel %vm6753_vm4, %v7672_v2, %v7674_v21 }
 0x697   : > { %v15632_v19 = vadd.f32 %v6007_v53, %v4665_v57  ;;  %v15642_v53 = vsel %vm6753_vm4, %v6771_v32, %v6773_v12 }
 0x699   : > { %v2146_v31 = vpop.f32.mrf.mxu1 }
 0x69a   : > { %v2555_v6 = vpop.f32.mrf.mxu2  ;;  %v4524_v22 = vpop.f32.mrf.mxu3 }
 0x69b   : > { %v2697_v11 = vadd.f32 %v2555_v6, %v2144_v36  ;;  %v13092_v6 = vld [vmem:[%s13435_s24 + $0x58] sm:$0xff]  }
 0x69c   : > { %10625 = vmatmul.msk.bf16.gmra.mxu1 %vm829_vm2, %v14012_v38  ;;  %v17802_v38 = vld [vmem:[#allocation85_spill] sm:$0xff] }
 0x69d   : > { %v4666_v14 = vadd.f32 %v4524_v22, %v2697_v11  ;;  %v6012_v43 = vpop.f32.mrf.mxu0  ;;  %v2147_v22 = vadd.f32 %v2146_v31, %v17801_v58  ;;  %v6775_v11 = vrot.slane %v13092_v6, 1 }
 0x69f   : > { %10706 = vmatmul.msk.bf16.gmra.mxu2 %vm829_vm2, %v6764_v30  ;;  %v15647_v33 = vadd.f32 %v6009_v61, %v4666_v14  ;;  %10787 = vmatmul.msk.bf16.gmra.mxu3 %vm829_vm2, %v7675_v46  ;;  %v7676_v61 = vrot.slane %v13091_v0, 1  ;;  %v13094_v0 = vld [vmem:[%s13435_s24 + $0x60] sm:$0xff]  }
 0x6a0   : > { %10868 = vmatmul.msk.bf16.gmra.mxu0 %vm829_vm2, %v15642_v53 }
 0x6a1   : > { %v2148_v32 = vpop.f32.mrf.mxu1 }
 0x6a2   : > { %v2558_v5 = vpop.f32.mrf.mxu2  ;;  %v4527_v42 = vpop.f32.mrf.mxu3  ;;  %v2149_v52 = vadd.f32 %v2148_v32, %v17802_v38  ;;  %v13093_v38 = vld [vmem:[%s13435_s24 + $0x4c] sm:$0xff]  }
 0x6a3   : > { %v2698_v2 = vadd.f32 %v2558_v5, %v2147_v22  ;;  %v7677_v22 = vsel %vm6753_vm4, %v7674_v21, %v7676_v61  ;;  %v15660_v5 = vsel %vm6753_vm4, %v6773_v12, %v6775_v11 }
 0x6a5   : > { %v4667_v57 = vadd.f32 %v4527_v42, %v2698_v2  ;;  %v6014_v41 = vpop.f32.mrf.mxu0 }
 0x6a7   : > { %v15653_v36 = vadd.f32 %v6012_v43, %v4667_v57  ;;  %v17804_v57 = vld [vmem:[#allocation89_spill] sm:$0xff] }
 0x6a9   : > { %v2151_v46 = vpop.f32.mrf.mxu1 }
 0x6aa   : > { %v2560_v37 = vpop.f32.mrf.mxu2  ;;  %v4529_v14 = vpop.f32.mrf.mxu3 }
 0x6ab   : > { %v2699_v30 = vadd.f32 %v2560_v37, %v2149_v52  ;;  %v7678_v52 = vrot.slane %v13093_v38, 1  ;;  %v17807_v38 = vld [vmem:[#allocation96_spill] sm:$0xff] }
 0x6ac   : > { %10626 = vmatmul.msk.bf16.gmra.mxu1 %vm829_vm2, %v14035_v39  ;;  %v6777_v39 = vrot.slane %v13094_v0, 1 }
 0x6ad   : > { %v4668_v31 = vadd.f32 %v4529_v14, %v2699_v30  ;;  %v6017_v58 = vpop.f32.mrf.mxu0  ;;  %v7679_v46 = vsel %vm6753_vm4, %v7676_v61, %v7678_v52 }
 0x6af   : > { %10707 = vmatmul.msk.bf16.gmra.mxu2 %vm829_vm2, %v15567_v50  ;;  %v15666_v43 = vadd.f32 %v6014_v41, %v4668_v31  ;;  %10788 = vmatmul.msk.bf16.gmra.mxu3 %vm829_vm2, %v7677_v22  ;;  %v15676_v31 = vsel %vm6753_vm4, %v6775_v11, %v6777_v39  ;;  %v17806_v22 = vld [vmem:[#allocation93_spill] sm:$0xff] }
 0x6b0   : > { %10869 = vmatmul.msk.bf16.gmra.mxu0 %vm829_vm2, %v15660_v5 }
 0x6b1   : > { %17803 = vst [vmem:[#allocation70_spill] sm:$0xff] %v15666_v43  ;;  %v2152_v32 = vpop.f32.mrf.mxu1 }
 0x6b2   : > { %v2563_v2 = vpop.f32.mrf.mxu2  ;;  %v4532_v42 = vpop.f32.mrf.mxu3  ;;  %v2153_v12 = vadd.f32 %v2152_v32, %v17804_v57 }
 0x6b5   : > { %v6018_v21 = vpop.f32.mrf.mxu0 }
 0x6b9   : > { %v2155_v41 = vpop.f32.mrf.mxu1 }
 0x6ba   : > { %v2564_v6 = vpop.f32.mrf.mxu2  ;;  %v4533_v50 = vpop.f32.mrf.mxu3  ;;  %v2156_v61 = vadd.f32 %v2155_v41, %v17806_v22 }
 0x6bb   : > { %v2700_v37 = vadd.f32 %v2564_v6, %v2153_v12  ;;  %v13096_v6 = vld [vmem:[%s13435_s24 + $0x68] sm:$0xff]  }
 0x6bc   : > { %10627 = vmatmul.msk.bf16.gmra.mxu1 %vm829_vm2, %v14055_v9 }
 0x6bd   : > { %v4669_v30 = vadd.f32 %v4533_v50, %v2700_v37  ;;  %v6021_v14 = vpop.f32.mrf.mxu0  ;;  %v6779_v37 = vrot.slane %v13096_v6, 1 }
 0x6bf   : > { %10708 = vmatmul.msk.bf16.gmra.mxu2 %vm829_vm2, %v15584_v29  ;;  %v15682_v58 = vadd.f32 %v6018_v21, %v4669_v30  ;;  %10789 = vmatmul.msk.bf16.gmra.mxu3 %vm829_vm2, %v7679_v46  ;;  %v13095_v29 = vld [vmem:[%s13435_s24 + $0x54] sm:$0xff]  }
 0x6c0   : > { %10870 = vmatmul.msk.bf16.gmra.mxu0 %vm829_vm2, %v15676_v31  ;;  %v7680_v21 = vrot.slane %v13095_v29, 1 }
 0x6c1   : > { %17805 = vst [vmem:[#allocation98_spill] sm:$0xff] %v15682_v58  ;;  %v2157_v32 = vpop.f32.mrf.mxu1 }
 0x6c2   : > { %v2567_v2 = vpop.f32.mrf.mxu2  ;;  %v4536_v11 = vpop.f32.mrf.mxu3  ;;  %v2158_v0 = vadd.f32 %v2157_v32, %v17807_v38  ;;  %v7681_v22 = vsel %vm6753_vm4, %v7678_v52, %v7680_v21 }
 0x6c3   : > { %v2701_v42 = vadd.f32 %v2567_v2, %v2156_v61  ;;  %v15695_v61 = vsel %vm6753_vm4, %v6777_v39, %v6779_v37  ;;  %v17808_v2 = vld [vmem:[#allocation100_spill] sm:$0xff] }
 0x6c5   : > { %v4670_v57 = vadd.f32 %v4536_v11, %v2701_v42  ;;  %v6023_v12 = vpop.f32.mrf.mxu0 }
 0x6c7   : > { %v15688_v9 = vadd.f32 %v6021_v14, %v4670_v57 }
 0x6c9   : > { %v2160_v58 = vpop.f32.mrf.mxu1 }
 0x6ca   : > { %v2569_v50 = vpop.f32.mrf.mxu2  ;;  %v4538_v46 = vpop.f32.mrf.mxu3  ;;  %v2161_v42 = vadd.f32 %v2160_v58, %v17808_v2 }
 0x6cb   : > { %v2702_v30 = vadd.f32 %v2569_v50, %v2158_v0 }
 0x6cc   : > { %10628 = vmatmul.msk.bf16.gmra.mxu1 %vm829_vm2, %v14078_v26  ;;  %v13097_v26 = vld [vmem:[%s13435_s24 + $0x5c] sm:$0xff]  }
 0x6cd   : > { %v4671_v43 = vadd.f32 %v4538_v46, %v2702_v30  ;;  %v6026_v41 = vpop.f32.mrf.mxu0  ;;  %v7682_v29 = vrot.slane %v13097_v26, 1  ;;  %v13100_v26 = vld [vmem:[%s13435_s24 + $0x78] sm:$0xff]  }
 0x6cf   : > { %10709 = vmatmul.msk.bf16.gmra.mxu2 %vm829_vm2, %v15604_v47  ;;  %v15701_v14 = vadd.f32 %v6023_v12, %v4671_v43  ;;  %10790 = vmatmul.msk.bf16.gmra.mxu3 %vm829_vm2, %v7681_v22  ;;  %v13098_v47 = vld [vmem:[%s13435_s24 + $0x70] sm:$0xff]   ;;  %v7683_v46 = vsel %vm6753_vm4, %v7680_v21, %v7682_v29 }
 0x6d0   : > { %10871 = vmatmul.msk.bf16.gmra.mxu0 %vm829_vm2, %v15695_v61  ;;  %v6781_v43 = vrot.slane %v13098_v47, 1  ;;  %v6783_v47 = vrot.slane %v13100_v26, 1 }
 0x6d1   : > { %v2162_v32 = vpop.f32.mrf.mxu1 }
 0x6d2   : > { %v2572_v52 = vpop.f32.mrf.mxu2  ;;  %v4541_v39 = vpop.f32.mrf.mxu3  ;;  %v15713_v58 = vsel %vm6753_vm4, %v6779_v37, %v6781_v43 }
 0x6d3   : > { %v2703_v11 = vadd.f32 %v2572_v52, %v2161_v42 }
 0x6d5   : > { %v4672_v57 = vadd.f32 %v4541_v39, %v2703_v11  ;;  %v6028_v38 = vpop.f32.mrf.mxu0  ;;  %v15731_v11 = vld [vmem:[%s17394_s3] ss:$0 sm:$0xff]  ;;  %v13099_v39 = vld [vmem:[%s13435_s24 + $0x64] sm:$0xff]  }
 0x6d7   : > { %v15707_v0 = vadd.f32 %v6026_v41, %v4672_v57  ;;  %v17809_v57 = vld [vmem:[#allocation102_spill] sm:$0xff] }
 0x6d9   : > { %v6251_v50 = vpop.f32.mrf.mxu1 }
 0x6da   : > { %v2574_v12 = vpop.f32.mrf.mxu2  ;;  %v4543_v6 = vpop.f32.mrf.mxu3  ;;  %v6619_v41 = vadd.f32 %v6251_v50, %v14005_v63  ;;  %v7684_v63 = vrot.slane %v13099_v39, 1 }
 0x6dc   : > { %10629 = vmatmul.msk.bf16.gmra.mxu1 %vm829_vm2, %v14100_v51  ;;  %v15726_v51 = vld [vmem:[%s17393_s2] ss:$0 sm:$0xff] }
 0x6dd   : > { %v8618_v30 = vpop.f32.mrf.mxu0 }
 0x6df   : > { %10710 = vmatmul.msk.bf16.gmra.mxu2 %vm829_vm2, %v15623_v18  ;;  %10791 = vmatmul.msk.bf16.gmra.mxu3 %vm829_vm2, %v7683_v46 }
 0x6e0   : > { %10872 = vmatmul.msk.bf16.gmra.mxu0 %vm829_vm2, %v15713_v58 }
 0x6e1   : > { %v6253_v37 = vpop.f32.mrf.mxu1 }
 0x6e2   : > { %v7167_v21 = vpop.f32.mrf.mxu2  ;;  %v8078_v2 = vpop.f32.mrf.mxu3  ;;  %v6620_v38 = vadd.f32 %v6253_v37, %v17809_v57 }
 0x6e3   : > { %v7535_v22 = vadd.f32 %v7167_v21, %v6619_v41  ;;  %v7685_v41 = vsel %vm6753_vm4, %v7682_v29, %v7684_v63 }
 0x6e5   : > { %v8446_v42 = vadd.f32 %v8078_v2, %v7535_v22  ;;  %v8620_v18 = vpop.f32.mrf.mxu0 }
 0x6e7   : > { %v8986_v52 = vadd.f32 %v8618_v30, %v8446_v42  ;;  %v15743_v42 = vsel %vm6753_vm4, %v6781_v43, %v6783_v47 }
 0x6e9   : > { %v9118_v32 = vmul.f32 %v15726_v51, %v8986_v52  ;;  %v6256_v30 = vpop.f32.mrf.mxu1 }
 0x6ea   : > { %v7169_v12 = vpop.f32.mrf.mxu2  ;;  %v8080_v46 = vpop.f32.mrf.mxu3  ;;  %v6621_v43 = vadd.f32 %v6256_v30, %v14028_v49 }
 0x6eb   : > { %v9250_v6 = vadd.f32 %v15731_v11, %v9118_v32  ;;  %v7536_v50 = vadd.f32 %v7169_v12, %v6620_v38 }
 0x6ec   : > { %10630 = vmatmul.msk.bf16.gmra.mxu1 %vm829_vm2, %v14121_v7 }
 0x6ed   : > { %vm9378_vm5 = vcmp.ge.f32.partialorder %v9250_v6, 0.0  ;;  %v9506_v21 = vmul.f32 0.1, %v9250_v6  ;;  %v8447_v22 = vadd.f32 %v8080_v46, %v7536_v50  ;;  %v8623_v2 = vpop.f32.mrf.mxu0  ;;  %v13101_v46 = vld [vmem:[%s13435_s24 + $0x6c] sm:$0xff]  }
 0x6ee   : > { %v7686_v30 = vrot.slane %v13101_v46, 1 }
 0x6ef   : > { %v9634_v37 = vsel %vm9378_vm5, %v9250_v6, %v9506_v21  ;;  %v8987_v52 = vadd.f32 %v8620_v18, %v8447_v22  ;;  %10711 = vmatmul.msk.bf16.gmra.mxu2 %vm829_vm2, %v15642_v53  ;;  %10792 = vmatmul.msk.bf16.gmra.mxu3 %vm829_vm2, %v7685_v41  ;;  %v17810_v21 = vld [vmem:[#allocation103_spill] sm:$0xff] }
 0x6f0   : > { %v9762_v39 = vpack.c.bf16 %v9634_v37, %v9634_v37  ;;  %10873 = vmatmul.msk.bf16.gmra.mxu0 %vm829_vm2, %v15743_v42  ;;  %v13102_v37 = vld [vmem:[%s13435_s24 + $0x80] sm:$0xff]  }
 0x6f1   : > { %v9119_v29 = vmul.f32 %v15726_v51, %v8987_v52  ;;  %v6258_v57 = vpop.f32.mrf.mxu1  ;;  %v6785_v52 = vrot.slane %v13102_v37, 1 }
 0x6f2   : > { %9767 = vst.msk [vmem:[%s15754_s22] sm:$0xf] %vm9766_vm6, %v9762_v39  ;;  %v7172_v7 = vpop.f32.mrf.mxu2  ;;  %v8083_v32 = vpop.f32.mrf.mxu3  ;;  %v6622_v22 = vadd.f32 %v6258_v57, %v17810_v21 }
 0x6f3   : > { %v9251_v53 = vadd.f32 %v15731_v11, %v9119_v29  ;;  %v7537_v18 = vadd.f32 %v7172_v7, %v6621_v43 }
 0x6f5   : > { %vm9379_vm7 = vcmp.ge.f32.partialorder %v9251_v53, 0.0  ;;  %v9507_v38 = vmul.f32 0.1, %v9251_v53  ;;  %v8448_v26 = vadd.f32 %v8083_v32, %v7537_v18  ;;  %v8625_v12 = vpop.f32.mrf.mxu0 }
 0x6f7   : > { %v9635_v6 = vsel %vm9379_vm7, %v9251_v53, %v9507_v38  ;;  %v8988_v50 = vadd.f32 %v8623_v2, %v8448_v26  ;;  %v7687_v2 = vsel %vm6753_vm4, %v7684_v63, %v7686_v30  ;;  %v15768_v26 = vsel %vm6753_vm4, %v6783_v47, %v6785_v52 }
 0x6f8   : > { %v9763_v49 = vpack.c.bf16 %v9635_v6, %v9635_v6 }
 0x6f9   : > { %v9120_v41 = vmul.f32 %v15726_v51, %v8988_v50  ;;  %v6261_v18 = vpop.f32.mrf.mxu1 }
 0x6fa   : > { %9768 = vst.msk [vmem:[%s15754_s22 + $0x4] sm:$0xf] %vm9766_vm6, %v9763_v49  ;;  %v7174_v39 = vpop.f32.mrf.mxu2  ;;  %v8085_v7 = vpop.f32.mrf.mxu3 }
 0x6fb   : > { %v9252_v29 = vadd.f32 %v15731_v11, %v9120_v41  ;;  %v7538_v43 = vadd.f32 %v7174_v39, %v6622_v22  ;;  %v17811_v22 = vld [vmem:[#allocation104_spill] sm:$0xff] }
 0x6fc   : > { %10631 = vmatmul.msk.bf16.gmra.mxu1 %vm829_vm2, %v14144_v23  ;;  %v13103_v39 = vld [vmem:[%s13435_s24 + $0x74] sm:$0xff]  }
 0x6fd   : > { %vm9380_vm8 = vcmp.ge.f32.partialorder %v9252_v29, 0.0  ;;  %v9508_v53 = vmul.f32 0.1, %v9252_v29  ;;  %v8449_v32 = vadd.f32 %v8085_v7, %v7538_v43  ;;  %v8628_v38 = vpop.f32.mrf.mxu0  ;;  %v13104_v43 = vld [vmem:[%s13435_s24 + $0x88] sm:$0xff]  }
 0x6fe   : > { %v6787_v7 = vrot.slane %v13104_v43, 1 }
 0x6ff   : > { %v9636_v57 = vsel %vm9380_vm8, %v9252_v29, %v9508_v53  ;;  %v8989_v6 = vadd.f32 %v8625_v12, %v8449_v32  ;;  %10712 = vmatmul.msk.bf16.gmra.mxu2 %vm829_vm2, %v15660_v5  ;;  %10793 = vmatmul.msk.bf16.gmra.mxu3 %vm829_vm2, %v7687_v2  ;;  %v7688_v29 = vrot.slane %v13103_v39, 1 }
 0x700   : > { %v9764_v50 = vpack.c.bf16 %v9636_v57, %v9636_v57  ;;  %10874 = vmatmul.msk.bf16.gmra.mxu0 %vm829_vm2, %v15768_v26 }
 0x701   : > { %v9121_v63 = vmul.f32 %v15726_v51, %v8989_v6  ;;  %v6262_v49 = vpop.f32.mrf.mxu1  ;;  %v7689_v6 = vsel %vm6753_vm4, %v7686_v30, %v7688_v29 }
 0x702   : > { %9769 = vst.msk [vmem:[%s15754_s22 + $0x8] sm:$0xf] %vm9766_vm6, %v9764_v50  ;;  %v7177_v47 = vpop.f32.mrf.mxu2  ;;  %v8088_v23 = vpop.f32.mrf.mxu3  ;;  %v6623_v37 = vadd.f32 %v6262_v49, %v17811_v22  ;;  %v15788_v50 = vsel %vm6753_vm4, %v6785_v52, %v6787_v7 }
 0x703   : > { %v9253_v12 = vadd.f32 %v15731_v11, %v9121_v63 }
 0x705   : > { %vm9381_vm9 = vcmp.ge.f32.partialorder %v9253_v12, 0.0  ;;  %v9509_v5 = vmul.f32 0.1, %v9253_v12  ;;  %v8629_v46 = vpop.f32.mrf.mxu0 }
 0x707   : > { %v9637_v41 = vsel %vm9381_vm9, %v9253_v12, %v9509_v5 }
 0x708   : > { %v9765_v21 = vpack.c.bf16 %v9637_v41, %v9637_v41 }
 0x709   : > { %v6265_v32 = vpop.f32.mrf.mxu1 }
 0x70a   : > { %9770 = vst.msk [vmem:[%s15754_s22 + $0xc] sm:$0xf] %vm9766_vm6, %v9765_v21  ;;  %v7178_v18 = vpop.f32.mrf.mxu2  ;;  %v8089_v53 = vpop.f32.mrf.mxu3  ;;  %v6624_v30 = vadd.f32 %v6265_v32, %v14071_v4  ;;  %v17812_v4 = vld [vmem:[#allocation105_spill] sm:$0xff] }
 0x70b   : > { %v7539_v2 = vadd.f32 %v7178_v18, %v6623_v37  ;;  %v13105_v37 = vld [vmem:[%s13435_s24 + $0x7c] sm:$0xff]  }
 0x70c   : > { %10632 = vmatmul.msk.bf16.gmra.mxu1 %vm829_vm2, %v14164_v44  ;;  %v7690_v39 = vrot.slane %v13105_v37, 1 }
 0x70d   : > { %v8450_v38 = vadd.f32 %v8089_v53, %v7539_v2  ;;  %v8632_v57 = vpop.f32.mrf.mxu0  ;;  %v13106_v2 = vld [vmem:[%s13435_s24 + $0x90] sm:$0xff]  }
 0x70e   : > { %v6789_v53 = vrot.slane %v13106_v2, 1 }
 0x70f   : > { %v8990_v63 = vadd.f32 %v8629_v46, %v8450_v38  ;;  %10713 = vmatmul.msk.bf16.gmra.mxu2 %vm829_vm2, %v15676_v31  ;;  %10794 = vmatmul.msk.bf16.gmra.mxu3 %vm829_vm2, %v7689_v6 }
 0x710   : > { %10875 = vmatmul.msk.bf16.gmra.mxu0 %vm829_vm2, %v15788_v50 }
 0x711   : > { %v9122_v47 = vmul.f32 %v15726_v51, %v8990_v63  ;;  %v6267_v49 = vpop.f32.mrf.mxu1 }
 0x712   : > { %v7181_v12 = vpop.f32.mrf.mxu2  ;;  %v8092_v44 = vpop.f32.mrf.mxu3  ;;  %v6625_v18 = vadd.f32 %v6267_v49, %v17812_v4 }
 0x713   : > { %v9254_v52 = vadd.f32 %v15731_v11, %v9122_v47  ;;  %v7540_v23 = vadd.f32 %v7181_v12, %v6624_v30 }
 0x715   : > { %vm9382_vm10 = vcmp.ge.f32.partialorder %v9254_v52, 0.0  ;;  %v9510_v31 = vmul.f32 0.1, %v9254_v52  ;;  %v8451_v5 = vadd.f32 %v8092_v44, %v7540_v23  ;;  %v8634_v46 = vpop.f32.mrf.mxu0  ;;  %v15809_v23 = vsel %vm6753_vm4, %v6787_v7, %v6789_v53 }
 0x717   : > { %v9638_v41 = vsel %vm9382_vm10, %v9254_v52, %v9510_v31  ;;  %v8991_v21 = vadd.f32 %v8632_v57, %v8451_v5  ;;  %v7691_v57 = vsel %vm6753_vm4, %v7688_v29, %v7690_v39  ;;  %v17813_v5 = vld [vmem:[#allocation106_spill] sm:$0xff] }
 0x718   : > { %v9771_v22 = vpack.c.bf16 %v9638_v41, %v9638_v41 }
 0x719   : > { %v9123_v43 = vmul.f32 %v15726_v51, %v8991_v21  ;;  %v6270_v47 = vpop.f32.mrf.mxu1 }
 0x71a   : > { %10944 = vst.msk [vmem:[%s15754_s22 + $0x10] sm:$0xf] %vm9766_vm6, %v9771_v22  ;;  %v7183_v32 = vpop.f32.mrf.mxu2  ;;  %v8094_v63 = vpop.f32.mrf.mxu3  ;;  %v6626_v7 = vadd.f32 %v6270_v47, %v17813_v5 }
 0x71b   : > { %v9255_v38 = vadd.f32 %v15731_v11, %v9123_v43  ;;  %v7541_v6 = vadd.f32 %v7183_v32, %v6625_v18 }
 0x71c   : > { %10633 = vmatmul.msk.bf16.gmra.mxu1 %vm829_vm2, %v14187_v48 }
 0x71d   : > { %vm9383_vm11 = vcmp.ge.f32.partialorder %v9255_v38, 0.0  ;;  %v9511_v30 = vmul.f32 0.1, %v9255_v38  ;;  %v8452_v12 = vadd.f32 %v8094_v63, %v7541_v6  ;;  %v8637_v52 = vpop.f32.mrf.mxu0  ;;  %v13108_v63 = vld [vmem:[%s13435_s24 + $0x98] sm:$0xff]  }
 0x71e   : > { %v6791_v47 = vrot.slane %v13108_v63, 1 }
 0x71f   : > { %v9639_v44 = vsel %vm9383_vm11, %v9255_v38, %v9511_v30  ;;  %v8992_v49 = vadd.f32 %v8634_v46, %v8452_v12  ;;  %10714 = vmatmul.msk.bf16.gmra.mxu2 %vm829_vm2, %v15695_v61  ;;  %10795 = vmatmul.msk.bf16.gmra.mxu3 %vm829_vm2, %v7691_v57  ;;  %v13107_v38 = vld [vmem:[%s13435_s24 + $0x84] sm:$0xff]  }
 0x720   : > { %v9772_v31 = vpack.c.bf16 %v9639_v44, %v9639_v44  ;;  %10876 = vmatmul.msk.bf16.gmra.mxu0 %vm829_vm2, %v15809_v23  ;;  %v7692_v6 = vrot.slane %v13107_v38, 1 }
 0x721   : > { %v9124_v29 = vmul.f32 %v15726_v51, %v8992_v49  ;;  %v6272_v21 = vpop.f32.mrf.mxu1 }
 0x722   : > { %10945 = vst.msk [vmem:[%s15754_s22 + $0x14] sm:$0xf] %vm9766_vm6, %v9772_v31  ;;  %v7186_v46 = vpop.f32.mrf.mxu2  ;;  %v8097_v61 = vpop.f32.mrf.mxu3 }
 0x723   : > { %v9256_v48 = vadd.f32 %v15731_v11, %v9124_v29  ;;  %v7542_v41 = vadd.f32 %v7186_v46, %v6626_v7  ;;  %v15831_v29 = vsel %vm6753_vm4, %v6789_v53, %v6791_v47 }
 0x725   : > { %vm9384_vm12 = vcmp.ge.f32.partialorder %v9256_v48, 0.0  ;;  %v9512_v22 = vmul.f32 0.1, %v9256_v48  ;;  %v8453_v37 = vadd.f32 %v8097_v61, %v7542_v41  ;;  %v8639_v43 = vpop.f32.mrf.mxu0 }
 0x726   : > { %v17814_v43 = vld [vmem:[#allocation107_spill] sm:$0xff] }
 0x727   : > { %v9640_v4 = vsel %vm9384_vm12, %v9256_v48, %v9512_v22  ;;  %v8993_v18 = vadd.f32 %v8637_v52, %v8453_v37  ;;  %v7693_v52 = vsel %vm6753_vm4, %v7690_v39, %v7692_v6  ;;  %v13109_v22 = vld [vmem:[%s13435_s24 + $0x8c] sm:$0xff]  }
 0x728   : > { %v9773_v2 = vpack.c.bf16 %v9640_v4, %v9640_v4 }
 0x729   : > { %v9125_v32 = vmul.f32 %v15726_v51, %v8993_v18  ;;  %v6274_v44 = vpop.f32.mrf.mxu1  ;;  %v13110_v18 = vld [vmem:[%s13435_s24 + $0xa0] sm:$0xff]  }
 0x72a   : > { %10946 = vst.msk [vmem:[%s15754_s22 + $0x18] sm:$0xf] %vm9766_vm6, %v9773_v2  ;;  %v7188_v57 = vpop.f32.mrf.mxu2  ;;  %v8099_v12 = vpop.f32.mrf.mxu3  ;;  %v6627_v39 = vadd.f32 %v6274_v44, %v14114_v24  ;;  %v6793_v2 = vrot.slane %v13110_v18, 1 }
 0x72b   : > { %v9257_v30 = vadd.f32 %v15731_v11, %v9125_v32 }
 0x72c   : > { %10634 = vmatmul.msk.bf16.gmra.mxu1 %vm829_vm2, %v14209_v17 }
 0x72d   : > { %vm9385_vm13 = vcmp.ge.f32.partialorder %v9257_v30, 0.0  ;;  %v9513_v49 = vmul.f32 0.1, %v9257_v30  ;;  %v8641_v31 = vpop.f32.mrf.mxu0 }
 0x72f   : > { %v9641_v5 = vsel %vm9385_vm13, %v9257_v30, %v9513_v49  ;;  %10715 = vmatmul.msk.bf16.gmra.mxu2 %vm829_vm2, %v15713_v58  ;;  %10796 = vmatmul.msk.bf16.gmra.mxu3 %vm829_vm2, %v7693_v52  ;;  %v7694_v58 = vrot.slane %v13109_v22, 1 }
 0x730   : > { %v9774_v7 = vpack.c.bf16 %v9641_v5, %v9641_v5  ;;  %10877 = vmatmul.msk.bf16.gmra.mxu0 %vm829_vm2, %v15831_v29 }
 0x731   : > { %v6276_v41 = vpop.f32.mrf.mxu1  ;;  %v7695_v30 = vsel %vm6753_vm4, %v7692_v6, %v7694_v58 }
 0x732   : > { %10947 = vst.msk [vmem:[%s15754_s22 + $0x1c] sm:$0xf] %vm9766_vm6, %v9774_v7  ;;  %v7190_v53 = vpop.f32.mrf.mxu2  ;;  %v8101_v48 = vpop.f32.mrf.mxu3  ;;  %v6628_v4 = vadd.f32 %v6276_v41, %v17814_v43 }
 0x733   : > { %v7543_v46 = vadd.f32 %v7190_v53, %v6627_v39 }
 0x735   : > { %v8454_v61 = vadd.f32 %v8101_v48, %v7543_v46  ;;  %v8643_v17 = vpop.f32.mrf.mxu0 }
 0x737   : > { %v8994_v21 = vadd.f32 %v8641_v31, %v8454_v61  ;;  %v15850_v31 = vsel %vm6753_vm4, %v6791_v47, %v6793_v2 }
 0x739   : > { %v9126_v37 = vmul.f32 %v15726_v51, %v8994_v21  ;;  %v6279_v57 = vpop.f32.mrf.mxu1 }
 0x73a   : > { %v7192_v32 = vpop.f32.mrf.mxu2  ;;  %v8103_v63 = vpop.f32.mrf.mxu3  ;;  %v6629_v47 = vadd.f32 %v6279_v57, %v14137_v28 }
 0x73b   : > { %v9258_v24 = vadd.f32 %v15731_v11, %v9126_v37  ;;  %v7544_v38 = vadd.f32 %v7192_v32, %v6628_v4  ;;  %v13111_v37 = vld [vmem:[%s13435_s24 + $0x94] sm:$0xff]   ;;  %v13112_v32 = vld [vmem:[%s13435_s24 + $0xa8] sm:$0xff]  }
 0x73c   : > { %10635 = vmatmul.msk.bf16.gmra.mxu1 %vm829_vm2, %v14230_v40  ;;  %v7696_v43 = vrot.slane %v13111_v37, 1  ;;  %v17815_v4 = vld [vmem:[#allocation108_spill] sm:$0xff] }
 0x73d   : > { %vm9386_vm14 = vcmp.ge.f32.partialorder %v9258_v24, 0.0  ;;  %v9514_v12 = vmul.f32 0.1, %v9258_v24  ;;  %v8455_v44 = vadd.f32 %v8103_v63, %v7544_v38  ;;  %v8646_v49 = vpop.f32.mrf.mxu0 }
 0x73f   : > { %v9642_v52 = vsel %vm9386_vm14, %v9258_v24, %v9514_v12  ;;  %v8995_v5 = vadd.f32 %v8643_v17, %v8455_v44  ;;  %10716 = vmatmul.msk.bf16.gmra.mxu2 %vm829_vm2, %v15743_v42  ;;  %10797 = vmatmul.msk.bf16.gmra.mxu3 %vm829_vm2, %v7695_v30  ;;  %v6795_v24 = vrot.slane %v13112_v32, 1  ;;  %v7697_v44 = vsel %vm6753_vm4, %v7694_v58, %v7696_v43 }
 0x740   : > { %v9780_v7 = vpack.c.bf16 %v9642_v52, %v9642_v52  ;;  %10878 = vmatmul.msk.bf16.gmra.mxu0 %vm829_vm2, %v15850_v31 }
 0x741   : > { %v9127_v6 = vmul.f32 %v15726_v51, %v8995_v5  ;;  %v6281_v46 = vpop.f32.mrf.mxu1 }
 0x742   : > { %10948 = vst.msk [vmem:[%s15754_s22 + $0x20] sm:$0xf] %vm9766_vm6, %v9780_v7  ;;  %v7195_v39 = vpop.f32.mrf.mxu2  ;;  %v8106_v42 = vpop.f32.mrf.mxu3  ;;  %v6630_v18 = vadd.f32 %v6281_v46, %v17815_v4  ;;  %v15873_v7 = vsel %vm6753_vm4, %v6793_v2, %v6795_v24 }
 0x743   : > { %v9259_v40 = vadd.f32 %v15731_v11, %v9127_v6  ;;  %v7545_v53 = vadd.f32 %v7195_v39, %v6629_v47 }
 0x745   : > { %vm9387_vm15 = vcmp.ge.f32.partialorder %v9259_v40, 0.0  ;;  %v9515_v48 = vmul.f32 0.1, %v9259_v40  ;;  %v8456_v41 = vadd.f32 %v8106_v42, %v7545_v53  ;;  %v8648_v61 = vpop.f32.mrf.mxu0 }
 0x747   : > { %v9643_v17 = vsel %vm9387_vm15, %v9259_v40, %v9515_v48  ;;  %v8996_v21 = vadd.f32 %v8646_v49, %v8456_v41  ;;  %v17816_v41 = vld [vmem:[#allocation109_spill] sm:$0xff] }
 0x748   : > { %v9781_v22 = vpack.c.bf16 %v9643_v17, %v9643_v17  ;;  %v13113_v17 = vld [vmem:[%s13435_s24 + $0x9c] sm:$0xff]  }
 0x749   : > { %v9128_v28 = vmul.f32 %v15726_v51, %v8996_v21  ;;  %v6284_v12 = vpop.f32.mrf.mxu1  ;;  %v7698_v21 = vrot.slane %v13113_v17, 1 }
 0x74a   : > { %10949 = vst.msk [vmem:[%s15754_s22 + $0x24] sm:$0xf] %vm9766_vm6, %v9781_v22  ;;  %v7197_v38 = vpop.f32.mrf.mxu2  ;;  %v8108_v30 = vpop.f32.mrf.mxu3  ;;  %v13114_v22 = vld [vmem:[%s13435_s24 + $0xb0] sm:$0xff]  }
 0x74b   : > { %v9260_v63 = vadd.f32 %v15731_v11, %v9128_v28  ;;  %v7546_v57 = vadd.f32 %v7197_v38, %v6630_v18  ;;  %v6797_v37 = vrot.slane %v13114_v22, 1 }
 0x74c   : > { %10636 = vmatmul.msk.bf16.gmra.mxu1 %vm829_vm2, %v14253_v34 }
 0x74d   : > { %vm9388_vm0 = vcmp.ge.f32.partialorder %v9260_v63, 0.0  ;;  %v9516_v49 = vmul.f32 0.1, %v9260_v63  ;;  %v8457_v52 = vadd.f32 %v8108_v30, %v7546_v57  ;;  %v8651_v5 = vpop.f32.mrf.mxu0  ;;  %v7699_v57 = vsel %vm6753_vm4, %v7696_v43, %v7698_v21 }
 0x74e   : > { %v15893_v30 = vsel %vm6753_vm4, %v6795_v24, %v6797_v37 }
 0x74f   : > { %v9644_v6 = vsel %vm9388_vm0, %v9260_v63, %v9516_v49  ;;  %v8997_v47 = vadd.f32 %v8648_v61, %v8457_v52  ;;  %10717 = vmatmul.msk.bf16.gmra.mxu2 %vm829_vm2, %v15768_v26  ;;  %10798 = vmatmul.msk.bf16.gmra.mxu3 %vm829_vm2, %v7697_v44 }
 0x750   : > { %v9782_v39 = vpack.c.bf16 %v9644_v6, %v9644_v6  ;;  %10879 = vmatmul.msk.bf16.gmra.mxu0 %vm829_vm2, %v15873_v7 }
 0x751   : > { %v9129_v58 = vmul.f32 %v15726_v51, %v8997_v47  ;;  %v6285_v53 = vpop.f32.mrf.mxu1 }
 0x752   : > { %10950 = vst.msk [vmem:[%s15754_s22 + $0x28] sm:$0xf] %vm9766_vm6, %v9782_v39  ;;  %v7200_v2 = vpop.f32.mrf.mxu2  ;;  %v8111_v34 = vpop.f32.mrf.mxu3  ;;  %v6631_v61 = vadd.f32 %v6285_v53, %v17816_v41 }
 0x753   : > { %v9261_v40 = vadd.f32 %v15731_v11, %v9129_v58 }
 0x755   : > { %vm9389_vm1 = vcmp.ge.f32.partialorder %v9261_v40, 0.0  ;;  %v9517_v26 = vmul.f32 0.1, %v9261_v40  ;;  %v8652_v42 = vpop.f32.mrf.mxu0 }
 0x757   : > { %v9645_v46 = vsel %vm9389_vm1, %v9261_v40, %v9517_v26  ;;  %v13115_v40 = vld [vmem:[%s13435_s24 + $0xa4] sm:$0xff]  }
 0x758   : > { %v9783_v48 = vpack.c.bf16 %v9645_v46, %v9645_v46  ;;  %v7700_v34 = vrot.slane %v13115_v40, 1  ;;  %v13118_v40 = vld [vmem:[%s13435_s24 + $0xc0] sm:$0xff]  }
 0x759   : > { %v6288_v32 = vpop.f32.mrf.mxu1 }
 0x75a   : > { %10951 = vst.msk [vmem:[%s15754_s22 + $0x2c] sm:$0xf] %vm9766_vm6, %v9783_v48  ;;  %v7201_v28 = vpop.f32.mrf.mxu2  ;;  %v8112_v18 = vpop.f32.mrf.mxu3  ;;  %v6632_v43 = vadd.f32 %v6288_v32, %v14180_v16  ;;  %v17817_v16 = vld [vmem:[#allocation110_spill] sm:$0xff] }
 0x75b   : > { %v7547_v4 = vadd.f32 %v7201_v28, %v6631_v61  ;;  %v7701_v28 = vsel %vm6753_vm4, %v7698_v21, %v7700_v34 }
 0x75c   : > { %10637 = vmatmul.msk.bf16.gmra.mxu1 %vm829_vm2, %v14273_v3 }
 0x75d   : > { %v8458_v38 = vadd.f32 %v8112_v18, %v7547_v4  ;;  %v8655_v63 = vpop.f32.mrf.mxu0 }
 0x75f   : > { %v8998_v12 = vadd.f32 %v8652_v42, %v8458_v38  ;;  %10718 = vmatmul.msk.bf16.gmra.mxu2 %vm829_vm2, %v15788_v50  ;;  %10799 = vmatmul.msk.bf16.gmra.mxu3 %vm829_vm2, %v7699_v57  ;;  %v13116_v42 = vld [vmem:[%s13435_s24 + $0xb8] sm:$0xff]  }
 0x760   : > { %10880 = vmatmul.msk.bf16.gmra.mxu0 %vm829_vm2, %v15893_v30  ;;  %v6799_v46 = vrot.slane %v13116_v42, 1 }
 0x761   : > { %v9130_v44 = vmul.f32 %v15726_v51, %v8998_v12  ;;  %v6290_v5 = vpop.f32.mrf.mxu1 }
 0x762   : > { %v7204_v49 = vpop.f32.mrf.mxu2  ;;  %v8115_v3 = vpop.f32.mrf.mxu3  ;;  %v6633_v26 = vadd.f32 %v6290_v5, %v17817_v16  ;;  %v15914_v38 = vsel %vm6753_vm4, %v6797_v37, %v6799_v46 }
 0x763   : > { %v9262_v24 = vadd.f32 %v15731_v11, %v9130_v44  ;;  %v7548_v52 = vadd.f32 %v7204_v49, %v6632_v43  ;;  %v17818_v44 = vld [vmem:[#allocation111_spill] sm:$0xff] }
 0x765   : > { %vm9390_vm5 = vcmp.ge.f32.partialorder %v9262_v24, 0.0  ;;  %v9518_v50 = vmul.f32 0.1, %v9262_v24  ;;  %v8459_v6 = vadd.f32 %v8115_v3, %v7548_v52  ;;  %v8657_v47 = vpop.f32.mrf.mxu0 }
 0x767   : > { %v9646_v39 = vsel %vm9390_vm5, %v9262_v24, %v9518_v50  ;;  %v8999_v58 = vadd.f32 %v8655_v63, %v8459_v6 }
 0x768   : > { %v9789_v2 = vpack.c.bf16 %v9646_v39, %v9646_v39 }
 0x769   : > { %v9131_v53 = vmul.f32 %v15726_v51, %v8999_v58  ;;  %v6293_v22 = vpop.f32.mrf.mxu1  ;;  %v13117_v58 = vld [vmem:[%s13435_s24 + $0xac] sm:$0xff]  }
 0x76a   : > { %10952 = vst.msk [vmem:[%s15754_s22 + $0x30] sm:$0xf] %vm9766_vm6, %v9789_v2  ;;  %v7206_v48 = vpop.f32.mrf.mxu2  ;;  %v8117_v17 = vpop.f32.mrf.mxu3  ;;  %v6634_v37 = vadd.f32 %v6293_v22, %v17818_v44  ;;  %v7702_v2 = vrot.slane %v13117_v58, 1 }
 0x76b   : > { %v9263_v41 = vadd.f32 %v15731_v11, %v9131_v53  ;;  %v7549_v61 = vadd.f32 %v7206_v48, %v6633_v26  ;;  %v6801_v53 = vrot.slane %v13118_v40, 1 }
 0x76c   : > { %10638 = vmatmul.msk.bf16.gmra.mxu1 %vm829_vm2, %v14296_v56 }
 0x76d   : > { %vm9391_vm7 = vcmp.ge.f32.partialorder %v9263_v41, 0.0  ;;  %v9519_v4 = vmul.f32 0.1, %v9263_v41  ;;  %v8460_v18 = vadd.f32 %v8117_v17, %v7549_v61  ;;  %v8660_v32 = vpop.f32.mrf.mxu0  ;;  %v7703_v17 = vsel %vm6753_vm4, %v7700_v34, %v7702_v2 }
 0x76e   : > { %v15936_v22 = vsel %vm6753_vm4, %v6799_v46, %v6801_v53 }
 0x76f   : > { %v9647_v63 = vsel %vm9391_vm7, %v9263_v41, %v9519_v4  ;;  %v9000_v57 = vadd.f32 %v8657_v47, %v8460_v18  ;;  %10719 = vmatmul.msk.bf16.gmra.mxu2 %vm829_vm2, %v15809_v23  ;;  %10800 = vmatmul.msk.bf16.gmra.mxu3 %vm829_vm2, %v7701_v28 }
 0x770   : > { %v9790_v12 = vpack.c.bf16 %v9647_v63, %v9647_v63  ;;  %10881 = vmatmul.msk.bf16.gmra.mxu0 %vm829_vm2, %v15914_v38 }
 0x771   : > { %v9132_v21 = vmul.f32 %v15726_v51, %v9000_v57  ;;  %v6295_v24 = vpop.f32.mrf.mxu1 }
 0x772   : > { %10953 = vst.msk [vmem:[%s15754_s22 + $0x34] sm:$0xf] %vm9766_vm6, %v9790_v12  ;;  %v7209_v43 = vpop.f32.mrf.mxu2  ;;  %v8120_v23 = vpop.f32.mrf.mxu3 }
 0x773   : > { %v9264_v56 = vadd.f32 %v15731_v11, %v9132_v21  ;;  %v7550_v49 = vadd.f32 %v7209_v43, %v6634_v37  ;;  %v13119_v21 = vld [vmem:[%s13435_s24 + $0xb4] sm:$0xff]  }
 0x774   : > { %v17819_v37 = vld [vmem:[#allocation112_spill] sm:$0xff] }
 0x775   : > { %vm9392_vm8 = vcmp.ge.f32.partialorder %v9264_v56, 0.0  ;;  %v9520_v52 = vmul.f32 0.1, %v9264_v56  ;;  %v8461_v3 = vadd.f32 %v8120_v23, %v7550_v49  ;;  %v8662_v5 = vpop.f32.mrf.mxu0 }
 0x777   : > { %v9648_v50 = vsel %vm9392_vm8, %v9264_v56, %v9520_v52  ;;  %v9001_v6 = vadd.f32 %v8660_v32, %v8461_v3  ;;  %v13120_v56 = vld [vmem:[%s13435_s24 + $0xc8] sm:$0xff]  }
 0x778   : > { %v9791_v47 = vpack.c.bf16 %v9648_v50, %v9648_v50  ;;  %v6803_v49 = vrot.slane %v13120_v56, 1 }
 0x779   : > { %v9133_v39 = vmul.f32 %v15726_v51, %v9001_v6  ;;  %v6297_v48 = vpop.f32.mrf.mxu1 }
 0x77a   : > { %10954 = vst.msk [vmem:[%s15754_s22 + $0x38] sm:$0xf] %vm9766_vm6, %v9791_v47  ;;  %v7211_v16 = vpop.f32.mrf.mxu2  ;;  %v8122_v42 = vpop.f32.mrf.mxu3  ;;  %v6635_v34 = vadd.f32 %v6297_v48, %v14223_v15 }
 0x77b   : > { %v9265_v26 = vadd.f32 %v15731_v11, %v9133_v39  ;;  %v15955_v39 = vsel %vm6753_vm4, %v6801_v53, %v6803_v49 }
 0x77c   : > { %10639 = vmatmul.msk.bf16.gmra.mxu1 %vm829_vm2, %v14318_v20 }
 0x77d   : > { %vm9393_vm9 = vcmp.ge.f32.partialorder %v9265_v26, 0.0  ;;  %v9521_v41 = vmul.f32 0.1, %v9265_v26  ;;  %v8664_v61 = vpop.f32.mrf.mxu0 }
 0x77f   : > { %v9649_v28 = vsel %vm9393_vm9, %v9265_v26, %v9521_v41  ;;  %10720 = vmatmul.msk.bf16.gmra.mxu2 %vm829_vm2, %v15831_v29  ;;  %10801 = vmatmul.msk.bf16.gmra.mxu3 %vm829_vm2, %v7703_v17  ;;  %v7704_v29 = vrot.slane %v13119_v21, 1 }
 0x780   : > { %v9792_v4 = vpack.c.bf16 %v9649_v28, %v9649_v28  ;;  %10882 = vmatmul.msk.bf16.gmra.mxu0 %vm829_vm2, %v15936_v22 }
 0x781   : > { %v6299_v63 = vpop.f32.mrf.mxu1  ;;  %v7705_v5 = vsel %vm6753_vm4, %v7702_v2, %v7704_v29 }
 0x782   : > { %10955 = vst.msk [vmem:[%s15754_s22 + $0x3c] sm:$0xf] %vm9766_vm6, %v9792_v4  ;;  %v7213_v46 = vpop.f32.mrf.mxu2  ;;  %v8124_v32 = vpop.f32.mrf.mxu3  ;;  %v6636_v43 = vadd.f32 %v6299_v63, %v17819_v37 }
 0x783   : > { %v7551_v18 = vadd.f32 %v7213_v46, %v6635_v34  ;;  %v13121_v46 = vld [vmem:[%s13435_s24 + $0xbc] sm:$0xff]  }
 0x785   : > { %v8462_v57 = vadd.f32 %v8124_v32, %v7551_v18  ;;  %v8666_v20 = vpop.f32.mrf.mxu0  ;;  %v7706_v18 = vrot.slane %v13121_v46, 1  ;;  %v17820_v32 = vld [vmem:[#allocation113_spill] sm:$0xff] }
 0x787   : > { %v9002_v12 = vadd.f32 %v8664_v61, %v8462_v57  ;;  %v13122_v57 = vld [vmem:[%s13435_s24 + $0xd0] sm:$0xff]   ;;  %v7707_v56 = vsel %vm6753_vm4, %v7704_v29, %v7706_v18 }
 0x789   : > { %v9134_v44 = vmul.f32 %v15726_v51, %v9002_v12  ;;  %v6302_v3 = vpop.f32.mrf.mxu1 }
 0x78a   : > { %v7215_v23 = vpop.f32.mrf.mxu2  ;;  %v8126_v52 = vpop.f32.mrf.mxu3  ;;  %v6637_v53 = vadd.f32 %v6302_v3, %v14246_v1 }
 0x78b   : > { %v9266_v15 = vadd.f32 %v15731_v11, %v9134_v44  ;;  %v7552_v24 = vadd.f32 %v7215_v23, %v6636_v43 }
 0x78c   : > { %10640 = vmatmul.msk.bf16.gmra.mxu1 %vm829_vm2, %v14339_v54 }
 0x78d   : > { %vm9394_vm10 = vcmp.ge.f32.partialorder %v9266_v15, 0.0  ;;  %v9522_v50 = vmul.f32 0.1, %v9266_v15  ;;  %v8463_v6 = vadd.f32 %v8126_v52, %v7552_v24  ;;  %v8669_v47 = vpop.f32.mrf.mxu0 }
 0x78f   : > { %v9650_v58 = vsel %vm9394_vm10, %v9266_v15, %v9522_v50  ;;  %v9003_v40 = vadd.f32 %v8666_v20, %v8463_v6  ;;  %10721 = vmatmul.msk.bf16.gmra.mxu2 %vm829_vm2, %v15850_v31  ;;  %10802 = vmatmul.msk.bf16.gmra.mxu3 %vm829_vm2, %v7705_v5  ;;  %v6805_v20 = vrot.slane %v13122_v57, 1 }
 0x790   : > { %v9798_v16 = vpack.c.bf16 %v9650_v58, %v9650_v58  ;;  %10883 = vmatmul.msk.bf16.gmra.mxu0 %vm829_vm2, %v15955_v39 }
 0x791   : > { %v9135_v2 = vmul.f32 %v15726_v51, %v9003_v40  ;;  %v6304_v48 = vpop.f32.mrf.mxu1  ;;  %v15978_v52 = vsel %vm6753_vm4, %v6803_v49, %v6805_v20 }
 0x792   : > { %10956 = vst.msk [vmem:[%s15754_s22 + $0x40] sm:$0xf] %vm9766_vm6, %v9798_v16  ;;  %v7218_v26 = vpop.f32.mrf.mxu2  ;;  %v8129_v31 = vpop.f32.mrf.mxu3  ;;  %v6638_v63 = vadd.f32 %v6304_v48, %v17820_v32 }
 0x793   : > { %v9267_v54 = vadd.f32 %v15731_v11, %v9135_v2  ;;  %v7553_v42 = vadd.f32 %v7218_v26, %v6637_v53  ;;  %v17821_v2 = vld [vmem:[#allocation114_spill] sm:$0xff] }
 0x794   : > { %v13123_v26 = vld [vmem:[%s13435_s24 + $0xc4] sm:$0xff]  }
 0x795   : > { %vm9395_vm11 = vcmp.ge.f32.partialorder %v9267_v54, 0.0  ;;  %v9523_v41 = vmul.f32 0.1, %v9267_v54  ;;  %v8464_v61 = vadd.f32 %v8129_v31, %v7553_v42  ;;  %v8671_v17 = vpop.f32.mrf.mxu0  ;;  %v13124_v42 = vld [vmem:[%s13435_s24 + $0xd8] sm:$0xff]  }
 0x796   : > { %v6807_v31 = vrot.slane %v13124_v42, 1 }
 0x797   : > { %v9651_v28 = vsel %vm9395_vm11, %v9267_v54, %v9523_v41  ;;  %v9004_v4 = vadd.f32 %v8669_v47, %v8464_v61  ;;  %v7708_v54 = vrot.slane %v13123_v26, 1 }
 0x798   : > { %v9799_v34 = vpack.c.bf16 %v9651_v28, %v9651_v28  ;;  %v15998_v46 = vsel %vm6753_vm4, %v6805_v20, %v6807_v31 }
 0x799   : > { %v9136_v1 = vmul.f32 %v15726_v51, %v9004_v4  ;;  %v6307_v43 = vpop.f32.mrf.mxu1 }
 0x79a   : > { %10957 = vst.msk [vmem:[%s15754_s22 + $0x44] sm:$0xf] %vm9766_vm6, %v9799_v34  ;;  %v7220_v12 = vpop.f32.mrf.mxu2  ;;  %v8131_v37 = vpop.f32.mrf.mxu3  ;;  %v7709_v34 = vsel %vm6753_vm4, %v7706_v18, %v7708_v54 }
 0x79b   : > { %v9268_v21 = vadd.f32 %v15731_v11, %v9136_v1  ;;  %v7554_v44 = vadd.f32 %v7220_v12, %v6638_v63 }
 0x79c   : > { %10641 = vmatmul.msk.bf16.gmra.mxu1 %vm829_vm2, %v14362_v55 }
 0x79d   : > { %vm9396_vm12 = vcmp.ge.f32.partialorder %v9268_v21, 0.0  ;;  %v9524_v23 = vmul.f32 0.1, %v9268_v21  ;;  %v8465_v15 = vadd.f32 %v8131_v37, %v7554_v44  ;;  %v8674_v24 = vpop.f32.mrf.mxu0 }
 0x79f   : > { %v9652_v3 = vsel %vm9396_vm12, %v9268_v21, %v9524_v23  ;;  %v9005_v5 = vadd.f32 %v8671_v17, %v8465_v15  ;;  %10722 = vmatmul.msk.bf16.gmra.mxu2 %vm829_vm2, %v15873_v7  ;;  %10803 = vmatmul.msk.bf16.gmra.mxu3 %vm829_vm2, %v7707_v56  ;;  %v13125_v23 = vld [vmem:[%s13435_s24 + $0xcc] sm:$0xff]  }
 0x7a0   : > { %v9800_v50 = vpack.c.bf16 %v9652_v3, %v9652_v3  ;;  %10884 = vmatmul.msk.bf16.gmra.mxu0 %vm829_vm2, %v15978_v52  ;;  %v7710_v15 = vrot.slane %v13125_v23, 1 }
 0x7a1   : > { %v9137_v29 = vmul.f32 %v15726_v51, %v9005_v5  ;;  %v6308_v47 = vpop.f32.mrf.mxu1  ;;  %v13126_v5 = vld [vmem:[%s13435_s24 + $0xe0] sm:$0xff]  }
 0x7a2   : > { %10958 = vst.msk [vmem:[%s15754_s22 + $0x48] sm:$0xf] %vm9766_vm6, %v9800_v50  ;;  %v7223_v49 = vpop.f32.mrf.mxu2  ;;  %v8134_v55 = vpop.f32.mrf.mxu3  ;;  %v6639_v53 = vadd.f32 %v6308_v47, %v17821_v2  ;;  %v6809_v50 = vrot.slane %v13126_v5, 1 }
 0x7a3   : > { %v9269_v6 = vadd.f32 %v15731_v11, %v9137_v29 }
 0x7a4   : > { %v16019_v2 = vsel %vm6753_vm4, %v6807_v31, %v6809_v50 }
 0x7a5   : > { %vm9397_vm13 = vcmp.ge.f32.partialorder %v9269_v6, 0.0  ;;  %v9525_v7 = vmul.f32 0.1, %v9269_v6  ;;  %v8675_v58 = vpop.f32.mrf.mxu0 }
 0x7a7   : > { %v9653_v40 = vsel %vm9397_vm13, %v9269_v6, %v9525_v7  ;;  %v7711_v7 = vsel %vm6753_vm4, %v7708_v54, %v7710_v15 }
 0x7a8   : > { %v9801_v16 = vpack.c.bf16 %v9653_v40, %v9653_v40 }
 0x7a9   : > { %v6311_v17 = vpop.f32.mrf.mxu1 }
 0x7aa   : > { %10959 = vst.msk [vmem:[%s15754_s22 + $0x4c] sm:$0xf] %vm9766_vm6, %v9801_v16  ;;  %v7224_v48 = vpop.f32.mrf.mxu2  ;;  %v8135_v61 = vpop.f32.mrf.mxu3  ;;  %v6640_v18 = vadd.f32 %v6311_v17, %v14289_v35  ;;  %v17822_v35 = vld [vmem:[#allocation115_spill] sm:$0xff] }
 0x7ab   : > { %v7555_v41 = vadd.f32 %v7224_v48, %v6639_v53  ;;  %v17823_v48 = vld [vmem:[#allocation116_spill] sm:$0xff] }
 0x7ac   : > { %10642 = vmatmul.msk.bf16.gmra.mxu1 %vm829_vm2, %v14382_v13 }
 0x7ad   : > { %v8466_v28 = vadd.f32 %v8135_v61, %v7555_v41  ;;  %v8678_v4 = vpop.f32.mrf.mxu0 }
 0x7af   : > { %v9006_v1 = vadd.f32 %v8675_v58, %v8466_v28  ;;  %10723 = vmatmul.msk.bf16.gmra.mxu2 %vm829_vm2, %v15893_v30  ;;  %10804 = vmatmul.msk.bf16.gmra.mxu3 %vm829_vm2, %v7709_v34 }
 0x7b0   : > { %10885 = vmatmul.msk.bf16.gmra.mxu0 %vm829_vm2, %v15998_v46 }
 0x7b1   : > { %v9138_v32 = vmul.f32 %v15726_v51, %v9006_v1  ;;  %v6313_v12 = vpop.f32.mrf.mxu1 }
 0x7b2   : > { %v7227_v63 = vpop.f32.mrf.mxu2  ;;  %v8138_v13 = vpop.f32.mrf.mxu3  ;;  %v6641_v3 = vadd.f32 %v6313_v12, %v17822_v35 }
 0x7b3   : > { %v9270_v57 = vadd.f32 %v15731_v11, %v9138_v32  ;;  %v7556_v20 = vadd.f32 %v7227_v63, %v6640_v18 }
 0x7b5   : > { %vm9398_vm14 = vcmp.ge.f32.partialorder %v9270_v57, 0.0  ;;  %v9526_v30 = vmul.f32 0.1, %v9270_v57  ;;  %v8467_v21 = vadd.f32 %v8138_v13, %v7556_v20  ;;  %v8680_v44 = vpop.f32.mrf.mxu0  ;;  %v13128_v13 = vld [vmem:[%s13435_s24 + $0xe8] sm:$0xff]  }
 0x7b6   : > { %v6811_v12 = vrot.slane %v13128_v13, 1 }
 0x7b7   : > { %v9654_v37 = vsel %vm9398_vm14, %v9270_v57, %v9526_v30  ;;  %v9007_v43 = vadd.f32 %v8678_v4, %v8467_v21  ;;  %v13127_v57 = vld [vmem:[%s13435_s24 + $0xd4] sm:$0xff]  }
 0x7b8   : > { %v9807_v56 = vpack.c.bf16 %v9654_v37, %v9654_v37  ;;  %v7712_v20 = vrot.slane %v13127_v57, 1 }
 0x7b9   : > { %v9139_v24 = vmul.f32 %v15726_v51, %v9007_v43  ;;  %v6316_v47 = vpop.f32.mrf.mxu1 }
 0x7ba   : > { %10960 = vst.msk [vmem:[%s15754_s22 + $0x50] sm:$0xf] %vm9766_vm6, %v9807_v56  ;;  %v7229_v29 = vpop.f32.mrf.mxu2  ;;  %v8140_v55 = vpop.f32.mrf.mxu3  ;;  %v6642_v31 = vadd.f32 %v6316_v47, %v17823_v48  ;;  %v7713_v23 = vsel %vm6753_vm4, %v7710_v15, %v7712_v20 }
 0x7bb   : > { %v9271_v49 = vadd.f32 %v15731_v11, %v9139_v24  ;;  %v7557_v6 = vadd.f32 %v7229_v29, %v6641_v3  ;;  %v16041_v24 = vsel %vm6753_vm4, %v6809_v50, %v6811_v12 }
 0x7bc   : > { %10643 = vmatmul.msk.bf16.gmra.mxu1 %vm829_vm2, %v14405_v10 }
 0x7bd   : > { %vm9399_vm15 = vcmp.ge.f32.partialorder %v9271_v49, 0.0  ;;  %v9527_v58 = vmul.f32 0.1, %v9271_v49  ;;  %v8468_v40 = vadd.f32 %v8140_v55, %v7557_v6  ;;  %v8683_v16 = vpop.f32.mrf.mxu0  ;;  %v13129_v6 = vld [vmem:[%s13435_s24 + $0xdc] sm:$0xff]  }
 0x7be   : > { %v16057_v55 = vld [vmem:[%s17393_s2] ss:$0 sm:$0xff] }
 0x7bf   : > { %v9655_v53 = vsel %vm9399_vm15, %v9271_v49, %v9527_v58  ;;  %v9008_v26 = vadd.f32 %v8680_v44, %v8468_v40  ;;  %10724 = vmatmul.msk.bf16.gmra.mxu2 %vm829_vm2, %v15914_v38  ;;  %10805 = vmatmul.msk.bf16.gmra.mxu3 %vm829_vm2, %v7711_v7  ;;  %v17824_v7 = vld [vmem:[#allocation117_spill] sm:$0xff]  ;;  %v13131_v58 = vld [vmem:[%s13435_s24 + $0xf0] sm:$0xff]  }
 0x7c0   : > { %v9808_v42 = vpack.c.bf16 %v9655_v53, %v9655_v53  ;;  %10886 = vmatmul.msk.bf16.gmra.mxu0 %vm829_vm2, %v16019_v2  ;;  %v6813_v40 = vrot.slane %v13131_v58, 1  ;;  %v16065_v53 = vld [vmem:[%s17394_s3] ss:$0 sm:$0xff] }
 0x7c1   : > { %v9140_v54 = vmul.f32 %v15726_v51, %v9008_v26  ;;  %v6318_v17 = vpop.f32.mrf.mxu1 }
 0x7c2   : > { %10961 = vst.msk [vmem:[%s15754_s22 + $0x54] sm:$0xf] %vm9766_vm6, %v9808_v42  ;;  %v7232_v41 = vpop.f32.mrf.mxu2  ;;  %v8143_v38 = vpop.f32.mrf.mxu3 }
 0x7c3   : > { %v9272_v10 = vadd.f32 %v15731_v11, %v9140_v54  ;;  %v7558_v61 = vadd.f32 %v7232_v41, %v6642_v31 }
 0x7c5   : > { %vm9400_vm0 = vcmp.ge.f32.partialorder %v9272_v10, 0.0  ;;  %v9528_v28 = vmul.f32 0.1, %v9272_v10  ;;  %v8469_v4 = vadd.f32 %v8143_v38, %v7558_v61  ;;  %v8685_v34 = vpop.f32.mrf.mxu0  ;;  %v16070_v38 = vsel %vm6753_vm4, %v6811_v12, %v6813_v40 }
 0x7c7   : > { %v9656_v1 = vsel %vm9400_vm0, %v9272_v10, %v9528_v28  ;;  %v9009_v32 = vadd.f32 %v8683_v16, %v8469_v4 }
 0x7c8   : > { %v9809_v18 = vpack.c.bf16 %v9656_v1, %v9656_v1 }
 0x7c9   : > { %v9141_v63 = vmul.f32 %v15726_v51, %v9009_v32  ;;  %v6320_v37 = vpop.f32.mrf.mxu1 }
 0x7ca   : > { %10962 = vst.msk [vmem:[%s15754_s22 + $0x58] sm:$0xf] %vm9766_vm6, %v9809_v18  ;;  %v7234_v30 = vpop.f32.mrf.mxu2  ;;  %v8145_v44 = vpop.f32.mrf.mxu3 }
 0x7cb   : > { %v9273_v21 = vadd.f32 %v15731_v11, %v9141_v63  ;;  %v6643_v11 = vadd.f32 %v6320_v37, %v14332_v45  ;;  %v13133_v44 = vld [vmem:[%s13435_s24 + $0xe4] sm:$0xff]  }
 0x7cc   : > { %10644 = vmatmul.msk.bf16.gmra.mxu1 %vm829_vm2, %v14427_v62  ;;  %v7716_v37 = vrot.slane %v13133_v44, 1 }
 0x7cd   : > { %vm9401_vm1 = vcmp.ge.f32.partialorder %v9273_v21, 0.0  ;;  %v9529_v43 = vmul.f32 0.1, %v9273_v21  ;;  %v8687_v56 = vpop.f32.mrf.mxu0 }
 0x7cf   : > { %v9657_v51 = vsel %vm9401_vm1, %v9273_v21, %v9529_v43  ;;  %10725 = vmatmul.msk.bf16.gmra.mxu2 %vm829_vm2, %v15936_v22  ;;  %10806 = vmatmul.msk.bf16.gmra.mxu3 %vm829_vm2, %v7713_v23  ;;  %v7714_v22 = vrot.slane %v13129_v6, 1  ;;  %v17825_v43 = vld [vmem:[#allocation118_spill] sm:$0xff]  ;;  %v13134_v23 = vld [vmem:[%s13435_s24 + $0xf8] sm:$0xff]  }
 0x7d0   : > { %v9810_v35 = vpack.c.bf16 %v9657_v51, %v9657_v51  ;;  %10887 = vmatmul.msk.bf16.gmra.mxu0 %vm829_vm2, %v16041_v24  ;;  %v6815_v51 = vrot.slane %v13134_v23, 1 }
 0x7d1   : > { %v6322_v50 = vpop.f32.mrf.mxu1  ;;  %v7715_v31 = vsel %vm6753_vm4, %v7712_v20, %v7714_v22 }
 0x7d2   : > { %10963 = vst.msk [vmem:[%s15754_s22 + $0x5c] sm:$0xf] %vm9766_vm6, %v9810_v35  ;;  %v7236_v15 = vpop.f32.mrf.mxu2  ;;  %v8147_v5 = vpop.f32.mrf.mxu3  ;;  %v6644_v45 = vadd.f32 %v6322_v50, %v17824_v7  ;;  %v7717_v50 = vsel %vm6753_vm4, %v7714_v22, %v7716_v37  ;;  %v16093_v6 = vsel %vm6753_vm4, %v6813_v40, %v6815_v51 }
 0x7d3   : > { %v7559_v3 = vadd.f32 %v7236_v15, %v6643_v11 }
 0x7d5   : > { %v8470_v29 = vadd.f32 %v8147_v5, %v7559_v3  ;;  %v8689_v62 = vpop.f32.mrf.mxu0 }
 0x7d7   : > { %v9010_v49 = vadd.f32 %v8687_v56, %v8470_v29 }
 0x7d9   : > { %v9142_v47 = vmul.f32 %v16057_v55, %v9010_v49  ;;  %v6325_v48 = vpop.f32.mrf.mxu1 }
 0x7da   : > { %v7238_v16 = vpop.f32.mrf.mxu2  ;;  %v8149_v54 = vpop.f32.mrf.mxu3  ;;  %v6645_v1 = vadd.f32 %v6325_v48, %v14355_v27 }
 0x7db   : > { %v9274_v26 = vadd.f32 %v16065_v53, %v9142_v47  ;;  %v7560_v42 = vadd.f32 %v7238_v16, %v6644_v45  ;;  %v17826_v45 = vld [vmem:[#allocation11_spill] sm:$0xff] }
 0x7dc   : > { %10645 = vmatmul.msk.bf16.gmra.mxu1 %vm829_vm2, %v14448_v60 }
 0x7dd   : > { %vm9402_vm5 = vcmp.ge.f32.partialorder %v9274_v26, 0.0  ;;  %v9530_v41 = vmul.f32 0.1, %v9274_v26  ;;  %v8471_v10 = vadd.f32 %v8149_v54, %v7560_v42  ;;  %v8692_v61 = vpop.f32.mrf.mxu0 }
 0x7df   : > { %v9658_v17 = vsel %vm9402_vm5, %v9274_v26, %v9530_v41  ;;  %v9011_v28 = vadd.f32 %v8689_v62, %v8471_v10  ;;  %10726 = vmatmul.msk.bf16.gmra.mxu2 %vm829_vm2, %v15955_v39  ;;  %10807 = vmatmul.msk.bf16.gmra.mxu3 %vm829_vm2, %v7715_v31  ;;  %v17827_v41 = vld [vmem:[#allocation119_spill] sm:$0xff] }
 0x7e0   : > { %v9816_v4 = vpack.c.bf16 %v9658_v17, %v9658_v17  ;;  %10888 = vmatmul.msk.bf16.gmra.mxu0 %vm829_vm2, %v16070_v38 }
 0x7e1   : > { %v9143_v34 = vmul.f32 %v16057_v55, %v9011_v28  ;;  %v6327_v63 = vpop.f32.mrf.mxu1  ;;  %v13136_v28 = vld [vmem:[%s13435_s24 + $0x100] sm:$0xff]  }
 0x7e2   : > { %10964 = vst.msk [vmem:[%s15754_s22 + $0x60] sm:$0xf] %vm9766_vm6, %v9816_v4  ;;  %v7241_v32 = vpop.f32.mrf.mxu2  ;;  %v8152_v39 = vpop.f32.mrf.mxu3  ;;  %v6646_v56 = vadd.f32 %v6327_v63, %v17825_v43  ;;  %v6817_v4 = vrot.slane %v13136_v28, 1 }
 0x7e3   : > { %v9275_v60 = vadd.f32 %v16065_v53, %v9143_v34  ;;  %v7561_v18 = vadd.f32 %v7241_v32, %v6645_v1 }
 0x7e5   : > { %vm9403_vm7 = vcmp.ge.f32.partialorder %v9275_v60, 0.0  ;;  %v9531_v57 = vmul.f32 0.1, %v9275_v60  ;;  %v8472_v20 = vadd.f32 %v8152_v39, %v7561_v18  ;;  %v8694_v13 = vpop.f32.mrf.mxu0 }
 0x7e7   : > { %v9659_v12 = vsel %vm9403_vm7, %v9275_v60, %v9531_v57  ;;  %v9012_v30 = vadd.f32 %v8692_v61, %v8472_v20  ;;  %v13135_v61 = vld [vmem:[%s13435_s24 + $0xec] sm:$0xff]   ;;  %v16113_v57 = vsel %vm6753_vm4, %v6815_v51, %v6817_v4 }
 0x7e8   : > { %v9817_v21 = vpack.c.bf16 %v9659_v12, %v9659_v12  ;;  %v7718_v17 = vrot.slane %v13135_v61, 1 }
 0x7e9   : > { %v9144_v27 = vmul.f32 %v16057_v55, %v9012_v30  ;;  %v6330_v5 = vpop.f32.mrf.mxu1  ;;  %v17829_v30 = vld [vmem:[#allocation120_spill] sm:$0xff] }
 0x7ea   : > { %10965 = vst.msk [vmem:[%s15754_s22 + $0x64] sm:$0xf] %vm9766_vm6, %v9817_v21  ;;  %v7243_v35 = vpop.f32.mrf.mxu2  ;;  %v8154_v3 = vpop.f32.mrf.mxu3  ;;  %v7719_v63 = vsel %vm6753_vm4, %v7716_v37, %v7718_v17 }
 0x7eb   : > { %v9276_v11 = vadd.f32 %v16065_v53, %v9144_v27  ;;  %v7562_v15 = vadd.f32 %v7243_v35, %v6646_v56 }
 0x7ec   : > { %10646 = vmatmul.msk.bf16.gmra.mxu1 %vm829_vm2, %v17826_v45 }
 0x7ed   : > { %vm9404_vm8 = vcmp.ge.f32.partialorder %v9276_v11, 0.0  ;;  %v9532_v29 = vmul.f32 0.1, %v9276_v11  ;;  %v8473_v62 = vadd.f32 %v8154_v3, %v7562_v15  ;;  %v8697_v49 = vpop.f32.mrf.mxu0  ;;  %v13137_v3 = vld [vmem:[%s13435_s24 + $0xf4] sm:$0xff]  }
 0x7ee   : > { %v7720_v5 = vrot.slane %v13137_v3, 1  ;;  %v13138_v49 = vld [vmem:[%s13435_s24 + $0x108] sm:$0xff]   ;;  %v17833_v3 = vld [vmem:[#allocation129_spill] sm:$0xff] }
 0x7ef   : > { %v9660_v47 = vsel %vm9404_vm8, %v9276_v11, %v9532_v29  ;;  %v9013_v7 = vadd.f32 %v8694_v13, %v8473_v62  ;;  %10727 = vmatmul.msk.bf16.gmra.mxu2 %vm829_vm2, %v15978_v52  ;;  %10808 = vmatmul.msk.bf16.gmra.mxu3 %vm829_vm2, %v7717_v50  ;;  %v17828_v13 = vld [vmem:[#allocation14_spill] sm:$0xff]  ;;  %v17830_v29 = vld [vmem:[#allocation121_spill] sm:$0xff] }
 0x7f0   : > { %v9818_v58 = vpack.c.bf16 %v9660_v47, %v9660_v47  ;;  %10889 = vmatmul.msk.bf16.gmra.mxu0 %vm829_vm2, %v16093_v6  ;;  %v6819_v47 = vrot.slane %v13138_v49, 1 }
 0x7f1   : > { %v9145_v22 = vmul.f32 %v16057_v55, %v9013_v7  ;;  %v6331_v42 = vpop.f32.mrf.mxu1 }
 0x7f2   : > { %10966 = vst.msk [vmem:[%s15754_s22 + $0x68] sm:$0xf] %vm9766_vm6, %v9818_v58  ;;  %v7246_v40 = vpop.f32.mrf.mxu2  ;;  %v8157_v26 = vpop.f32.mrf.mxu3  ;;  %v6647_v10 = vadd.f32 %v6331_v42, %v17827_v41  ;;  %v17831_v41 = vld [vmem:[#allocation20_spill] sm:$0xff] }
 0x7f3   : > { %v9277_v16 = vadd.f32 %v16065_v53, %v9145_v22 }
 0x7f5   : > { %vm9405_vm9 = vcmp.ge.f32.partialorder %v9277_v16, 0.0  ;;  %v9533_v52 = vmul.f32 0.1, %v9277_v16  ;;  %v8698_v54 = vpop.f32.mrf.mxu0 }
 0x7f7   : > { %v9661_v48 = vsel %vm9405_vm9, %v9277_v16, %v9533_v52  ;;  %v7721_v16 = vsel %vm6753_vm4, %v7718_v17, %v7720_v5  ;;  %v17832_v17 = vld [vmem:[#allocation122_spill] sm:$0xff] }
 0x7f8   : > { %v9819_v31 = vpack.c.bf16 %v9661_v48, %v9661_v48 }
 0x7f9   : > { %v6334_v60 = vpop.f32.mrf.mxu1 }
 0x7fa   : > { %10967 = vst.msk [vmem:[%s15754_s22 + $0x6c] sm:$0xf] %vm9766_vm6, %v9819_v31  ;;  %v7247_v34 = vpop.f32.mrf.mxu2  ;;  %v8158_v32 = vpop.f32.mrf.mxu3  ;;  %v6648_v21 = vadd.f32 %v6334_v60, %v17829_v30  ;;  %v13139_v30 = vld [vmem:[%s13435_s24 + $0xfc] sm:$0xff]  }
 0x7fb   : > { %v7563_v1 = vadd.f32 %v7247_v34, %v6647_v10 }
 0x7fc   : > { %10647 = vmatmul.msk.bf16.gmra.mxu1 %vm829_vm2, %v17828_v13 }
 0x7fd   : > { %v8474_v18 = vadd.f32 %v8158_v32, %v7563_v1  ;;  %v8701_v39 = vpop.f32.mrf.mxu0 }
 0x7ff   : > { %v9014_v20 = vadd.f32 %v8698_v54, %v8474_v18  ;;  %10728 = vmatmul.msk.bf16.gmra.mxu2 %vm829_vm2, %v15998_v46  ;;  %10809 = vmatmul.msk.bf16.gmra.mxu3 %vm829_vm2, %v7719_v63  ;;  %v16134_v54 = vsel %vm6753_vm4, %v6817_v4, %v6819_v47 }
 0x800   : > { %10890 = vmatmul.msk.bf16.gmra.mxu0 %vm829_vm2, %v16113_v57 }
 0x801   : > { %v9146_v12 = vmul.f32 %v16057_v55, %v9014_v20  ;;  %v6336_v56 = vpop.f32.mrf.mxu1 }
 0x802   : > { %v7250_v44 = vpop.f32.mrf.mxu2  ;;  %v8161_v43 = vpop.f32.mrf.mxu3  ;;  %v6649_v62 = vadd.f32 %v6336_v56, %v17830_v29  ;;  %v17834_v29 = vld [vmem:[#allocation123_spill] sm:$0xff] }
 0x803   : > { %v9278_v37 = vadd.f32 %v16065_v53, %v9146_v12  ;;  %v7564_v27 = vadd.f32 %v7250_v44, %v6648_v21  ;;  %v7722_v21 = vrot.slane %v13139_v30, 1  ;;  %v13140_v44 = vld [vmem:[%s13435_s24 + $0x110] sm:$0xff]  }
 0x805   : > { %vm9406_vm10 = vcmp.ge.f32.partialorder %v9278_v37, 0.0  ;;  %v9534_v46 = vmul.f32 0.1, %v9278_v37  ;;  %v8475_v23 = vadd.f32 %v8161_v43, %v7564_v27  ;;  %v8703_v51 = vpop.f32.mrf.mxu0 }
 0x807   : > { %v9662_v35 = vsel %vm9406_vm10, %v9278_v37, %v9534_v46  ;;  %v9015_v11 = vadd.f32 %v8701_v39, %v8475_v23  ;;  %v6821_v37 = vrot.slane %v13140_v44, 1 }
 0x808   : > { %v9825_v15 = vpack.c.bf16 %v9662_v35, %v9662_v35  ;;  %v7723_v35 = vsel %vm6753_vm4, %v7720_v5, %v7722_v21 }
 0x809   : > { %v9147_v50 = vmul.f32 %v16057_v55, %v9015_v11  ;;  %v6339_v40 = vpop.f32.mrf.mxu1  ;;  %v16156_v11 = vsel %vm6753_vm4, %v6819_v47, %v6821_v37 }
 0x80a   : > { %10968 = vst.msk [vmem:[%s15754_s22 + $0x70] sm:$0xf] %vm9766_vm6, %v9825_v15  ;;  %v7252_v7 = vpop.f32.mrf.mxu2  ;;  %v8163_v22 = vpop.f32.mrf.mxu3  ;;  %v6650_v28 = vadd.f32 %v6339_v40, %v17832_v17  ;;  %v13141_v40 = vld [vmem:[%s13435_s24 + $0x104] sm:$0xff]  }
 0x80b   : > { %v9279_v45 = vadd.f32 %v16065_v53, %v9147_v50  ;;  %v7565_v58 = vadd.f32 %v7252_v7, %v6649_v62 }
 0x80c   : > { %10648 = vmatmul.msk.bf16.gmra.mxu1 %vm829_vm2, %v17831_v41 }
 0x80d   : > { %vm9407_vm11 = vcmp.ge.f32.partialorder %v9279_v45, 0.0  ;;  %v9535_v26 = vmul.f32 0.1, %v9279_v45  ;;  %v8476_v42 = vadd.f32 %v8163_v22, %v7565_v58  ;;  %v8706_v52 = vpop.f32.mrf.mxu0 }
 0x80f   : > { %v9663_v48 = vsel %vm9407_vm11, %v9279_v45, %v9535_v26  ;;  %v9016_v31 = vadd.f32 %v8703_v51, %v8476_v42  ;;  %10729 = vmatmul.msk.bf16.gmra.mxu2 %vm829_vm2, %v16019_v2  ;;  %10810 = vmatmul.msk.bf16.gmra.mxu3 %vm829_vm2, %v7721_v16  ;;  %v17835_v26 = vld [vmem:[#allocation124_spill] sm:$0xff] }
 0x810   : > { %v9826_v10 = vpack.c.bf16 %v9663_v48, %v9663_v48  ;;  %10891 = vmatmul.msk.bf16.gmra.mxu0 %vm829_vm2, %v16134_v54 }
 0x811   : > { %v9148_v61 = vmul.f32 %v16057_v55, %v9016_v31  ;;  %v6341_v32 = vpop.f32.mrf.mxu1 }
 0x812   : > { %10969 = vst.msk [vmem:[%s15754_s22 + $0x74] sm:$0xf] %vm9766_vm6, %v9826_v10  ;;  %v7255_v4 = vpop.f32.mrf.mxu2  ;;  %v8166_v2 = vpop.f32.mrf.mxu3 }
 0x813   : > { %v9280_v34 = vadd.f32 %v16065_v53, %v9148_v61  ;;  %v7566_v1 = vadd.f32 %v7255_v4, %v6650_v28 }
 0x815   : > { %vm9408_vm12 = vcmp.ge.f32.partialorder %v9280_v34, 0.0  ;;  %v9536_v60 = vmul.f32 0.1, %v9280_v34  ;;  %v8477_v18 = vadd.f32 %v8166_v2, %v7566_v1  ;;  %v8708_v39 = vpop.f32.mrf.mxu0 }
 0x817   : > { %v9664_v63 = vsel %vm9408_vm12, %v9280_v34, %v9536_v60  ;;  %v9017_v20 = vadd.f32 %v8706_v52, %v8477_v18  ;;  %v13142_v52 = vld [vmem:[%s13435_s24 + $0x118] sm:$0xff]   ;;  %v17836_v18 = vld [vmem:[#allocation29_spill] sm:$0xff] }
 0x818   : > { %v9827_v13 = vpack.c.bf16 %v9664_v63, %v9664_v63  ;;  %v6823_v48 = vrot.slane %v13142_v52, 1 }
 0x819   : > { %v9149_v12 = vmul.f32 %v16057_v55, %v9017_v20  ;;  %v6343_v46 = vpop.f32.mrf.mxu1  ;;  %v17837_v20 = vld [vmem:[#allocation125_spill] sm:$0xff] }
 0x81a   : > { %10970 = vst.msk [vmem:[%s15754_s22 + $0x78] sm:$0xf] %vm9766_vm6, %v9827_v13  ;;  %v7257_v27 = vpop.f32.mrf.mxu2  ;;  %v8168_v56 = vpop.f32.mrf.mxu3  ;;  %v6651_v5 = vadd.f32 %v6343_v46, %v17834_v29  ;;  %v16175_v2 = vsel %vm6753_vm4, %v6821_v37, %v6823_v48  ;;  %v13144_v29 = vld [vmem:[%s13435_s24 + $0x120] sm:$0xff]  }
 0x81b   : > { %v9281_v43 = vadd.f32 %v16065_v53, %v9149_v12 }
 0x81c   : > { %10649 = vmatmul.msk.bf16.gmra.mxu1 %vm829_vm2, %v17833_v3  ;;  %v17838_v3 = vld [vmem:[#allocation126_spill] sm:$0xff] }
 0x81d   : > { %vm9409_vm13 = vcmp.ge.f32.partialorder %v9281_v43, 0.0  ;;  %v9537_v23 = vmul.f32 0.1, %v9281_v43  ;;  %v8710_v51 = vpop.f32.mrf.mxu0 }
 0x81f   : > { %v9665_v15 = vsel %vm9409_vm13, %v9281_v43, %v9537_v23  ;;  %10730 = vmatmul.msk.bf16.gmra.mxu2 %vm829_vm2, %v16041_v24  ;;  %10811 = vmatmul.msk.bf16.gmra.mxu3 %vm829_vm2, %v7723_v35  ;;  %v7724_v24 = vrot.slane %v13141_v40, 1 }
 0x820   : > { %v9828_v50 = vpack.c.bf16 %v9665_v15, %v9665_v15  ;;  %10892 = vmatmul.msk.bf16.gmra.mxu0 %vm829_vm2, %v16156_v11 }
 0x821   : > { %v6345_v7 = vpop.f32.mrf.mxu1  ;;  %v7725_v28 = vsel %vm6753_vm4, %v7722_v21, %v7724_v24 }
 0x822   : > { %10971 = vst.msk [vmem:[%s15754_s22 + $0x7c] sm:$0xf] %vm9766_vm6, %v9828_v50  ;;  %v7259_v62 = vpop.f32.mrf.mxu2  ;;  %v8170_v47 = vpop.f32.mrf.mxu3  ;;  %v6652_v42 = vadd.f32 %v6345_v7, %v17835_v26 }
 0x823   : > { %v7567_v49 = vadd.f32 %v7259_v62, %v6651_v5  ;;  %v6825_v5 = vrot.slane %v13144_v29, 1 }
 0x825   : > { %v8478_v45 = vadd.f32 %v8170_v47, %v7567_v49  ;;  %v8712_v58 = vpop.f32.mrf.mxu0  ;;  %v16198_v26 = vsel %vm6753_vm4, %v6823_v48, %v6825_v5 }
 0x827   : > { %v9018_v22 = vadd.f32 %v8710_v51, %v8478_v45  ;;  %v13143_v51 = vld [vmem:[%s13435_s24 + $0x10c] sm:$0xff]  }
 0x828   : > { %v7726_v35 = vrot.slane %v13143_v51, 1 }
 0x829   : > { %v9150_v16 = vmul.f32 %v16057_v55, %v9018_v22  ;;  %v6348_v17 = vpop.f32.mrf.mxu1 }
 0x82a   : > { %v7261_v31 = vpop.f32.mrf.mxu2  ;;  %v8172_v61 = vpop.f32.mrf.mxu3  ;;  %v6653_v13 = vadd.f32 %v6348_v17, %v17837_v20 }
 0x82b   : > { %v9282_v41 = vadd.f32 %v16065_v53, %v9150_v16  ;;  %v7568_v10 = vadd.f32 %v7261_v31, %v6652_v42  ;;  %v17839_v31 = vld [vmem:[#allocation35_spill] sm:$0xff] }
 0x82c   : > { %10650 = vmatmul.msk.bf16.gmra.mxu1 %vm829_vm2, %v17836_v18 }
 0x82d   : > { %vm9410_vm14 = vcmp.ge.f32.partialorder %v9282_v41, 0.0  ;;  %v9538_v4 = vmul.f32 0.1, %v9282_v41  ;;  %v8479_v34 = vadd.f32 %v8172_v61, %v7568_v10  ;;  %v8715_v1 = vpop.f32.mrf.mxu0 }
 0x82f   : > { %v9666_v32 = vsel %vm9410_vm14, %v9282_v41, %v9538_v4  ;;  %v9019_v60 = vadd.f32 %v8712_v58, %v8479_v34  ;;  %10731 = vmatmul.msk.bf16.gmra.mxu2 %vm829_vm2, %v16070_v38  ;;  %10812 = vmatmul.msk.bf16.gmra.mxu3 %vm829_vm2, %v7725_v28  ;;  %v7727_v58 = vsel %vm6753_vm4, %v7724_v24, %v7726_v35 }
 0x830   : > { %v9834_v39 = vpack.c.bf16 %v9666_v32, %v9666_v32  ;;  %10893 = vmatmul.msk.bf16.gmra.mxu0 %vm829_vm2, %v16175_v2 }
 0x831   : > { %v9151_v63 = vmul.f32 %v16057_v55, %v9019_v60  ;;  %v6350_v44 = vpop.f32.mrf.mxu1  ;;  %v13145_v60 = vld [vmem:[%s13435_s24 + $0x114] sm:$0xff]  }
 0x832   : > { %10972 = vst.msk [vmem:[%s15754_s22 + $0x80] sm:$0xf] %vm9766_vm6, %v9834_v39  ;;  %v7264_v12 = vpop.f32.mrf.mxu2  ;;  %v8175_v38 = vpop.f32.mrf.mxu3  ;;  %v6654_v50 = vadd.f32 %v6350_v44, %v17838_v3  ;;  %v7728_v18 = vrot.slane %v13145_v60, 1  ;;  %v13146_v39 = vld [vmem:[%s13435_s24 + $0x128] sm:$0xff]  }
 0x833   : > { %v9283_v30 = vadd.f32 %v16065_v53, %v9151_v63  ;;  %v7569_v21 = vadd.f32 %v7264_v12, %v6653_v13  ;;  %v6827_v63 = vrot.slane %v13146_v39, 1 }
 0x834   : > { %v7729_v44 = vsel %vm6753_vm4, %v7726_v35, %v7728_v18 }
 0x835   : > { %vm9411_vm15 = vcmp.ge.f32.partialorder %v9283_v30, 0.0  ;;  %v9539_v37 = vmul.f32 0.1, %v9283_v30  ;;  %v8480_v27 = vadd.f32 %v8175_v38, %v7569_v21  ;;  %v8717_v43 = vpop.f32.mrf.mxu0 }
 0x837   : > { %v9667_v56 = vsel %vm9411_vm15, %v9283_v30, %v9539_v37  ;;  %v9020_v46 = vadd.f32 %v8715_v1, %v8480_v27  ;;  %v17840_v1 = vld [vmem:[#allocation127_spill] sm:$0xff]  ;;  %v16218_v37 = vsel %vm6753_vm4, %v6825_v5, %v6827_v63 }
 0x838   : > { %v9835_v23 = vpack.c.bf16 %v9667_v56, %v9667_v56 }
 0x839   : > { %v9152_v15 = vmul.f32 %v16057_v55, %v9020_v46  ;;  %v6353_v45 = vpop.f32.mrf.mxu1  ;;  %v17842_v46 = vld [vmem:[#allocation17_spill] sm:$0xff] }
 0x83a   : > { %10973 = vst.msk [vmem:[%s15754_s22 + $0x84] sm:$0xf] %vm9766_vm6, %v9835_v23  ;;  %v7266_v62 = vpop.f32.mrf.mxu2  ;;  %v8177_v7 = vpop.f32.mrf.mxu3 }
 0x83b   : > { %v9284_v49 = vadd.f32 %v16065_v53, %v9152_v15  ;;  %v7570_v47 = vadd.f32 %v7266_v62, %v6654_v50 }
 0x83c   : > { %10651 = vmatmul.msk.bf16.gmra.mxu1 %vm829_vm2, %v17839_v31 }
 0x83d   : > { %vm9412_vm0 = vcmp.ge.f32.partialorder %v9284_v49, 0.0  ;;  %v9540_v22 = vmul.f32 0.1, %v9284_v49  ;;  %v8481_v40 = vadd.f32 %v8177_v7, %v7570_v47  ;;  %v8720_v16 = vpop.f32.mrf.mxu0  ;;  %v13147_v7 = vld [vmem:[%s13435_s24 + $0x11c] sm:$0xff]  }
 0x83e   : > { %v7730_v45 = vrot.slane %v13147_v7, 1  ;;  %v13148_v16 = vld [vmem:[%s13435_s24 + $0x130] sm:$0xff]   ;;  %v17846_v7 = vld [vmem:[#allocation134_spill] sm:$0xff] }
 0x83f   : > { %v9668_v42 = vsel %vm9412_vm0, %v9284_v49, %v9540_v22  ;;  %v9021_v52 = vadd.f32 %v8717_v43, %v8481_v40  ;;  %10732 = vmatmul.msk.bf16.gmra.mxu2 %vm829_vm2, %v16093_v6  ;;  %10813 = vmatmul.msk.bf16.gmra.mxu3 %vm829_vm2, %v7727_v58  ;;  %v17841_v43 = vld [vmem:[#allocation38_spill] sm:$0xff]  ;;  %v17843_v22 = vld [vmem:[#allocation128_spill] sm:$0xff] }
 0x840   : > { %v9836_v41 = vpack.c.bf16 %v9668_v42, %v9668_v42  ;;  %10894 = vmatmul.msk.bf16.gmra.mxu0 %vm829_vm2, %v16198_v26  ;;  %v6829_v42 = vrot.slane %v13148_v16, 1 }
 0x841   : > { %v9153_v24 = vmul.f32 %v16057_v55, %v9021_v52  ;;  %v6354_v17 = vpop.f32.mrf.mxu1 }
 0x842   : > { %10974 = vst.msk [vmem:[%s15754_s22 + $0x88] sm:$0xf] %vm9766_vm6, %v9836_v41  ;;  %v7269_v48 = vpop.f32.mrf.mxu2  ;;  %v8180_v61 = vpop.f32.mrf.mxu3  ;;  %v6655_v32 = vadd.f32 %v6354_v17, %v17840_v1  ;;  %v17844_v1 = vld [vmem:[#allocation44_spill] sm:$0xff] }
 0x843   : > { %v9285_v10 = vadd.f32 %v16065_v53, %v9153_v24 }
 0x845   : > { %vm9413_vm1 = vcmp.ge.f32.partialorder %v9285_v10, 0.0  ;;  %v9541_v6 = vmul.f32 0.1, %v9285_v10  ;;  %v8721_v28 = vpop.f32.mrf.mxu0 }
 0x847   : > { %v9669_v4 = vsel %vm9413_vm1, %v9285_v10, %v9541_v6  ;;  %v7731_v10 = vsel %vm6753_vm4, %v7728_v18, %v7730_v45  ;;  %v17845_v18 = vld [vmem:[#allocation23_spill] sm:$0xff] }
 0x848   : > { %v9837_v34 = vpack.c.bf16 %v9669_v4, %v9669_v4 }
 0x849   : > { %v6357_v30 = vpop.f32.mrf.mxu1 }
 0x84a   : > { %10975 = vst.msk [vmem:[%s15754_s22 + $0x8c] sm:$0xf] %vm9766_vm6, %v9837_v34  ;;  %v7270_v20 = vpop.f32.mrf.mxu2  ;;  %v8181_v12 = vpop.f32.mrf.mxu3  ;;  %v6656_v23 = vadd.f32 %v6357_v30, %v17842_v46  ;;  %v13149_v46 = vld [vmem:[%s13435_s24 + $0x124] sm:$0xff]  }
 0x84b   : > { %v7571_v13 = vadd.f32 %v7270_v20, %v6655_v32 }
 0x84c   : > { %10652 = vmatmul.msk.bf16.gmra.mxu1 %vm829_vm2, %v17841_v43 }
 0x84d   : > { %v8482_v21 = vadd.f32 %v8181_v12, %v7571_v13  ;;  %v8724_v38 = vpop.f32.mrf.mxu0 }
 0x84f   : > { %v9022_v27 = vadd.f32 %v8721_v28, %v8482_v21  ;;  %10733 = vmatmul.msk.bf16.gmra.mxu2 %vm829_vm2, %v16113_v57  ;;  %10814 = vmatmul.msk.bf16.gmra.mxu3 %vm829_vm2, %v7729_v44  ;;  %v16239_v28 = vsel %vm6753_vm4, %v6827_v63, %v6829_v42 }
 0x850   : > { %10895 = vmatmul.msk.bf16.gmra.mxu0 %vm829_vm2, %v16218_v37 }
 0x851   : > { %v9154_v56 = vmul.f32 %v16057_v55, %v9022_v27  ;;  %v6359_v50 = vpop.f32.mrf.mxu1 }
 0x852   : > { %v7273_v51 = vpop.f32.mrf.mxu2  ;;  %v8184_v3 = vpop.f32.mrf.mxu3  ;;  %v6657_v40 = vadd.f32 %v6359_v50, %v17843_v22  ;;  %v17847_v22 = vld [vmem:[#allocation26_spill] sm:$0xff] }
 0x853   : > { %v9286_v35 = vadd.f32 %v16065_v53, %v9154_v56  ;;  %v7572_v15 = vadd.f32 %v7273_v51, %v6656_v23  ;;  %v7732_v23 = vrot.slane %v13149_v46, 1  ;;  %v13150_v51 = vld [vmem:[%s13435_s24 + $0x138] sm:$0xff]  }
 0x855   : > { %vm9414_vm5 = vcmp.ge.f32.partialorder %v9286_v35, 0.0  ;;  %v9542_v57 = vmul.f32 0.1, %v9286_v35  ;;  %v8483_v29 = vadd.f32 %v8184_v3, %v7572_v15  ;;  %v8726_v5 = vpop.f32.mrf.mxu0 }
 0x857   : > { %v9670_v62 = vsel %vm9414_vm5, %v9286_v35, %v9542_v57  ;;  %v9023_v49 = vadd.f32 %v8724_v38, %v8483_v29  ;;  %v6831_v35 = vrot.slane %v13150_v51, 1 }
 0x858   : > { %v9843_v47 = vpack.c.bf16 %v9670_v62, %v9670_v62  ;;  %v7733_v62 = vsel %vm6753_vm4, %v7730_v45, %v7732_v23 }
 0x859   : > { %v9155_v58 = vmul.f32 %v16057_v55, %v9023_v49  ;;  %v6362_v48 = vpop.f32.mrf.mxu1  ;;  %v16261_v49 = vsel %vm6753_vm4, %v6829_v42, %v6831_v35 }
 0x85a   : > { %10976 = vst.msk [vmem:[%s15754_s22 + $0x90] sm:$0xf] %vm9766_vm6, %v9843_v47  ;;  %v7275_v52 = vpop.f32.mrf.mxu2  ;;  %v8186_v24 = vpop.f32.mrf.mxu3  ;;  %v6658_v39 = vadd.f32 %v6362_v48, %v17845_v18  ;;  %v13151_v48 = vld [vmem:[%s13435_s24 + $0x12c] sm:$0xff]  }
 0x85b   : > { %v9287_v31 = vadd.f32 %v16065_v53, %v9155_v58  ;;  %v7573_v41 = vadd.f32 %v7275_v52, %v6657_v40 }
 0x85c   : > { %10653 = vmatmul.msk.bf16.gmra.mxu1 %vm829_vm2, %v17844_v1 }
 0x85d   : > { %vm9415_vm7 = vcmp.ge.f32.partialorder %v9287_v31, 0.0  ;;  %v9543_v61 = vmul.f32 0.1, %v9287_v31  ;;  %v8484_v17 = vadd.f32 %v8186_v24, %v7573_v41  ;;  %v8729_v6 = vpop.f32.mrf.mxu0 }
 0x85f   : > { %v9671_v4 = vsel %vm9415_vm7, %v9287_v31, %v9543_v61  ;;  %v9024_v34 = vadd.f32 %v8726_v5, %v8484_v17  ;;  %10734 = vmatmul.msk.bf16.gmra.mxu2 %vm829_vm2, %v16134_v54  ;;  %10815 = vmatmul.msk.bf16.gmra.mxu3 %vm829_vm2, %v7731_v10  ;;  %v17848_v61 = vld [vmem:[#allocation130_spill] sm:$0xff] }
 0x860   : > { %v9844_v32 = vpack.c.bf16 %v9671_v4, %v9671_v4  ;;  %10896 = vmatmul.msk.bf16.gmra.mxu0 %vm829_vm2, %v16239_v28 }
 0x861   : > { %v9156_v60 = vmul.f32 %v16057_v55, %v9024_v34  ;;  %v6364_v12 = vpop.f32.mrf.mxu1 }
 0x862   : > { %10977 = vst.msk [vmem:[%s15754_s22 + $0x94] sm:$0xf] %vm9766_vm6, %v9844_v32  ;;  %v7278_v63 = vpop.f32.mrf.mxu2  ;;  %v8189_v54 = vpop.f32.mrf.mxu3 }
 0x863   : > { %v9288_v20 = vadd.f32 %v16065_v53, %v9156_v60  ;;  %v7574_v13 = vadd.f32 %v7278_v63, %v6658_v39 }
 0x865   : > { %vm9416_vm8 = vcmp.ge.f32.partialorder %v9288_v20, 0.0  ;;  %v9544_v30 = vmul.f32 0.1, %v9288_v20  ;;  %v8485_v21 = vadd.f32 %v8189_v54, %v7574_v13  ;;  %v8731_v38 = vpop.f32.mrf.mxu0 }
 0x867   : > { %v9672_v44 = vsel %vm9416_vm8, %v9288_v20, %v9544_v30  ;;  %v9025_v27 = vadd.f32 %v8729_v6, %v8485_v21  ;;  %v13152_v6 = vld [vmem:[%s13435_s24 + $0x140] sm:$0xff]  }
 0x868   : > { %v9845_v43 = vpack.c.bf16 %v9672_v44, %v9672_v44  ;;  %v6833_v4 = vrot.slane %v13152_v6, 1  ;;  %v17849_v21 = vld [vmem:[#allocation53_spill] sm:$0xff] }
 0x869   : > { %v9157_v56 = vmul.f32 %v16057_v55, %v9025_v27  ;;  %v6366_v57 = vpop.f32.mrf.mxu1  ;;  %v17850_v27 = vld [vmem:[#allocation32_spill] sm:$0xff] }
 0x86a   : > { %10978 = vst.msk [vmem:[%s15754_s22 + $0x98] sm:$0xf] %vm9766_vm6, %v9845_v43  ;;  %v7280_v15 = vpop.f32.mrf.mxu2  ;;  %v8191_v50 = vpop.f32.mrf.mxu3  ;;  %v6659_v45 = vadd.f32 %v6366_v57, %v17847_v22  ;;  %v16280_v54 = vsel %vm6753_vm4, %v6831_v35, %v6833_v4  ;;  %v13154_v22 = vld [vmem:[%s13435_s24 + $0x148] sm:$0xff]  }
 0x86b   : > { %v9289_v3 = vadd.f32 %v16065_v53, %v9157_v56 }
 0x86c   : > { %10654 = vmatmul.msk.bf16.gmra.mxu1 %vm829_vm2, %v17846_v7  ;;  %v17851_v7 = vld [vmem:[#allocation131_spill] sm:$0xff] }
 0x86d   : > { %vm9417_vm9 = vcmp.ge.f32.partialorder %v9289_v3, 0.0  ;;  %v9545_v29 = vmul.f32 0.1, %v9289_v3  ;;  %v8733_v5 = vpop.f32.mrf.mxu0 }
 0x86f   : > { %v9673_v47 = vsel %vm9417_vm9, %v9289_v3, %v9545_v29  ;;  %10735 = vmatmul.msk.bf16.gmra.mxu2 %vm829_vm2, %v16156_v11  ;;  %10816 = vmatmul.msk.bf16.gmra.mxu3 %vm829_vm2, %v7733_v62  ;;  %v7734_v11 = vrot.slane %v13151_v48, 1 }
 0x870   : > { %v9846_v58 = vpack.c.bf16 %v9673_v47, %v9673_v47  ;;  %10897 = vmatmul.msk.bf16.gmra.mxu0 %vm829_vm2, %v16261_v49 }
 0x871   : > { %v6368_v52 = vpop.f32.mrf.mxu1  ;;  %v7735_v39 = vsel %vm6753_vm4, %v7732_v23, %v7734_v11 }
 0x872   : > { %10979 = vst.msk [vmem:[%s15754_s22 + $0x9c] sm:$0xf] %vm9766_vm6, %v9846_v58  ;;  %v7282_v40 = vpop.f32.mrf.mxu2  ;;  %v8193_v42 = vpop.f32.mrf.mxu3  ;;  %v6660_v17 = vadd.f32 %v6368_v52, %v17848_v61 }
 0x873   : > { %v7575_v16 = vadd.f32 %v7282_v40, %v6659_v45  ;;  %v6835_v45 = vrot.slane %v13154_v22, 1 }
 0x875   : > { %v8486_v31 = vadd.f32 %v8193_v42, %v7575_v16  ;;  %v8735_v41 = vpop.f32.mrf.mxu0  ;;  %v16303_v61 = vsel %vm6753_vm4, %v6833_v4, %v6835_v45 }
 0x877   : > { %v9026_v24 = vadd.f32 %v8733_v5, %v8486_v31  ;;  %v13153_v5 = vld [vmem:[%s13435_s24 + $0x134] sm:$0xff]  }
 0x878   : > { %v7736_v62 = vrot.slane %v13153_v5, 1 }
 0x879   : > { %v9158_v10 = vmul.f32 %v16057_v55, %v9026_v24  ;;  %v6371_v18 = vpop.f32.mrf.mxu1 }
 0x87a   : > { %v7284_v34 = vpop.f32.mrf.mxu2  ;;  %v8195_v60 = vpop.f32.mrf.mxu3  ;;  %v6661_v43 = vadd.f32 %v6371_v18, %v17850_v27 }
 0x87b   : > { %v9290_v1 = vadd.f32 %v16065_v53, %v9158_v10  ;;  %v7576_v32 = vadd.f32 %v7284_v34, %v6660_v17  ;;  %v17852_v34 = vld [vmem:[#allocation59_spill] sm:$0xff] }
 0x87c   : > { %10655 = vmatmul.msk.bf16.gmra.mxu1 %vm829_vm2, %v17849_v21 }
 0x87d   : > { %vm9418_vm10 = vcmp.ge.f32.partialorder %v9290_v1, 0.0  ;;  %v9546_v63 = vmul.f32 0.1, %v9290_v1  ;;  %v8487_v20 = vadd.f32 %v8195_v60, %v7576_v32  ;;  %v8738_v13 = vpop.f32.mrf.mxu0 }
 0x87f   : > { %v9674_v12 = vsel %vm9418_vm10, %v9290_v1, %v9546_v63  ;;  %v9027_v30 = vadd.f32 %v8735_v41, %v8487_v20  ;;  %10736 = vmatmul.msk.bf16.gmra.mxu2 %vm829_vm2, %v16175_v2  ;;  %10817 = vmatmul.msk.bf16.gmra.mxu3 %vm829_vm2, %v7735_v39  ;;  %v7737_v41 = vsel %vm6753_vm4, %v7734_v11, %v7736_v62 }
 0x880   : > { %v9852_v38 = vpack.c.bf16 %v9674_v12, %v9674_v12  ;;  %10898 = vmatmul.msk.bf16.gmra.mxu0 %vm829_vm2, %v16280_v54 }
 0x881   : > { %v9159_v44 = vmul.f32 %v16057_v55, %v9027_v30  ;;  %v6373_v51 = vpop.f32.mrf.mxu1  ;;  %v13155_v30 = vld [vmem:[%s13435_s24 + $0x13c] sm:$0xff]  }
 0x882   : > { %10980 = vst.msk [vmem:[%s15754_s22 + $0xa0] sm:$0xf] %vm9766_vm6, %v9852_v38  ;;  %v7287_v56 = vpop.f32.mrf.mxu2  ;;  %v8198_v2 = vpop.f32.mrf.mxu3  ;;  %v6662_v58 = vadd.f32 %v6373_v51, %v17851_v7  ;;  %v7738_v21 = vrot.slane %v13155_v30, 1  ;;  %v13156_v38 = vld [vmem:[%s13435_s24 + $0x150] sm:$0xff]  }
 0x883   : > { %v9291_v46 = vadd.f32 %v16065_v53, %v9159_v44  ;;  %v7577_v23 = vadd.f32 %v7287_v56, %v6661_v43  ;;  %v6837_v44 = vrot.slane %v13156_v38, 1 }
 0x884   : > { %v7739_v51 = vsel %vm6753_vm4, %v7736_v62, %v7738_v21 }
 0x885   : > { %vm9419_vm11 = vcmp.ge.f32.partialorder %v9291_v46, 0.0  ;;  %v9547_v35 = vmul.f32 0.1, %v9291_v46  ;;  %v8488_v15 = vadd.f32 %v8198_v2, %v7577_v23  ;;  %v8740_v3 = vpop.f32.mrf.mxu0 }
 0x887   : > { %v9675_v50 = vsel %vm9419_vm11, %v9291_v46, %v9547_v35  ;;  %v9028_v57 = vadd.f32 %v8738_v13, %v8488_v15  ;;  %v17853_v13 = vld [vmem:[#allocation132_spill] sm:$0xff]  ;;  %v16323_v35 = vsel %vm6753_vm4, %v6835_v45, %v6837_v44 }
 0x888   : > { %v9853_v29 = vpack.c.bf16 %v9675_v50, %v9675_v50 }
 0x889   : > { %v9160_v47 = vmul.f32 %v16057_v55, %v9028_v57  ;;  %v6376_v31 = vpop.f32.mrf.mxu1  ;;  %v17855_v57 = vld [vmem:[#allocation41_spill] sm:$0xff] }
 0x88a   : > { %10981 = vst.msk [vmem:[%s15754_s22 + $0xa4] sm:$0xf] %vm9766_vm6, %v9853_v29  ;;  %v7289_v40 = vpop.f32.mrf.mxu2  ;;  %v8200_v52 = vpop.f32.mrf.mxu3 }
 0x88b   : > { %v9292_v16 = vadd.f32 %v16065_v53, %v9160_v47  ;;  %v7578_v42 = vadd.f32 %v7289_v40, %v6662_v58 }
 0x88c   : > { %10656 = vmatmul.msk.bf16.gmra.mxu1 %vm829_vm2, %v17852_v34 }
 0x88d   : > { %vm9420_vm12 = vcmp.ge.f32.partialorder %v9292_v16, 0.0  ;;  %v9548_v24 = vmul.f32 0.1, %v9292_v16  ;;  %v8489_v48 = vadd.f32 %v8200_v52, %v7578_v42  ;;  %v8743_v10 = vpop.f32.mrf.mxu0  ;;  %v13157_v52 = vld [vmem:[%s13435_s24 + $0x144] sm:$0xff]  }
 0x88e   : > { %v7740_v31 = vrot.slane %v13157_v52, 1  ;;  %v13158_v10 = vld [vmem:[%s13435_s24 + $0x158] sm:$0xff]   ;;  %v17859_v52 = vld [vmem:[#allocation139_spill] sm:$0xff] }
 0x88f   : > { %v9676_v17 = vsel %vm9420_vm12, %v9292_v16, %v9548_v24  ;;  %v9029_v6 = vadd.f32 %v8740_v3, %v8489_v48  ;;  %10737 = vmatmul.msk.bf16.gmra.mxu2 %vm829_vm2, %v16198_v26  ;;  %10818 = vmatmul.msk.bf16.gmra.mxu3 %vm829_vm2, %v7737_v41  ;;  %v17854_v3 = vld [vmem:[#allocation62_spill] sm:$0xff]  ;;  %v17856_v24 = vld [vmem:[#allocation133_spill] sm:$0xff] }
 0x890   : > { %v9854_v1 = vpack.c.bf16 %v9676_v17, %v9676_v17  ;;  %10899 = vmatmul.msk.bf16.gmra.mxu0 %vm829_vm2, %v16303_v61  ;;  %v6839_v17 = vrot.slane %v13158_v10, 1 }
 0x891   : > { %v9161_v11 = vmul.f32 %v16057_v55, %v9029_v6  ;;  %v6377_v18 = vpop.f32.mrf.mxu1 }
 0x892   : > { %10982 = vst.msk [vmem:[%s15754_s22 + $0xa8] sm:$0xf] %vm9766_vm6, %v9854_v1  ;;  %v7292_v4 = vpop.f32.mrf.mxu2  ;;  %v8203_v60 = vpop.f32.mrf.mxu3  ;;  %v6663_v12 = vadd.f32 %v6377_v18, %v17853_v13  ;;  %v17857_v13 = vld [vmem:[#allocation68_spill] sm:$0xff] }
 0x893   : > { %v9293_v32 = vadd.f32 %v16065_v53, %v9161_v11 }
 0x895   : > { %vm9421_vm13 = vcmp.ge.f32.partialorder %v9293_v32, 0.0  ;;  %v9549_v26 = vmul.f32 0.1, %v9293_v32  ;;  %v8744_v39 = vpop.f32.mrf.mxu0 }
 0x897   : > { %v9677_v63 = vsel %vm9421_vm13, %v9293_v32, %v9549_v26  ;;  %v7741_v32 = vsel %vm6753_vm4, %v7738_v21, %v7740_v31  ;;  %v17858_v21 = vld [vmem:[#allocation47_spill] sm:$0xff] }
 0x898   : > { %v9855_v20 = vpack.c.bf16 %v9677_v63, %v9677_v63 }
 0x899   : > { %v6380_v46 = vpop.f32.mrf.mxu1 }
 0x89a   : > { %10983 = vst.msk [vmem:[%s15754_s22 + $0xac] sm:$0xf] %vm9766_vm6, %v9855_v20  ;;  %v7293_v27 = vpop.f32.mrf.mxu2  ;;  %v8204_v56 = vpop.f32.mrf.mxu3  ;;  %v6664_v29 = vadd.f32 %v6380_v46, %v17855_v57  ;;  %v13159_v57 = vld [vmem:[%s13435_s24 + $0x14c] sm:$0xff]  }
 0x89b   : > { %v7579_v43 = vadd.f32 %v7293_v27, %v6663_v12 }
 0x89c   : > { %10657 = vmatmul.msk.bf16.gmra.mxu1 %vm829_vm2, %v17854_v3 }
 0x89d   : > { %v8490_v23 = vadd.f32 %v8204_v56, %v7579_v43  ;;  %v8747_v2 = vpop.f32.mrf.mxu0 }
 0x89f   : > { %v9030_v15 = vadd.f32 %v8744_v39, %v8490_v23  ;;  %10738 = vmatmul.msk.bf16.gmra.mxu2 %vm829_vm2, %v16218_v37  ;;  %10819 = vmatmul.msk.bf16.gmra.mxu3 %vm829_vm2, %v7739_v51  ;;  %v16344_v39 = vsel %vm6753_vm4, %v6837_v44, %v6839_v17 }
 0x8a0   : > { %10900 = vmatmul.msk.bf16.gmra.mxu0 %vm829_vm2, %v16323_v35 }
 0x8a1   : > { %v9162_v50 = vmul.f32 %v16057_v55, %v9030_v15  ;;  %v6382_v58 = vpop.f32.mrf.mxu1 }
 0x8a2   : > { %v7296_v5 = vpop.f32.mrf.mxu2  ;;  %v8207_v7 = vpop.f32.mrf.mxu3  ;;  %v6665_v48 = vadd.f32 %v6382_v58, %v17856_v24  ;;  %v17860_v24 = vld [vmem:[#allocation50_spill] sm:$0xff] }
 0x8a3   : > { %v9294_v62 = vadd.f32 %v16065_v53, %v9162_v50  ;;  %v7580_v47 = vadd.f32 %v7296_v5, %v6664_v29  ;;  %v7742_v29 = vrot.slane %v13159_v57, 1  ;;  %v13160_v5 = vld [vmem:[%s13435_s24 + $0x160] sm:$0xff]  }
 0x8a5   : > { %vm9422_vm14 = vcmp.ge.f32.partialorder %v9294_v62, 0.0  ;;  %v9550_v37 = vmul.f32 0.1, %v9294_v62  ;;  %v8491_v22 = vadd.f32 %v8207_v7, %v7580_v47  ;;  %v8749_v45 = vpop.f32.mrf.mxu0 }
 0x8a7   : > { %v9678_v40 = vsel %vm9422_vm14, %v9294_v62, %v9550_v37  ;;  %v9031_v16 = vadd.f32 %v8747_v2, %v8491_v22  ;;  %v6841_v62 = vrot.slane %v13160_v5, 1 }
 0x8a8   : > { %v9861_v42 = vpack.c.bf16 %v9678_v40, %v9678_v40  ;;  %v7743_v40 = vsel %vm6753_vm4, %v7740_v31, %v7742_v29 }
 0x8a9   : > { %v9163_v41 = vmul.f32 %v16057_v55, %v9031_v16  ;;  %v6385_v4 = vpop.f32.mrf.mxu1  ;;  %v16366_v16 = vsel %vm6753_vm4, %v6839_v17, %v6841_v62 }
 0x8aa   : > { %10984 = vst.msk [vmem:[%s15754_s22 + $0xb0] sm:$0xf] %vm9766_vm6, %v9861_v42  ;;  %v7298_v6 = vpop.f32.mrf.mxu2  ;;  %v8209_v11 = vpop.f32.mrf.mxu3  ;;  %v6666_v38 = vadd.f32 %v6385_v4, %v17858_v21  ;;  %v13161_v4 = vld [vmem:[%s13435_s24 + $0x154] sm:$0xff]  }
 0x8ab   : > { %v9295_v34 = vadd.f32 %v16065_v53, %v9163_v41  ;;  %v7581_v1 = vadd.f32 %v7298_v6, %v6665_v48 }
 0x8ac   : > { %10658 = vmatmul.msk.bf16.gmra.mxu1 %vm829_vm2, %v17857_v13 }
 0x8ad   : > { %vm9423_vm15 = vcmp.ge.f32.partialorder %v9295_v34, 0.0  ;;  %v9551_v60 = vmul.f32 0.1, %v9295_v34  ;;  %v8492_v18 = vadd.f32 %v8209_v11, %v7581_v1  ;;  %v8752_v26 = vpop.f32.mrf.mxu0 }
 0x8af   : > { %v9679_v63 = vsel %vm9423_vm15, %v9295_v34, %v9551_v60  ;;  %v9032_v20 = vadd.f32 %v8749_v45, %v8492_v18  ;;  %10739 = vmatmul.msk.bf16.gmra.mxu2 %vm829_vm2, %v16239_v28  ;;  %10820 = vmatmul.msk.bf16.gmra.mxu3 %vm829_vm2, %v7741_v32  ;;  %v17861_v60 = vld [vmem:[#allocation135_spill] sm:$0xff] }
 0x8b0   : > { %v9862_v12 = vpack.c.bf16 %v9679_v63, %v9679_v63  ;;  %10901 = vmatmul.msk.bf16.gmra.mxu0 %vm829_vm2, %v16344_v39 }
 0x8b1   : > { %v9164_v30 = vmul.f32 %v16057_v55, %v9032_v20  ;;  %v6387_v56 = vpop.f32.mrf.mxu1 }
 0x8b2   : > { %10985 = vst.msk [vmem:[%s15754_s22 + $0xb4] sm:$0xf] %vm9766_vm6, %v9862_v12  ;;  %v7301_v44 = vpop.f32.mrf.mxu2  ;;  %v8212_v28 = vpop.f32.mrf.mxu3 }
 0x8b3   : > { %v9296_v27 = vadd.f32 %v16065_v53, %v9164_v30  ;;  %v7582_v43 = vadd.f32 %v7301_v44, %v6666_v38 }
 0x8b5   : > { %vm9424_vm0 = vcmp.ge.f32.partialorder %v9296_v27, 0.0  ;;  %v9552_v46 = vmul.f32 0.1, %v9296_v27  ;;  %v8493_v23 = vadd.f32 %v8212_v28, %v7582_v43  ;;  %v8754_v2 = vpop.f32.mrf.mxu0 }
 0x8b7   : > { %v9680_v51 = vsel %vm9424_vm0, %v9296_v27, %v9552_v46  ;;  %v9033_v15 = vadd.f32 %v8752_v26, %v8493_v23  ;;  %v13162_v26 = vld [vmem:[%s13435_s24 + $0x168] sm:$0xff]   ;;  %v17862_v46 = vld [vmem:[#allocation77_spill] sm:$0xff] }
 0x8b8   : > { %v9863_v3 = vpack.c.bf16 %v9680_v51, %v9680_v51  ;;  %v6843_v63 = vrot.slane %v13162_v26, 1  ;;  %v16397_v23 = vld [vmem:[%s17393_s2] ss:$0 sm:$0xff]  ;;  %v17863_v51 = vld [vmem:[#allocation56_spill] sm:$0xff] }
 0x8b9   : > { %v9165_v50 = vmul.f32 %v16057_v55, %v9033_v15  ;;  %v6389_v37 = vpop.f32.mrf.mxu1 }
 0x8ba   : > { %10986 = vst.msk [vmem:[%s15754_s22 + $0xb8] sm:$0xf] %vm9766_vm6, %v9863_v3  ;;  %v7303_v47 = vpop.f32.mrf.mxu2  ;;  %v8214_v58 = vpop.f32.mrf.mxu3  ;;  %v6667_v31 = vadd.f32 %v6389_v37, %v17860_v24  ;;  %v16385_v28 = vsel %vm6753_vm4, %v6841_v62, %v6843_v63  ;;  %v13166_v24 = vld [vmem:[%s13435_s24 + $0x170] sm:$0xff]  }
 0x8bb   : > { %v9297_v7 = vadd.f32 %v16065_v53, %v9165_v50 }
 0x8bc   : > { %10659 = vmatmul.msk.bf16.gmra.mxu1 %vm829_vm2, %v17859_v52  ;;  %v17864_v52 = vld [vmem:[#allocation136_spill] sm:$0xff] }
 0x8bd   : > { %vm9425_vm1 = vcmp.ge.f32.partialorder %v9297_v7, 0.0  ;;  %v9553_v22 = vmul.f32 0.1, %v9297_v7  ;;  %v8756_v45 = vpop.f32.mrf.mxu0 }
 0x8bf   : > { %v9681_v42 = vsel %vm9425_vm1, %v9297_v7, %v9553_v22  ;;  %10740 = vmatmul.msk.bf16.gmra.mxu2 %vm829_vm2, %v16261_v49  ;;  %10821 = vmatmul.msk.bf16.gmra.mxu3 %vm829_vm2, %v7743_v40  ;;  %v7744_v49 = vrot.slane %v13161_v4, 1 }
 0x8c0   : > { %v9864_v41 = vpack.c.bf16 %v9681_v42, %v9681_v42  ;;  %10902 = vmatmul.msk.bf16.gmra.mxu0 %vm829_vm2, %v16366_v16 }
 0x8c1   : > { %v6391_v6 = vpop.f32.mrf.mxu1  ;;  %v7745_v38 = vsel %vm6753_vm4, %v7742_v29, %v7744_v49 }
 0x8c2   : > { %10987 = vst.msk [vmem:[%s15754_s22 + $0xbc] sm:$0xf] %vm9766_vm6, %v9864_v41  ;;  %v7305_v48 = vpop.f32.mrf.mxu2  ;;  %v8216_v17 = vpop.f32.mrf.mxu3  ;;  %v6668_v18 = vadd.f32 %v6391_v6, %v17861_v60 }
 0x8c3   : > { %v7583_v10 = vadd.f32 %v7305_v48, %v6667_v31  ;;  %v6845_v31 = vrot.slane %v13166_v24, 1 }
 0x8c5   : > { %v8494_v34 = vadd.f32 %v8216_v17, %v7583_v10  ;;  %v8758_v1 = vpop.f32.mrf.mxu0  ;;  %v16418_v60 = vsel %vm6753_vm4, %v6843_v63, %v6845_v31 }
 0x8c7   : > { %v9034_v11 = vadd.f32 %v8756_v45, %v8494_v34  ;;  %v13165_v45 = vld [vmem:[%s13435_s24 + $0x15c] sm:$0xff]  }
 0x8c8   : > { %v7746_v40 = vrot.slane %v13165_v45, 1 }
 0x8c9   : > { %v9166_v32 = vmul.f32 %v16057_v55, %v9034_v11  ;;  %v6394_v21 = vpop.f32.mrf.mxu1 }
 0x8ca   : > { %v7307_v20 = vpop.f32.mrf.mxu2  ;;  %v8218_v30 = vpop.f32.mrf.mxu3  ;;  %v6669_v15 = vadd.f32 %v6394_v21, %v17863_v51 }
 0x8cb   : > { %v9298_v13 = vadd.f32 %v16065_v53, %v9166_v32  ;;  %v7584_v12 = vadd.f32 %v7307_v20, %v6668_v18  ;;  %v17865_v20 = vld [vmem:[#allocation83_spill] sm:$0xff] }
 0x8cc   : > { %10660 = vmatmul.msk.bf16.gmra.mxu1 %vm829_vm2, %v17862_v46 }
 0x8cd   : > { %vm9426_vm5 = vcmp.ge.f32.partialorder %v9298_v13, 0.0  ;;  %v9554_v44 = vmul.f32 0.1, %v9298_v13  ;;  %v8495_v27 = vadd.f32 %v8218_v30, %v7584_v12  ;;  %v8761_v43 = vpop.f32.mrf.mxu0 }
 0x8cf   : > { %v9682_v55 = vsel %vm9426_vm5, %v9298_v13, %v9554_v44  ;;  %v9035_v56 = vadd.f32 %v8758_v1, %v8495_v27  ;;  %10741 = vmatmul.msk.bf16.gmra.mxu2 %vm829_vm2, %v16280_v54  ;;  %10822 = vmatmul.msk.bf16.gmra.mxu3 %vm829_vm2, %v7745_v38  ;;  %v16406_v54 = vld [vmem:[%s17394_s3] ss:$0 sm:$0xff]  ;;  %v7747_v1 = vsel %vm6753_vm4, %v7744_v49, %v7746_v40 }
 0x8d0   : > { %v9870_v53 = vpack.c.bf16 %v9682_v55, %v9682_v55  ;;  %10903 = vmatmul.msk.bf16.gmra.mxu0 %vm829_vm2, %v16385_v28 }
 0x8d1   : > { %v9167_v2 = vmul.f32 %v16397_v23, %v9035_v56  ;;  %v6396_v5 = vpop.f32.mrf.mxu1  ;;  %v13167_v56 = vld [vmem:[%s13435_s24 + $0x164] sm:$0xff]  }
 0x8d2   : > { %10988 = vst.msk [vmem:[%s15754_s22 + $0xc0] sm:$0xf] %vm9766_vm6, %v9870_v53  ;;  %v7310_v3 = vpop.f32.mrf.mxu2  ;;  %v8221_v29 = vpop.f32.mrf.mxu3  ;;  %v6670_v41 = vadd.f32 %v6396_v5, %v17864_v52  ;;  %v7748_v46 = vrot.slane %v13167_v56, 1  ;;  %v13168_v53 = vld [vmem:[%s13435_s24 + $0x178] sm:$0xff]  }
 0x8d3   : > { %v9299_v50 = vadd.f32 %v16406_v54, %v9167_v2  ;;  %v7585_v57 = vadd.f32 %v7310_v3, %v6669_v15  ;;  %v6847_v2 = vrot.slane %v13168_v53, 1 }
 0x8d4   : > { %v7749_v5 = vsel %vm6753_vm4, %v7746_v40, %v7748_v46 }
 0x8d5   : > { %vm9427_vm7 = vcmp.ge.f32.partialorder %v9299_v50, 0.0  ;;  %v9555_v62 = vmul.f32 0.1, %v9299_v50  ;;  %v8496_v47 = vadd.f32 %v8221_v29, %v7585_v57  ;;  %v8763_v7 = vpop.f32.mrf.mxu0 }
 0x8d7   : > { %v9683_v58 = vsel %vm9427_vm7, %v9299_v50, %v9555_v62  ;;  %v9036_v37 = vadd.f32 %v8761_v43, %v8496_v47  ;;  %v17866_v43 = vld [vmem:[#allocation137_spill] sm:$0xff]  ;;  %v16438_v62 = vsel %vm6753_vm4, %v6845_v31, %v6847_v2 }
 0x8d8   : > { %v9871_v22 = vpack.c.bf16 %v9683_v58, %v9683_v58 }
 0x8d9   : > { %v9168_v42 = vmul.f32 %v16397_v23, %v9036_v37  ;;  %v6399_v34 = vpop.f32.mrf.mxu1  ;;  %v17868_v37 = vld [vmem:[#allocation65_spill] sm:$0xff] }
 0x8da   : > { %10989 = vst.msk [vmem:[%s15754_s22 + $0xc4] sm:$0xf] %vm9766_vm6, %v9871_v22  ;;  %v7312_v48 = vpop.f32.mrf.mxu2  ;;  %v8223_v6 = vpop.f32.mrf.mxu3 }
 0x8db   : > { %v9300_v10 = vadd.f32 %v16406_v54, %v9168_v42  ;;  %v7586_v17 = vadd.f32 %v7312_v48, %v6670_v41 }
 0x8dc   : > { %10661 = vmatmul.msk.bf16.gmra.mxu1 %vm829_vm2, %v17865_v20 }
 0x8dd   : > { %vm9428_vm8 = vcmp.ge.f32.partialorder %v9300_v10, 0.0  ;;  %v9556_v11 = vmul.f32 0.1, %v9300_v10  ;;  %v8497_v4 = vadd.f32 %v8223_v6, %v7586_v17  ;;  %v8766_v32 = vpop.f32.mrf.mxu0  ;;  %v13169_v6 = vld [vmem:[%s13435_s24 + $0x16c] sm:$0xff]  }
 0x8de   : > { %v7750_v34 = vrot.slane %v13169_v6, 1  ;;  %v13170_v32 = vld [vmem:[%s13435_s24 + $0x180] sm:$0xff]   ;;  %v17872_v6 = vld [vmem:[#allocation144_spill] sm:$0xff] }
 0x8df   : > { %v9684_v18 = vsel %vm9428_vm8, %v9300_v10, %v9556_v11  ;;  %v9037_v26 = vadd.f32 %v8763_v7, %v8497_v4  ;;  %10742 = vmatmul.msk.bf16.gmra.mxu2 %vm829_vm2, %v16303_v61  ;;  %10823 = vmatmul.msk.bf16.gmra.mxu3 %vm829_vm2, %v7747_v1  ;;  %v17867_v7 = vld [vmem:[#allocation87_spill] sm:$0xff]  ;;  %v17869_v11 = vld [vmem:[#allocation138_spill] sm:$0xff] }
 0x8e0   : > { %v9872_v13 = vpack.c.bf16 %v9684_v18, %v9684_v18  ;;  %10904 = vmatmul.msk.bf16.gmra.mxu0 %vm829_vm2, %v16418_v60  ;;  %v6849_v18 = vrot.slane %v13170_v32, 1 }
 0x8e1   : > { %v9169_v49 = vmul.f32 %v16397_v23, %v9037_v26  ;;  %v6400_v21 = vpop.f32.mrf.mxu1 }
 0x8e2   : > { %10990 = vst.msk [vmem:[%s15754_s22 + $0xc8] sm:$0xf] %vm9766_vm6, %v9872_v13  ;;  %v7315_v63 = vpop.f32.mrf.mxu2  ;;  %v8226_v30 = vpop.f32.mrf.mxu3  ;;  %v6671_v55 = vadd.f32 %v6400_v21, %v17866_v43  ;;  %v17870_v43 = vld [vmem:[#allocation94_spill] sm:$0xff] }
 0x8e3   : > { %v9301_v12 = vadd.f32 %v16406_v54, %v9169_v49 }
 0x8e5   : > { %vm9429_vm9 = vcmp.ge.f32.partialorder %v9301_v12, 0.0  ;;  %v9557_v61 = vmul.f32 0.1, %v9301_v12  ;;  %v8767_v38 = vpop.f32.mrf.mxu0 }
 0x8e7   : > { %v9685_v44 = vsel %vm9429_vm9, %v9301_v12, %v9557_v61  ;;  %v7751_v12 = vsel %vm6753_vm4, %v7748_v46, %v7750_v34  ;;  %v17871_v46 = vld [vmem:[#allocation71_spill] sm:$0xff] }
 0x8e8   : > { %v9873_v27 = vpack.c.bf16 %v9685_v44, %v9685_v44 }
 0x8e9   : > { %v6403_v50 = vpop.f32.mrf.mxu1 }
 0x8ea   : > { %10991 = vst.msk [vmem:[%s15754_s22 + $0xcc] sm:$0xf] %vm9766_vm6, %v9873_v27  ;;  %v7316_v51 = vpop.f32.mrf.mxu2  ;;  %v8227_v3 = vpop.f32.mrf.mxu3  ;;  %v6672_v22 = vadd.f32 %v6403_v50, %v17868_v37  ;;  %v13171_v37 = vld [vmem:[%s13435_s24 + $0x174] sm:$0xff]  }
 0x8eb   : > { %v7587_v15 = vadd.f32 %v7316_v51, %v6671_v55 }
 0x8ec   : > { %10662 = vmatmul.msk.bf16.gmra.mxu1 %vm829_vm2, %v17867_v7 }
 0x8ed   : > { %v8498_v57 = vadd.f32 %v8227_v3, %v7587_v15  ;;  %v8770_v29 = vpop.f32.mrf.mxu0 }
 0x8ef   : > { %v9038_v47 = vadd.f32 %v8767_v38, %v8498_v57  ;;  %10743 = vmatmul.msk.bf16.gmra.mxu2 %vm829_vm2, %v16323_v35  ;;  %10824 = vmatmul.msk.bf16.gmra.mxu3 %vm829_vm2, %v7749_v5  ;;  %v16459_v38 = vsel %vm6753_vm4, %v6847_v2, %v6849_v18 }
 0x8f0   : > { %10905 = vmatmul.msk.bf16.gmra.mxu0 %vm829_vm2, %v16438_v62 }
 0x8f1   : > { %v9170_v58 = vmul.f32 %v16397_v23, %v9038_v47  ;;  %v6405_v41 = vpop.f32.mrf.mxu1 }
 0x8f2   : > { %v7319_v45 = vpop.f32.mrf.mxu2  ;;  %v8230_v52 = vpop.f32.mrf.mxu3  ;;  %v6673_v4 = vadd.f32 %v6405_v41, %v17869_v11  ;;  %v17873_v11 = vld [vmem:[#allocation74_spill] sm:$0xff] }
 0x8f3   : > { %v9302_v40 = vadd.f32 %v16406_v54, %v9170_v58  ;;  %v7588_v42 = vadd.f32 %v7319_v45, %v6672_v22  ;;  %v7752_v22 = vrot.slane %v13171_v37, 1  ;;  %v13172_v45 = vld [vmem:[%s13435_s24 + $0x188] sm:$0xff]  }
 0x8f5   : > { %vm9430_vm10 = vcmp.ge.f32.partialorder %v9302_v40, 0.0  ;;  %v9558_v35 = vmul.f32 0.1, %v9302_v40  ;;  %v8499_v24 = vadd.f32 %v8230_v52, %v7588_v42  ;;  %v8772_v31 = vpop.f32.mrf.mxu0 }
 0x8f7   : > { %v9686_v48 = vsel %vm9430_vm10, %v9302_v40, %v9558_v35  ;;  %v9039_v10 = vadd.f32 %v8770_v29, %v8499_v24  ;;  %v6851_v40 = vrot.slane %v13172_v45, 1 }
 0x8f8   : > { %v9879_v17 = vpack.c.bf16 %v9686_v48, %v9686_v48  ;;  %v7753_v48 = vsel %vm6753_vm4, %v7750_v34, %v7752_v22 }
 0x8f9   : > { %v9171_v1 = vmul.f32 %v16397_v23, %v9039_v10  ;;  %v6408_v63 = vpop.f32.mrf.mxu1  ;;  %v16481_v10 = vsel %vm6753_vm4, %v6849_v18, %v6851_v40 }
 0x8fa   : > { %10992 = vst.msk [vmem:[%s15754_s22 + $0xd0] sm:$0xf] %vm9766_vm6, %v9879_v17  ;;  %v7321_v26 = vpop.f32.mrf.mxu2  ;;  %v8232_v49 = vpop.f32.mrf.mxu3  ;;  %v6674_v53 = vadd.f32 %v6408_v63, %v17871_v46  ;;  %v13173_v63 = vld [vmem:[%s13435_s24 + $0x17c] sm:$0xff]  }
 0x8fb   : > { %v9303_v20 = vadd.f32 %v16406_v54, %v9171_v1  ;;  %v7589_v13 = vadd.f32 %v7321_v26, %v6673_v4 }
 0x8fc   : > { %10663 = vmatmul.msk.bf16.gmra.mxu1 %vm829_vm2, %v17870_v43 }
 0x8fd   : > { %vm9431_vm11 = vcmp.ge.f32.partialorder %v9303_v20, 0.0  ;;  %v9559_v30 = vmul.f32 0.1, %v9303_v20  ;;  %v8500_v21 = vadd.f32 %v8232_v49, %v7589_v13  ;;  %v8775_v61 = vpop.f32.mrf.mxu0 }
 0x8ff   : > { %v9687_v44 = vsel %vm9431_vm11, %v9303_v20, %v9559_v30  ;;  %v9040_v27 = vadd.f32 %v8772_v31, %v8500_v21  ;;  %10744 = vmatmul.msk.bf16.gmra.mxu2 %vm829_vm2, %v16344_v39  ;;  %10825 = vmatmul.msk.bf16.gmra.mxu3 %vm829_vm2, %v7751_v12  ;;  %v17874_v30 = vld [vmem:[#allocation140_spill] sm:$0xff] }
 0x900   : > { %v9880_v55 = vpack.c.bf16 %v9687_v44, %v9687_v44  ;;  %10906 = vmatmul.msk.bf16.gmra.mxu0 %vm829_vm2, %v16459_v38 }
 0x901   : > { %v9172_v56 = vmul.f32 %v16397_v23, %v9040_v27  ;;  %v6410_v3 = vpop.f32.mrf.mxu1 }
 0x902   : > { %10993 = vst.msk [vmem:[%s15754_s22 + $0xd4] sm:$0xf] %vm9766_vm6, %v9880_v55  ;;  %v7324_v2 = vpop.f32.mrf.mxu2  ;;  %v8235_v39 = vpop.f32.mrf.mxu3 }
 0x903   : > { %v9304_v51 = vadd.f32 %v16406_v54, %v9172_v56  ;;  %v7590_v15 = vadd.f32 %v7324_v2, %v6674_v53 }
 0x905   : > { %vm9432_vm12 = vcmp.ge.f32.partialorder %v9304_v51, 0.0  ;;  %v9560_v50 = vmul.f32 0.1, %v9304_v51  ;;  %v8501_v57 = vadd.f32 %v8235_v39, %v7590_v15  ;;  %v8777_v29 = vpop.f32.mrf.mxu0 }
 0x907   : > { %v9688_v5 = vsel %vm9432_vm12, %v9304_v51, %v9560_v50  ;;  %v9041_v47 = vadd.f32 %v8775_v61, %v8501_v57  ;;  %v13174_v61 = vld [vmem:[%s13435_s24 + $0x190] sm:$0xff]  }
 0x908   : > { %v9881_v7 = vpack.c.bf16 %v9688_v5, %v9688_v5  ;;  %v6853_v44 = vrot.slane %v13174_v61, 1  ;;  %v17875_v57 = vld [vmem:[#allocation7_spill] sm:$0xff] }
 0x909   : > { %v9173_v58 = vmul.f32 %v16397_v23, %v9041_v47  ;;  %v6412_v35 = vpop.f32.mrf.mxu1  ;;  %v17876_v47 = vld [vmem:[#allocation80_spill] sm:$0xff] }
 0x90a   : > { %10994 = vst.msk [vmem:[%s15754_s22 + $0xd8] sm:$0xf] %vm9766_vm6, %v9881_v7  ;;  %v7326_v42 = vpop.f32.mrf.mxu2  ;;  %v8237_v41 = vpop.f32.mrf.mxu3  ;;  %v6675_v34 = vadd.f32 %v6412_v35, %v17873_v11  ;;  %v16500_v39 = vsel %vm6753_vm4, %v6851_v40, %v6853_v44  ;;  %v13176_v11 = vld [vmem:[%s13435_s24 + $0x198] sm:$0xff]  }
 0x90b   : > { %v9305_v52 = vadd.f32 %v16406_v54, %v9173_v58 }
 0x90c   : > { %10664 = vmatmul.msk.bf16.gmra.mxu1 %vm829_vm2, %v17872_v6  ;;  %v17877_v6 = vld [vmem:[#allocation141_spill] sm:$0xff] }
 0x90d   : > { %vm9433_vm13 = vcmp.ge.f32.partialorder %v9305_v52, 0.0  ;;  %v9561_v24 = vmul.f32 0.1, %v9305_v52  ;;  %v8779_v31 = vpop.f32.mrf.mxu0 }
 0x90f   : > { %v9689_v17 = vsel %vm9433_vm13, %v9305_v52, %v9561_v24  ;;  %10745 = vmatmul.msk.bf16.gmra.mxu2 %vm829_vm2, %v16366_v16  ;;  %10826 = vmatmul.msk.bf16.gmra.mxu3 %vm829_vm2, %v7753_v48  ;;  %v7754_v16 = vrot.slane %v13173_v63, 1 }
 0x910   : > { %v9882_v1 = vpack.c.bf16 %v9689_v17, %v9689_v17  ;;  %10907 = vmatmul.msk.bf16.gmra.mxu0 %vm829_vm2, %v16481_v10 }
 0x911   : > { %v6414_v26 = vpop.f32.mrf.mxu1  ;;  %v7755_v53 = vsel %vm6753_vm4, %v7752_v22, %v7754_v16 }
 0x912   : > { %10995 = vst.msk [vmem:[%s15754_s22 + $0xdc] sm:$0xf] %vm9766_vm6, %v9882_v1  ;;  %v7328_v4 = vpop.f32.mrf.mxu2  ;;  %v8239_v18 = vpop.f32.mrf.mxu3  ;;  %v6676_v21 = vadd.f32 %v6414_v26, %v17874_v30 }
 0x913   : > { %v7591_v32 = vadd.f32 %v7328_v4, %v6675_v34  ;;  %v6855_v34 = vrot.slane %v13176_v11, 1 }
 0x915   : > { %v8502_v20 = vadd.f32 %v8239_v18, %v7591_v32  ;;  %v8781_v13 = vpop.f32.mrf.mxu0  ;;  %v16523_v30 = vsel %vm6753_vm4, %v6853_v44, %v6855_v34 }
 0x917   : > { %v9042_v49 = vadd.f32 %v8779_v31, %v8502_v20  ;;  %v13175_v31 = vld [vmem:[%s13435_s24 + $0x184] sm:$0xff]  }
 0x918   : > { %v7756_v48 = vrot.slane %v13175_v31, 1 }
 0x919   : > { %v9174_v12 = vmul.f32 %v16397_v23, %v9042_v49  ;;  %v6417_v46 = vpop.f32.mrf.mxu1 }
 0x91a   : > { %v7330_v27 = vpop.f32.mrf.mxu2  ;;  %v8241_v56 = vpop.f32.mrf.mxu3  ;;  %v6677_v7 = vadd.f32 %v6417_v46, %v17876_v47 }
 0x91b   : > { %v9306_v43 = vadd.f32 %v16406_v54, %v9174_v12  ;;  %v7592_v55 = vadd.f32 %v7330_v27, %v6676_v21  ;;  %v17878_v27 = vld [vmem:[#allocation12_spill] sm:$0xff] }
 0x91c   : > { %10665 = vmatmul.msk.bf16.gmra.mxu1 %vm829_vm2, %v17875_v57 }
 0x91d   : > { %vm9434_vm14 = vcmp.ge.f32.partialorder %v9306_v43, 0.0  ;;  %v9562_v2 = vmul.f32 0.1, %v9306_v43  ;;  %v8503_v51 = vadd.f32 %v8241_v56, %v7592_v55  ;;  %v8784_v15 = vpop.f32.mrf.mxu0 }
 0x91f   : > { %v9690_v3 = vsel %vm9434_vm14, %v9306_v43, %v9562_v2  ;;  %v9043_v50 = vadd.f32 %v8781_v13, %v8503_v51  ;;  %10746 = vmatmul.msk.bf16.gmra.mxu2 %vm829_vm2, %v16385_v28  ;;  %10827 = vmatmul.msk.bf16.gmra.mxu3 %vm829_vm2, %v7755_v53  ;;  %v7757_v13 = vsel %vm6753_vm4, %v7754_v16, %v7756_v48 }
 0x920   : > { %v9888_v29 = vpack.c.bf16 %v9690_v3, %v9690_v3  ;;  %10908 = vmatmul.msk.bf16.gmra.mxu0 %vm829_vm2, %v16500_v39 }
 0x921   : > { %v9175_v5 = vmul.f32 %v16397_v23, %v9043_v50  ;;  %v6419_v45 = vpop.f32.mrf.mxu1  ;;  %v13177_v50 = vld [vmem:[%s13435_s24 + $0x18c] sm:$0xff]  }
 0x922   : > { %10996 = vst.msk [vmem:[%s15754_s22 + $0xe0] sm:$0xf] %vm9766_vm6, %v9888_v29  ;;  %v7333_v58 = vpop.f32.mrf.mxu2  ;;  %v8244_v28 = vpop.f32.mrf.mxu3  ;;  %v6678_v1 = vadd.f32 %v6419_v45, %v17877_v6  ;;  %v7758_v57 = vrot.slane %v13177_v50, 1  ;;  %v13178_v29 = vld [vmem:[%s13435_s24 + $0x1a0] sm:$0xff]  }
 0x923   : > { %v9307_v37 = vadd.f32 %v16406_v54, %v9175_v5  ;;  %v7593_v22 = vadd.f32 %v7333_v58, %v6677_v7  ;;  %v6857_v5 = vrot.slane %v13178_v29, 1 }
 0x924   : > { %v7759_v45 = vsel %vm6753_vm4, %v7756_v48, %v7758_v57 }
 0x925   : > { %vm9435_vm15 = vcmp.ge.f32.partialorder %v9307_v37, 0.0  ;;  %v9563_v40 = vmul.f32 0.1, %v9307_v37  ;;  %v8504_v42 = vadd.f32 %v8244_v28, %v7593_v22  ;;  %v8786_v52 = vpop.f32.mrf.mxu0 }
 0x927   : > { %v9691_v41 = vsel %vm9435_vm15, %v9307_v37, %v9563_v40  ;;  %v9044_v35 = vadd.f32 %v8784_v15, %v8504_v42  ;;  %v17879_v15 = vld [vmem:[#allocation142_spill] sm:$0xff]  ;;  %v16543_v40 = vsel %vm6753_vm4, %v6855_v34, %v6857_v5 }
 0x928   : > { %v9889_v24 = vpack.c.bf16 %v9691_v41, %v9691_v41 }
 0x929   : > { %v9176_v17 = vmul.f32 %v16397_v23, %v9044_v35  ;;  %v6422_v20 = vpop.f32.mrf.mxu1  ;;  %v17881_v35 = vld [vmem:[#allocation90_spill] sm:$0xff] }
 0x92a   : > { %10997 = vst.msk [vmem:[%s15754_s22 + $0xe4] sm:$0xf] %vm9766_vm6, %v9889_v24  ;;  %v7335_v4 = vpop.f32.mrf.mxu2  ;;  %v8246_v26 = vpop.f32.mrf.mxu3 }
 0x92b   : > { %v9308_v32 = vadd.f32 %v16406_v54, %v9176_v17  ;;  %v7594_v18 = vadd.f32 %v7335_v4, %v6678_v1 }
 0x92c   : > { %10666 = vmatmul.msk.bf16.gmra.mxu1 %vm829_vm2, %v17878_v27 }
 0x92d   : > { %vm9436_vm0 = vcmp.ge.f32.partialorder %v9308_v32, 0.0  ;;  %v9564_v49 = vmul.f32 0.1, %v9308_v32  ;;  %v8505_v63 = vadd.f32 %v8246_v26, %v7594_v18  ;;  %v8789_v12 = vpop.f32.mrf.mxu0  ;;  %v13179_v26 = vld [vmem:[%s13435_s24 + $0x194] sm:$0xff]  }
 0x92e   : > { %v7760_v20 = vrot.slane %v13179_v26, 1  ;;  %v13180_v12 = vld [vmem:[%s13435_s24 + $0x1a8] sm:$0xff]   ;;  %v17885_v26 = vld [vmem:[#allocation149_spill] sm:$0xff] }
 0x92f   : > { %v9692_v21 = vsel %vm9436_vm0, %v9308_v32, %v9564_v49  ;;  %v9045_v61 = vadd.f32 %v8786_v52, %v8505_v63  ;;  %10747 = vmatmul.msk.bf16.gmra.mxu2 %vm829_vm2, %v16418_v60  ;;  %10828 = vmatmul.msk.bf16.gmra.mxu3 %vm829_vm2, %v7757_v13  ;;  %v17880_v52 = vld [vmem:[#allocation15_spill] sm:$0xff] }
 0x930   : > { %v9890_v43 = vpack.c.bf16 %v9692_v21, %v9692_v21  ;;  %10909 = vmatmul.msk.bf16.gmra.mxu0 %vm829_vm2, %v16523_v30  ;;  %v17882_v49 = vld [vmem:[#allocation143_spill] sm:$0xff]  ;;  %v6859_v21 = vrot.slane %v13180_v12, 1 }
 0x931   : > { %v9177_v16 = vmul.f32 %v16397_v23, %v9045_v61  ;;  %v6423_v46 = vpop.f32.mrf.mxu1 }
 0x932   : > { %10998 = vst.msk [vmem:[%s15754_s22 + $0xe8] sm:$0xf] %vm9766_vm6, %v9890_v43  ;;  %v7338_v44 = vpop.f32.mrf.mxu2  ;;  %v8249_v56 = vpop.f32.mrf.mxu3  ;;  %v6679_v3 = vadd.f32 %v6423_v46, %v17879_v15  ;;  %v17883_v15 = vld [vmem:[#allocation21_spill] sm:$0xff] }
 0x933   : > { %v9309_v55 = vadd.f32 %v16406_v54, %v9177_v16 }
 0x935   : > { %vm9437_vm1 = vcmp.ge.f32.partialorder %v9309_v55, 0.0  ;;  %v9565_v60 = vmul.f32 0.1, %v9309_v55  ;;  %v8790_v53 = vpop.f32.mrf.mxu0 }
 0x937   : > { %v9693_v2 = vsel %vm9437_vm1, %v9309_v55, %v9565_v60  ;;  %v7761_v55 = vsel %vm6753_vm4, %v7758_v57, %v7760_v20  ;;  %v17884_v57 = vld [vmem:[#allocation97_spill] sm:$0xff] }
 0x938   : > { %v9891_v51 = vpack.c.bf16 %v9693_v2, %v9693_v2 }
 0x939   : > { %v6426_v37 = vpop.f32.mrf.mxu1 }
 0x93a   : > { %10999 = vst.msk [vmem:[%s15754_s22 + $0xec] sm:$0xf] %vm9766_vm6, %v9891_v51  ;;  %v7339_v47 = vpop.f32.mrf.mxu2  ;;  %v8250_v58 = vpop.f32.mrf.mxu3  ;;  %v6680_v24 = vadd.f32 %v6426_v37, %v17881_v35  ;;  %v13181_v35 = vld [vmem:[%s13435_s24 + $0x19c] sm:$0xff]  }
 0x93b   : > { %v7595_v7 = vadd.f32 %v7339_v47, %v6679_v3 }
 0x93c   : > { %10667 = vmatmul.msk.bf16.gmra.mxu1 %vm829_vm2, %v17880_v52 }
 0x93d   : > { %v8506_v22 = vadd.f32 %v8250_v58, %v7595_v7  ;;  %v8793_v28 = vpop.f32.mrf.mxu0 }
 0x93f   : > { %v9046_v42 = vadd.f32 %v8790_v53, %v8506_v22  ;;  %10748 = vmatmul.msk.bf16.gmra.mxu2 %vm829_vm2, %v16438_v62  ;;  %10829 = vmatmul.msk.bf16.gmra.mxu3 %vm829_vm2, %v7759_v45  ;;  %v16564_v53 = vsel %vm6753_vm4, %v6857_v5, %v6859_v21 }
 0x940   : > { %10910 = vmatmul.msk.bf16.gmra.mxu0 %vm829_vm2, %v16543_v40 }
 0x941   : > { %v9178_v41 = vmul.f32 %v16397_v23, %v9046_v42  ;;  %v6428_v1 = vpop.f32.mrf.mxu1 }
 0x942   : > { %v7342_v31 = vpop.f32.mrf.mxu2  ;;  %v8253_v6 = vpop.f32.mrf.mxu3  ;;  %v6681_v63 = vadd.f32 %v6428_v1, %v17882_v49  ;;  %v17886_v49 = vld [vmem:[#allocation5_spill] sm:$0xff] }
 0x943   : > { %v9310_v48 = vadd.f32 %v16406_v54, %v9178_v41  ;;  %v7596_v17 = vadd.f32 %v7342_v31, %v6680_v24  ;;  %v7762_v24 = vrot.slane %v13181_v35, 1  ;;  %v13182_v31 = vld [vmem:[%s13435_s24 + $0x1b0] sm:$0xff]  }
 0x945   : > { %vm9438_vm5 = vcmp.ge.f32.partialorder %v9310_v48, 0.0  ;;  %v9566_v62 = vmul.f32 0.1, %v9310_v48  ;;  %v8507_v11 = vadd.f32 %v8253_v6, %v7596_v17  ;;  %v8795_v34 = vpop.f32.mrf.mxu0 }
 0x947   : > { %v9694_v4 = vsel %vm9438_vm5, %v9310_v48, %v9566_v62  ;;  %v9047_v32 = vadd.f32 %v8793_v28, %v8507_v11  ;;  %v6861_v48 = vrot.slane %v13182_v31, 1 }
 0x948   : > { %v9897_v18 = vpack.c.bf16 %v9694_v4, %v9694_v4  ;;  %v7763_v4 = vsel %vm6753_vm4, %v7760_v20, %v7762_v24 }
 0x949   : > { %v9179_v13 = vmul.f32 %v16397_v23, %v9047_v32  ;;  %v6431_v44 = vpop.f32.mrf.mxu1  ;;  %v16586_v32 = vsel %vm6753_vm4, %v6859_v21, %v6861_v48 }
 0x94a   : > { %11000 = vst.msk [vmem:[%s15754_s22 + $0xf0] sm:$0xf] %vm9766_vm6, %v9897_v18  ;;  %v7344_v61 = vpop.f32.mrf.mxu2  ;;  %v8255_v16 = vpop.f32.mrf.mxu3  ;;  %v6682_v29 = vadd.f32 %v6431_v44, %v17884_v57  ;;  %v13183_v44 = vld [vmem:[%s13435_s24 + $0x1a4] sm:$0xff]  }
 0x94b   : > { %v9311_v27 = vadd.f32 %v16406_v54, %v9179_v13  ;;  %v7597_v43 = vadd.f32 %v7344_v61, %v6681_v63 }
 0x94c   : > { %10668 = vmatmul.msk.bf16.gmra.mxu1 %vm829_vm2, %v17883_v15 }
 0x94d   : > { %vm9439_vm7 = vcmp.ge.f32.partialorder %v9311_v27, 0.0  ;;  %v9567_v56 = vmul.f32 0.1, %v9311_v27  ;;  %v8508_v46 = vadd.f32 %v8255_v16, %v7597_v43  ;;  %v8798_v60 = vpop.f32.mrf.mxu0 }
 0x94f   : > { %v9695_v2 = vsel %vm9439_vm7, %v9311_v27, %v9567_v56  ;;  %v9048_v51 = vadd.f32 %v8795_v34, %v8508_v46  ;;  %10749 = vmatmul.msk.bf16.gmra.mxu2 %vm829_vm2, %v16459_v38  ;;  %10830 = vmatmul.msk.bf16.gmra.mxu3 %vm829_vm2, %v7761_v55  ;;  %v17887_v56 = vld [vmem:[#allocation145_spill] sm:$0xff] }
 0x950   : > { %v9898_v3 = vpack.c.bf16 %v9695_v2, %v9695_v2  ;;  %10911 = vmatmul.msk.bf16.gmra.mxu0 %vm829_vm2, %v16564_v53 }
 0x951   : > { %v9180_v50 = vmul.f32 %v16397_v23, %v9048_v51  ;;  %v6433_v58 = vpop.f32.mrf.mxu1 }
 0x952   : > { %11001 = vst.msk [vmem:[%s15754_s22 + $0xf4] sm:$0xf] %vm9766_vm6, %v9898_v3  ;;  %v7347_v5 = vpop.f32.mrf.mxu2  ;;  %v8258_v38 = vpop.f32.mrf.mxu3 }
 0x953   : > { %v9312_v47 = vadd.f32 %v16406_v54, %v9180_v50  ;;  %v7598_v7 = vadd.f32 %v7347_v5, %v6682_v29 }
 0x955   : > { %vm9440_vm8 = vcmp.ge.f32.partialorder %v9312_v47, 0.0  ;;  %v9568_v37 = vmul.f32 0.1, %v9312_v47  ;;  %v8509_v22 = vadd.f32 %v8258_v38, %v7598_v7  ;;  %v8800_v28 = vpop.f32.mrf.mxu0 }
 0x957   : > { %v9696_v45 = vsel %vm9440_vm8, %v9312_v47, %v9568_v37  ;;  %v9049_v42 = vadd.f32 %v8798_v60, %v8509_v22  ;;  %v13184_v60 = vld [vmem:[%s13435_s24 + $0x1b8] sm:$0xff]   ;;  %v17888_v22 = vld [vmem:[#allocation30_spill] sm:$0xff] }
 0x958   : > { %v9899_v52 = vpack.c.bf16 %v9696_v45, %v9696_v45  ;;  %v6863_v2 = vrot.slane %v13184_v60, 1 }
 0x959   : > { %v9181_v41 = vmul.f32 %v16397_v23, %v9049_v42  ;;  %v6435_v62 = vpop.f32.mrf.mxu1  ;;  %v17889_v42 = vld [vmem:[#allocation9_spill] sm:$0xff] }
 0x95a   : > { %11002 = vst.msk [vmem:[%s15754_s22 + $0xf8] sm:$0xf] %vm9766_vm6, %v9899_v52  ;;  %v7349_v17 = vpop.f32.mrf.mxu2  ;;  %v8260_v1 = vpop.f32.mrf.mxu3  ;;  %v6683_v20 = vadd.f32 %v6435_v62, %v17886_v49  ;;  %v16605_v38 = vsel %vm6753_vm4, %v6861_v48, %v6863_v2  ;;  %v13186_v49 = vld [vmem:[%s13435_s24 + $0x1c0] sm:$0xff]  }
 0x95b   : > { %v9313_v6 = vadd.f32 %v16406_v54, %v9181_v41 }
 0x95c   : > { %10669 = vmatmul.msk.bf16.gmra.mxu1 %vm829_vm2, %v17885_v26  ;;  %v17890_v26 = vld [vmem:[#allocation146_spill] sm:$0xff] }
 0x95d   : > { %vm9441_vm9 = vcmp.ge.f32.partialorder %v9313_v6, 0.0  ;;  %v9569_v11 = vmul.f32 0.1, %v9313_v6  ;;  %v8802_v34 = vpop.f32.mrf.mxu0 }
 0x95f   : > { %v9697_v18 = vsel %vm9441_vm9, %v9313_v6, %v9569_v11  ;;  %10750 = vmatmul.msk.bf16.gmra.mxu2 %vm829_vm2, %v16481_v10  ;;  %10831 = vmatmul.msk.bf16.gmra.mxu3 %vm829_vm2, %v7763_v4  ;;  %v7764_v10 = vrot.slane %v13183_v44, 1 }
 0x960   : > { %v9900_v13 = vpack.c.bf16 %v9697_v18, %v9697_v18  ;;  %10912 = vmatmul.msk.bf16.gmra.mxu0 %vm829_vm2, %v16586_v32 }
 0x961   : > { %v6437_v61 = vpop.f32.mrf.mxu1  ;;  %v7765_v29 = vsel %vm6753_vm4, %v7762_v24, %v7764_v10 }
 0x962   : > { %11003 = vst.msk [vmem:[%s15754_s22 + $0xfc] sm:$0xf] %vm9766_vm6, %v9900_v13  ;;  %v7351_v63 = vpop.f32.mrf.mxu2  ;;  %v8262_v21 = vpop.f32.mrf.mxu3  ;;  %v6684_v46 = vadd.f32 %v6437_v61, %v17887_v56 }
 0x963   : > { %v7599_v12 = vadd.f32 %v7351_v63, %v6683_v20  ;;  %v6865_v20 = vrot.slane %v13186_v49, 1 }
 0x965   : > { %v8510_v27 = vadd.f32 %v8262_v21, %v7599_v12  ;;  %v8804_v43 = vpop.f32.mrf.mxu0  ;;  %v16628_v56 = vsel %vm6753_vm4, %v6863_v2, %v6865_v20 }
 0x967   : > { %v9050_v16 = vadd.f32 %v8802_v34, %v8510_v27  ;;  %v13185_v34 = vld [vmem:[%s13435_s24 + $0x1ac] sm:$0xff]  }
 0x968   : > { %v7766_v4 = vrot.slane %v13185_v34, 1 }
 0x969   : > { %v9182_v55 = vmul.f32 %v16397_v23, %v9050_v16  ;;  %v6440_v57 = vpop.f32.mrf.mxu1 }
 0x96a   : > { %v7353_v51 = vpop.f32.mrf.mxu2  ;;  %v8264_v50 = vpop.f32.mrf.mxu3  ;;  %v6685_v52 = vadd.f32 %v6440_v57, %v17889_v42 }
 0x96b   : > { %v9314_v15 = vadd.f32 %v16406_v54, %v9182_v55  ;;  %v7600_v3 = vadd.f32 %v7353_v51, %v6684_v46  ;;  %v17891_v51 = vld [vmem:[#allocation36_spill] sm:$0xff] }
 0x96c   : > { %10670 = vmatmul.msk.bf16.gmra.mxu1 %vm829_vm2, %v17888_v22 }
 0x96d   : > { %vm9442_vm10 = vcmp.ge.f32.partialorder %v9314_v15, 0.0  ;;  %v9570_v5 = vmul.f32 0.1, %v9314_v15  ;;  %v8511_v47 = vadd.f32 %v8264_v50, %v7600_v3  ;;  %v8807_v7 = vpop.f32.mrf.mxu0 }
 0x96f   : > { %v9698_v58 = vsel %vm9442_vm10, %v9314_v15, %v9570_v5  ;;  %v9051_v37 = vadd.f32 %v8804_v43, %v8511_v47  ;;  %10751 = vmatmul.msk.bf16.gmra.mxu2 %vm829_vm2, %v16500_v39  ;;  %10832 = vmatmul.msk.bf16.gmra.mxu3 %vm829_vm2, %v7765_v29  ;;  %v7767_v43 = vsel %vm6753_vm4, %v7764_v10, %v7766_v4 }
 0x970   : > { %v9906_v28 = vpack.c.bf16 %v9698_v58, %v9698_v58  ;;  %10913 = vmatmul.msk.bf16.gmra.mxu0 %vm829_vm2, %v16605_v38 }
 0x971   : > { %v9183_v45 = vmul.f32 %v16397_v23, %v9051_v37  ;;  %v6442_v31 = vpop.f32.mrf.mxu1  ;;  %v13187_v37 = vld [vmem:[%s13435_s24 + $0x1b4] sm:$0xff]  }
 0x972   : > { %11004 = vst.msk [vmem:[%s15754_s22 + $0x100] sm:$0xf] %vm9766_vm6, %v9906_v28  ;;  %v7356_v41 = vpop.f32.mrf.mxu2  ;;  %v8267_v39 = vpop.f32.mrf.mxu3  ;;  %v6686_v13 = vadd.f32 %v6442_v31, %v17890_v26  ;;  %v7768_v22 = vrot.slane %v13187_v37, 1  ;;  %v13188_v28 = vld [vmem:[%s13435_s24 + $0x1c8] sm:$0xff]  }
 0x973   : > { %v9315_v35 = vadd.f32 %v16406_v54, %v9183_v45  ;;  %v7601_v24 = vadd.f32 %v7356_v41, %v6685_v52  ;;  %v6867_v45 = vrot.slane %v13188_v28, 1 }
 0x974   : > { %v7769_v31 = vsel %vm6753_vm4, %v7766_v4, %v7768_v22 }
 0x975   : > { %vm9443_vm11 = vcmp.ge.f32.partialorder %v9315_v35, 0.0  ;;  %v9571_v48 = vmul.f32 0.1, %v9315_v35  ;;  %v8512_v17 = vadd.f32 %v8267_v39, %v7601_v24  ;;  %v8809_v6 = vpop.f32.mrf.mxu0 }
 0x977   : > { %v9699_v1 = vsel %vm9443_vm11, %v9315_v35, %v9571_v48  ;;  %v9052_v62 = vadd.f32 %v8807_v7, %v8512_v17  ;;  %v17892_v7 = vld [vmem:[#allocation147_spill] sm:$0xff]  ;;  %v16648_v48 = vsel %vm6753_vm4, %v6865_v20, %v6867_v45 }
 0x978   : > { %v9907_v11 = vpack.c.bf16 %v9699_v1, %v9699_v1 }
 0x979   : > { %v9184_v18 = vmul.f32 %v16397_v23, %v9052_v62  ;;  %v6445_v27 = vpop.f32.mrf.mxu1  ;;  %v17894_v62 = vld [vmem:[#allocation18_spill] sm:$0xff] }
 0x97a   : > { %11005 = vst.msk [vmem:[%s15754_s22 + $0x104] sm:$0xf] %vm9766_vm6, %v9907_v11  ;;  %v7358_v63 = vpop.f32.mrf.mxu2  ;;  %v8269_v61 = vpop.f32.mrf.mxu3 }
 0x97b   : > { %v9316_v12 = vadd.f32 %v16406_v54, %v9184_v18  ;;  %v7602_v21 = vadd.f32 %v7358_v63, %v6686_v13 }
 0x97c   : > { %10671 = vmatmul.msk.bf16.gmra.mxu1 %vm829_vm2, %v17891_v51 }
 0x97d   : > { %vm9444_vm12 = vcmp.ge.f32.partialorder %v9316_v12, 0.0  ;;  %v9572_v16 = vmul.f32 0.1, %v9316_v12  ;;  %v8513_v44 = vadd.f32 %v8269_v61, %v7602_v21  ;;  %v8812_v55 = vpop.f32.mrf.mxu0  ;;  %v13189_v61 = vld [vmem:[%s13435_s24 + $0x1bc] sm:$0xff]  }
 0x97e   : > { %v7770_v27 = vrot.slane %v13189_v61, 1  ;;  %v13190_v55 = vld [vmem:[%s13435_s24 + $0x1d0] sm:$0xff]   ;;  %v17898_v61 = vld [vmem:[#allocation154_spill] sm:$0xff] }
 0x97f   : > { %v9700_v46 = vsel %vm9444_vm12, %v9316_v12, %v9572_v16  ;;  %v9053_v60 = vadd.f32 %v8809_v6, %v8513_v44  ;;  %10752 = vmatmul.msk.bf16.gmra.mxu2 %vm829_vm2, %v16523_v30  ;;  %10833 = vmatmul.msk.bf16.gmra.mxu3 %vm829_vm2, %v7767_v43  ;;  %v17893_v6 = vld [vmem:[#allocation39_spill] sm:$0xff]  ;;  %v17895_v16 = vld [vmem:[#allocation148_spill] sm:$0xff] }
 0x980   : > { %v9908_v15 = vpack.c.bf16 %v9700_v46, %v9700_v46  ;;  %10914 = vmatmul.msk.bf16.gmra.mxu0 %vm829_vm2, %v16628_v56  ;;  %v6869_v46 = vrot.slane %v13190_v55, 1 }
 0x981   : > { %v9185_v10 = vmul.f32 %v16397_v23, %v9053_v60  ;;  %v6446_v57 = vpop.f32.mrf.mxu1 }
 0x982   : > { %11006 = vst.msk [vmem:[%s15754_s22 + $0x108] sm:$0xf] %vm9766_vm6, %v9908_v15  ;;  %v7361_v2 = vpop.f32.mrf.mxu2  ;;  %v8272_v50 = vpop.f32.mrf.mxu3  ;;  %v6687_v58 = vadd.f32 %v6446_v57, %v17892_v7  ;;  %v17896_v7 = vld [vmem:[#allocation45_spill] sm:$0xff] }
 0x983   : > { %v9317_v3 = vadd.f32 %v16406_v54, %v9185_v10 }
 0x985   : > { %vm9445_vm13 = vcmp.ge.f32.partialorder %v9317_v3, 0.0  ;;  %v9573_v30 = vmul.f32 0.1, %v9317_v3  ;;  %v8813_v29 = vpop.f32.mrf.mxu0 }
 0x987   : > { %v9701_v5 = vsel %vm9445_vm13, %v9317_v3, %v9573_v30  ;;  %v7771_v3 = vsel %vm6753_vm4, %v7768_v22, %v7770_v27  ;;  %v17897_v22 = vld [vmem:[#allocation24_spill] sm:$0xff] }
 0x988   : > { %v9909_v47 = vpack.c.bf16 %v9701_v5, %v9701_v5 }
 0x989   : > { %v6449_v35 = vpop.f32.mrf.mxu1 }
 0x98a   : > { %11007 = vst.msk [vmem:[%s15754_s22 + $0x10c] sm:$0xf] %vm9766_vm6, %v9909_v47  ;;  %v7362_v42 = vpop.f32.mrf.mxu2  ;;  %v8273_v41 = vpop.f32.mrf.mxu3  ;;  %v6688_v11 = vadd.f32 %v6449_v35, %v17894_v62  ;;  %v13191_v62 = vld [vmem:[%s13435_s24 + $0x1c4] sm:$0xff]  }
 0x98b   : > { %v7603_v52 = vadd.f32 %v7362_v42, %v6687_v58 }
 0x98c   : > { %10672 = vmatmul.msk.bf16.gmra.mxu1 %vm829_vm2, %v17893_v6 }
 0x98d   : > { %v8514_v24 = vadd.f32 %v8273_v41, %v7603_v52  ;;  %v8816_v39 = vpop.f32.mrf.mxu0 }
 0x98f   : > { %v9054_v17 = vadd.f32 %v8813_v29, %v8514_v24  ;;  %10753 = vmatmul.msk.bf16.gmra.mxu2 %vm829_vm2, %v16543_v40  ;;  %10834 = vmatmul.msk.bf16.gmra.mxu3 %vm829_vm2, %v7769_v31  ;;  %v16669_v29 = vsel %vm6753_vm4, %v6867_v45, %v6869_v46 }
 0x990   : > { %10915 = vmatmul.msk.bf16.gmra.mxu0 %vm829_vm2, %v16648_v48 }
 0x991   : > { %v9186_v1 = vmul.f32 %v16397_v23, %v9054_v17  ;;  %v6451_v13 = vpop.f32.mrf.mxu1 }
 0x992   : > { %v7365_v34 = vpop.f32.mrf.mxu2  ;;  %v8276_v26 = vpop.f32.mrf.mxu3  ;;  %v6689_v44 = vadd.f32 %v6451_v13, %v17895_v16  ;;  %v17899_v16 = vld [vmem:[#allocation27_spill] sm:$0xff] }
 0x993   : > { %v9318_v4 = vadd.f32 %v16406_v54, %v9186_v1  ;;  %v7604_v18 = vadd.f32 %v7365_v34, %v6688_v11  ;;  %v7772_v11 = vrot.slane %v13191_v62, 1  ;;  %v13192_v34 = vld [vmem:[%s13435_s24 + $0x1d8] sm:$0xff]  }
 0x995   : > { %vm9446_vm14 = vcmp.ge.f32.partialorder %v9318_v4, 0.0  ;;  %v9574_v40 = vmul.f32 0.1, %v9318_v4  ;;  %v8515_v49 = vadd.f32 %v8276_v26, %v7604_v18  ;;  %v8818_v20 = vpop.f32.mrf.mxu0 }
 0x997   : > { %v9702_v63 = vsel %vm9446_vm14, %v9318_v4, %v9574_v40  ;;  %v9055_v12 = vadd.f32 %v8816_v39, %v8515_v49  ;;  %v6871_v4 = vrot.slane %v13192_v34, 1 }
 0x998   : > { %v9915_v21 = vpack.c.bf16 %v9702_v63, %v9702_v63  ;;  %v7773_v63 = vsel %vm6753_vm4, %v7770_v27, %v7772_v11 }
 0x999   : > { %v9187_v43 = vmul.f32 %v16397_v23, %v9055_v12  ;;  %v6454_v2 = vpop.f32.mrf.mxu1  ;;  %v16691_v12 = vsel %vm6753_vm4, %v6869_v46, %v6871_v4 }
 0x99a   : > { %11008 = vst.msk [vmem:[%s15754_s22 + $0x110] sm:$0xf] %vm9766_vm6, %v9915_v21  ;;  %v7367_v60 = vpop.f32.mrf.mxu2  ;;  %v8278_v10 = vpop.f32.mrf.mxu3  ;;  %v6690_v28 = vadd.f32 %v6454_v2, %v17897_v22  ;;  %v13193_v2 = vld [vmem:[%s13435_s24 + $0x1cc] sm:$0xff]  }
 0x99b   : > { %v9319_v51 = vadd.f32 %v16406_v54, %v9187_v43  ;;  %v7605_v15 = vadd.f32 %v7367_v60, %v6689_v44 }
 0x99c   : > { %10673 = vmatmul.msk.bf16.gmra.mxu1 %vm829_vm2, %v17896_v7 }
 0x99d   : > { %vm9447_vm15 = vcmp.ge.f32.partialorder %v9319_v51, 0.0  ;;  %v9575_v50 = vmul.f32 0.1, %v9319_v51  ;;  %v8516_v57 = vadd.f32 %v8278_v10, %v7605_v15  ;;  %v8821_v30 = vpop.f32.mrf.mxu0 }
 0x99f   : > { %v9703_v5 = vsel %vm9447_vm15, %v9319_v51, %v9575_v50  ;;  %v9056_v47 = vadd.f32 %v8818_v20, %v8516_v57  ;;  %10754 = vmatmul.msk.bf16.gmra.mxu2 %vm829_vm2, %v16564_v53  ;;  %10835 = vmatmul.msk.bf16.gmra.mxu3 %vm829_vm2, %v7771_v3  ;;  %v17900_v50 = vld [vmem:[#allocation150_spill] sm:$0xff] }
 0x9a0   : > { %v9916_v58 = vpack.c.bf16 %v9703_v5, %v9703_v5  ;;  %10916 = vmatmul.msk.bf16.gmra.mxu0 %vm829_vm2, %v16669_v29 }
 0x9a1   : > { %v9188_v37 = vmul.f32 %v16397_v23, %v9056_v47  ;;  %v6456_v41 = vpop.f32.mrf.mxu1 }
 0x9a2   : > { %11009 = vst.msk [vmem:[%s15754_s22 + $0x114] sm:$0xf] %vm9766_vm6, %v9916_v58  ;;  %v7370_v45 = vpop.f32.mrf.mxu2  ;;  %v8281_v53 = vpop.f32.mrf.mxu3 }
 0x9a3   : > { %v9320_v42 = vadd.f32 %v16406_v54, %v9188_v37  ;;  %v7606_v52 = vadd.f32 %v7370_v45, %v6690_v28 }
 0x9a5   : > { %vm9448_vm0 = vcmp.ge.f32.partialorder %v9320_v42, 0.0  ;;  %v9576_v35 = vmul.f32 0.1, %v9320_v42  ;;  %v8517_v24 = vadd.f32 %v8281_v53, %v7606_v52  ;;  %v8823_v39 = vpop.f32.mrf.mxu0 }
 0x9a7   : > { %v9704_v31 = vsel %vm9448_vm0, %v9320_v42, %v9576_v35  ;;  %v9057_v17 = vadd.f32 %v8821_v30, %v8517_v24  ;;  %v13194_v30 = vld [vmem:[%s13435_s24 + $0x1e0] sm:$0xff]   ;;  %v17901_v24 = vld [vmem:[#allocation54_spill] sm:$0xff] }
 0x9a8   : > { %v9917_v6 = vpack.c.bf16 %v9704_v31, %v9704_v31  ;;  %v6873_v5 = vrot.slane %v13194_v30, 1 }
 0x9a9   : > { %v9189_v1 = vmul.f32 %v16397_v23, %v9057_v17  ;;  %v6458_v40 = vpop.f32.mrf.mxu1  ;;  %v17902_v17 = vld [vmem:[#allocation33_spill] sm:$0xff] }
 0x9aa   : > { %11010 = vst.msk [vmem:[%s15754_s22 + $0x118] sm:$0xf] %vm9766_vm6, %v9917_v6  ;;  %v7372_v18 = vpop.f32.mrf.mxu2  ;;  %v8283_v13 = vpop.f32.mrf.mxu3  ;;  %v6691_v27 = vadd.f32 %v6458_v40, %v17899_v16  ;;  %v16710_v53 = vsel %vm6753_vm4, %v6871_v4, %v6873_v5 }
 0x9ab   : > { %v9321_v26 = vadd.f32 %v16406_v54, %v9189_v1 }
 0x9ac   : > { %10674 = vmatmul.msk.bf16.gmra.mxu1 %vm829_vm2, %v17898_v61 }
 0x9ad   : > { %vm9449_vm1 = vcmp.ge.f32.partialorder %v9321_v26, 0.0  ;;  %v9577_v49 = vmul.f32 0.1, %v9321_v26  ;;  %v8825_v20 = vpop.f32.mrf.mxu0 }
 0x9af   : > { %v9705_v21 = vsel %vm9449_vm1, %v9321_v26, %v9577_v49  ;;  %10755 = vmatmul.msk.bf16.gmra.mxu2 %vm829_vm2, %v16586_v32  ;;  %10836 = vmatmul.msk.bf16.gmra.mxu3 %vm829_vm2, %v7773_v63  ;;  %v7774_v32 = vrot.slane %v13193_v2, 1  ;;  %v16728_v63 = vld [vmem:[%s17393_s2] ss:$0 sm:$0xff] }
 0x9b0   : > { %v9918_v43 = vpack.c.bf16 %v9705_v21, %v9705_v21  ;;  %10917 = vmatmul.msk.bf16.gmra.mxu0 %vm829_vm2, %v16691_v12  ;;  %v17903_v21 = vld [vmem:[#allocation151_spill] sm:$0xff] }
 0x9b1   : > { %v6460_v60 = vpop.f32.mrf.mxu1  ;;  %v7775_v28 = vsel %vm6753_vm4, %v7772_v11, %v7774_v32 }
 0x9b2   : > { %11011 = vst.msk [vmem:[%s15754_s22 + $0x11c] sm:$0xf] %vm9766_vm6, %v9918_v43  ;;  %v7374_v44 = vpop.f32.mrf.mxu2  ;;  %v8285_v46 = vpop.f32.mrf.mxu3  ;;  %v6692_v57 = vadd.f32 %v6460_v60, %v17900_v50  ;;  %v13197_v43 = vld [vmem:[%s13435_s24 + $0x1e8] sm:$0xff]  }
 0x9b3   : > { %v7607_v55 = vadd.f32 %v7374_v44, %v6691_v27  ;;  %v6875_v16 = vrot.slane %v13197_v43, 1  ;;  %v16738_v44 = vld [vmem:[%s17394_s3] ss:$0 sm:$0xff] }
 0x9b5   : > { %v8518_v51 = vadd.f32 %v8285_v46, %v7607_v55  ;;  %v8827_v15 = vpop.f32.mrf.mxu0  ;;  %v16743_v50 = vsel %vm6753_vm4, %v6873_v5, %v6875_v16 }
 0x9b7   : > { %v9058_v10 = vadd.f32 %v8825_v20, %v8518_v51 }
 0x9b9   : > { %v9190_v3 = vmul.f32 %v16397_v23, %v9058_v10  ;;  %v6463_v22 = vpop.f32.mrf.mxu1 }
 0x9ba   : > { %v7376_v47 = vpop.f32.mrf.mxu2  ;;  %v8287_v37 = vpop.f32.mrf.mxu3  ;;  %v6693_v6 = vadd.f32 %v6463_v22, %v17902_v17 }
 0x9bb   : > { %v9322_v7 = vadd.f32 %v16406_v54, %v9190_v3  ;;  %v7608_v58 = vadd.f32 %v7376_v47, %v6692_v57  ;;  %v17904_v47 = vld [vmem:[#allocation60_spill] sm:$0xff] }
 0x9bc   : > { %10675 = vmatmul.msk.bf16.gmra.mxu1 %vm829_vm2, %v17901_v24 }
 0x9bd   : > { %vm9450_vm5 = vcmp.ge.f32.partialorder %v9322_v7, 0.0  ;;  %v9578_v45 = vmul.f32 0.1, %v9322_v7  ;;  %v8519_v42 = vadd.f32 %v8287_v37, %v7608_v58  ;;  %v8830_v52 = vpop.f32.mrf.mxu0 }
 0x9bf   : > { %v9706_v41 = vsel %vm9450_vm5, %v9322_v7, %v9578_v45  ;;  %v9059_v35 = vadd.f32 %v8827_v15, %v8519_v42  ;;  %10756 = vmatmul.msk.bf16.gmra.mxu2 %vm829_vm2, %v16605_v38  ;;  %10837 = vmatmul.msk.bf16.gmra.mxu3 %vm829_vm2, %v7775_v28 }
 0x9c0   : > { %v9924_v39 = vpack.c.bf16 %v9706_v41, %v9706_v41  ;;  %10918 = vmatmul.msk.bf16.gmra.mxu0 %vm829_vm2, %v16710_v53 }
 0x9c1   : > { %v9191_v31 = vmul.f32 %v16397_v23, %v9059_v35  ;;  %v6465_v38 = vpop.f32.mrf.mxu1  ;;  %v13195_v23 = vld [vmem:[%s13435_s24 + $0x1d4] sm:$0xff]   ;;  %v13199_v35 = vld [vmem:[%s13435_s24 + $0x1dc] sm:$0xff]  }
 0x9c2   : > { %11012 = vst.msk [vmem:[%s15754_s22 + $0x120] sm:$0xf] %vm9766_vm6, %v9924_v39  ;;  %v7379_v1 = vpop.f32.mrf.mxu2  ;;  %v8290_v34 = vpop.f32.mrf.mxu3  ;;  %v7776_v20 = vrot.slane %v13195_v23, 1  ;;  %v6694_v61 = vadd.f32 %v6465_v38, %v17903_v21  ;;  %v7778_v24 = vrot.slane %v13199_v35, 1  ;;  %v13200_v39 = vld [vmem:[%s13435_s24 + $0x1f0] sm:$0xff]  }
 0x9c3   : > { %v9323_v62 = vadd.f32 %v16406_v54, %v9191_v31  ;;  %v7609_v11 = vadd.f32 %v7379_v1, %v6693_v6  ;;  %v6877_v31 = vrot.slane %v13200_v39, 1 }
 0x9c4   : > { %v7777_v15 = vsel %vm6753_vm4, %v7774_v32, %v7776_v20  ;;  %v7779_v38 = vsel %vm6753_vm4, %v7776_v20, %v7778_v24 }
 0x9c5   : > { %vm9451_vm7 = vcmp.ge.f32.partialorder %v9323_v62, 0.0  ;;  %v9579_v4 = vmul.f32 0.1, %v9323_v62  ;;  %v8520_v18 = vadd.f32 %v8290_v34, %v7609_v11  ;;  %v8832_v26 = vpop.f32.mrf.mxu0 }
 0x9c7   : > { %v9707_v13 = vsel %vm9451_vm7, %v9323_v62, %v9579_v4  ;;  %v9060_v40 = vadd.f32 %v8830_v52, %v8520_v18  ;;  %v17905_v52 = vld [vmem:[#allocation152_spill] sm:$0xff]  ;;  %v16763_v4 = vsel %vm6753_vm4, %v6875_v16, %v6877_v31 }
 0x9c8   : > { %v9925_v49 = vpack.c.bf16 %v9707_v13, %v9707_v13 }
 0x9c9   : > { %v9192_v54 = vmul.f32 %v16728_v63, %v9060_v40  ;;  %v6468_v51 = vpop.f32.mrf.mxu1  ;;  %v17907_v40 = vld [vmem:[#allocation42_spill] sm:$0xff] }
 0x9ca   : > { %11013 = vst.msk [vmem:[%s15754_s22 + $0x124] sm:$0xf] %vm9766_vm6, %v9925_v49  ;;  %v7381_v27 = vpop.f32.mrf.mxu2  ;;  %v8292_v60 = vpop.f32.mrf.mxu3 }
 0x9cb   : > { %v9324_v55 = vadd.f32 %v16738_v44, %v9192_v54  ;;  %v7610_v46 = vadd.f32 %v7381_v27, %v6694_v61 }
 0x9cc   : > { %10676 = vmatmul.msk.bf16.gmra.mxu1 %vm829_vm2, %v17904_v47 }
 0x9cd   : > { %vm9452_vm8 = vcmp.ge.f32.partialorder %v9324_v55, 0.0  ;;  %v9580_v10 = vmul.f32 0.1, %v9324_v55  ;;  %v8521_v2 = vadd.f32 %v8292_v60, %v7610_v46  ;;  %v8835_v3 = vpop.f32.mrf.mxu0  ;;  %v13201_v60 = vld [vmem:[%s13435_s24 + $0x1e4] sm:$0xff]  }
 0x9ce   : > { %v7780_v51 = vrot.slane %v13201_v60, 1  ;;  %v13202_v3 = vld [vmem:[%s13435_s24 + $0x1f8] sm:$0xff]   ;;  %v17911_v60 = vld [vmem:[#allocation159_spill] sm:$0xff] }
 0x9cf   : > { %v9708_v57 = vsel %vm9452_vm8, %v9324_v55, %v9580_v10  ;;  %v9061_v30 = vadd.f32 %v8832_v26, %v8521_v2  ;;  %10757 = vmatmul.msk.bf16.gmra.mxu2 %vm829_vm2, %v16628_v56  ;;  %10838 = vmatmul.msk.bf16.gmra.mxu3 %vm829_vm2, %v7777_v15  ;;  %v17906_v26 = vld [vmem:[#allocation63_spill] sm:$0xff]  ;;  %v17908_v10 = vld [vmem:[#allocation153_spill] sm:$0xff] }
 0x9d0   : > { %v9926_v7 = vpack.c.bf16 %v9708_v57, %v9708_v57  ;;  %10919 = vmatmul.msk.bf16.gmra.mxu0 %vm829_vm2, %v16743_v50  ;;  %v6879_v57 = vrot.slane %v13202_v3, 1 }
 0x9d1   : > { %v9193_v32 = vmul.f32 %v16728_v63, %v9061_v30  ;;  %v6469_v22 = vpop.f32.mrf.mxu1 }
 0x9d2   : > { %11014 = vst.msk [vmem:[%s15754_s22 + $0x128] sm:$0xf] %vm9766_vm6, %v9926_v7  ;;  %v7384_v5 = vpop.f32.mrf.mxu2  ;;  %v8295_v37 = vpop.f32.mrf.mxu3  ;;  %v6695_v41 = vadd.f32 %v6469_v22, %v17905_v52  ;;  %v17909_v52 = vld [vmem:[#allocation69_spill] sm:$0xff] }
 0x9d3   : > { %v9325_v58 = vadd.f32 %v16738_v44, %v9193_v32 }
 0x9d5   : > { %vm9453_vm9 = vcmp.ge.f32.partialorder %v9325_v58, 0.0  ;;  %v9581_v56 = vmul.f32 0.1, %v9325_v58  ;;  %v8836_v28 = vpop.f32.mrf.mxu0 }
 0x9d7   : > { %v9709_v45 = vsel %vm9453_vm9, %v9325_v58, %v9581_v56  ;;  %v7781_v58 = vsel %vm6753_vm4, %v7778_v24, %v7780_v51  ;;  %v17910_v24 = vld [vmem:[#allocation48_spill] sm:$0xff] }
 0x9d8   : > { %v9927_v42 = vpack.c.bf16 %v9709_v45, %v9709_v45 }
 0x9d9   : > { %v6472_v62 = vpop.f32.mrf.mxu1 }
 0x9da   : > { %11015 = vst.msk [vmem:[%s15754_s22 + $0x12c] sm:$0xf] %vm9766_vm6, %v9927_v42  ;;  %v7385_v17 = vpop.f32.mrf.mxu2  ;;  %v8296_v1 = vpop.f32.mrf.mxu3  ;;  %v6696_v49 = vadd.f32 %v6472_v62, %v17907_v40  ;;  %v13203_v40 = vld [vmem:[%s13435_s24 + $0x1ec] sm:$0xff]  }
 0x9db   : > { %v7611_v6 = vadd.f32 %v7385_v17, %v6695_v41 }
 0x9dc   : > { %10677 = vmatmul.msk.bf16.gmra.mxu1 %vm829_vm2, %v17906_v26 }
 0x9dd   : > { %v8522_v11 = vadd.f32 %v8296_v1, %v7611_v6  ;;  %v8839_v34 = vpop.f32.mrf.mxu0 }
 0x9df   : > { %v9062_v18 = vadd.f32 %v8836_v28, %v8522_v11  ;;  %10758 = vmatmul.msk.bf16.gmra.mxu2 %vm829_vm2, %v16648_v48  ;;  %10839 = vmatmul.msk.bf16.gmra.mxu3 %vm829_vm2, %v7779_v38  ;;  %v16784_v28 = vsel %vm6753_vm4, %v6877_v31, %v6879_v57 }
 0x9e0   : > { %10920 = vmatmul.msk.bf16.gmra.mxu0 %vm829_vm2, %v16763_v4 }
 0x9e1   : > { %v9194_v13 = vmul.f32 %v16728_v63, %v9062_v18  ;;  %v6474_v61 = vpop.f32.mrf.mxu1 }
 0x9e2   : > { %v7388_v23 = vpop.f32.mrf.mxu2  ;;  %v8299_v21 = vpop.f32.mrf.mxu3  ;;  %v6697_v2 = vadd.f32 %v6474_v61, %v17908_v10  ;;  %v17912_v10 = vld [vmem:[#allocation51_spill] sm:$0xff] }
 0x9e3   : > { %v9326_v20 = vadd.f32 %v16738_v44, %v9194_v13  ;;  %v7612_v54 = vadd.f32 %v7388_v23, %v6696_v49  ;;  %v7782_v49 = vrot.slane %v13203_v40, 1  ;;  %v13204_v23 = vld [vmem:[%s13435_s24 + $0x200] sm:$0xff]  }
 0x9e5   : > { %vm9454_vm10 = vcmp.ge.f32.partialorder %v9326_v20, 0.0  ;;  %v9582_v48 = vmul.f32 0.1, %v9326_v20  ;;  %v8523_v43 = vadd.f32 %v8299_v21, %v7612_v54  ;;  %v8841_v16 = vpop.f32.mrf.mxu0 }
 0x9e7   : > { %v9710_v27 = vsel %vm9454_vm10, %v9326_v20, %v9582_v48  ;;  %v9063_v55 = vadd.f32 %v8839_v34, %v8523_v43  ;;  %v6881_v20 = vrot.slane %v13204_v23, 1 }
 0x9e8   : > { %v9933_v46 = vpack.c.bf16 %v9710_v27, %v9710_v27  ;;  %v7783_v27 = vsel %vm6753_vm4, %v7780_v51, %v7782_v49 }
 0x9e9   : > { %v9195_v15 = vmul.f32 %v16728_v63, %v9063_v55  ;;  %v6477_v5 = vpop.f32.mrf.mxu1  ;;  %v16806_v55 = vsel %vm6753_vm4, %v6879_v57, %v6881_v20 }
 0x9ea   : > { %11016 = vst.msk [vmem:[%s15754_s22 + $0x130] sm:$0xf] %vm9766_vm6, %v9933_v46  ;;  %v7390_v30 = vpop.f32.mrf.mxu2  ;;  %v8301_v32 = vpop.f32.mrf.mxu3  ;;  %v6698_v39 = vadd.f32 %v6477_v5, %v17910_v24  ;;  %v13205_v5 = vld [vmem:[%s13435_s24 + $0x1f4] sm:$0xff]  }
 0x9eb   : > { %v9327_v47 = vadd.f32 %v16738_v44, %v9195_v15  ;;  %v7613_v7 = vadd.f32 %v7390_v30, %v6697_v2 }
 0x9ec   : > { %10678 = vmatmul.msk.bf16.gmra.mxu1 %vm829_vm2, %v17909_v52 }
 0x9ed   : > { %vm9455_vm11 = vcmp.ge.f32.partialorder %v9327_v47, 0.0  ;;  %v9583_v37 = vmul.f32 0.1, %v9327_v47  ;;  %v8524_v22 = vadd.f32 %v8301_v32, %v7613_v7  ;;  %v8844_v56 = vpop.f32.mrf.mxu0 }
 0x9ef   : > { %v9711_v45 = vsel %vm9455_vm11, %v9327_v47, %v9583_v37  ;;  %v9064_v42 = vadd.f32 %v8841_v16, %v8524_v22  ;;  %10759 = vmatmul.msk.bf16.gmra.mxu2 %vm829_vm2, %v16669_v29  ;;  %10840 = vmatmul.msk.bf16.gmra.mxu3 %vm829_vm2, %v7781_v58  ;;  %v17913_v37 = vld [vmem:[#allocation155_spill] sm:$0xff] }
 0x9f0   : > { %v9934_v41 = vpack.c.bf16 %v9711_v45, %v9711_v45  ;;  %10921 = vmatmul.msk.bf16.gmra.mxu0 %vm829_vm2, %v16784_v28 }
 0x9f1   : > { %v9196_v35 = vmul.f32 %v16728_v63, %v9064_v42  ;;  %v6479_v1 = vpop.f32.mrf.mxu1 }
 0x9f2   : > { %11017 = vst.msk [vmem:[%s15754_s22 + $0x134] sm:$0xf] %vm9766_vm6, %v9934_v41  ;;  %v7393_v31 = vpop.f32.mrf.mxu2  ;;  %v8304_v29 = vpop.f32.mrf.mxu3 }
 0x9f3   : > { %v9328_v17 = vadd.f32 %v16738_v44, %v9196_v35  ;;  %v7614_v6 = vadd.f32 %v7393_v31, %v6698_v39 }
 0x9f5   : > { %vm9456_vm12 = vcmp.ge.f32.partialorder %v9328_v17, 0.0  ;;  %v9584_v62 = vmul.f32 0.1, %v9328_v17  ;;  %v8525_v11 = vadd.f32 %v8304_v29, %v7614_v6  ;;  %v8846_v34 = vpop.f32.mrf.mxu0 }
 0x9f7   : > { %v9712_v38 = vsel %vm9456_vm12, %v9328_v17, %v9584_v62  ;;  %v9065_v18 = vadd.f32 %v8844_v56, %v8525_v11  ;;  %v13206_v56 = vld [vmem:[%s13435_s24 + $0x208] sm:$0xff]  }
 0x9f8   : > { %v9935_v26 = vpack.c.bf16 %v9712_v38, %v9712_v38  ;;  %v6883_v45 = vrot.slane %v13206_v56, 1  ;;  %v17914_v11 = vld [vmem:[#allocation78_spill] sm:$0xff] }
 0x9f9   : > { %v9197_v13 = vmul.f32 %v16728_v63, %v9065_v18  ;;  %v6481_v48 = vpop.f32.mrf.mxu1  ;;  %v17915_v18 = vld [vmem:[#allocation57_spill] sm:$0xff] }
 0x9fa   : > { %11018 = vst.msk [vmem:[%s15754_s22 + $0x138] sm:$0xf] %vm9766_vm6, %v9935_v26  ;;  %v7395_v54 = vpop.f32.mrf.mxu2  ;;  %v8306_v61 = vpop.f32.mrf.mxu3  ;;  %v6699_v51 = vadd.f32 %v6481_v48, %v17912_v10  ;;  %v16825_v29 = vsel %vm6753_vm4, %v6881_v20, %v6883_v45  ;;  %v13208_v10 = vld [vmem:[%s13435_s24 + $0x210] sm:$0xff]  }
 0x9fb   : > { %v9329_v21 = vadd.f32 %v16738_v44, %v9197_v13 }
 0x9fc   : > { %10679 = vmatmul.msk.bf16.gmra.mxu1 %vm829_vm2, %v17911_v60  ;;  %v17916_v60 = vld [vmem:[#allocation156_spill] sm:$0xff] }
 0x9fd   : > { %vm9457_vm13 = vcmp.ge.f32.partialorder %v9329_v21, 0.0  ;;  %v9585_v43 = vmul.f32 0.1, %v9329_v21  ;;  %v8848_v16 = vpop.f32.mrf.mxu0 }
 0x9ff   : > { %v9713_v46 = vsel %vm9457_vm13, %v9329_v21, %v9585_v43  ;;  %10760 = vmatmul.msk.bf16.gmra.mxu2 %vm829_vm2, %v16691_v12  ;;  %10841 = vmatmul.msk.bf16.gmra.mxu3 %vm829_vm2, %v7783_v27  ;;  %v7784_v12 = vrot.slane %v13205_v5, 1 }
 0xa00   : > { %v9936_v15 = vpack.c.bf16 %v9713_v46, %v9713_v46  ;;  %10922 = vmatmul.msk.bf16.gmra.mxu0 %vm829_vm2, %v16806_v55 }
 0xa01   : > { %v6483_v30 = vpop.f32.mrf.mxu1  ;;  %v7785_v39 = vsel %vm6753_vm4, %v7782_v49, %v7784_v12 }
 0xa02   : > { %11019 = vst.msk [vmem:[%s15754_s22 + $0x13c] sm:$0xf] %vm9766_vm6, %v9936_v15  ;;  %v7397_v2 = vpop.f32.mrf.mxu2  ;;  %v8308_v57 = vpop.f32.mrf.mxu3  ;;  %v6700_v22 = vadd.f32 %v6483_v30, %v17913_v37 }
 0xa03   : > { %v7615_v3 = vadd.f32 %v7397_v2, %v6699_v51  ;;  %v6885_v51 = vrot.slane %v13208_v10, 1 }
 0xa05   : > { %v8526_v47 = vadd.f32 %v8308_v57, %v7615_v3  ;;  %v8850_v7 = vpop.f32.mrf.mxu0  ;;  %v16848_v37 = vsel %vm6753_vm4, %v6883_v45, %v6885_v51 }
 0xa07   : > { %v9066_v32 = vadd.f32 %v8848_v16, %v8526_v47  ;;  %v13207_v16 = vld [vmem:[%s13435_s24 + $0x1fc] sm:$0xff]  }
 0xa08   : > { %v7786_v27 = vrot.slane %v13207_v16, 1 }
 0xa09   : > { %v9198_v58 = vmul.f32 %v16728_v63, %v9066_v32  ;;  %v6486_v24 = vpop.f32.mrf.mxu1 }
 0xa0a   : > { %v7399_v42 = vpop.f32.mrf.mxu2  ;;  %v8310_v35 = vpop.f32.mrf.mxu3  ;;  %v6701_v26 = vadd.f32 %v6486_v24, %v17915_v18 }
 0xa0b   : > { %v9330_v52 = vadd.f32 %v16738_v44, %v9198_v58  ;;  %v7616_v41 = vadd.f32 %v7399_v42, %v6700_v22  ;;  %v17917_v42 = vld [vmem:[#allocation84_spill] sm:$0xff] }
 0xa0c   : > { %10680 = vmatmul.msk.bf16.gmra.mxu1 %vm829_vm2, %v17914_v11 }
 0xa0d   : > { %vm9458_vm14 = vcmp.ge.f32.partialorder %v9330_v52, 0.0  ;;  %v9586_v31 = vmul.f32 0.1, %v9330_v52  ;;  %v8527_v17 = vadd.f32 %v8310_v35, %v7616_v41  ;;  %v8853_v6 = vpop.f32.mrf.mxu0 }
 0xa0f   : > { %v9714_v1 = vsel %vm9458_vm14, %v9330_v52, %v9586_v31  ;;  %v9067_v62 = vadd.f32 %v8850_v7, %v8527_v17  ;;  %10761 = vmatmul.msk.bf16.gmra.mxu2 %vm829_vm2, %v16710_v53  ;;  %10842 = vmatmul.msk.bf16.gmra.mxu3 %vm829_vm2, %v7785_v39  ;;  %v7787_v7 = vsel %vm6753_vm4, %v7784_v12, %v7786_v27 }
 0xa10   : > { %v9942_v34 = vpack.c.bf16 %v9714_v1, %v9714_v1  ;;  %10923 = vmatmul.msk.bf16.gmra.mxu0 %vm829_vm2, %v16825_v29 }
 0xa11   : > { %v9199_v38 = vmul.f32 %v16728_v63, %v9067_v62  ;;  %v6488_v23 = vpop.f32.mrf.mxu1  ;;  %v13209_v62 = vld [vmem:[%s13435_s24 + $0x204] sm:$0xff]  }
 0xa12   : > { %11020 = vst.msk [vmem:[%s15754_s22 + $0x140] sm:$0xf] %vm9766_vm6, %v9942_v34  ;;  %v7402_v13 = vpop.f32.mrf.mxu2  ;;  %v8313_v53 = vpop.f32.mrf.mxu3  ;;  %v6702_v15 = vadd.f32 %v6488_v23, %v17916_v60  ;;  %v7788_v11 = vrot.slane %v13209_v62, 1  ;;  %v13210_v34 = vld [vmem:[%s13435_s24 + $0x218] sm:$0xff]  }
 0xa13   : > { %v9331_v40 = vadd.f32 %v16738_v44, %v9199_v38  ;;  %v7617_v49 = vadd.f32 %v7402_v13, %v6701_v26  ;;  %v6887_v38 = vrot.slane %v13210_v34, 1 }
 0xa14   : > { %v7789_v23 = vsel %vm6753_vm4, %v7786_v27, %v7788_v11 }
 0xa15   : > { %vm9459_vm15 = vcmp.ge.f32.partialorder %v9331_v40, 0.0  ;;  %v9587_v20 = vmul.f32 0.1, %v9331_v40  ;;  %v8528_v54 = vadd.f32 %v8313_v53, %v7617_v49  ;;  %v8855_v21 = vpop.f32.mrf.mxu0 }
 0xa17   : > { %v9715_v61 = vsel %vm9459_vm15, %v9331_v40, %v9587_v20  ;;  %v9068_v48 = vadd.f32 %v8853_v6, %v8528_v54  ;;  %v17918_v6 = vld [vmem:[#allocation157_spill] sm:$0xff]  ;;  %v16868_v20 = vsel %vm6753_vm4, %v6885_v51, %v6887_v38 }
 0xa18   : > { %v9943_v43 = vpack.c.bf16 %v9715_v61, %v9715_v61 }
 0xa19   : > { %v9200_v46 = vmul.f32 %v16728_v63, %v9068_v48  ;;  %v6491_v47 = vpop.f32.mrf.mxu1  ;;  %v17920_v48 = vld [vmem:[#allocation66_spill] sm:$0xff] }
 0xa1a   : > { %11021 = vst.msk [vmem:[%s15754_s22 + $0x144] sm:$0xf] %vm9766_vm6, %v9943_v43  ;;  %v7404_v2 = vpop.f32.mrf.mxu2  ;;  %v8315_v30 = vpop.f32.mrf.mxu3 }
 0xa1b   : > { %v9332_v3 = vadd.f32 %v16738_v44, %v9200_v46  ;;  %v7618_v57 = vadd.f32 %v7404_v2, %v6702_v15 }
 0xa1c   : > { %10681 = vmatmul.msk.bf16.gmra.mxu1 %vm829_vm2, %v17917_v42 }
 0xa1d   : > { %vm9460_vm0 = vcmp.ge.f32.partialorder %v9332_v3, 0.0  ;;  %v9588_v32 = vmul.f32 0.1, %v9332_v3  ;;  %v8529_v5 = vadd.f32 %v8315_v30, %v7618_v57  ;;  %v8858_v58 = vpop.f32.mrf.mxu0  ;;  %v13211_v30 = vld [vmem:[%s13435_s24 + $0x20c] sm:$0xff]  }
 0xa1e   : > { %v7790_v47 = vrot.slane %v13211_v30, 1  ;;  %v13212_v58 = vld [vmem:[%s13435_s24 + $0x220] sm:$0xff]   ;;  %v17924_v30 = vld [vmem:[#allocation164_spill] sm:$0xff] }
 0xa1f   : > { %v9716_v22 = vsel %vm9460_vm0, %v9332_v3, %v9588_v32  ;;  %v9069_v56 = vadd.f32 %v8855_v21, %v8529_v5  ;;  %10762 = vmatmul.msk.bf16.gmra.mxu2 %vm829_vm2, %v16743_v50  ;;  %10843 = vmatmul.msk.bf16.gmra.mxu3 %vm829_vm2, %v7787_v7  ;;  %v17919_v21 = vld [vmem:[#allocation88_spill] sm:$0xff]  ;;  %v17921_v32 = vld [vmem:[#allocation158_spill] sm:$0xff] }
 0xa20   : > { %v9944_v52 = vpack.c.bf16 %v9716_v22, %v9716_v22  ;;  %10924 = vmatmul.msk.bf16.gmra.mxu0 %vm829_vm2, %v16848_v37  ;;  %v6889_v22 = vrot.slane %v13212_v58, 1 }
 0xa21   : > { %v9201_v12 = vmul.f32 %v16728_v63, %v9069_v56  ;;  %v6492_v24 = vpop.f32.mrf.mxu1 }
 0xa22   : > { %11022 = vst.msk [vmem:[%s15754_s22 + $0x148] sm:$0xf] %vm9766_vm6, %v9944_v52  ;;  %v7407_v45 = vpop.f32.mrf.mxu2  ;;  %v8318_v35 = vpop.f32.mrf.mxu3  ;;  %v6703_v1 = vadd.f32 %v6492_v24, %v17918_v6  ;;  %v17922_v6 = vld [vmem:[#allocation95_spill] sm:$0xff] }
 0xa23   : > { %v9333_v41 = vadd.f32 %v16738_v44, %v9201_v12 }
 0xa25   : > { %vm9461_vm1 = vcmp.ge.f32.partialorder %v9333_v41, 0.0  ;;  %v9589_v50 = vmul.f32 0.1, %v9333_v41  ;;  %v8859_v39 = vpop.f32.mrf.mxu0 }
 0xa27   : > { %v9717_v31 = vsel %vm9461_vm1, %v9333_v41, %v9589_v50  ;;  %v7791_v41 = vsel %vm6753_vm4, %v7788_v11, %v7790_v47  ;;  %v17923_v11 = vld [vmem:[#allocation72_spill] sm:$0xff] }
 0xa28   : > { %v9945_v17 = vpack.c.bf16 %v9717_v31, %v9717_v31 }
 0xa29   : > { %v6495_v40 = vpop.f32.mrf.mxu1 }
 0xa2a   : > { %11023 = vst.msk [vmem:[%s15754_s22 + $0x14c] sm:$0xf] %vm9766_vm6, %v9945_v17  ;;  %v7408_v18 = vpop.f32.mrf.mxu2  ;;  %v8319_v13 = vpop.f32.mrf.mxu3  ;;  %v6704_v43 = vadd.f32 %v6495_v40, %v17920_v48  ;;  %v13213_v48 = vld [vmem:[%s13435_s24 + $0x214] sm:$0xff]  }
 0xa2b   : > { %v7619_v26 = vadd.f32 %v7408_v18, %v6703_v1 }
 0xa2c   : > { %10682 = vmatmul.msk.bf16.gmra.mxu1 %vm829_vm2, %v17919_v21 }
 0xa2d   : > { %v8530_v49 = vadd.f32 %v8319_v13, %v7619_v26  ;;  %v8862_v53 = vpop.f32.mrf.mxu0 }
 0xa2f   : > { %v9070_v54 = vadd.f32 %v8859_v39, %v8530_v49  ;;  %10763 = vmatmul.msk.bf16.gmra.mxu2 %vm829_vm2, %v16763_v4  ;;  %10844 = vmatmul.msk.bf16.gmra.mxu3 %vm829_vm2, %v7789_v23  ;;  %v16889_v39 = vsel %vm6753_vm4, %v6887_v38, %v6889_v22 }
 0xa30   : > { %10925 = vmatmul.msk.bf16.gmra.mxu0 %vm829_vm2, %v16868_v20 }
 0xa31   : > { %v9202_v61 = vmul.f32 %v16728_v63, %v9070_v54  ;;  %v6497_v15 = vpop.f32.mrf.mxu1 }
 0xa32   : > { %v7411_v16 = vpop.f32.mrf.mxu2  ;;  %v8322_v60 = vpop.f32.mrf.mxu3  ;;  %v6705_v5 = vadd.f32 %v6497_v15, %v17921_v32  ;;  %v17925_v32 = vld [vmem:[#allocation75_spill] sm:$0xff] }
 0xa33   : > { %v9334_v27 = vadd.f32 %v16738_v44, %v9202_v61  ;;  %v7620_v46 = vadd.f32 %v7411_v16, %v6704_v43  ;;  %v7792_v43 = vrot.slane %v13213_v48, 1  ;;  %v13214_v16 = vld [vmem:[%s13435_s24 + $0x228] sm:$0xff]  }
 0xa35   : > { %vm9462_vm5 = vcmp.ge.f32.partialorder %v9334_v27, 0.0  ;;  %v9590_v4 = vmul.f32 0.1, %v9334_v27  ;;  %v8531_v10 = vadd.f32 %v8322_v60, %v7620_v46  ;;  %v8864_v51 = vpop.f32.mrf.mxu0 }
 0xa37   : > { %v9718_v2 = vsel %vm9462_vm5, %v9334_v27, %v9590_v4  ;;  %v9071_v3 = vadd.f32 %v8862_v53, %v8531_v10  ;;  %v6891_v27 = vrot.slane %v13214_v16, 1 }
 0xa38   : > { %v9951_v57 = vpack.c.bf16 %v9718_v2, %v9718_v2  ;;  %v7793_v2 = vsel %vm6753_vm4, %v7790_v47, %v7792_v43 }
 0xa39   : > { %v9203_v7 = vmul.f32 %v16728_v63, %v9071_v3  ;;  %v6500_v45 = vpop.f32.mrf.mxu1  ;;  %v16911_v3 = vsel %vm6753_vm4, %v6889_v22, %v6891_v27 }
 0xa3a   : > { %11024 = vst.msk [vmem:[%s15754_s22 + $0x150] sm:$0xf] %vm9766_vm6, %v9951_v57  ;;  %v7413_v56 = vpop.f32.mrf.mxu2  ;;  %v8324_v12 = vpop.f32.mrf.mxu3  ;;  %v6706_v34 = vadd.f32 %v6500_v45, %v17923_v11  ;;  %v13215_v45 = vld [vmem:[%s13435_s24 + $0x21c] sm:$0xff]  }
 0xa3b   : > { %v9335_v42 = vadd.f32 %v16738_v44, %v9203_v7  ;;  %v7621_v52 = vadd.f32 %v7413_v56, %v6705_v5 }
 0xa3c   : > { %10683 = vmatmul.msk.bf16.gmra.mxu1 %vm829_vm2, %v17922_v6 }
 0xa3d   : > { %vm9463_vm7 = vcmp.ge.f32.partialorder %v9335_v42, 0.0  ;;  %v9591_v35 = vmul.f32 0.1, %v9335_v42  ;;  %v8532_v24 = vadd.f32 %v8324_v12, %v7621_v52  ;;  %v8867_v50 = vpop.f32.mrf.mxu0 }
 0xa3f   : > { %v9719_v31 = vsel %vm9463_vm7, %v9335_v42, %v9591_v35  ;;  %v9072_v17 = vadd.f32 %v8864_v51, %v8532_v24  ;;  %10764 = vmatmul.msk.bf16.gmra.mxu2 %vm829_vm2, %v16784_v28  ;;  %10845 = vmatmul.msk.bf16.gmra.mxu3 %vm829_vm2, %v7791_v41  ;;  %v17926_v35 = vld [vmem:[#allocation160_spill] sm:$0xff] }
 0xa40   : > { %v9952_v1 = vpack.c.bf16 %v9719_v31, %v9719_v31  ;;  %10926 = vmatmul.msk.bf16.gmra.mxu0 %vm829_vm2, %v16889_v39 }
 0xa41   : > { %v9204_v62 = vmul.f32 %v16728_v63, %v9072_v17  ;;  %v6502_v13 = vpop.f32.mrf.mxu1 }
 0xa42   : > { %11025 = vst.msk [vmem:[%s15754_s22 + $0x154] sm:$0xf] %vm9766_vm6, %v9952_v1  ;;  %v7416_v38 = vpop.f32.mrf.mxu2  ;;  %v8327_v28 = vpop.f32.mrf.mxu3 }
 0xa43   : > { %v9336_v18 = vadd.f32 %v16738_v44, %v9204_v62  ;;  %v7622_v26 = vadd.f32 %v7416_v38, %v6706_v34 }
 0xa45   : > { %vm9464_vm8 = vcmp.ge.f32.partialorder %v9336_v18, 0.0  ;;  %v9592_v40 = vmul.f32 0.1, %v9336_v18  ;;  %v8533_v49 = vadd.f32 %v8327_v28, %v7622_v26  ;;  %v8869_v53 = vpop.f32.mrf.mxu0 }
 0xa47   : > { %v9720_v23 = vsel %vm9464_vm8, %v9336_v18, %v9592_v40  ;;  %v9073_v54 = vadd.f32 %v8867_v50, %v8533_v49  ;;  %v13216_v50 = vld [vmem:[%s13435_s24 + $0x230] sm:$0xff]   ;;  %v17927_v49 = vld [vmem:[#allocation8_spill] sm:$0xff] }
 0xa48   : > { %v9953_v21 = vpack.c.bf16 %v9720_v23, %v9720_v23  ;;  %v6893_v31 = vrot.slane %v13216_v50, 1 }
 0xa49   : > { %v9205_v61 = vmul.f32 %v16728_v63, %v9073_v54  ;;  %v6504_v4 = vpop.f32.mrf.mxu1  ;;  %v17928_v54 = vld [vmem:[#allocation81_spill] sm:$0xff] }
 0xa4a   : > { %11026 = vst.msk [vmem:[%s15754_s22 + $0x158] sm:$0xf] %vm9766_vm6, %v9953_v21  ;;  %v7418_v46 = vpop.f32.mrf.mxu2  ;;  %v8329_v15 = vpop.f32.mrf.mxu3  ;;  %v6707_v47 = vadd.f32 %v6504_v4, %v17925_v32  ;;  %v16930_v28 = vsel %vm6753_vm4, %v6891_v27, %v6893_v31  ;;  %v13218_v32 = vld [vmem:[%s13435_s24 + $0x238] sm:$0xff]  }
 0xa4b   : > { %v9337_v60 = vadd.f32 %v16738_v44, %v9205_v61 }
 0xa4c   : > { %10684 = vmatmul.msk.bf16.gmra.mxu1 %vm829_vm2, %v17924_v30  ;;  %v17929_v30 = vld [vmem:[#allocation161_spill] sm:$0xff] }
 0xa4d   : > { %vm9465_vm9 = vcmp.ge.f32.partialorder %v9337_v60, 0.0  ;;  %v9593_v10 = vmul.f32 0.1, %v9337_v60  ;;  %v8871_v51 = vpop.f32.mrf.mxu0 }
 0xa4f   : > { %v9721_v57 = vsel %vm9465_vm9, %v9337_v60, %v9593_v10  ;;  %10765 = vmatmul.msk.bf16.gmra.mxu2 %vm829_vm2, %v16806_v55  ;;  %10846 = vmatmul.msk.bf16.gmra.mxu3 %vm829_vm2, %v7793_v2  ;;  %v7794_v55 = vrot.slane %v13215_v45, 1 }
 0xa50   : > { %v9954_v7 = vpack.c.bf16 %v9721_v57, %v9721_v57  ;;  %10927 = vmatmul.msk.bf16.gmra.mxu0 %vm829_vm2, %v16911_v3 }
 0xa51   : > { %v6506_v56 = vpop.f32.mrf.mxu1  ;;  %v7795_v34 = vsel %vm6753_vm4, %v7792_v43, %v7794_v55 }
 0xa52   : > { %11027 = vst.msk [vmem:[%s15754_s22 + $0x15c] sm:$0xf] %vm9766_vm6, %v9954_v7  ;;  %v7420_v5 = vpop.f32.mrf.mxu2  ;;  %v8331_v22 = vpop.f32.mrf.mxu3  ;;  %v6708_v24 = vadd.f32 %v6506_v56, %v17926_v35 }
 0xa53   : > { %v7623_v58 = vadd.f32 %v7420_v5, %v6707_v47  ;;  %v6895_v47 = vrot.slane %v13218_v32, 1 }
 0xa55   : > { %v8534_v42 = vadd.f32 %v8331_v22, %v7623_v58  ;;  %v8873_v52 = vpop.f32.mrf.mxu0  ;;  %v16953_v35 = vsel %vm6753_vm4, %v6893_v31, %v6895_v47 }
 0xa57   : > { %v9074_v12 = vadd.f32 %v8871_v51, %v8534_v42  ;;  %v13217_v51 = vld [vmem:[%s13435_s24 + $0x224] sm:$0xff]  }
 0xa58   : > { %v7796_v2 = vrot.slane %v13217_v51, 1 }
 0xa59   : > { %v9206_v41 = vmul.f32 %v16728_v63, %v9074_v12  ;;  %v6509_v11 = vpop.f32.mrf.mxu1 }
 0xa5a   : > { %v7422_v17 = vpop.f32.mrf.mxu2  ;;  %v8333_v62 = vpop.f32.mrf.mxu3  ;;  %v6709_v21 = vadd.f32 %v6509_v11, %v17928_v54 }
 0xa5b   : > { %v9338_v6 = vadd.f32 %v16738_v44, %v9206_v41  ;;  %v7624_v1 = vadd.f32 %v7422_v17, %v6708_v24  ;;  %v17930_v17 = vld [vmem:[#allocation13_spill] sm:$0xff] }
 0xa5c   : > { %10685 = vmatmul.msk.bf16.gmra.mxu1 %vm829_vm2, %v17927_v49 }
 0xa5d   : > { %vm9466_vm10 = vcmp.ge.f32.partialorder %v9338_v6, 0.0  ;;  %v9594_v38 = vmul.f32 0.1, %v9338_v6  ;;  %v8535_v18 = vadd.f32 %v8333_v62, %v7624_v1  ;;  %v8876_v26 = vpop.f32.mrf.mxu0 }
 0xa5f   : > { %v9722_v13 = vsel %vm9466_vm10, %v9338_v6, %v9594_v38  ;;  %v9075_v40 = vadd.f32 %v8873_v52, %v8535_v18  ;;  %10766 = vmatmul.msk.bf16.gmra.mxu2 %vm829_vm2, %v16825_v29  ;;  %10847 = vmatmul.msk.bf16.gmra.mxu3 %vm829_vm2, %v7795_v34  ;;  %v7797_v52 = vsel %vm6753_vm4, %v7794_v55, %v7796_v2 }
 0xa60   : > { %v9960_v53 = vpack.c.bf16 %v9722_v13, %v9722_v13  ;;  %10928 = vmatmul.msk.bf16.gmra.mxu0 %vm829_vm2, %v16930_v28 }
 0xa61   : > { %v9207_v23 = vmul.f32 %v16728_v63, %v9075_v40  ;;  %v6511_v16 = vpop.f32.mrf.mxu1  ;;  %v13219_v40 = vld [vmem:[%s13435_s24 + $0x22c] sm:$0xff]  }
 0xa62   : > { %11028 = vst.msk [vmem:[%s15754_s22 + $0x160] sm:$0xf] %vm9766_vm6, %v9960_v53  ;;  %v7425_v61 = vpop.f32.mrf.mxu2  ;;  %v8336_v29 = vpop.f32.mrf.mxu3  ;;  %v6710_v7 = vadd.f32 %v6511_v16, %v17929_v30  ;;  %v7798_v49 = vrot.slane %v13219_v40, 1  ;;  %v13220_v53 = vld [vmem:[%s13435_s24 + $0x240] sm:$0xff]  }
 0xa63   : > { %v9339_v48 = vadd.f32 %v16738_v44, %v9207_v23  ;;  %v7625_v43 = vadd.f32 %v7425_v61, %v6709_v21  ;;  %v6897_v23 = vrot.slane %v13220_v53, 1 }
 0xa64   : > { %v7799_v16 = vsel %vm6753_vm4, %v7796_v2, %v7798_v49 }
 0xa65   : > { %vm9467_vm11 = vcmp.ge.f32.partialorder %v9339_v48, 0.0  ;;  %v9595_v27 = vmul.f32 0.1, %v9339_v48  ;;  %v8536_v46 = vadd.f32 %v8336_v29, %v7625_v43  ;;  %v8878_v60 = vpop.f32.mrf.mxu0 }
 0xa67   : > { %v9723_v15 = vsel %vm9467_vm11, %v9339_v48, %v9595_v27  ;;  %v9076_v4 = vadd.f32 %v8876_v26, %v8536_v46  ;;  %v17931_v26 = vld [vmem:[#allocation162_spill] sm:$0xff]  ;;  %v16973_v27 = vsel %vm6753_vm4, %v6895_v47, %v6897_v23 }
 0xa68   : > { %v9961_v10 = vpack.c.bf16 %v9723_v15, %v9723_v15 }
 0xa69   : > { %v9208_v57 = vmul.f32 %v16728_v63, %v9076_v4  ;;  %v6514_v42 = vpop.f32.mrf.mxu1  ;;  %v17933_v4 = vld [vmem:[#allocation92_spill] sm:$0xff] }
 0xa6a   : > { %11029 = vst.msk [vmem:[%s15754_s22 + $0x164] sm:$0xf] %vm9766_vm6, %v9961_v10  ;;  %v7427_v5 = vpop.f32.mrf.mxu2  ;;  %v8338_v56 = vpop.f32.mrf.mxu3 }
 0xa6b   : > { %v9340_v58 = vadd.f32 %v16738_v44, %v9208_v57  ;;  %v7626_v22 = vadd.f32 %v7427_v5, %v6710_v7 }
 0xa6c   : > { %10686 = vmatmul.msk.bf16.gmra.mxu1 %vm829_vm2, %v17930_v17 }
 0xa6d   : > { %vm9468_vm12 = vcmp.ge.f32.partialorder %v9340_v58, 0.0  ;;  %v9596_v12 = vmul.f32 0.1, %v9340_v58  ;;  %v8537_v45 = vadd.f32 %v8338_v56, %v7626_v22  ;;  %v8881_v41 = vpop.f32.mrf.mxu0  ;;  %v13221_v56 = vld [vmem:[%s13435_s24 + $0x234] sm:$0xff]  }
 0xa6e   : > { %v7800_v42 = vrot.slane %v13221_v56, 1  ;;  %v13222_v41 = vld [vmem:[%s13435_s24 + $0x248] sm:$0xff]   ;;  %v17937_v56 = vld [vmem:[#allocation169_spill] sm:$0xff] }
 0xa6f   : > { %v9724_v24 = vsel %vm9468_vm12, %v9340_v58, %v9596_v12  ;;  %v9077_v50 = vadd.f32 %v8878_v60, %v8537_v45  ;;  %10767 = vmatmul.msk.bf16.gmra.mxu2 %vm829_vm2, %v16848_v37  ;;  %10848 = vmatmul.msk.bf16.gmra.mxu3 %vm829_vm2, %v7797_v52  ;;  %v17932_v60 = vld [vmem:[#allocation16_spill] sm:$0xff]  ;;  %v17934_v12 = vld [vmem:[#allocation163_spill] sm:$0xff] }
 0xa70   : > { %v9962_v6 = vpack.c.bf16 %v9724_v24, %v9724_v24  ;;  %10929 = vmatmul.msk.bf16.gmra.mxu0 %vm829_vm2, %v16953_v35  ;;  %v6899_v24 = vrot.slane %v13222_v41, 1 }
 0xa71   : > { %v9209_v55 = vmul.f32 %v16728_v63, %v9077_v50  ;;  %v6515_v11 = vpop.f32.mrf.mxu1 }
 0xa72   : > { %11030 = vst.msk [vmem:[%s15754_s22 + $0x168] sm:$0xf] %vm9766_vm6, %v9962_v6  ;;  %v7430_v31 = vpop.f32.mrf.mxu2  ;;  %v8341_v62 = vpop.f32.mrf.mxu3  ;;  %v6711_v13 = vadd.f32 %v6515_v11, %v17931_v26  ;;  %v17935_v26 = vld [vmem:[#allocation22_spill] sm:$0xff] }
 0xa73   : > { %v9341_v1 = vadd.f32 %v16738_v44, %v9209_v55 }
 0xa75   : > { %vm9469_vm13 = vcmp.ge.f32.partialorder %v9341_v1, 0.0  ;;  %v9597_v37 = vmul.f32 0.1, %v9341_v1  ;;  %v8882_v34 = vpop.f32.mrf.mxu0 }
 0xa77   : > { %v9725_v38 = vsel %vm9469_vm13, %v9341_v1, %v9597_v37  ;;  %v7801_v1 = vsel %vm6753_vm4, %v7798_v49, %v7800_v42  ;;  %v17936_v49 = vld [vmem:[#allocation99_spill] sm:$0xff] }
 0xa78   : > { %v9963_v18 = vpack.c.bf16 %v9725_v38, %v9725_v38 }
 0xa79   : > { %v6518_v48 = vpop.f32.mrf.mxu1 }
 0xa7a   : > { %11031 = vst.msk [vmem:[%s15754_s22 + $0x16c] sm:$0xf] %vm9766_vm6, %v9963_v18  ;;  %v7431_v54 = vpop.f32.mrf.mxu2  ;;  %v8342_v61 = vpop.f32.mrf.mxu3  ;;  %v6712_v10 = vadd.f32 %v6518_v48, %v17933_v4  ;;  %v13223_v4 = vld [vmem:[%s13435_s24 + $0x23c] sm:$0xff]  }
 0xa7b   : > { %v7627_v21 = vadd.f32 %v7431_v54, %v6711_v13 }
 0xa7c   : > { %10687 = vmatmul.msk.bf16.gmra.mxu1 %vm829_vm2, %v17932_v60 }
 0xa7d   : > { %v8538_v43 = vadd.f32 %v8342_v61, %v7627_v21  ;;  %v8885_v29 = vpop.f32.mrf.mxu0 }
 0xa7f   : > { %v9078_v46 = vadd.f32 %v8882_v34, %v8538_v43  ;;  %10768 = vmatmul.msk.bf16.gmra.mxu2 %vm829_vm2, %v16868_v20  ;;  %10849 = vmatmul.msk.bf16.gmra.mxu3 %vm829_vm2, %v7799_v16  ;;  %v16994_v34 = vsel %vm6753_vm4, %v6897_v23, %v6899_v24 }
 0xa80   : > { %10930 = vmatmul.msk.bf16.gmra.mxu0 %vm829_vm2, %v16973_v27 }
 0xa81   : > { %v9210_v15 = vmul.f32 %v16728_v63, %v9078_v46  ;;  %v6520_v7 = vpop.f32.mrf.mxu1 }
 0xa82   : > { %v7434_v51 = vpop.f32.mrf.mxu2  ;;  %v8345_v30 = vpop.f32.mrf.mxu3  ;;  %v6713_v45 = vadd.f32 %v6520_v7, %v17934_v12  ;;  %v17938_v12 = vld [vmem:[#allocation6_spill] sm:$0xff] }
 0xa83   : > { %v9342_v2 = vadd.f32 %v16738_v44, %v9210_v15  ;;  %v7628_v57 = vadd.f32 %v7434_v51, %v6712_v10  ;;  %v7802_v10 = vrot.slane %v13223_v4, 1  ;;  %v13224_v51 = vld [vmem:[%s13435_s24 + $0x250] sm:$0xff]  }
 0xa85   : > { %vm9470_vm14 = vcmp.ge.f32.partialorder %v9342_v2, 0.0  ;;  %v9598_v20 = vmul.f32 0.1, %v9342_v2  ;;  %v8539_v32 = vadd.f32 %v8345_v30, %v7628_v57  ;;  %v8887_v47 = vpop.f32.mrf.mxu0 }
 0xa87   : > { %v9726_v5 = vsel %vm9470_vm14, %v9342_v2, %v9598_v20  ;;  %v9079_v58 = vadd.f32 %v8885_v29, %v8539_v32  ;;  %v6901_v2 = vrot.slane %v13224_v51, 1 }
 0xa88   : > { %v9969_v22 = vpack.c.bf16 %v9726_v5, %v9726_v5  ;;  %v7803_v5 = vsel %vm6753_vm4, %v7800_v42, %v7802_v10 }
 0xa89   : > { %v9211_v52 = vmul.f32 %v16728_v63, %v9079_v58  ;;  %v6523_v31 = vpop.f32.mrf.mxu1  ;;  %v17016_v58 = vsel %vm6753_vm4, %v6899_v24, %v6901_v2 }
 0xa8a   : > { %11032 = vst.msk [vmem:[%s15754_s22 + $0x170] sm:$0xf] %vm9766_vm6, %v9969_v22  ;;  %v7436_v50 = vpop.f32.mrf.mxu2  ;;  %v8347_v55 = vpop.f32.mrf.mxu3  ;;  %v6714_v53 = vadd.f32 %v6523_v31, %v17936_v49  ;;  %v13225_v31 = vld [vmem:[%s13435_s24 + $0x244] sm:$0xff]  }
 0xa8b   : > { %v9343_v17 = vadd.f32 %v16738_v44, %v9211_v52  ;;  %v7629_v6 = vadd.f32 %v7436_v50, %v6713_v45 }
 0xa8c   : > { %10688 = vmatmul.msk.bf16.gmra.mxu1 %vm829_vm2, %v17935_v26 }
 0xa8d   : > { %vm9471_vm15 = vcmp.ge.f32.partialorder %v9343_v17, 0.0  ;;  %v9599_v62 = vmul.f32 0.1, %v9343_v17  ;;  %v8540_v11 = vadd.f32 %v8347_v55, %v7629_v6  ;;  %v8890_v37 = vpop.f32.mrf.mxu0 }
 0xa8f   : > { %v9727_v38 = vsel %vm9471_vm15, %v9343_v17, %v9599_v62  ;;  %v9080_v18 = vadd.f32 %v8887_v47, %v8540_v11  ;;  %10769 = vmatmul.msk.bf16.gmra.mxu2 %vm829_vm2, %v16889_v39  ;;  %10850 = vmatmul.msk.bf16.gmra.mxu3 %vm829_vm2, %v7801_v1  ;;  %v17939_v62 = vld [vmem:[#allocation165_spill] sm:$0xff] }
 0xa90   : > { %v9970_v13 = vpack.c.bf16 %v9727_v38, %v9727_v38  ;;  %10931 = vmatmul.msk.bf16.gmra.mxu0 %vm829_vm2, %v16994_v34 }
 0xa91   : > { %v9212_v40 = vmul.f32 %v16728_v63, %v9080_v18  ;;  %v6525_v61 = vpop.f32.mrf.mxu1 }
 0xa92   : > { %11033 = vst.msk [vmem:[%s15754_s22 + $0x174] sm:$0xf] %vm9766_vm6, %v9970_v13  ;;  %v7439_v23 = vpop.f32.mrf.mxu2  ;;  %v8350_v39 = vpop.f32.mrf.mxu3 }
 0xa93   : > { %v9344_v54 = vadd.f32 %v16738_v44, %v9212_v40  ;;  %v7630_v21 = vadd.f32 %v7439_v23, %v6714_v53 }
 0xa95   : > { %vm9472_vm0 = vcmp.ge.f32.partialorder %v9344_v54, 0.0  ;;  %v9600_v48 = vmul.f32 0.1, %v9344_v54  ;;  %v8541_v43 = vadd.f32 %v8350_v39, %v7630_v21  ;;  %v8892_v29 = vpop.f32.mrf.mxu0 }
 0xa97   : > { %v9728_v16 = vsel %vm9472_vm0, %v9344_v54, %v9600_v48  ;;  %v9081_v46 = vadd.f32 %v8890_v37, %v8541_v43  ;;  %v13226_v37 = vld [vmem:[%s13435_s24 + $0x258] sm:$0xff]   ;;  %v17940_v43 = vld [vmem:[#allocation31_spill] sm:$0xff] }
 0xa98   : > { %v9971_v60 = vpack.c.bf16 %v9728_v16, %v9728_v16  ;;  %v6903_v38 = vrot.slane %v13226_v37, 1 }
 0xa99   : > { %v9213_v15 = vmul.f32 %v16728_v63, %v9081_v46  ;;  %v6527_v20 = vpop.f32.mrf.mxu1  ;;  %v17941_v46 = vld [vmem:[#allocation10_spill] sm:$0xff] }
 0xa9a   : > { %11034 = vst.msk [vmem:[%s15754_s22 + $0x178] sm:$0xf] %vm9766_vm6, %v9971_v60  ;;  %v7441_v57 = vpop.f32.mrf.mxu2  ;;  %v8352_v7 = vpop.f32.mrf.mxu3  ;;  %v6715_v42 = vadd.f32 %v6527_v20, %v17938_v12  ;;  %v17035_v39 = vsel %vm6753_vm4, %v6901_v2, %v6903_v38  ;;  %v13228_v12 = vld [vmem:[%s13435_s24 + $0x260] sm:$0xff]  }
 0xa9b   : > { %v9345_v30 = vadd.f32 %v16738_v44, %v9213_v15 }
 0xa9c   : > { %10689 = vmatmul.msk.bf16.gmra.mxu1 %vm829_vm2, %v17937_v56  ;;  %v17942_v56 = vld [vmem:[#allocation166_spill] sm:$0xff] }
 0xa9d   : > { %vm9473_vm1 = vcmp.ge.f32.partialorder %v9345_v30, 0.0  ;;  %v9601_v32 = vmul.f32 0.1, %v9345_v30  ;;  %v8894_v47 = vpop.f32.mrf.mxu0 }
 0xa9f   : > { %v9729_v22 = vsel %vm9473_vm1, %v9345_v30, %v9601_v32  ;;  %10770 = vmatmul.msk.bf16.gmra.mxu2 %vm829_vm2, %v16911_v3  ;;  %10851 = vmatmul.msk.bf16.gmra.mxu3 %vm829_vm2, %v7803_v5  ;;  %v7804_v3 = vrot.slane %v13225_v31, 1 }
 0xaa0   : > { %v9972_v52 = vpack.c.bf16 %v9729_v22, %v9729_v22  ;;  %10932 = vmatmul.msk.bf16.gmra.mxu0 %vm829_vm2, %v17016_v58 }
 0xaa1   : > { %v6529_v50 = vpop.f32.mrf.mxu1  ;;  %v7805_v53 = vsel %vm6753_vm4, %v7802_v10, %v7804_v3 }
 0xaa2   : > { %11035 = vst.msk [vmem:[%s15754_s22 + $0x17c] sm:$0xf] %vm9766_vm6, %v9972_v52  ;;  %v7443_v45 = vpop.f32.mrf.mxu2  ;;  %v8354_v24 = vpop.f32.mrf.mxu3  ;;  %v6716_v11 = vadd.f32 %v6529_v50, %v17939_v62 }
 0xaa3   : > { %v7631_v41 = vadd.f32 %v7443_v45, %v6715_v42  ;;  %v6905_v42 = vrot.slane %v13228_v12, 1 }
 0xaa5   : > { %v8542_v17 = vadd.f32 %v8354_v24, %v7631_v41  ;;  %v8896_v6 = vpop.f32.mrf.mxu0 }
 0xaa7   : > { %v9082_v55 = vadd.f32 %v8894_v47, %v8542_v17  ;;  %v13227_v47 = vld [vmem:[%s13435_s24 + $0x24c] sm:$0xff]  }
 0xaa8   : > { %v7806_v5 = vrot.slane %v13227_v47, 1 }
 0xaa9   : > { %v9214_v1 = vmul.f32 %v16728_v63, %v9082_v55  ;;  %v6532_v49 = vpop.f32.mrf.mxu1 }
 0xaaa   : > { %v7445_v18 = vpop.f32.mrf.mxu2  ;;  %v8356_v40 = vpop.f32.mrf.mxu3  ;;  %v6717_v60 = vadd.f32 %v6532_v49, %v17941_v46 }
 0xaab   : > { %v9346_v26 = vadd.f32 %v16738_v44, %v9214_v1  ;;  %v7632_v13 = vadd.f32 %v7445_v18, %v6716_v11 }
 0xaac   : > { %10690 = vmatmul.msk.bf16.gmra.mxu1 %vm829_vm2, %v17940_v43 }
 0xaad   : > { %vm9474_vm5 = vcmp.ge.f32.partialorder %v9346_v26, 0.0  ;;  %v9602_v23 = vmul.f32 0.1, %v9346_v26  ;;  %v8543_v54 = vadd.f32 %v8356_v40, %v7632_v13  ;;  %v8899_v21 = vpop.f32.mrf.mxu0 }
 0xaaf   : > { %v9730_v61 = vsel %vm9474_vm5, %v9346_v26, %v9602_v23  ;;  %v9083_v48 = vadd.f32 %v8896_v6, %v8543_v54  ;;  %10771 = vmatmul.msk.bf16.gmra.mxu2 %vm829_vm2, %v16930_v28  ;;  %10852 = vmatmul.msk.bf16.gmra.mxu3 %vm829_vm2, %v7805_v53  ;;  %v7807_v6 = vsel %vm6753_vm4, %v7804_v3, %v7806_v5  ;;  %v17070_v3 = vld [vmem:[%s17393_s2] ss:$0 sm:$0xff]  ;;  %v17943_v23 = vld [vmem:[#allocation167_spill] sm:$0xff] }
 0xab0   : > { %v9978_v29 = vpack.c.bf16 %v9730_v61, %v9730_v61  ;;  %10933 = vmatmul.msk.bf16.gmra.mxu0 %vm829_vm2, %v17035_v39 }
 0xab1   : > { %v9215_v16 = vmul.f32 %v16728_v63, %v9083_v48  ;;  %v6534_v51 = vpop.f32.mrf.mxu1  ;;  %v13232_v48 = vld [vmem:[%s13435_s24 + $0x268] sm:$0xff]  }
 0xab2   : > { %11036 = vst.msk [vmem:[%s15754_s22 + $0x180] sm:$0xf] %vm9766_vm6, %v9978_v29  ;;  %v7448_v15 = vpop.f32.mrf.mxu2  ;;  %v8359_v28 = vpop.f32.mrf.mxu3  ;;  %v6718_v52 = vadd.f32 %v6534_v51, %v17942_v56  ;;  %v6907_v43 = vrot.slane %v13232_v48, 1 }
 0xab3   : > { %v9347_v4 = vadd.f32 %v16738_v44, %v9215_v16  ;;  %v7633_v10 = vadd.f32 %v7448_v15, %v6717_v60 }
 0xab5   : > { %vm9475_vm7 = vcmp.ge.f32.partialorder %v9347_v4, 0.0  ;;  %v9603_v2 = vmul.f32 0.1, %v9347_v4  ;;  %v8544_v57 = vadd.f32 %v8359_v28, %v7633_v10  ;;  %v8901_v30 = vpop.f32.mrf.mxu0  ;;  %v17088_v28 = vsel %vm6753_vm4, %v6905_v42, %v6907_v43 }
 0xab7   : > { %v9731_v7 = vsel %vm9475_vm7, %v9347_v4, %v9603_v2  ;;  %v9084_v20 = vadd.f32 %v8899_v21, %v8544_v57  ;;  %v13231_v21 = vld [vmem:[%s13435_s24 + $0x254] sm:$0xff]  }
 0xab8   : > { %v9979_v32 = vpack.c.bf16 %v9731_v7, %v9731_v7  ;;  %v7808_v61 = vrot.slane %v13231_v21, 1  ;;  %v17944_v2 = vld [vmem:[#allocation40_spill] sm:$0xff] }
 0xab9   : > { %v9216_v22 = vmul.f32 %v16728_v63, %v9084_v20  ;;  %v6537_v17 = vpop.f32.mrf.mxu1  ;;  %v17058_v63 = vsel %vm6753_vm4, %v6903_v38, %v6905_v42 }
 0xaba   : > { %11037 = vst.msk [vmem:[%s15754_s22 + $0x184] sm:$0xf] %vm9766_vm6, %v9979_v32  ;;  %v7450_v45 = vpop.f32.mrf.mxu2  ;;  %v8361_v50 = vpop.f32.mrf.mxu3  ;;  %v7809_v10 = vsel %vm6753_vm4, %v7806_v5, %v7808_v61  ;;  %v17946_v17 = vld [vmem:[#allocation168_spill] sm:$0xff] }
 0xabb   : > { %v9348_v41 = vadd.f32 %v16738_v44, %v9216_v22  ;;  %v7634_v24 = vadd.f32 %v7450_v45, %v6718_v52 }
 0xabc   : > { %10691 = vmatmul.msk.bf16.gmra.mxu1 %vm829_vm2, %v15450_v8 }
 0xabd   : > { %vm9476_vm8 = vcmp.ge.f32.partialorder %v9348_v41, 0.0  ;;  %v9604_v55 = vmul.f32 0.1, %v9348_v41  ;;  %v8545_v31 = vadd.f32 %v8361_v50, %v7634_v24  ;;  %v8904_v1 = vpop.f32.mrf.mxu0 }
 0xabf   : > { %v9732_v62 = vsel %vm9476_vm8, %v9348_v41, %v9604_v55  ;;  %v9085_v11 = vadd.f32 %v8901_v30, %v8545_v31  ;;  %10772 = vmatmul.msk.bf16.gmra.mxu2 %vm829_vm2, %v16953_v35  ;;  %10853 = vmatmul.msk.bf16.gmra.mxu3 %vm829_vm2, %v7807_v6  ;;  %v17078_v35 = vld [vmem:[%s17394_s3] ss:$0 sm:$0xff]  ;;  %v17945_v30 = vld [vmem:[#allocation19_spill] sm:$0xff] }
 0xac0   : > { %v9980_v44 = vpack.c.bf16 %v9732_v62, %v9732_v62  ;;  %10934 = vmatmul.msk.bf16.gmra.mxu0 %vm829_vm2, %v17058_v63  ;;  %v13233_v41 = vld [vmem:[%s13435_s24 + $0x25c] sm:$0xff]   ;;  %v13234_v55 = vld [vmem:[%s13435_s24 + $0x270] sm:$0xff]  }
 0xac1   : > { %v9217_v37 = vmul.f32 %v17070_v3, %v9085_v11  ;;  %v6538_v26 = vpop.f32.mrf.mxu1  ;;  %v7810_v24 = vrot.slane %v13233_v41, 1  ;;  %v6909_v31 = vrot.slane %v13234_v55, 1 }
 0xac2   : > { %11038 = vst.msk [vmem:[%s15754_s22 + $0x188] sm:$0xf] %vm9766_vm6, %v9980_v44  ;;  %v7453_v8 = vpop.f32.mrf.mxu2  ;;  %v8364_v18 = vpop.f32.mrf.mxu3  ;;  %v6719_v54 = vadd.f32 %v6538_v26, %v17943_v23 }
 0xac3   : > { %v9349_v38 = vadd.f32 %v17078_v35, %v9217_v37  ;;  %v7811_v8 = vsel %vm6753_vm4, %v7808_v61, %v7810_v24 }
 0xac5   : > { %vm9477_vm9 = vcmp.ge.f32.partialorder %v9349_v38, 0.0  ;;  %v9605_v13 = vmul.f32 0.1, %v9349_v38  ;;  %v8905_v40 = vpop.f32.mrf.mxu0 }
 0xac7   : > { %v9733_v49 = vsel %vm9477_vm9, %v9349_v38, %v9605_v13  ;;  %v17109_v13 = vsel %vm6753_vm4, %v6907_v43, %v6909_v31 }
 0xac8   : > { %v9981_v53 = vpack.c.bf16 %v9733_v49, %v9733_v49 }
 0xac9   : > { %v6541_v60 = vpop.f32.mrf.mxu1 }
 0xaca   : > { %11039 = vst.msk [vmem:[%s15754_s22 + $0x18c] sm:$0xf] %vm9766_vm6, %v9981_v53  ;;  %v7454_v29 = vpop.f32.mrf.mxu2  ;;  %v8365_v46 = vpop.f32.mrf.mxu3  ;;  %v6720_v7 = vadd.f32 %v6541_v60, %v17945_v30 }
 0xacb   : > { %v7635_v16 = vadd.f32 %v7454_v29, %v6719_v54  ;;  %v17947_v54 = vld [vmem:[#allocation25_spill] sm:$0xff] }
 0xacc   : > { %10692 = vmatmul.msk.bf16.gmra.mxu1 %vm829_vm2, %v17944_v2 }
 0xacd   : > { %v8546_v15 = vadd.f32 %v8365_v46, %v7635_v16  ;;  %v8908_v4 = vpop.f32.mrf.mxu0 }
 0xacf   : > { %v9086_v51 = vadd.f32 %v8905_v40, %v8546_v15  ;;  %10773 = vmatmul.msk.bf16.gmra.mxu2 %vm829_vm2, %v16973_v27  ;;  %10854 = vmatmul.msk.bf16.gmra.mxu3 %vm829_vm2, %v7809_v10 }
 0xad0   : > { %10935 = vmatmul.msk.bf16.gmra.mxu0 %vm829_vm2, %v17088_v28 }
 0xad1   : > { %v9218_v57 = vmul.f32 %v17070_v3, %v9086_v51  ;;  %v6543_v22 = vpop.f32.mrf.mxu1  ;;  %v13235_v51 = vld [vmem:[%s13435_s24 + $0x264] sm:$0xff]  }
 0xad2   : > { %v7457_v20 = vpop.f32.mrf.mxu2  ;;  %v8368_v5 = vpop.f32.mrf.mxu3  ;;  %v6721_v6 = vadd.f32 %v6543_v22, %v17946_v17  ;;  %v7812_v2 = vrot.slane %v13235_v51, 1 }
 0xad3   : > { %v9350_v32 = vadd.f32 %v17078_v35, %v9218_v57  ;;  %v7636_v47 = vadd.f32 %v7457_v20, %v6720_v7  ;;  %v13236_v57 = vld [vmem:[%s13435_s24 + $0x278] sm:$0xff]  }
 0xad4   : > { %v17126_v30 = vrot.slane %v13236_v57, 1 }
 0xad5   : > { %vm9478_vm10 = vcmp.ge.f32.partialorder %v9350_v32, 0.0  ;;  %v9606_v27 = vmul.f32 0.1, %v9350_v32  ;;  %v8547_v56 = vadd.f32 %v8368_v5, %v7636_v47  ;;  %v8910_v52 = vpop.f32.mrf.mxu0 }
 0xad7   : > { %v9734_v12 = vsel %vm9478_vm10, %v9350_v32, %v9606_v27  ;;  %v9087_v42 = vadd.f32 %v8908_v4, %v8547_v56  ;;  %v7813_v27 = vsel %vm6753_vm4, %v7810_v24, %v7812_v2  ;;  %v17134_v56 = vsel %vm6753_vm4, %v6909_v31, %v17126_v30 }
 0xad8   : > { %v9987_v45 = vpack.c.bf16 %v9734_v12, %v9734_v12 }
 0xad9   : > { %v9219_v50 = vmul.f32 %v17070_v3, %v9087_v42  ;;  %v6546_v37 = vpop.f32.mrf.mxu1  ;;  %v17948_v42 = vld [vmem:[#allocation28_spill] sm:$0xff] }
 0xada   : > { %11040 = vst.msk [vmem:[%s15754_s22 + $0x190] sm:$0xf] %vm9766_vm6, %v9987_v45  ;;  %v7459_v1 = vpop.f32.mrf.mxu2  ;;  %v8370_v44 = vpop.f32.mrf.mxu3  ;;  %v6722_v21 = vadd.f32 %v6546_v37, %v17947_v54  ;;  %v17949_v37 = vld [vmem:[#allocation170_spill] sm:$0xff] }
 0xadb   : > { %v9351_v62 = vadd.f32 %v17078_v35, %v9219_v50  ;;  %v7637_v11 = vadd.f32 %v7459_v1, %v6721_v6  ;;  %v17147_v6 = vld [vmem:[%s13435_s24 + $0x280] sm:$0xff]  }
 0xadc   : > { %10693 = vmatmul.msk.bf16.gmra.mxu1 %vm829_vm2, %v15494_v59 }
 0xadd   : > { %vm9479_vm11 = vcmp.ge.f32.partialorder %v9351_v62, 0.0  ;;  %v9607_v38 = vmul.f32 0.1, %v9351_v62  ;;  %v8548_v18 = vadd.f32 %v8370_v44, %v7637_v11  ;;  %v8913_v26 = vpop.f32.mrf.mxu0 }
 0xadf   : > { %v9735_v40 = vsel %vm9479_vm11, %v9351_v62, %v9607_v38  ;;  %v9088_v49 = vadd.f32 %v8910_v52, %v8548_v18  ;;  %10774 = vmatmul.msk.bf16.gmra.mxu2 %vm829_vm2, %v16994_v34  ;;  %10855 = vmatmul.msk.bf16.gmra.mxu3 %vm829_vm2, %v7811_v8  ;;  %v13238_v62 = vld [vmem:[%s13435_s24 + $0x26c] sm:$0xff]   ;;  %v8576_v38 = vrot.slane %v17147_v6, 1 }
 0xae0   : > { %v9988_v53 = vpack.c.bf16 %v9735_v40, %v9735_v40  ;;  %10936 = vmatmul.msk.bf16.gmra.mxu0 %vm829_vm2, %v17109_v13  ;;  %v7814_v11 = vrot.slane %v13238_v62, 1 }
 0xae1   : > { %v9220_v23 = vmul.f32 %v17070_v3, %v9088_v49  ;;  %v6548_v43 = vpop.f32.mrf.mxu1 }
 0xae2   : > { %11041 = vst.msk [vmem:[%s15754_s22 + $0x194] sm:$0xf] %vm9766_vm6, %v9988_v53  ;;  %v7462_v61 = vpop.f32.mrf.mxu2  ;;  %v8373_v34 = vpop.f32.mrf.mxu3 }
 0xae3   : > { %v9352_v59 = vadd.f32 %v17078_v35, %v9220_v23  ;;  %v7638_v48 = vadd.f32 %v7462_v61, %v6722_v21  ;;  %v17950_v23 = vld [vmem:[#allocation175_spill] sm:$0xff]  ;;  %v7815_v21 = vsel %vm6753_vm4, %v7812_v2, %v7814_v11 }
 0xae5   : > { %vm9480_vm12 = vcmp.ge.f32.partialorder %v9352_v59, 0.0  ;;  %v9608_v29 = vmul.f32 0.1, %v9352_v59  ;;  %v8549_v16 = vadd.f32 %v8373_v34, %v7638_v48  ;;  %v8915_v46 = vpop.f32.mrf.mxu0  ;;  %v8577_v34 = vsel %vm6753_vm4, %v17126_v30, %v8576_v38 }
 0xae7   : > { %v9736_v60 = vsel %vm9480_vm12, %v9352_v59, %v9608_v29  ;;  %v9089_v15 = vadd.f32 %v8913_v26, %v8549_v16 }
 0xae8   : > { %v9989_v4 = vpack.c.bf16 %v9736_v60, %v9736_v60  ;;  %v17951_v60 = vld [vmem:[#allocation34_spill] sm:$0xff] }
 0xae9   : > { %v9221_v10 = vmul.f32 %v17070_v3, %v9089_v15  ;;  %v6550_v47 = vpop.f32.mrf.mxu1 }
 0xaea   : > { %11042 = vst.msk [vmem:[%s15754_s22 + $0x198] sm:$0xf] %vm9766_vm6, %v9989_v4  ;;  %v7464_v7 = vpop.f32.mrf.mxu2  ;;  %v8375_v32 = vpop.f32.mrf.mxu3  ;;  %v6723_v45 = vadd.f32 %v6550_v47, %v17948_v42  ;;  %v17168_v4 = vld [vmem:[%s13435_s24 + $0x288] sm:$0xff]  }
 0xaeb   : > { %v9353_v20 = vadd.f32 %v17078_v35, %v9221_v10  ;;  %v6181_v7 = vshrl.u32 %v17147_v6, 16 }
 0xaec   : > { %10694 = vmatmul.msk.bf16.gmra.mxu1 %vm829_vm2, %v15513_v25  ;;  %v6177_v25 = vshll.u32 %v17147_v6, 16  ;;  %v8578_v6 = vrot.slane %v17168_v4, 1 }
 0xaed   : > { %vm9481_vm13 = vcmp.ge.f32.partialorder %v9353_v20, 0.0  ;;  %v9609_v5 = vmul.f32 0.1, %v9353_v20  ;;  %v8917_v22 = vpop.f32.mrf.mxu0 }
 0xaee   : > { %v6179_v1 = vrot.slane %v6177_v25, 1 }
 0xaef   : > { %v9737_v52 = vsel %vm9481_vm13, %v9353_v20, %v9609_v5  ;;  %10775 = vmatmul.msk.bf16.gmra.mxu2 %vm829_vm2, %v17016_v58  ;;  %10856 = vmatmul.msk.bf16.gmra.mxu3 %vm829_vm2, %v7813_v27  ;;  %v6185_v20 = vshll.u32 %v17168_v4, 16 }
 0xaf0   : > { %v9990_v12 = vpack.c.bf16 %v9737_v52, %v9737_v52  ;;  %10937 = vmatmul.msk.bf16.gmra.mxu0 %vm829_vm2, %v17134_v56  ;;  %v6180_v54 = vsel %vm3280_vm3, %v17950_v23, %v6179_v1 }
 0xaf1   : > { %v6552_v17 = vpop.f32.mrf.mxu1  ;;  %v6187_v42 = vrot.slane %v6185_v20, 1 }
 0xaf2   : > { %11043 = vst.msk [vmem:[%s15754_s22 + $0x19c] sm:$0xf] %vm9766_vm6, %v9990_v12  ;;  %v7466_v41 = vpop.f32.mrf.mxu2  ;;  %v8377_v50 = vpop.f32.mrf.mxu3  ;;  %v6724_v8 = vadd.f32 %v6552_v17, %v17949_v37  ;;  %v6183_v12 = vor.u32 %v6181_v7, %v6179_v1 }
 0xaf3   : > { %v7639_v24 = vadd.f32 %v7466_v41, %v6723_v45  ;;  %v13239_v45 = vld [vmem:[%s13435_s24 + $0x274] sm:$0xff]  }
 0xaf4   : > { %v7816_v41 = vrot.slane %v13239_v45, 1  ;;  %v6188_v1 = vsel %vm3280_vm3, %v6183_v12, %v6187_v42 }
 0xaf5   : > { %v8550_v58 = vadd.f32 %v8377_v50, %v7639_v24  ;;  %v8919_v55 = vpop.f32.mrf.mxu0  ;;  %v17952_v50 = vld [vmem:[#allocation37_spill] sm:$0xff] }
 0xaf7   : > { %v9090_v31 = vadd.f32 %v8917_v22, %v8550_v58 }
 0xaf9   : > { %v9222_v44 = vmul.f32 %v17070_v3, %v9090_v31  ;;  %v6555_v53 = vpop.f32.mrf.mxu1 }
 0xafa   : > { %v7468_v18 = vpop.f32.mrf.mxu2  ;;  %v8379_v49 = vpop.f32.mrf.mxu3  ;;  %v6725_v15 = vadd.f32 %v6555_v53, %v17951_v60  ;;  %v17953_v60 = vld [vmem:[#allocation172_spill] sm:$0xff] }
 0xafb   : > { %v9354_v26 = vadd.f32 %v17078_v35, %v9222_v44  ;;  %v7640_v40 = vadd.f32 %v7468_v18, %v6724_v8  ;;  %v7817_v44 = vsel %vm6753_vm4, %v7814_v11, %v7816_v41 }
 0xafc   : > { %10695 = vmatmul.msk.bf16.gmra.mxu1 %vm829_vm2, %v6180_v54 }
 0xafd   : > { %vm9482_vm14 = vcmp.ge.f32.partialorder %v9354_v26, 0.0  ;;  %v9610_v61 = vmul.f32 0.1, %v9354_v26  ;;  %v8551_v59 = vadd.f32 %v8379_v49, %v7640_v40  ;;  %v8922_v48 = vpop.f32.mrf.mxu0 }
 0xaff   : > { %v9738_v43 = vsel %vm9482_vm14, %v9354_v26, %v9610_v61  ;;  %v9091_v29 = vadd.f32 %v8919_v55, %v8551_v59  ;;  %10776 = vmatmul.msk.bf16.gmra.mxu2 %vm829_vm2, %v17035_v39  ;;  %10857 = vmatmul.msk.bf16.gmra.mxu3 %vm829_vm2, %v7815_v21  ;;  %v8579_v26 = vsel %vm6753_vm4, %v8576_v38, %v8578_v6  ;;  %v6189_v61 = vshrl.u32 %v17168_v4, 16  ;;  %v17196_v59 = vld [vmem:[%s13435_s24 + $0x290] sm:$0xff]  }
 0xb00   : > { %v9996_v16 = vpack.c.bf16 %v9738_v43, %v9738_v43  ;;  %10938 = vmatmul.msk.bf16.gmra.mxu0 %vm829_vm2, %v8577_v34 }
 0xb01   : > { %v9223_v46 = vmul.f32 %v17070_v3, %v9091_v29  ;;  %v6557_v39 = vpop.f32.mrf.mxu1 }
 0xb02   : > { %11044 = vst.msk [vmem:[%s15754_s22 + $0x1a0] sm:$0xf] %vm9766_vm6, %v9996_v16  ;;  %v7471_v10 = vpop.f32.mrf.mxu2  ;;  %v8382_v57 = vpop.f32.mrf.mxu3  ;;  %v6726_v17 = vadd.f32 %v6557_v39, %v17952_v50  ;;  %v6191_v16 = vor.u32 %v6189_v61, %v6187_v42  ;;  %v17955_v42 = vld [vmem:[#allocation43_spill] sm:$0xff] }
 0xb03   : > { %v9355_v51 = vadd.f32 %v17078_v35, %v9223_v46  ;;  %v7641_v2 = vadd.f32 %v7471_v10, %v6725_v15  ;;  %v17954_v10 = vld [vmem:[#allocation171_spill] sm:$0xff] }
 0xb05   : > { %vm9483_vm15 = vcmp.ge.f32.partialorder %v9355_v51, 0.0  ;;  %v9611_v32 = vmul.f32 0.1, %v9355_v51  ;;  %v8552_v47 = vadd.f32 %v8382_v57, %v7641_v2  ;;  %v8924_v5 = vpop.f32.mrf.mxu0  ;;  %v8580_v2 = vrot.slane %v17196_v59, 1 }
 0xb07   : > { %v9739_v22 = vsel %vm9483_vm15, %v9355_v51, %v9611_v32  ;;  %v9092_v27 = vadd.f32 %v8922_v48, %v8552_v47  ;;  %v7818_v51 = vrot.slane %v17954_v10, 1 }
 0xb08   : > { %v9997_v52 = vpack.c.bf16 %v9739_v22, %v9739_v22  ;;  %v8581_v22 = vsel %vm6753_vm4, %v8578_v6, %v8580_v2 }
 0xb09   : > { %v9224_v24 = vmul.f32 %v17070_v3, %v9092_v27  ;;  %v6560_v62 = vpop.f32.mrf.mxu1 }
 0xb0a   : > { %11045 = vst.msk [vmem:[%s15754_s22 + $0x1a4] sm:$0xf] %vm9766_vm6, %v9997_v52  ;;  %v7473_v25 = vpop.f32.mrf.mxu2  ;;  %v8384_v31 = vpop.f32.mrf.mxu3  ;;  %v17213_v52 = vld [vmem:[%s13435_s24 + $0x298] sm:$0xff] }
 0xb0b   : > { %v9356_v58 = vadd.f32 %v17078_v35, %v9224_v24  ;;  %v7642_v55 = vadd.f32 %v7473_v25, %v6726_v17  ;;  %v6197_v25 = vshrl.u32 %v17196_v59, 16 }
 0xb0c   : > { %10696 = vmatmul.msk.bf16.gmra.mxu1 %vm829_vm2, %v6188_v1 }
 0xb0d   : > { %vm9484_vm0 = vcmp.ge.f32.partialorder %v9356_v58, 0.0  ;;  %v9612_v37 = vmul.f32 0.1, %v9356_v58  ;;  %v8553_v8 = vadd.f32 %v8384_v31, %v7642_v55  ;;  %v8927_v18 = vpop.f32.mrf.mxu0 }
 0xb0e   : > { %v13241_v18 = vld [vmem:[%s13435_s24 + $0x284] sm:$0xff]  }
 0xb0f   : > { %v9740_v40 = vsel %vm9484_vm0, %v9356_v58, %v9612_v37  ;;  %v9093_v49 = vadd.f32 %v8924_v5, %v8553_v8  ;;  %10777 = vmatmul.msk.bf16.gmra.mxu2 %vm829_vm2, %v17058_v63  ;;  %10858 = vmatmul.msk.bf16.gmra.mxu3 %vm829_vm2, %v7817_v44  ;;  %v6193_v63 = vshll.u32 %v17196_v59, 16  ;;  %v7819_v5 = vsel %vm6753_vm4, %v7816_v41, %v7818_v51 }
 0xb10   : > { %v9998_v53 = vpack.c.bf16 %v9740_v40, %v9740_v40  ;;  %10939 = vmatmul.msk.bf16.gmra.mxu0 %vm829_vm2, %v8579_v26  ;;  %v7820_v26 = vrot.slane %v13241_v18, 1 }
 0xb11   : > { %v9225_v11 = vmul.f32 %v17070_v3, %v9093_v49  ;;  %v6561_v21 = vpop.f32.mrf.mxu1  ;;  %v6195_v46 = vrot.slane %v6193_v63, 1  ;;  %v17956_v49 = vld [vmem:[#allocation46_spill] sm:$0xff] }
 0xb12   : > { %11046 = vst.msk [vmem:[%s15754_s22 + $0x1a8] sm:$0xf] %vm9766_vm6, %v9998_v53  ;;  %v7476_v23 = vpop.f32.mrf.mxu2  ;;  %v8387_v38 = vpop.f32.mrf.mxu3  ;;  %v6727_v15 = vadd.f32 %v6561_v21, %v17953_v60  ;;  %v7821_v63 = vsel %vm6753_vm4, %v7818_v51, %v7820_v26  ;;  %v17957_v51 = vld [vmem:[#allocation49_spill] sm:$0xff] }
 0xb13   : > { %v9357_v54 = vadd.f32 %v17078_v35, %v9225_v11  ;;  %v6196_v20 = vsel %vm3280_vm3, %v6191_v16, %v6195_v46  ;;  %v6199_v37 = vor.u32 %v6197_v25, %v6195_v46  ;;  %v8582_v11 = vrot.slane %v17213_v52, 1  ;;  %v2874_v25 = vld [vmem:[%s13435_s24 + $0x2a8] sm:$0x1] }
 0xb15   : > { %vm9485_vm1 = vcmp.ge.f32.partialorder %v9357_v54, 0.0  ;;  %v9613_v48 = vmul.f32 0.1, %v9357_v54  ;;  %v8928_v34 = vpop.f32.mrf.mxu0 }
 0xb17   : > { %v9741_v43 = vsel %vm9485_vm1, %v9357_v54, %v9613_v48 }
 0xb18   : > { %v9999_v29 = vpack.c.bf16 %v9741_v43, %v9741_v43 }
 0xb19   : > { %v6564_v7 = vpop.f32.mrf.mxu1 }
 0xb1a   : > { %11047 = vst.msk [vmem:[%s15754_s22 + $0x1ac] sm:$0xf] %vm9766_vm6, %v9999_v29  ;;  %v7477_v4 = vpop.f32.mrf.mxu2  ;;  %v8388_v39 = vpop.f32.mrf.mxu3  ;;  %v6728_v45 = vadd.f32 %v6564_v7, %v17955_v42  ;;  %v8583_v29 = vsel %vm6753_vm4, %v8580_v2, %v8582_v11 }
 0xb1b   : > { %v7643_v57 = vadd.f32 %v7477_v4, %v6727_v15  ;;  %v17236_v15 = vld [vmem:[%s13435_s24 + $0x2a0] sm:$0xff] }
 0xb1c   : > { %10697 = vmatmul.msk.bf16.gmra.mxu1 %vm829_vm2, %v6196_v20  ;;  %v6205_v20 = vshrl.u32 %v17213_v52, 16 }
 0xb1d   : > { %v8554_v32 = vadd.f32 %v8388_v39, %v7643_v57  ;;  %v8931_v47 = vpop.f32.mrf.mxu0 }
 0xb1f   : > { %v9094_v27 = vadd.f32 %v8928_v34, %v8554_v32  ;;  %10778 = vmatmul.msk.bf16.gmra.mxu2 %vm829_vm2, %v17088_v28  ;;  %10859 = vmatmul.msk.bf16.gmra.mxu3 %vm829_vm2, %v7819_v5  ;;  %v6201_v28 = vshll.u32 %v17213_v52, 16  ;;  %v6209_v32 = vshll.u32 %v17236_v15, 16 }
 0xb20   : > { %10940 = vmatmul.msk.bf16.gmra.mxu0 %vm829_vm2, %v8581_v22 }
 0xb21   : > { %v9226_v12 = vmul.f32 %v17070_v3, %v9094_v27  ;;  %v6566_v6 = vpop.f32.mrf.mxu1  ;;  %v6203_v8 = vrot.slane %v6201_v28, 1 }
 0xb22   : > { %v7480_v24 = vpop.f32.mrf.mxu2  ;;  %v8391_v17 = vpop.f32.mrf.mxu3  ;;  %v6729_v53 = vadd.f32 %v6566_v6, %v17956_v49  ;;  %v8584_v6 = vrot.slane %v17236_v15, 1 }
 0xb23   : > { %v9358_v41 = vadd.f32 %v17078_v35, %v9226_v12  ;;  %v7644_v50 = vadd.f32 %v7480_v24, %v6728_v45  ;;  %v6204_v59 = vsel %vm3280_vm3, %v6199_v37, %v6203_v8  ;;  %v6207_v45 = vor.u32 %v6205_v20, %v6203_v8 }
 0xb24   : > { %v6211_v24 = vrot.slane %v6209_v32, 1  ;;  %v8585_v8 = vsel %vm6753_vm4, %v8582_v11, %v8584_v6 }
 0xb25   : > { %vm9486_vm5 = vcmp.ge.f32.partialorder %v9358_v41, 0.0  ;;  %v9614_v58 = vmul.f32 0.1, %v9358_v41  ;;  %v8555_v55 = vadd.f32 %v8391_v17, %v7644_v50  ;;  %v8933_v31 = vpop.f32.mrf.mxu0  ;;  %v13242_v50 = vld [vmem:[%s13435_s24 + $0x28c] sm:$0xff]   ;;  %s13265_s24 = scalar_lea.hbm %s17395_s4, 1024 }
 0xb26   : > { %v7822_v17 = vrot.slane %v13242_v50, 1  ;;  %p13267_p2 = scmp.lt.s32.totalorder %s13265_s24, %s13261_s26 }
 0xb27   : > { %v9742_v62 = vsel %vm9486_vm5, %v9358_v41, %v9614_v58  ;;  %v9095_v1 = vadd.f32 %v8931_v47, %v8555_v55 }
 0xb28   : > { %v10005_v44 = vpack.c.bf16 %v9742_v62, %v9742_v62  ;;  %v6169_v62 = vunpack.c.l.b16 %v2874_v25  ;;  %v7823_v37 = vsel %vm6753_vm4, %v7820_v26, %v7822_v17  ;;  %p13268_p3 = por %p13267_p2, %p13266_p1 }
 0xb29   : > { %v9227_v40 = vmul.f32 %v17070_v3, %v9095_v1  ;;  %v6569_v61 = vpop.f32.mrf.mxu1 }
 0xb2a   : > { %11048 = vst.msk [vmem:[%s15754_s22 + $0x1b0] sm:$0xf] %vm9766_vm6, %v10005_v44  ;;  %v7482_v23 = vpop.f32.mrf.mxu2  ;;  %v8393_v21 = vpop.f32.mrf.mxu3  ;;  %v6730_v4 = vadd.f32 %v6569_v61, %v17957_v51  ;;  %v6175_v49 = vpack.c.b16 %v6169_v62, %v6169_v62  ;;  %p13269_p5 = pnand %p13268_p3, %p13264_p0 }
 0xb2b   : > { %v9359_v54 = vadd.f32 %v17078_v35, %v9227_v40  ;;  %v7645_v38 = vadd.f32 %v7482_v23, %v6729_v53  ;;  %v17958_v53 = vld [vmem:[#allocation174_spill] sm:$0xff] }
 0xb2c   : > { %10698 = vmatmul.msk.bf16.gmra.mxu1 %vm829_vm2, %v6204_v59  ;;  %v6217_v61 = vshll.u32 %v6175_v49, 16 }
 0xb2d   : > { %vm9487_vm7 = vcmp.ge.f32.partialorder %v9359_v54, 0.0  ;;  %v9615_v48 = vmul.f32 0.1, %v9359_v54  ;;  %v8556_v34 = vadd.f32 %v8393_v21, %v7645_v38  ;;  %v8936_v43 = vpop.f32.mrf.mxu0  ;;  %v6213_v21 = vshrl.u32 %v17236_v15, 16 }
 0xb2f   : > { %v9743_v16 = vsel %vm9487_vm7, %v9359_v54, %v9615_v48  ;;  %v9096_v46 = vadd.f32 %v8933_v31, %v8556_v34  ;;  %10779 = vmatmul.msk.bf16.gmra.mxu2 %vm829_vm2, %v17109_v13  ;;  %10860 = vmatmul.msk.bf16.gmra.mxu3 %vm829_vm2, %v7821_v63  ;;  %v6212_v31 = vsel %vm3280_vm3, %v6207_v45, %v6211_v24  ;;  %v6219_v34 = vrot.slane %v6217_v61, 1 }
 0xb30   : > { %v10006_v60 = vpack.c.bf16 %v9743_v16, %v9743_v16  ;;  %10941 = vmatmul.msk.bf16.gmra.mxu0 %vm829_vm2, %v8583_v29  ;;  %v6215_v48 = vor.u32 %v6213_v21, %v6211_v24  ;;  %v17960_v16 = vld [vmem:[#allocation173_spill] sm:$0xff]  ;;  %v17962_v24 = vld [vmem:[#allocation58_spill] sm:$0xff] }
 0xb31   : > { %v9228_v10 = vmul.f32 %v17070_v3, %v9096_v46  ;;  %v6571_v13 = vpop.f32.mrf.mxu1  ;;  %v7824_v46 = vrot.slane %v17960_v16, 1 }
 0xb32   : > { %11049 = vst.msk [vmem:[%s15754_s22 + $0x1b4] sm:$0xf] %vm9766_vm6, %v10006_v60  ;;  %v7485_v2 = vpop.f32.mrf.mxu2  ;;  %v8396_v7 = vpop.f32.mrf.mxu3  ;;  %v6220_v13 = vsel %vm3280_vm3, %v6215_v48, %v6219_v34 }
 0xb33   : > { %v9360_v57 = vadd.f32 %v17078_v35, %v9228_v10  ;;  %v7646_v39 = vadd.f32 %v7485_v2, %v6730_v4  ;;  %v17961_v10 = vld [vmem:[#allocation55_spill] sm:$0xff]  ;;  %v8586_v4 = vrot.slane %v6175_v49, 1  ;;  %v7825_v32 = vsel %vm6753_vm4, %v7822_v17, %v7824_v46 }
 0xb35   : > { %vm9488_vm8 = vcmp.ge.f32.partialorder %v9360_v57, 0.0  ;;  %v9616_v47 = vmul.f32 0.1, %v9360_v57  ;;  %v8557_v5 = vadd.f32 %v8396_v7, %v7646_v39  ;;  %v8938_v22 = vpop.f32.mrf.mxu0 }
 0xb37   : > { %v9744_v27 = vsel %vm9488_vm8, %v9360_v57, %v9616_v47  ;;  %v9097_v12 = vadd.f32 %v8936_v43, %v8557_v5  ;;  %v17959_v43 = vld [vmem:[#allocation52_spill] sm:$0xff] }
 0xb38   : > { %v10007_v42 = vpack.c.bf16 %v9744_v27, %v9744_v27  ;;  %v6913_v29 = vrot.slane %v17959_v43, 1  ;;  %v8587_v27 = vsel %vm6753_vm4, %v8584_v6, %v8586_v4 }
 0xb39   : > { %v9229_v41 = vmul.f32 %v17070_v3, %v9097_v12  ;;  %v6573_v55 = vpop.f32.mrf.mxu1 }
 0xb3a   : > { %11050 = vst.msk [vmem:[%s15754_s22 + $0x1b8] sm:$0xf] %vm9766_vm6, %v10007_v42  ;;  %v7487_v52 = vpop.f32.mrf.mxu2  ;;  %v8398_v58 = vpop.f32.mrf.mxu3  ;;  %v6731_v23 = vadd.f32 %v6573_v55, %v17958_v53  ;;  %v6914_v20 = vsel %vm6753_vm4, %v17126_v30, %v6913_v29 }
 0xb3b   : > { %v9361_v28 = vadd.f32 %v17078_v35, %v9229_v41 }
 0xb3c   : > { %10699 = vmatmul.msk.bf16.gmra.mxu1 %vm829_vm2, %v6212_v31 }
 0xb3d   : > { %vm9489_vm9 = vcmp.ge.f32.partialorder %v9361_v28, 0.0  ;;  %v9617_v1 = vmul.f32 0.1, %v9361_v28  ;;  %v8940_v44 = vpop.f32.mrf.mxu0 }
 0xb3f   : > { %v9745_v18 = vsel %vm9489_vm9, %v9361_v28, %v9617_v1  ;;  %10780 = vmatmul.msk.bf16.gmra.mxu2 %vm829_vm2, %v17134_v56  ;;  %10861 = vmatmul.msk.bf16.gmra.mxu3 %vm829_vm2, %v7823_v37  ;;  %v17963_v37 = vld [vmem:[#allocation61_spill] sm:$0xff] }
 0xb40   : > { %v10008_v40 = vpack.c.bf16 %v9745_v18, %v9745_v18  ;;  %10942 = vmatmul.msk.bf16.gmra.mxu0 %vm829_vm2, %v8585_v8 }
 0xb41   : > { %v6575_v11 = vpop.f32.mrf.mxu1 }
 0xb42   : > { %11051 = vst.msk [vmem:[%s15754_s22 + $0x1bc] sm:$0xf] %vm9766_vm6, %v10008_v40  ;;  %v7489_v54 = vpop.f32.mrf.mxu2  ;;  %v8400_v38 = vpop.f32.mrf.mxu3  ;;  %v6732_v51 = vadd.f32 %v6575_v11, %v17961_v10 }
 0xb43   : > { %v7647_v26 = vadd.f32 %v7489_v54, %v6731_v23 }
 0xb45   : > { %v8558_v59 = vadd.f32 %v8400_v38, %v7647_v26  ;;  %v8942_v63 = vpop.f32.mrf.mxu0 }
 0xb47   : > { %v9098_v56 = vadd.f32 %v8940_v44, %v8558_v59 }
 0xb49   : > { %v9230_v60 = vmul.f32 %v17070_v3, %v9098_v56  ;;  %v6578_v7 = vpop.f32.mrf.mxu1 }
 0xb4a   : > { %v7491_v2 = vpop.f32.mrf.mxu2  ;;  %v8402_v15 = vpop.f32.mrf.mxu3  ;;  %v6733_v41 = vadd.f32 %v6578_v7, %v17962_v24 }
 0xb4b   : > { %v9362_v57 = vadd.f32 %v17078_v35, %v9230_v60  ;;  %v7648_v39 = vadd.f32 %v7491_v2, %v6732_v51  ;;  %v17964_v60 = vld [vmem:[#allocation86_spill] sm:$0xff] }
 0xb4c   : > { %10700 = vmatmul.msk.bf16.gmra.mxu1 %vm829_vm2, %v6220_v13 }
 0xb4d   : > { %vm9490_vm10 = vcmp.ge.f32.partialorder %v9362_v57, 0.0  ;;  %v9618_v47 = vmul.f32 0.1, %v9362_v57  ;;  %v8559_v5 = vadd.f32 %v8402_v15, %v7648_v39  ;;  %v8945_v22 = vpop.f32.mrf.mxu0 }
 0xb4f   : > { %v9746_v12 = vsel %vm9490_vm10, %v9362_v57, %v9618_v47  ;;  %v9099_v42 = vadd.f32 %v8942_v63, %v8559_v5  ;;  %10781 = vmatmul.msk.bf16.gmra.mxu2 %vm829_vm2, %v6914_v20  ;;  %10862 = vmatmul.msk.bf16.gmra.mxu3 %vm829_vm2, %v7825_v32  ;;  %v17965_v20 = vld [vmem:[#allocation64_spill] sm:$0xff] }
 0xb50   : > { %v10014_v45 = vpack.c.bf16 %v9746_v12, %v9746_v12  ;;  %10943 = vmatmul.msk.bf16.gmra.mxu0 %vm829_vm2, %v8587_v27 }
 0xb51   : > { %v9231_v30 = vmul.f32 %v17070_v3, %v9099_v42  ;;  %v6580_v52 = vpop.f32.mrf.mxu1 }
 0xb52   : > { %11052 = vst.msk [vmem:[%s15754_s22 + $0x1c0] sm:$0xf] %vm9766_vm6, %v10014_v45  ;;  %v7494_v50 = vpop.f32.mrf.mxu2  ;;  %v8405_v25 = vpop.f32.mrf.mxu3  ;;  %v6734_v8 = vadd.f32 %v6580_v52, %v17963_v37 }
 0xb53   : > { %v9363_v17 = vadd.f32 %v17078_v35, %v9231_v30  ;;  %v7649_v6 = vadd.f32 %v7494_v50, %v6733_v41 }
 0xb55   : > { %vm9491_vm3 = vcmp.ge.f32.partialorder %v9363_v17, 0.0  ;;  %v9619_v28 = vmul.f32 0.1, %v9363_v17  ;;  %v8560_v58 = vadd.f32 %v8405_v25, %v7649_v6  ;;  %v8947_v55 = vpop.f32.mrf.mxu0  ;;  %v17966_v6 = vld [vmem:[#allocation91_spill] sm:$0xff] }
 0xb57   : > { %v9747_v31 = vsel %vm9491_vm3, %v9363_v17, %v9619_v28  ;;  %v9100_v62 = vadd.f32 %v8945_v22, %v8560_v58 }
 0xb58   : > { %v10015_v1 = vpack.c.bf16 %v9747_v31, %v9747_v31 }
 0xb59   : > { %v9232_v44 = vmul.f32 %v17070_v3, %v9100_v62  ;;  %v6583_v23 = vpop.f32.mrf.mxu1 }
 0xb5a   : > { %11053 = vst.msk [vmem:[%s15754_s22 + $0x1c4] sm:$0xf] %vm9766_vm6, %v10015_v1  ;;  %v7496_v18 = vpop.f32.mrf.mxu2  ;;  %v8407_v53 = vpop.f32.mrf.mxu3 }
 0xb5b   : > { %v9364_v40 = vadd.f32 %v17078_v35, %v9232_v44  ;;  %v7650_v49 = vadd.f32 %v7496_v18, %v6734_v8 }
 0xb5d   : > { %vm9492_vm2 = vcmp.ge.f32.partialorder %v9364_v40, 0.0  ;;  %v9620_v54 = vmul.f32 0.1, %v9364_v40  ;;  %v8561_v26 = vadd.f32 %v8407_v53, %v7650_v49  ;;  %v8950_v38 = vpop.f32.mrf.mxu0  ;;  %v17967_v49 = vld [vmem:[#allocation67_spill] sm:$0xff] }
 0xb5f   : > { %v9748_v11 = vsel %vm9492_vm2, %v9364_v40, %v9620_v54  ;;  %v9101_v21 = vadd.f32 %v8947_v55, %v8561_v26 }
 0xb60   : > { %v10016_v61 = vpack.c.bf16 %v9748_v11, %v9748_v11 }
 0xb61   : > { %v9233_v59 = vmul.f32 %v17070_v3, %v9101_v21  ;;  %v6584_v34 = vpop.f32.mrf.mxu1 }
 0xb62   : > { %11054 = vst.msk [vmem:[%s15754_s22 + $0x1c8] sm:$0xf] %vm9766_vm6, %v10016_v61  ;;  %v7499_v63 = vpop.f32.mrf.mxu2  ;;  %v8410_v48 = vpop.f32.mrf.mxu3  ;;  %v6735_v10 = vadd.f32 %v6584_v34, %v17964_v60 }
 0xb63   : > { %v9365_v56 = vadd.f32 %v17078_v35, %v9233_v59 }
 0xb65   : > { %vm9493_vm4 = vcmp.ge.f32.partialorder %v9365_v56, 0.0  ;;  %v9621_v43 = vmul.f32 0.1, %v9365_v56  ;;  %v8951_v29 = vpop.f32.mrf.mxu0 }
 0xb67   : > { %v9749_v16 = vsel %vm9493_vm4, %v9365_v56, %v9621_v43 }
 0xb68   : > { %v10017_v46 = vpack.c.bf16 %v9749_v16, %v9749_v16 }
 0xb69   : > { %v6587_v57 = vpop.f32.mrf.mxu1 }
 0xb6a   : > { %11055 = vst.msk [vmem:[%s15754_s22 + $0x1cc] sm:$0xf] %vm9766_vm6, %v10017_v46  ;;  %v7500_v51 = vpop.f32.mrf.mxu2  ;;  %v8411_v2 = vpop.f32.mrf.mxu3  ;;  %v6736_v32 = vadd.f32 %v6587_v57, %v17965_v20 }
 0xb6b   : > { %v7651_v4 = vadd.f32 %v7500_v51, %v6735_v10 }
 0xb6d   : > { %v8562_v39 = vadd.f32 %v8411_v2, %v7651_v4  ;;  %v8954_v15 = vpop.f32.mrf.mxu0 }
 0xb6f   : > { %v9102_v7 = vadd.f32 %v8951_v29, %v8562_v39 }
 0xb71   : > { %v9234_v13 = vmul.f32 %v17070_v3, %v9102_v7  ;;  %v6589_v12 = vpop.f32.mrf.mxu1 }
 0xb72   : > { %v7503_v47 = vpop.f32.mrf.mxu2  ;;  %v8414_v27 = vpop.f32.mrf.mxu3  ;;  %v6737_v25 = vadd.f32 %v6589_v12, %v17966_v6 }
 0xb73   : > { %v9366_v5 = vadd.f32 %v17078_v35, %v9234_v13  ;;  %v7652_v22 = vadd.f32 %v7503_v47, %v6736_v32 }
 0xb75   : > { %vm9494_vm11 = vcmp.ge.f32.partialorder %v9366_v5, 0.0  ;;  %v9622_v42 = vmul.f32 0.1, %v9366_v5  ;;  %v8563_v45 = vadd.f32 %v8414_v27, %v7652_v22  ;;  %v8956_v30 = vpop.f32.mrf.mxu0 }
 0xb77   : > { %v9750_v24 = vsel %vm9494_vm11, %v9366_v5, %v9622_v42  ;;  %v9103_v41 = vadd.f32 %v8954_v15, %v8563_v45 }
 0xb78   : > { %v10023_v50 = vpack.c.bf16 %v9750_v24, %v9750_v24 }
 0xb79   : > { %v9235_v17 = vmul.f32 %v17070_v3, %v9103_v41  ;;  %v6592_v31 = vpop.f32.mrf.mxu1 }
 0xb7a   : > { %11056 = vst.msk [vmem:[%s15754_s22 + $0x1d0] sm:$0xf] %vm9766_vm6, %v10023_v50  ;;  %v7505_v52 = vpop.f32.mrf.mxu2  ;;  %v8416_v55 = vpop.f32.mrf.mxu3  ;;  %v6738_v53 = vadd.f32 %v6592_v31, %v17967_v49 }
 0xb7b   : > { %v9367_v28 = vadd.f32 %v17078_v35, %v9235_v17  ;;  %v7653_v58 = vadd.f32 %v7505_v52, %v6737_v25 }
 0xb7d   : > { %vm9495_vm12 = vcmp.ge.f32.partialorder %v9367_v28, 0.0  ;;  %v9623_v62 = vmul.f32 0.1, %v9367_v28  ;;  %v8564_v1 = vadd.f32 %v8416_v55, %v7653_v58  ;;  %v8959_v44 = vpop.f32.mrf.mxu0 }
 0xb7f   : > { %v9751_v37 = vsel %vm9495_vm12, %v9367_v28, %v9623_v62  ;;  %v9104_v8 = vadd.f32 %v8956_v30, %v8564_v1 }
 0xb80   : > { %v10024_v18 = vpack.c.bf16 %v9751_v37, %v9751_v37 }
 0xb81   : > { %v9236_v40 = vmul.f32 %v17070_v3, %v9104_v8  ;;  %v6594_v11 = vpop.f32.mrf.mxu1 }
 0xb82   : > { %11057 = vst.msk [vmem:[%s15754_s22 + $0x1d4] sm:$0xf] %vm9766_vm6, %v10024_v18  ;;  %v7508_v23 = vpop.f32.mrf.mxu2  ;;  %v8419_v38 = vpop.f32.mrf.mxu3 }
 0xb83   : > { %v9368_v54 = vadd.f32 %v17078_v35, %v9236_v40  ;;  %v7654_v26 = vadd.f32 %v7508_v23, %v6738_v53  ;;  %v17968_v40 = vld [vmem:[#allocation70_spill] sm:$0xff] }
 0xb85   : > { %vm9496_vm13 = vcmp.ge.f32.partialorder %v9368_v54, 0.0  ;;  %v9624_v21 = vmul.f32 0.1, %v9368_v54  ;;  %v8565_v61 = vadd.f32 %v8419_v38, %v7654_v26  ;;  %v8961_v59 = vpop.f32.mrf.mxu0 }
 0xb87   : > { %v9752_v63 = vsel %vm9496_vm13, %v9368_v54, %v9624_v21  ;;  %v9105_v56 = vadd.f32 %v8959_v44, %v8565_v61 }
 0xb88   : > { %v10025_v48 = vpack.c.bf16 %v9752_v63, %v9752_v63 }
 0xb89   : > { %v9237_v34 = vmul.f32 %v17070_v3, %v9105_v56  ;;  %v6596_v46 = vpop.f32.mrf.mxu1 }
 0xb8a   : > { %11058 = vst.msk [vmem:[%s15754_s22 + $0x1d8] sm:$0xf] %vm9766_vm6, %v10025_v48  ;;  %v7510_v43 = vpop.f32.mrf.mxu2  ;;  %v8421_v16 = vpop.f32.mrf.mxu3  ;;  %v6739_v2 = vadd.f32 %v6596_v46, %v15632_v19 }
 0xb8b   : > { %v9369_v29 = vadd.f32 %v17078_v35, %v9237_v34 }
 0xb8d   : > { %vm9497_vm14 = vcmp.ge.f32.partialorder %v9369_v29, 0.0  ;;  %v9625_v60 = vmul.f32 0.1, %v9369_v29  ;;  %v8963_v10 = vpop.f32.mrf.mxu0 }
 0xb8f   : > { %v9753_v51 = vsel %vm9497_vm14, %v9369_v29, %v9625_v60 }
 0xb90   : > { %v10026_v4 = vpack.c.bf16 %v9753_v51, %v9753_v51  ;;  %v17969_v51 = vld [vmem:[#allocation98_spill] sm:$0xff] }
 0xb91   : > { %v6598_v7 = vpop.f32.mrf.mxu1 }
 0xb92   : > { %11059 = vst.msk [vmem:[%s15754_s22 + $0x1dc] sm:$0xf] %vm9766_vm6, %v10026_v4  ;;  %v7512_v57 = vpop.f32.mrf.mxu2  ;;  %v8423_v15 = vpop.f32.mrf.mxu3  ;;  %v6740_v5 = vadd.f32 %v6598_v7, %v15647_v33 }
 0xb93   : > { %v7655_v39 = vadd.f32 %v7512_v57, %v6739_v2 }
 0xb95   : > { %v8566_v13 = vadd.f32 %v8423_v15, %v7655_v39  ;;  %v8965_v20 = vpop.f32.mrf.mxu0 }
 0xb97   : > { %v9106_v32 = vadd.f32 %v8963_v10, %v8566_v13 }
 0xb99   : > { %v9238_v47 = vmul.f32 %v17070_v3, %v9106_v32  ;;  %v6601_v19 = vpop.f32.mrf.mxu1 }
 0xb9a   : > { %v7514_v22 = vpop.f32.mrf.mxu2  ;;  %v8425_v42 = vpop.f32.mrf.mxu3  ;;  %v6741_v25 = vadd.f32 %v6601_v19, %v15653_v36 }
 0xb9b   : > { %v9370_v27 = vadd.f32 %v17078_v35, %v9238_v47  ;;  %v7656_v12 = vadd.f32 %v7514_v22, %v6740_v5  ;;  %v13244_v5 = vld [vmem:[%s17394_s3] ss:$0 sm:$0xff] }
 0xb9d   : > { %vm9498_vm15 = vcmp.ge.f32.partialorder %v9370_v27, 0.0  ;;  %v9626_v45 = vmul.f32 0.1, %v9370_v27  ;;  %v8567_v30 = vadd.f32 %v8425_v42, %v7656_v12  ;;  %v8968_v24 = vpop.f32.mrf.mxu0 }
 0xb9f   : > { %v9754_v41 = vsel %vm9498_vm15, %v9370_v27, %v9626_v45  ;;  %v9107_v50 = vadd.f32 %v8965_v20, %v8567_v30 }
 0xba0   : > { %v10032_v17 = vpack.c.bf16 %v9754_v41, %v9754_v41 }
 0xba1   : > { %v9239_v6 = vmul.f32 %v17070_v3, %v9107_v50  ;;  %v6603_v55 = vpop.f32.mrf.mxu1 }
 0xba2   : > { %11060 = vst.msk [vmem:[%s15754_s22 + $0x1e0] sm:$0xf] %vm9766_vm6, %v10032_v17  ;;  %v7517_v33 = vpop.f32.mrf.mxu2  ;;  %v8428_v58 = vpop.f32.mrf.mxu3  ;;  %v6742_v36 = vadd.f32 %v6603_v55, %v17968_v40 }
 0xba3   : > { %v9371_v52 = vadd.f32 %v17078_v35, %v9239_v6  ;;  %v7657_v28 = vadd.f32 %v7517_v33, %v6741_v25 }
 0xba5   : > { %vm9499_vm0 = vcmp.ge.f32.partialorder %v9371_v52, 0.0  ;;  %v9627_v31 = vmul.f32 0.1, %v9371_v52  ;;  %v8568_v62 = vadd.f32 %v8428_v58, %v7657_v28  ;;  %v8970_v1 = vpop.f32.mrf.mxu0 }
 0xba7   : > { %v9755_v44 = vsel %vm9499_vm0, %v9371_v52, %v9627_v31  ;;  %v9108_v37 = vadd.f32 %v8968_v24, %v8568_v62 }
 0xba8   : > { %v10033_v8 = vpack.c.bf16 %v9755_v44, %v9755_v44 }
 0xba9   : > { %v9240_v18 = vmul.f32 %v17070_v3, %v9108_v37  ;;  %v6606_v26 = vpop.f32.mrf.mxu1 }
 0xbaa   : > { %11061 = vst.msk [vmem:[%s15754_s22 + $0x1e4] sm:$0xf] %vm9766_vm6, %v10033_v8  ;;  %v7519_v49 = vpop.f32.mrf.mxu2  ;;  %v8430_v54 = vpop.f32.mrf.mxu3 }
 0xbab   : > { %v9372_v53 = vadd.f32 %v17078_v35, %v9240_v18  ;;  %v7658_v23 = vadd.f32 %v7519_v49, %v6742_v36 }
 0xbad   : > { %vm9500_vm1 = vcmp.ge.f32.partialorder %v9372_v53, 0.0  ;;  %v9628_v38 = vmul.f32 0.1, %v9372_v53  ;;  %v8569_v11 = vadd.f32 %v8430_v54, %v7658_v23  ;;  %v8973_v21 = vpop.f32.mrf.mxu0 }
 0xbaf   : > { %v9756_v61 = vsel %vm9500_vm1, %v9372_v53, %v9628_v38  ;;  %v9109_v59 = vadd.f32 %v8970_v1, %v8569_v11 }
 0xbb0   : > { %v10034_v63 = vpack.c.bf16 %v9756_v61, %v9756_v61 }
 0xbb1   : > { %v9241_v56 = vmul.f32 %v17070_v3, %v9109_v59  ;;  %v6607_v29 = vpop.f32.mrf.mxu1 }
 0xbb2   : > { %11062 = vst.msk [vmem:[%s15754_s22 + $0x1e8] sm:$0xf] %vm9766_vm6, %v10034_v63  ;;  %v7522_v48 = vpop.f32.mrf.mxu2  ;;  %v8433_v43 = vpop.f32.mrf.mxu3  ;;  %v6743_v4 = vadd.f32 %v6607_v29, %v17969_v51 }
 0xbb3   : > { %v9373_v34 = vadd.f32 %v17078_v35, %v9241_v56  ;;  %v13243_v35 = vld [vmem:[%s17393_s2] ss:$0 sm:$0xff] }
 0xbb5   : > { %vm9501_vm5 = vcmp.ge.f32.partialorder %v9373_v34, 0.0  ;;  %v9629_v16 = vmul.f32 0.1, %v9373_v34  ;;  %v8974_v46 = vpop.f32.mrf.mxu0 }
 0xbb7   : > { %v9757_v60 = vsel %vm9501_vm5, %v9373_v34, %v9629_v16 }
 0xbb8   : > { %v10035_v10 = vpack.c.bf16 %v9757_v60, %v9757_v60 }
 0xbb9   : > { %v6610_v3 = vpop.f32.mrf.mxu1 }
 0xbba   : > { %11063 = vst.msk [vmem:[%s15754_s22 + $0x1ec] sm:$0xf] %vm9766_vm6, %v10035_v10  ;;  %v7523_v2 = vpop.f32.mrf.mxu2  ;;  %v8434_v39 = vpop.f32.mrf.mxu3  ;;  %v6744_v32 = vadd.f32 %v6610_v3, %v15688_v9 }
 0xbbb   : > { %v7659_v57 = vadd.f32 %v7523_v2, %v6743_v4 }
 0xbbd   : > { %v8570_v15 = vadd.f32 %v8434_v39, %v7659_v57  ;;  %v8977_v7 = vpop.f32.mrf.mxu0 }
 0xbbf   : > { %v9110_v13 = vadd.f32 %v8974_v46, %v8570_v15 }
 0xbc1   : > { %v9242_v20 = vmul.f32 %v13243_v35, %v9110_v13  ;;  %v6612_v42 = vpop.f32.mrf.mxu1 }
 0xbc2   : > { %v7526_v47 = vpop.f32.mrf.mxu2  ;;  %v8437_v12 = vpop.f32.mrf.mxu3  ;;  %v6745_v9 = vadd.f32 %v6612_v42, %v15701_v14 }
 0xbc3   : > { %v9374_v22 = vadd.f32 %v13244_v5, %v9242_v20  ;;  %v7660_v27 = vadd.f32 %v7526_v47, %v6744_v32 }
 0xbc5   : > { %vm9502_vm7 = vcmp.ge.f32.partialorder %v9374_v22, 0.0  ;;  %v9630_v19 = vmul.f32 0.1, %v9374_v22  ;;  %v8571_v45 = vadd.f32 %v8437_v12, %v7660_v27  ;;  %v8979_v30 = vpop.f32.mrf.mxu0 }
 0xbc7   : > { %v9758_v24 = vsel %vm9502_vm7, %v9374_v22, %v9630_v19  ;;  %v9111_v41 = vadd.f32 %v8977_v7, %v8571_v45 }
 0xbc8   : > { %v10041_v50 = vpack.c.bf16 %v9758_v24, %v9758_v24 }
 0xbc9   : > { %v9243_v17 = vmul.f32 %v13243_v35, %v9111_v41  ;;  %v6615_v28 = vpop.f32.mrf.mxu1 }
 0xbca   : > { %11064 = vst.msk [vmem:[%s15754_s22 + $0x1f0] sm:$0xf] %vm9766_vm6, %v10041_v50  ;;  %v7528_v6 = vpop.f32.mrf.mxu2  ;;  %v8439_v52 = vpop.f32.mrf.mxu3  ;;  %v6746_v8 = vadd.f32 %v6615_v28, %v15707_v0 }
 0xbcb   : > { %v9375_v25 = vadd.f32 %v13244_v5, %v9243_v17  ;;  %v7661_v33 = vadd.f32 %v7528_v6, %v6745_v9 }
 0xbcd   : > { %vm9503_vm8 = vcmp.ge.f32.partialorder %v9375_v25, 0.0  ;;  %v9631_v58 = vmul.f32 0.1, %v9375_v25  ;;  %v8572_v55 = vadd.f32 %v8439_v52, %v7661_v33  ;;  %v8982_v31 = vpop.f32.mrf.mxu0 }
 0xbcf   : > { %v9759_v62 = vsel %vm9503_vm8, %v9375_v25, %v9631_v58  ;;  %v9112_v1 = vadd.f32 %v8979_v30, %v8572_v55 }
 0xbd0   : > { %v10042_v44 = vpack.c.bf16 %v9759_v62, %v9759_v62 }
 0xbd1   : > { %v9244_v37 = vmul.f32 %v13243_v35, %v9112_v1  ;;  %v6617_v49 = vpop.f32.mrf.mxu1 }
 0xbd2   : > { %11065 = vst.msk [vmem:[%s15754_s22 + $0x1f4] sm:$0xf] %vm9766_vm6, %v10042_v44  ;;  %v7531_v14 = vpop.f32.mrf.mxu2  ;;  %v8442_v36 = vpop.f32.mrf.mxu3 }
 0xbd3   : > { %v9376_v18 = vadd.f32 %v13244_v5, %v9244_v37  ;;  %v7662_v40 = vadd.f32 %v7531_v14, %v6746_v8 }
 0xbd5   : > { %vm9504_vm9 = vcmp.ge.f32.partialorder %v9376_v18, 0.0  ;;  %v9632_v53 = vmul.f32 0.1, %v9376_v18  ;;  %v8573_v23 = vadd.f32 %v8442_v36, %v7662_v40  ;;  %v8984_v54 = vpop.f32.mrf.mxu0 }
 0xbd7   : > { %v9760_v26 = vsel %vm9504_vm9, %v9376_v18, %v9632_v53  ;;  %v9113_v38 = vadd.f32 %v8982_v31, %v8573_v23 }
 0xbd8   : > { %v10043_v11 = vpack.c.bf16 %v9760_v26, %v9760_v26 }
 0xbd9   : > { %v9245_v0 = vmul.f32 %v13243_v35, %v9113_v38 }
 0xbda   : > { %11066 = vst.msk [vmem:[%s15754_s22 + $0x1f8] sm:$0xf] %vm9766_vm6, %v10043_v11  ;;  %v7533_v21 = vpop.f32.mrf.mxu2  ;;  %v8444_v59 = vpop.f32.mrf.mxu3 }
 0xbdb   : > { %v9377_v61 = vadd.f32 %v13244_v5, %v9245_v0 }
 0xbdd   : > { %vm9505_vm10 = vcmp.ge.f32.partialorder %v9377_v61, 0.0  ;;  %v9633_v63 = vmul.f32 0.1, %v9377_v61 }
 0xbdf   : > { %v9761_v56 = vsel %vm9505_vm10, %v9377_v61, %v9633_v63 }
 0xbe0   : > { %v10044_v48 = vpack.c.bf16 %v9761_v56, %v9761_v56 }
 0xbe2   : > { %11067 = vst.msk [vmem:[%s15754_s22 + $0x1fc] sm:$0xf] %vm9766_vm6, %v10044_v48 }
 0xbe3   : > { %13272 = shalt.err (!%p13269_p5)
}
 0xbe4   : > { %s13326_s14 = smov 64   ;;  %s13327_s22 = smov 4  }
 0xbe5   : > { %13015 = dma.vmem_to_hbm [thread:$0]  (%p13393_p4), %s10065_s12, 8192, %s10067_s13, %s10051_s18, %s13326_s14, %s13326_s14, %s13327_s22  }
 0xbe6 PF: > { %p13021_p6 = scmp.ge.s32.totalorder %s13323_s20, 2  ;;  %s10081_s7 = sand.u32 1, %s13303_s15  }
 0xbe7   : > { %s10082_s8 = scalar_lea.sflag [#allocation3], %s10081_s7 }
 0xbe8   : > { %p13018_p7 = pnand %p13021_p6, %p13400_p8 }
 0xbea   : > { %p13019_p9 = pneg %p13018_p7 }
 0xbec   : > { %13298 = dma.done.wait (%p13019_p9), %s10082_s8, 8192  }
 0xbed   : > { %13300 = vsyncadd (%p13019_p9), %s10082_s8, 4294959104  ;;  %s17_s20 = sadd.s32 1, %s13323_s20   ;;  %s17970_s15 = smov %s13307_s16 }
 0xbee   : > { %p14_p10 = scmp.ge.s32.totalorder %s17_s20, 4   ;;  %s17971_s16 = smov %s13311_s17 }
 0xbef   : > { %s17972_s17 = smov %s13406_s28  ;;  %s17973_s18 = smov %s13319_s19 }
 0xbf0   : > { %s17974_s19 = smov %s17976_s23  ;;  %16 = sbr.rel (!%p14_p10) target bundleno = 4 (0x4), region = 119 }
 0xbf5   :  { %10088 = vsyncpa [#allocation3], 1 }
 0xbf6   :  { %10090 = vsyncpa [#allocation3 + $0x1], 1 }

</bundles_post_ra>
